<compile_context>
chip_gen: v5e
topology: v5e:2x2
jax: 0.10.0
libtpu: 0.0.40
codegen_flags: <defaults>
</compile_context>

<pallas_src>
import functools

import jax
import jax.numpy as jnp
from jax import lax
from jax.experimental import pallas as pl
from jax.experimental.pallas import tpu as pltpu


def _ceil_to(x, m):
    return ((x + m - 1) // m) * m


# ----------------------------------------------------------------------------
# Pallas GEMM kernel with fused bias + LeakyReLU epilogue (used for the convs)
# ----------------------------------------------------------------------------
def _gemm_kernel(a_ref, b_ref, bias_ref, o_ref, *, apply_act, slope):
    y = jnp.dot(a_ref[...], b_ref[...], preferred_element_type=jnp.float32)
    y = y + bias_ref[...]
    if apply_act:
        y = jnp.where(y >= 0, y, slope * y)
    o_ref[...] = y.astype(o_ref.dtype)


def _pick_tm(M, K):
    """M-tile sized so the bf16 A block is ~4 MiB (keeps v5e VMEM happy),
    with a cheap split to >=2 grid steps so v7x can use both TensorCores."""
    Mp8 = _ceil_to(M, 8)
    tm = (4 * 1024 * 1024) // (2 * max(K, 1))
    tm = max(512, (tm // 512) * 512)
    tm = min(tm, 4096, Mp8)
    if _ceil_to(M, tm) // tm < 2 and tm >= 16 and (tm // 2) % 8 == 0:
        tm //= 2
    return tm


def pallas_gemm(a, b, bias=None, act_slope=None, out_dtype=jnp.float32):
    """y = act(a @ b + bias); a:(M,K) b:(K,N) bias:(N,).  Full-K/N blocks."""
    M, K = a.shape
    K2, N = b.shape
    assert K == K2
    if bias is None:
        bias = jnp.zeros((N,), jnp.float32)
    # bf16 operands halve HBM traffic on the dominant im2col A matrix; the MXU
    # still accumulates in f32 (preferred_element_type in the kernel).
    a_bf = a if a.dtype == jnp.bfloat16 else a.astype(jnp.bfloat16)
    b_bf = b if b.dtype == jnp.bfloat16 else b.astype(jnp.bfloat16)
    tm = _pick_tm(M, K)
    Mp = _ceil_to(M, tm)
    if Mp != M:
        a_bf = jnp.pad(a_bf, ((0, Mp - M), (0, 0)))
    bias2 = bias.reshape(1, N).astype(jnp.float32)

    kernel = functools.partial(
        _gemm_kernel,
        apply_act=act_slope is not None,
        slope=0.0 if act_slope is None else float(act_slope))

    # NOTE: for N < 128 the output stores are masked (lane-sparse); acceptable
    # here since outputs are bf16 and the early layers are tiny.
    out = pl.pallas_call(
        kernel,
        out_shape=jax.ShapeDtypeStruct((Mp, N), out_dtype),
        grid_spec=pltpu.PrefetchScalarGridSpec(
            num_scalar_prefetch=0,
            grid=(Mp // tm,),
            in_specs=[pl.BlockSpec((tm, K), lambda i: (i, 0)),   # full-K block
                      pl.BlockSpec((K, N), lambda i: (0, 0)),    # resident B
                      pl.BlockSpec((1, N), lambda i: (0, 0))],   # resident bias
            out_specs=pl.BlockSpec((tm, N), lambda i: (i, 0)),
        ),
        compiler_params=pltpu.CompilerParams(
            dimension_semantics=("parallel",)),
    )(a_bf, b_bf, bias2)
    return out[:M]


# ----------------------------------------------------------------------------
# Conv2d (NHWC activations, OIHW weights) via bf16 im2col + Pallas GEMM
# ----------------------------------------------------------------------------
def conv2d_nhwc_pallas(x_nhwc, w, b, stride, pad, act_slope=None,
                       out_dtype=jnp.bfloat16):
    B, H, W, C = x_nhwc.shape
    O, _, kh, kw = w.shape
    # Build im2col patches directly in bf16 (no f32 copy of A in HBM).
    xp = jnp.pad(x_nhwc.astype(jnp.bfloat16),
                 ((0, 0), (pad, pad), (pad, pad), (0, 0)))
    OH = (H + 2 * pad - kh) // stride + 1
    OW = (W + 2 * pad - kw) // stride + 1
    cols = [xp[:, i:i + stride * OH:stride, j:j + stride * OW:stride, :]
            for i in range(kh) for j in range(kw)]
    patches = jnp.concatenate(cols, axis=-1)             # (B,OH,OW,kh*kw*C)
    a = patches.reshape(B * OH * OW, kh * kw * C)
    wmat = jnp.transpose(w, (2, 3, 1, 0)).reshape(kh * kw * C, O)  # (i,j,c)->O
    y = pallas_gemm(a, wmat, b, act_slope=act_slope, out_dtype=out_dtype)
    return y.reshape(B, OH, OW, O)


def instance_norm_nhwc(x, gamma, beta, eps=1e-5):
    xf = x.astype(jnp.float32)
    mean = jnp.mean(xf, axis=(1, 2), keepdims=True)
    var = jnp.maximum(jnp.mean(xf * xf, axis=(1, 2), keepdims=True)
                      - mean * mean, 0.0)                 # one-pass variance
    xn = (xf - mean) * lax.rsqrt(var + eps)
    y = xn * gamma.reshape(1, 1, 1, -1) + beta.reshape(1, 1, 1, -1)
    return y.astype(x.dtype)


# ----------------------------------------------------------------------------
# Classifier: Upsample(256) -> 5x [conv s2 + LReLU (+ IN)] -> Dropout -> conv8
# ----------------------------------------------------------------------------
def init_classifier_params(key, num_classes, use_in=True):
    chans = [3, 16, 32, 64, 128, 128]
    params = {"convs": [], "ins": []}
    for i in range(5):
        key, k1 = jax.random.split(key)
        cin, cout = chans[i], chans[i + 1]
        w = 0.05 * jax.random.normal(k1, (cout, cin, 3, 3), jnp.float32)
        params["convs"].append((w, jnp.zeros((cout,), jnp.float32)))
        if use_in and i < 4:
            params["ins"].append((jnp.ones((cout,), jnp.float32),
                                  jnp.zeros((cout,), jnp.float32)))
        else:
            params["ins"].append(None)
    key, k2 = jax.random.split(key)
    wf = 0.05 * jax.random.normal(k2, (num_classes, 128, 8, 8), jnp.float32)
    params["final"] = (wf, jnp.zeros((num_classes,), jnp.float32))
    return params


def classifier_forward(x_nchw, p, upsample_size=256):
    B = x_nchw.shape[0]
    # bilinear resize, half-pixel centers, no antialias == torch F.interpolate
    x = jax.image.resize(x_nchw, (B, x_nchw.shape[1], upsample_size,
                                  upsample_size), method="bilinear",
                         antialias=False)
    x = jnp.transpose(x, (0, 2, 3, 1))                    # NHWC once
    for i, (w, b) in enumerate(p["convs"]):
        x = conv2d_nhwc_pallas(x, w, b, stride=2, pad=1, act_slope=0.2,
                               out_dtype=jnp.bfloat16)
        if p["ins"][i] is not None:
            x = instance_norm_nhwc(x, *p["ins"][i])
    # TODO(synk): nn.Dropout(p=0.5) is identity here (eval/inference forward).
    wf, bf = p["final"]
    # final 8x8 conv on the 8x8 map == full contraction; tiny GEMV -> XLA dot
    xf = jnp.transpose(x, (0, 3, 1, 2)).reshape(B, -1).astype(jnp.float32)
    return xf @ wf.reshape(wf.shape[0], -1).T + bf[None, :]


# ----------------------------------------------------------------------------
# 3D-LUT trilinear lookup.  Classifier weights are pre-folded into a single
# combined LUT per batch element; the Pallas kernel contracts the g/b axes on
# the MXU (bf16, f32 acc) and finishes the r axis on the VPU, so no (D^3, P)
# tensor is ever materialized (works at the default dims=33 as well).
# ----------------------------------------------------------------------------
def _make_lut_kernel(D, Dp):
    scale = (D - 1) / 1.0001  # binsize convention of Image-Adaptive-3DLUT

    def kernel(x_ref, lut_ref, o_ref):
        idx = lax.broadcasted_iota(jnp.int32, (Dp, 1), 0).astype(jnp.float32)
        rc = x_ref[0, 0:1, :] * scale                            # (1, P)
        gc = x_ref[0, 1:2, :] * scale
        bc = x_ref[0, 2:3, :] * scale
        # trilinear "hat" weights along g/b: (Dp, P); rows >= D are exactly 0.
        wg = jnp.maximum(1.0 - jnp.abs(gc - idx), 0.0)
        wb = jnp.maximum(1.0 - jnp.abs(bc - idx), 0.0)
        P = wg.shape[1]
        # (Dp, Dp, P) -> (Dp^2, P): 8-aligned sublane merge (Dp % 8 == 0).
        wgb = (wg[:, None, :] * wb[None, :, :]).reshape(Dp * Dp, P)
        # Single MXU matmul: (3*Dp, Dp^2) x (Dp^2, P) -> (3*Dp, P), f32 acc.
        slab = jnp.dot(lut_ref[0], wgb.astype(jnp.bfloat16),
                       preferred_element_type=jnp.float32)
        # Finish the r contraction with a VPU weighted sum per channel
        # (static 8-aligned row slices; padded r rows hold zero LUT values).
        wr = jnp.maximum(1.0 - jnp.abs(rc - idx), 0.0)           # (Dp, P)
        outs = [jnp.sum(slab[c * Dp:(c + 1) * Dp, :] * wr,
                        axis=0, keepdims=True) for c in range(3)]
        o_ref[...] = jnp.concatenate(outs, axis=0)[None].astype(o_ref.dtype)

    return kernel


def _build_lut_mat(combined_lut, dims):
    """(B, 3, D^3) f32 -> (B, 3*Dp, Dp^2) bf16; row = c*Dp + r, col = g*Dp + b,
    zero padded so every in-kernel slice/reshape stays 8-aligned."""
    B = combined_lut.shape[0]
    Dp = _ceil_to(dims, 8)
    lut5 = combined_lut.reshape(B, 3, dims, dims, dims)
    if Dp != dims:
        p = Dp - dims
        lut5 = jnp.pad(lut5, ((0, 0), (0, 0), (0, p), (0, p), (0, p)))
    return lut5.reshape(B, 3 * Dp, Dp * Dp).astype(jnp.bfloat16)


def lut_apply_pallas(x_flat, combined_lut, dims):
    """x_flat: (B,3,HW) in [0,1]; combined_lut: (B,3,D^3) -> (B,3,HW) f32."""
    B, _, HW = x_flat.shape
    Dp = _ceil_to(dims, 8)
    lut_mat = _build_lut_mat(combined_lut, dims)          # (B, 3*Dp, Dp^2) bf16
    # VMEM-aware pixel tile: live intermediates per pixel ~ wgb(f32 build +
    # bf16 copy) + slab(f32).  Budget ~8 MiB keeps all generations (incl. v7x
    # 64 MiB physical / 32 MiB scoped) comfortable even at dims=33.
    per_px = Dp * Dp * 6 + 3 * Dp * 4 + 64
    p_tile = max(128, min(4096, ((8 * 1024 * 1024) // per_px) // 128 * 128))
    p_tile = min(p_tile, _ceil_to(HW, 128))
    HWp = _ceil_to(HW, p_tile)
    if HWp != HW:
        x_flat = jnp.pad(x_flat, ((0, 0), (0, 0), (0, HWp - HW)))
    out = pl.pallas_call(
        _make_lut_kernel(dims, Dp),
        out_shape=jax.ShapeDtypeStruct((B, 3, HWp), jnp.float32),
        grid_spec=pltpu.PrefetchScalarGridSpec(
            num_scalar_prefetch=0,
            grid=(B, HWp // p_tile),
            in_specs=[
                pl.BlockSpec((1, 3, p_tile), lambda b, t: (b, 0, t)),
                pl.BlockSpec((1, 3 * Dp, Dp * Dp), lambda b, t: (b, 0, 0)),
            ],
            out_specs=pl.BlockSpec((1, 3, p_tile), lambda b, t: (b, 0, t)),
        ),
        compiler_params=pltpu.CompilerParams(
            dimension_semantics=("parallel", "parallel")),
    )(x_flat, lut_mat)
    return out[:, :, :HW]


# ----------------------------------------------------------------------------
# LUT parameters: lut0 = identity LUT, lut1 = `nums` supplement LUTs
# ----------------------------------------------------------------------------
def init_luts(key, dims, nums, is_zero=False):
    grid = jnp.arange(dims, dtype=jnp.float32) / (dims - 1)
    r = jnp.broadcast_to(grid[:, None, None], (dims, dims, dims))
    g = jnp.broadcast_to(grid[None, :, None], (dims, dims, dims))
    b = jnp.broadcast_to(grid[None, None, :], (dims, dims, dims))
    lut0 = jnp.stack([r, g, b], axis=0)                          # (3, D, D, D)
    if is_zero:
        lut1 = jnp.zeros((nums, 3, dims, dims, dims), jnp.float32)
    else:
        key, k = jax.random.split(key)
        lut1 = 0.02 * jax.random.normal(k, (nums, 3, dims, dims, dims),
                                        jnp.float32)
    return lut0, lut1


# ----------------------------------------------------------------------------
# Gen3DLutModel.forward
# ----------------------------------------------------------------------------
def gen3dlut_forward(x, cls_params, lut0, lut1, dims):
    cls_pre = classifier_forward(x, cls_params)                  # (B, nums+1)
    B, C, H, W = x.shape
    x_flat = x.reshape(B, 3, H * W)
    lut_stack = jnp.concatenate([lut0[None], lut1], axis=0)      # (L, 3, D,D,D)
    lut_flat = lut_stack.reshape(lut_stack.shape[0], 3, dims ** 3)
    # Fold classifier weights into the LUTs (linear in LUT values, so this is
    # exactly the torch per-LUT weighted sum).  Tiny einsum -> (B, 3, D^3).
    combined_lut = jnp.einsum("bl,lcd->bcd", cls_pre, lut_flat,
                              precision=lax.Precision.HIGHEST)
    combine = lut_apply_pallas(x_flat, combined_lut, dims)
    combine_a = combine.reshape(B, 3, H, W)
    weights_norm = jnp.mean(cls_pre ** 2)
    return combine_a, weights_norm


# ----------------------------------------------------------------------------
# Plain-JAX reference of the LUT path (per-LUT, torch-order combine)
# ----------------------------------------------------------------------------
def lut_ref_jax(x_flat, lut_flat, cls_pre, dims):
    B, _, HW = x_flat.shape
    scale = (dims - 1) / 1.0001
    coord = x_flat * scale
    idx = jnp.arange(dims, dtype=jnp.float32)
    w = jnp.maximum(1.0 - jnp.abs(coord[:, :, None, :] -
                                  idx[None, None, :, None]), 0.0)  # (B,3,D,HW)
    wr, wg, wb = w[:, 0], w[:, 1], w[:, 2]
    w3 = (wr[:, :, None, None, :] * wg[:, None, :, None, :] *
          wb[:, None, None, :, :]).reshape(B, dims ** 3, HW)
    outs = jnp.einsum("lcd,bdp->blcp", lut_flat, w3)
    return jnp.einsum("bl,blcp->bcp", cls_pre, outs)


if __name__ == "__main__":
    key = jax.random.PRNGKey(0)
    B, C, H, W = 2, 3, 16, 16
    dims, nums, use_in = 8, 8, True            # small DIMS via cfg override
    num_classes = nums + 1

    key, kx, kc, kl, km1, km2 = jax.random.split(key, 6)
    x = jax.random.uniform(kx, (B, C, H, W), jnp.float32)        # image in [0,1]
    cls_params = init_classifier_params(kc, num_classes, use_in)
    lut0, lut1 = init_luts(kl, dims, nums, is_zero=False)

    combine_a, weights_norm = gen3dlut_forward(x, cls_params, lut0, lut1, dims)
    combine_a = jax.block_until_ready(combine_a)
    weights_norm = jax.block_until_ready(weights_norm)

    assert combine_a.shape == (B, 3, H, W)
    assert weights_norm.shape == ()
    assert bool(jnp.all(jnp.isfinite(combine_a)))

    # Sanity: Pallas GEMM (bf16 operands, f32 acc) vs XLA on unaligned shapes
    a_t = jax.random.normal(km1, (50, 37), jnp.float32)
    b_t = jax.random.normal(km2, (37, 20), jnp.float32)
    got = pallas_gemm(a_t, b_t)
    ref_mm = jnp.dot(a_t.astype(jnp.bfloat16).astype(jnp.float32),
                     b_t.astype(jnp.bfloat16).astype(jnp.float32),
                     precision=lax.Precision.HIGHEST)
    assert bool(jnp.allclose(got, ref_mm, rtol=2e-2, atol=2e-2))

    # Sanity: Pallas LUT path (pre-combined LUTs, bf16 MXU) vs per-LUT f32 ref
    cls_pre = classifier_forward(x, cls_params)
    lut_stack = jnp.concatenate([lut0[None], lut1], axis=0)
    lut_flat = lut_stack.reshape(lut_stack.shape[0], 3, dims ** 3)
    ref = lut_ref_jax(x.reshape(B, 3, H * W), lut_flat, cls_pre, dims)
    assert bool(jnp.allclose(combine_a.reshape(B, 3, H * W), ref,
                             rtol=2e-2, atol=2e-2))

    print("KERNEL_OK")
</pallas_src>

<mosaic_0001>
module attributes {stable_mosaic.version = 11 : i64} {
  func.func @_gemm_kernel(%arg0: i32, %arg1: memref<4096x27xbf16, #tpu.memory_space<vmem>>, %arg2: memref<27x16xbf16, #tpu.memory_space<vmem>>, %arg3: memref<1x16xf32, #tpu.memory_space<vmem>>, %arg4: memref<4096x16xbf16, #tpu.memory_space<vmem>>) attributes {dimension_semantics = [#tpu.dimension_semantics<parallel>], iteration_bounds = array<i64: 8>, scalar_prefetch = 0 : i64, scratch_operands = 0 : i64, tpu.core_type = #tpu.core_type<tc>, window_params = [{transform_indices = @transform_0, window_bounds = array<i64: 4096, 27>}, {pipeline_mode = #tpu.pipeline_mode<synchronous>, transform_indices = @transform_1, window_bounds = array<i64: 27, 16>}, {pipeline_mode = #tpu.pipeline_mode<synchronous>, transform_indices = @transform_2, window_bounds = array<i64: 1, 16>}, {transform_indices = @transform_3, window_bounds = array<i64: 4096, 16>}]} {
    %c0 = arith.constant 0 : index
    %c0_0 = arith.constant 0 : index
    %0 = vector.load %arg1[%c0, %c0_0] : memref<4096x27xbf16, #tpu.memory_space<vmem>>, vector<4096x27xbf16>
    %c0_1 = arith.constant 0 : index
    %c0_2 = arith.constant 0 : index
    %1 = vector.load %arg2[%c0_1, %c0_2] : memref<27x16xbf16, #tpu.memory_space<vmem>>, vector<27x16xbf16>
    %cst = arith.constant dense<0.000000e+00> : vector<4096x16xf32>
    %2 = tpu.matmul %0, %1, %cst {dimension_numbers = #tpu.dot_dimension_numbers<[1], [0], [0], [1], [0, 0, 1, 1], [], []>} : vector<4096x27xbf16>, vector<27x16xbf16>, vector<4096x16xf32> -> vector<4096x16xf32>
    %c0_3 = arith.constant 0 : index
    %c0_4 = arith.constant 0 : index
    %3 = vector.load %arg3[%c0_3, %c0_4] : memref<1x16xf32, #tpu.memory_space<vmem>>, vector<1x16xf32>
    %4 = vector.broadcast %3 : vector<1x16xf32> to vector<4096x16xf32>
    %5 = arith.addf %2, %4 : vector<4096x16xf32>
    %cst_5 = arith.constant 0.000000e+00 : f32
    %6 = vector.broadcast %cst_5 : f32 to vector<4096x16xf32>
    %7 = arith.cmpf oge, %5, %6 : vector<4096x16xf32>
    %cst_6 = arith.constant 2.000000e-01 : f32
    %8 = vector.broadcast %cst_6 : f32 to vector<4096x16xf32>
    %9 = arith.mulf %8, %5 : vector<4096x16xf32>
    %10 = arith.select %7, %5, %9 : vector<4096x16xi1>, vector<4096x16xf32>
    %11 = arith.truncf %10 : vector<4096x16xf32> to vector<4096x16xbf16>
    %c0_7 = arith.constant 0 : index
    %c0_8 = arith.constant 0 : index
    %12 = vector.load %arg4[%c0_7, %c0_8] : memref<4096x16xbf16, #tpu.memory_space<vmem>>, vector<4096x16xbf16>
    tpu.vector_store %arg4[%c0_7, %c0_8], %11 {strides = array<i32>} : memref<4096x16xbf16, #tpu.memory_space<vmem>>, vector<4096x16xbf16>,
    return
  }
  func.func @transform_0(%arg0: i32) -> (i32, i32) {
    %c0_i32 = arith.constant 0 : i32
    %c0_i32_0 = arith.constant 0 : i32
    return %arg0, %c0_i32 : i32, i32
  }
  func.func @transform_1(%arg0: i32) -> (i32, i32) {
    %c0_i32 = arith.constant 0 : i32
    %c0_i32_0 = arith.constant 0 : i32
    %c0_i32_1 = arith.constant 0 : i32
    return %c0_i32, %c0_i32_0 : i32, i32
  }
  func.func @transform_2(%arg0: i32) -> (i32, i32) {
    %c0_i32 = arith.constant 0 : i32
    %c0_i32_0 = arith.constant 0 : i32
    %c0_i32_1 = arith.constant 0 : i32
    return %c0_i32, %c0_i32_0 : i32, i32
  }
  func.func @transform_3(%arg0: i32) -> (i32, i32) {
    %c0_i32 = arith.constant 0 : i32
    %c0_i32_0 = arith.constant 0 : i32
    return %arg0, %c0_i32 : i32, i32
  }
}

</mosaic_0001>

<bundles_post_ra>
// kernel: tpu_custom_call.1
= control target key start
LH: loop header
LB: loop body
LE: loop exit
PB: predicated region body
PF: predicated region fallthrough
CT: control target
= control target key end

     0   :  { %s8277_s12 = smov 0   ;;  %s10402_s0 = inlined_call_operand.vmem [shape: bf16[32768,27], index: 0, kind: input, shape index: {}]   ;;  %s10403_s1 = inlined_call_operand.vmem [shape: bf16[27,16], index: 1, kind: input, shape index: {}]   ;;  %s10404_s2 = inlined_call_operand.vmem [shape: f32[1,16], index: 2, kind: input, shape index: {}]   ;;  %s10405_s3 = inlined_call_operand.vmem [shape: bf16[32768,16], index: 3, kind: output, shape index: {}]  }
   0x1 LB: > { %s6668_s13 = sadd.s32 4294967295, %s8254_s12   ;;  %p6672_p0 = scmp.ge.s32.totalorder %s8254_s12, 1  ;;  %s8254_s12 = sphi %s8277_s12, %s13_s12  }
   0x2   : > { %p138_p1 = scmp.lt.s32.totalorder %s8254_s12, 9 }
   0x4   : > { %p139_p2 = pnand %p6672_p0, %p138_p1 }
   0x5   : > { %s6673_s18 = sshll.u32 (!%p139_p2), %s6668_s13, 9 }
   0x6   : > { %142 = sbr.rel (%p139_p2) target bundleno = 1182 (0x49e), region = 32  ;;  %p163_p3 = scmp.lt.s32.totalorder (!%p139_p2), %s6673_s18, 4095 }
   0xb   : > { %v7707_v0 = vld [vmem:[%s10403_s1 + $0x8] sm:$0xf]  ;;  %v8224_v1 = vld [vmem:[%s10403_s1 + $0x8] sm:$0x30]  ;;  %vm2755_vm0 = vcmask 1044480   ;;  %vm2756_vm1 = vcmask 1045504  }
   0xc   : > { %v7708_v2 = vor.u32 %v8224_v1, %v7707_v0  ;;  %v8256_v3 = vmov 65535   ;;  %s10407_s18 = smov (!%p163_p3, %s6673_s18), 4095  ;;  %v8223_v7 = vld [vmem:[%s10403_s1] sm:$0xff]  ;;  %vm1986_vm2 = vcmask 220160   ;;  %vm6099_vm5 = vcmask 125952  }
   0xd   : > { %v2757_v4 = vsel %vm2755_vm0, 4294967295, %v8256_v3  ;;  %s6674_s21 = sshll.u32 %s10407_s18, 2  ;;  %v8371_v40 = vld [vmem:[%s10404_s2] ss:$0 sm:$0xff] }
   0xe   : > { %v2758_v5 = vsel %vm2756_vm1, %v2757_v4, 0  ;;  %s8302_s24 = scalar_lea.vmem %s10402_s0, %s6674_s21  ;;  %s8388_s29 = scalar_lea.vmem %s10405_s3, %s6674_s21 }
   0xf   : > { %v2760_v6 = vand.u32 %v7708_v2, %v2758_v5  ;;  %v7967_v8 = vld [vmem:[%s8302_s24] sm:$0xff]  ;;  %v7968_v12 = vld [vmem:[%s8302_s24 + $0x8] sm:$0xff]  ;;  %v7969_v16 = vld [vmem:[%s8302_s24 + $0x10] sm:$0xff] }
  0x10   : > { %v8031_v9 = vld [vmem:[%s8302_s24 + $0x200] sm:$0xff]  ;;  %v8032_v13 = vld [vmem:[%s8302_s24 + $0x208] sm:$0xff]  ;;  %v8033_v17 = vld [vmem:[%s8302_s24 + $0x210] sm:$0xff] }
  0x11   : > { %2768 = vmatpush.bf16.msra.mxu0 %v2760_v6  ;;  %8225 = vmatpush.bf16.msra.mxu1 %v2760_v6  ;;  %v8095_v10 = vld [vmem:[%s8302_s24 + $0x400] sm:$0xff]  ;;  %v8096_v14 = vld [vmem:[%s8302_s24 + $0x408] sm:$0xff]  ;;  %v8097_v18 = vld [vmem:[%s8302_s24 + $0x410] sm:$0xff] }
  0x12   : > { %8226 = vmatpush.bf16.msra.mxu2 %v2760_v6  ;;  %8227 = vmatpush.bf16.msra.mxu3 %v2760_v6  ;;  %v8159_v11 = vld [vmem:[%s8302_s24 + $0x600] sm:$0xff]  ;;  %v8160_v15 = vld [vmem:[%s8302_s24 + $0x608] sm:$0xff]  ;;  %v8161_v19 = vld [vmem:[%s8302_s24 + $0x610] sm:$0xff] }
  0x13   : > { %v7970_v20 = vld [vmem:[%s8302_s24 + $0x18] sm:$0xff]  ;;  %v7971_v24 = vld [vmem:[%s8302_s24 + $0x20] sm:$0xff]  ;;  %v7972_v28 = vld [vmem:[%s8302_s24 + $0x28] sm:$0xff] }
  0x14   : > { %v8034_v21 = vld [vmem:[%s8302_s24 + $0x218] sm:$0xff]  ;;  %v8035_v25 = vld [vmem:[%s8302_s24 + $0x220] sm:$0xff]  ;;  %v8036_v29 = vld [vmem:[%s8302_s24 + $0x228] sm:$0xff] }
  0x15   : > { %2769 = vmatpush.bf16.msra.mxu0 %v8223_v7  ;;  %8228 = vmatpush.bf16.msra.mxu1 %v8223_v7  ;;  %v8098_v22 = vld [vmem:[%s8302_s24 + $0x418] sm:$0xff]  ;;  %v8099_v26 = vld [vmem:[%s8302_s24 + $0x420] sm:$0xff]  ;;  %v8100_v30 = vld [vmem:[%s8302_s24 + $0x428] sm:$0xff] }
  0x16   : > { %8229 = vmatpush.bf16.msra.mxu2 %v8223_v7  ;;  %8230 = vmatpush.bf16.msra.mxu3 %v8223_v7  ;;  %v8162_v23 = vld [vmem:[%s8302_s24 + $0x618] sm:$0xff]  ;;  %v8163_v27 = vld [vmem:[%s8302_s24 + $0x620] sm:$0xff]  ;;  %v8164_v31 = vld [vmem:[%s8302_s24 + $0x628] sm:$0xff] }
  0x17   : > { %v7973_v32 = vld [vmem:[%s8302_s24 + $0x30] sm:$0xff]  ;;  %v7974_v36 = vld [vmem:[%s8302_s24 + $0x38] sm:$0xff]  ;;  %v7975_v41 = vld [vmem:[%s8302_s24 + $0x40] sm:$0xff] }
  0x18   : > { %7709 = vmatmul.msk.bf16.vlgmr.msra.gmra.mxu0 %vm1986_vm2, %v7967_v8  ;;  %7773 = vmatmul.msk.bf16.vlgmr.msra.gmra.mxu1 %vm1986_vm2, %v8031_v9  ;;  %v8037_v33 = vld [vmem:[%s8302_s24 + $0x230] sm:$0xff]  ;;  %v8038_v37 = vld [vmem:[%s8302_s24 + $0x238] sm:$0xff]  ;;  %v8039_v42 = vld [vmem:[%s8302_s24 + $0x240] sm:$0xff] }
  0x19   : > { %7837 = vmatmul.msk.bf16.vlgmr.msra.gmra.mxu2 %vm1986_vm2, %v8095_v10  ;;  %7901 = vmatmul.msk.bf16.vlgmr.msra.gmra.mxu3 %vm1986_vm2, %v8159_v11  ;;  %v8101_v34 = vld [vmem:[%s8302_s24 + $0x430] sm:$0xff]  ;;  %v8102_v38 = vld [vmem:[%s8302_s24 + $0x438] sm:$0xff]  ;;  %v8103_v45 = vld [vmem:[%s8302_s24 + $0x440] sm:$0xff] }
  0x1a   : > { %v8165_v35 = vld [vmem:[%s8302_s24 + $0x630] sm:$0xff]  ;;  %v8166_v39 = vld [vmem:[%s8302_s24 + $0x638] sm:$0xff]  ;;  %v8167_v46 = vld [vmem:[%s8302_s24 + $0x640] sm:$0xff] }
  0x28   : > { %7710 = vmatmul.msk.bf16.gmra.mxu0 %vm1986_vm2, %v7968_v12  ;;  %7774 = vmatmul.msk.bf16.gmra.mxu1 %vm1986_vm2, %v8032_v13  ;;  %v7976_v13 = vld [vmem:[%s8302_s24 + $0x48] sm:$0xff] }
  0x29   : > { %7838 = vmatmul.msk.bf16.gmra.mxu2 %vm1986_vm2, %v8096_v14  ;;  %7902 = vmatmul.msk.bf16.gmra.mxu3 %vm1986_vm2, %v8160_v15  ;;  %v8040_v14 = vld [vmem:[%s8302_s24 + $0x248] sm:$0xff] }
  0x38   : > { %7711 = vmatmul.msk.bf16.gmra.mxu0 %vm1986_vm2, %v7969_v16  ;;  %7775 = vmatmul.msk.bf16.gmra.mxu1 %vm1986_vm2, %v8033_v17 }
  0x39   : > { %7839 = vmatmul.msk.bf16.gmra.mxu2 %vm1986_vm2, %v8097_v18  ;;  %7903 = vmatmul.msk.bf16.gmra.mxu3 %vm1986_vm2, %v8161_v19  ;;  %v8104_v19 = vld [vmem:[%s8302_s24 + $0x448] sm:$0xff] }
  0x48   : > { %7712 = vmatmul.msk.bf16.gmra.mxu0 %vm1986_vm2, %v7970_v20  ;;  %7776 = vmatmul.msk.bf16.gmra.mxu1 %vm1986_vm2, %v8034_v21  ;;  %v8168_v20 = vld [vmem:[%s8302_s24 + $0x648] sm:$0xff] }
  0x49   : > { %7840 = vmatmul.msk.bf16.gmra.mxu2 %vm1986_vm2, %v8098_v22  ;;  %7904 = vmatmul.msk.bf16.gmra.mxu3 %vm1986_vm2, %v8162_v23 }
  0x58   : > { %7713 = vmatmul.msk.bf16.gmra.mxu0 %vm1986_vm2, %v7971_v24  ;;  %7777 = vmatmul.msk.bf16.gmra.mxu1 %vm1986_vm2, %v8035_v25 }
  0x59   : > { %7841 = vmatmul.msk.bf16.gmra.mxu2 %vm1986_vm2, %v8099_v26  ;;  %7905 = vmatmul.msk.bf16.gmra.mxu3 %vm1986_vm2, %v8163_v27 }
  0x68   : > { %7714 = vmatmul.msk.bf16.gmra.mxu0 %vm1986_vm2, %v7972_v28  ;;  %7778 = vmatmul.msk.bf16.gmra.mxu1 %vm1986_vm2, %v8036_v29 }
  0x69   : > { %7842 = vmatmul.msk.bf16.gmra.mxu2 %vm1986_vm2, %v8100_v30  ;;  %7906 = vmatmul.msk.bf16.gmra.mxu3 %vm1986_vm2, %v8164_v31 }
  0x78   : > { %7715 = vmatmul.msk.bf16.gmra.mxu0 %vm1986_vm2, %v7973_v32  ;;  %7779 = vmatmul.msk.bf16.gmra.mxu1 %vm1986_vm2, %v8037_v33 }
  0x79   : > { %7843 = vmatmul.msk.bf16.gmra.mxu2 %vm1986_vm2, %v8101_v34  ;;  %7907 = vmatmul.msk.bf16.gmra.mxu3 %vm1986_vm2, %v8165_v35 }
  0x88   : > { %7716 = vmatmul.msk.bf16.gmra.mxu0 %vm1986_vm2, %v7974_v36  ;;  %7780 = vmatmul.msk.bf16.gmra.mxu1 %vm1986_vm2, %v8038_v37 }
  0x89   : > { %7844 = vmatmul.msk.bf16.gmra.mxu2 %vm1986_vm2, %v8102_v38  ;;  %7908 = vmatmul.msk.bf16.gmra.mxu3 %vm1986_vm2, %v8166_v39 }
  0x95   : > { %v2771_v43 = vpop.f32.mrf.mxu0  ;;  %v3091_v44 = vpop.f32.mrf.mxu1 }
  0x96   : > { %v2772_v47 = vadd.f32 %v8371_v40, %v2771_v43  ;;  %v3092_v48 = vadd.f32 %v8371_v40, %v3091_v44 }
  0x98   : > { %vm4051_vm3 = vcmp.ge.f32.partialorder %v2772_v47, 0.0  ;;  %v4563_v49 = vmul.f32 0.2, %v2772_v47  ;;  %vm4179_vm4 = vcmp.ge.f32.partialorder %v3092_v48, 0.0  ;;  %v4691_v50 = vmul.f32 0.2, %v3092_v48  ;;  %7717 = vmatmul.msk.bf16.gmra.mxu0 %vm1986_vm2, %v7975_v41  ;;  %7781 = vmatmul.msk.bf16.gmra.mxu1 %vm1986_vm2, %v8039_v42 }
  0x99   : > { %7845 = vmatmul.msk.bf16.gmra.mxu2 %vm1986_vm2, %v8103_v45  ;;  %7909 = vmatmul.msk.bf16.gmra.mxu3 %vm1986_vm2, %v8167_v46 }
  0x9a   : > { %v5075_v51 = vsel %vm4051_vm3, %v2772_v47, %v4563_v49  ;;  %v5203_v52 = vsel %vm4179_vm4, %v3092_v48, %v4691_v50 }
  0x9b   : > { %v5587_v53 = vpack.c.bf16 %v5075_v51, %v5075_v51  ;;  %v5715_v54 = vpack.c.bf16 %v5203_v52, %v5203_v52 }
  0x9c   : > { %v3411_v55 = vpop.f32.mrf.mxu2  ;;  %v3731_v56 = vpop.f32.mrf.mxu3 }
  0x9d   : > { %6100 = vst.msk [vmem:[%s8388_s29] sm:$0xf] %vm6099_vm5, %v5587_v53  ;;  %v3412_v57 = vadd.f32 %v8371_v40, %v3411_v55  ;;  %v3732_v58 = vadd.f32 %v8371_v40, %v3731_v56  ;;  %v2773_v59 = vpop.f32.mrf.mxu0  ;;  %v3093_v60 = vpop.f32.mrf.mxu1 }
  0x9e   : > { %6228 = vst.msk [vmem:[%s8388_s29 + $0x200] sm:$0xf] %vm6099_vm5, %v5715_v54  ;;  %v2774_v61 = vadd.f32 %v8371_v40, %v2773_v59  ;;  %v3094_v62 = vadd.f32 %v8371_v40, %v3093_v60  ;;  %v8041_v59 = vld [vmem:[%s8302_s24 + $0x250] sm:$0xff] }
  0x9f   : > { %vm4307_vm6 = vcmp.ge.f32.partialorder %v3412_v57, 0.0  ;;  %v4819_v63 = vmul.f32 0.2, %v3412_v57  ;;  %vm4435_vm7 = vcmp.ge.f32.partialorder %v3732_v58, 0.0  ;;  %v4947_v0 = vmul.f32 0.2, %v3732_v58 }
  0xa0   : > { %vm4052_vm8 = vcmp.ge.f32.partialorder %v2774_v61, 0.0  ;;  %v4564_v1 = vmul.f32 0.2, %v2774_v61  ;;  %vm4180_vm9 = vcmp.ge.f32.partialorder %v3094_v62, 0.0  ;;  %v4692_v2 = vmul.f32 0.2, %v3094_v62 }
  0xa1   : > { %v5331_v3 = vsel %vm4307_vm6, %v3412_v57, %v4819_v63  ;;  %v5459_v4 = vsel %vm4435_vm7, %v3732_v58, %v4947_v0  ;;  %v7977_v58 = vld [vmem:[%s8302_s24 + $0x50] sm:$0xff] }
  0xa2   : > { %v5843_v5 = vpack.c.bf16 %v5331_v3, %v5331_v3  ;;  %v5971_v6 = vpack.c.bf16 %v5459_v4, %v5459_v4  ;;  %v5076_v7 = vsel %vm4052_vm8, %v2774_v61, %v4564_v1  ;;  %v5204_v8 = vsel %vm4180_vm9, %v3094_v62, %v4692_v2  ;;  %v8105_v0 = vld [vmem:[%s8302_s24 + $0x450] sm:$0xff] }
  0xa3   : > { %v5588_v9 = vpack.c.bf16 %v5076_v7, %v5076_v7  ;;  %v5716_v10 = vpack.c.bf16 %v5204_v8, %v5204_v8  ;;  %v8169_v1 = vld [vmem:[%s8302_s24 + $0x650] sm:$0xff] }
  0xa4   : > { %6356 = vst.msk [vmem:[%s8388_s29 + $0x400] sm:$0xf] %vm6099_vm5, %v5843_v5  ;;  %v3413_v11 = vpop.f32.mrf.mxu2  ;;  %v3733_v12 = vpop.f32.mrf.mxu3 }
  0xa5   : > { %6484 = vst.msk [vmem:[%s8388_s29 + $0x600] sm:$0xf] %vm6099_vm5, %v5971_v6  ;;  %v3414_v15 = vadd.f32 %v8371_v40, %v3413_v11  ;;  %v3734_v16 = vadd.f32 %v8371_v40, %v3733_v12  ;;  %v2776_v17 = vpop.f32.mrf.mxu0  ;;  %v3096_v18 = vpop.f32.mrf.mxu1 }
  0xa6   : > { %6101 = vst.msk [vmem:[%s8388_s29 + $0x4] sm:$0xf] %vm6099_vm5, %v5588_v9  ;;  %v2777_v21 = vadd.f32 %v8371_v40, %v2776_v17  ;;  %v3097_v22 = vadd.f32 %v8371_v40, %v3096_v18 }
  0xa7   : > { %6229 = vst.msk [vmem:[%s8388_s29 + $0x204] sm:$0xf] %vm6099_vm5, %v5716_v10  ;;  %vm4308_vm10 = vcmp.ge.f32.partialorder %v3414_v15, 0.0  ;;  %v4820_v23 = vmul.f32 0.2, %v3414_v15  ;;  %vm4436_vm11 = vcmp.ge.f32.partialorder %v3734_v16, 0.0 }
  0xa8   : > { %v4948_v24 = vmul.f32 0.2, %v3734_v16  ;;  %vm4053_vm12 = vcmp.ge.f32.partialorder %v2777_v21, 0.0  ;;  %v4565_v25 = vmul.f32 0.2, %v2777_v21  ;;  %vm4181_vm13 = vcmp.ge.f32.partialorder %v3097_v22, 0.0  ;;  %7718 = vmatmul.msk.bf16.gmra.mxu0 %vm1986_vm2, %v7976_v13  ;;  %7782 = vmatmul.msk.bf16.gmra.mxu1 %vm1986_vm2, %v8040_v14 }
  0xa9   : > { %v5332_v26 = vsel %vm4308_vm10, %v3414_v15, %v4820_v23  ;;  %v4693_v27 = vmul.f32 0.2, %v3097_v22  ;;  %7846 = vmatmul.msk.bf16.gmra.mxu2 %vm1986_vm2, %v8104_v19  ;;  %7910 = vmatmul.msk.bf16.gmra.mxu3 %vm1986_vm2, %v8168_v20 }
  0xaa   : > { %v5844_v28 = vpack.c.bf16 %v5332_v26, %v5332_v26  ;;  %v5460_v29 = vsel %vm4436_vm11, %v3734_v16, %v4948_v24  ;;  %v5077_v30 = vsel %vm4053_vm12, %v2777_v21, %v4565_v25 }
  0xab   : > { %v5972_v31 = vpack.c.bf16 %v5460_v29, %v5460_v29  ;;  %v5589_v32 = vpack.c.bf16 %v5077_v30, %v5077_v30  ;;  %v5205_v33 = vsel %vm4181_vm13, %v3097_v22, %v4693_v27 }
  0xac   : > { %6357 = vst.msk [vmem:[%s8388_s29 + $0x404] sm:$0xf] %vm6099_vm5, %v5844_v28  ;;  %v5717_v34 = vpack.c.bf16 %v5205_v33, %v5205_v33  ;;  %v3416_v35 = vpop.f32.mrf.mxu2  ;;  %v3736_v36 = vpop.f32.mrf.mxu3 }
  0xad   : > { %6485 = vst.msk [vmem:[%s8388_s29 + $0x604] sm:$0xf] %vm6099_vm5, %v5972_v31  ;;  %v3417_v37 = vadd.f32 %v8371_v40, %v3416_v35  ;;  %v3737_v38 = vadd.f32 %v8371_v40, %v3736_v36  ;;  %v2778_v39 = vpop.f32.mrf.mxu0  ;;  %v3098_v41 = vpop.f32.mrf.mxu1 }
  0xae   : > { %6102 = vst.msk [vmem:[%s8388_s29 + $0x8] sm:$0xf] %vm6099_vm5, %v5589_v32  ;;  %v2779_v42 = vadd.f32 %v8371_v40, %v2778_v39  ;;  %v3099_v43 = vadd.f32 %v8371_v40, %v3098_v41  ;;  %v8042_v39 = vld [vmem:[%s8302_s24 + $0x258] sm:$0xff] }
  0xaf   : > { %6230 = vst.msk [vmem:[%s8388_s29 + $0x208] sm:$0xf] %vm6099_vm5, %v5717_v34  ;;  %vm4309_vm14 = vcmp.ge.f32.partialorder %v3417_v37, 0.0  ;;  %v4821_v44 = vmul.f32 0.2, %v3417_v37  ;;  %vm4437_vm15 = vcmp.ge.f32.partialorder %v3737_v38, 0.0 }
  0xb0   : > { %v4949_v45 = vmul.f32 0.2, %v3737_v38  ;;  %vm4054_vm0 = vcmp.ge.f32.partialorder %v2779_v42, 0.0  ;;  %v4566_v46 = vmul.f32 0.2, %v2779_v42  ;;  %vm4182_vm1 = vcmp.ge.f32.partialorder %v3099_v43, 0.0 }
  0xb1   : > { %v5333_v47 = vsel %vm4309_vm14, %v3417_v37, %v4821_v44  ;;  %v4694_v48 = vmul.f32 0.2, %v3099_v43 }
  0xb2   : > { %v5845_v49 = vpack.c.bf16 %v5333_v47, %v5333_v47  ;;  %v5461_v50 = vsel %vm4437_vm15, %v3737_v38, %v4949_v45  ;;  %v5078_v51 = vsel %vm4054_vm0, %v2779_v42, %v4566_v46  ;;  %v7978_v38 = vld [vmem:[%s8302_s24 + $0x58] sm:$0xff] }
  0xb3   : > { %v5973_v52 = vpack.c.bf16 %v5461_v50, %v5461_v50  ;;  %v5590_v53 = vpack.c.bf16 %v5078_v51, %v5078_v51  ;;  %v5206_v54 = vsel %vm4182_vm1, %v3099_v43, %v4694_v48  ;;  %v8106_v45 = vld [vmem:[%s8302_s24 + $0x458] sm:$0xff] }
  0xb4   : > { %6358 = vst.msk [vmem:[%s8388_s29 + $0x408] sm:$0xf] %vm6099_vm5, %v5845_v49  ;;  %v5718_v55 = vpack.c.bf16 %v5206_v54, %v5206_v54  ;;  %v3418_v56 = vpop.f32.mrf.mxu2  ;;  %v3738_v57 = vpop.f32.mrf.mxu3  ;;  %v8170_v46 = vld [vmem:[%s8302_s24 + $0x658] sm:$0xff] }
  0xb5   : > { %6486 = vst.msk [vmem:[%s8388_s29 + $0x608] sm:$0xf] %vm6099_vm5, %v5973_v52  ;;  %v3419_v60 = vadd.f32 %v8371_v40, %v3418_v56  ;;  %v3739_v61 = vadd.f32 %v8371_v40, %v3738_v57  ;;  %v2781_v62 = vpop.f32.mrf.mxu0  ;;  %v3101_v63 = vpop.f32.mrf.mxu1 }
  0xb6   : > { %6103 = vst.msk [vmem:[%s8388_s29 + $0xc] sm:$0xf] %vm6099_vm5, %v5590_v53  ;;  %v2782_v2 = vadd.f32 %v8371_v40, %v2781_v62  ;;  %v3102_v3 = vadd.f32 %v8371_v40, %v3101_v63 }
  0xb7   : > { %6231 = vst.msk [vmem:[%s8388_s29 + $0x20c] sm:$0xf] %vm6099_vm5, %v5718_v55  ;;  %vm4310_vm3 = vcmp.ge.f32.partialorder %v3419_v60, 0.0  ;;  %v4822_v4 = vmul.f32 0.2, %v3419_v60  ;;  %vm4438_vm4 = vcmp.ge.f32.partialorder %v3739_v61, 0.0 }
  0xb8   : > { %v4950_v5 = vmul.f32 0.2, %v3739_v61  ;;  %vm4055_vm6 = vcmp.ge.f32.partialorder %v2782_v2, 0.0  ;;  %v4567_v6 = vmul.f32 0.2, %v2782_v2  ;;  %vm4183_vm7 = vcmp.ge.f32.partialorder %v3102_v3, 0.0  ;;  %7719 = vmatmul.msk.bf16.gmra.mxu0 %vm1986_vm2, %v7977_v58  ;;  %7783 = vmatmul.msk.bf16.gmra.mxu1 %vm1986_vm2, %v8041_v59 }
  0xb9   : > { %v5334_v7 = vsel %vm4310_vm3, %v3419_v60, %v4822_v4  ;;  %v4695_v8 = vmul.f32 0.2, %v3102_v3  ;;  %7847 = vmatmul.msk.bf16.gmra.mxu2 %vm1986_vm2, %v8105_v0  ;;  %7911 = vmatmul.msk.bf16.gmra.mxu3 %vm1986_vm2, %v8169_v1 }
  0xba   : > { %v5846_v9 = vpack.c.bf16 %v5334_v7, %v5334_v7  ;;  %v5462_v10 = vsel %vm4438_vm4, %v3739_v61, %v4950_v5  ;;  %v5079_v11 = vsel %vm4055_vm6, %v2782_v2, %v4567_v6 }
  0xbb   : > { %v5974_v12 = vpack.c.bf16 %v5462_v10, %v5462_v10  ;;  %v5591_v13 = vpack.c.bf16 %v5079_v11, %v5079_v11  ;;  %v5207_v14 = vsel %vm4183_vm7, %v3102_v3, %v4695_v8 }
  0xbc   : > { %6359 = vst.msk [vmem:[%s8388_s29 + $0x40c] sm:$0xf] %vm6099_vm5, %v5846_v9  ;;  %v5719_v15 = vpack.c.bf16 %v5207_v14, %v5207_v14  ;;  %v3421_v16 = vpop.f32.mrf.mxu2  ;;  %v3741_v17 = vpop.f32.mrf.mxu3 }
  0xbd   : > { %6487 = vst.msk [vmem:[%s8388_s29 + $0x60c] sm:$0xf] %vm6099_vm5, %v5974_v12  ;;  %v3422_v18 = vadd.f32 %v8371_v40, %v3421_v16  ;;  %v3742_v19 = vadd.f32 %v8371_v40, %v3741_v17  ;;  %v2783_v20 = vpop.f32.mrf.mxu0  ;;  %v3103_v21 = vpop.f32.mrf.mxu1 }
  0xbe   : > { %6104 = vst.msk [vmem:[%s8388_s29 + $0x10] sm:$0xf] %vm6099_vm5, %v5591_v13  ;;  %v2784_v22 = vadd.f32 %v8371_v40, %v2783_v20  ;;  %v3104_v23 = vadd.f32 %v8371_v40, %v3103_v21  ;;  %v8043_v20 = vld [vmem:[%s8302_s24 + $0x260] sm:$0xff] }
  0xbf   : > { %6232 = vst.msk [vmem:[%s8388_s29 + $0x210] sm:$0xf] %vm6099_vm5, %v5719_v15  ;;  %vm4311_vm8 = vcmp.ge.f32.partialorder %v3422_v18, 0.0  ;;  %v4823_v24 = vmul.f32 0.2, %v3422_v18  ;;  %vm4439_vm9 = vcmp.ge.f32.partialorder %v3742_v19, 0.0 }
  0xc0   : > { %v4951_v25 = vmul.f32 0.2, %v3742_v19  ;;  %vm4056_vm10 = vcmp.ge.f32.partialorder %v2784_v22, 0.0  ;;  %v4568_v26 = vmul.f32 0.2, %v2784_v22  ;;  %vm4184_vm11 = vcmp.ge.f32.partialorder %v3104_v23, 0.0 }
  0xc1   : > { %v5335_v27 = vsel %vm4311_vm8, %v3422_v18, %v4823_v24  ;;  %v4696_v28 = vmul.f32 0.2, %v3104_v23 }
  0xc2   : > { %v5847_v29 = vpack.c.bf16 %v5335_v27, %v5335_v27  ;;  %v5463_v30 = vsel %vm4439_vm9, %v3742_v19, %v4951_v25  ;;  %v5080_v31 = vsel %vm4056_vm10, %v2784_v22, %v4568_v26  ;;  %v7979_v19 = vld [vmem:[%s8302_s24 + $0x60] sm:$0xff] }
  0xc3   : > { %v5975_v32 = vpack.c.bf16 %v5463_v30, %v5463_v30  ;;  %v5592_v33 = vpack.c.bf16 %v5080_v31, %v5080_v31  ;;  %v5208_v34 = vsel %vm4184_vm11, %v3104_v23, %v4696_v28  ;;  %v8107_v25 = vld [vmem:[%s8302_s24 + $0x460] sm:$0xff] }
  0xc4   : > { %6360 = vst.msk [vmem:[%s8388_s29 + $0x410] sm:$0xf] %vm6099_vm5, %v5847_v29  ;;  %v5720_v35 = vpack.c.bf16 %v5208_v34, %v5208_v34  ;;  %v3423_v36 = vpop.f32.mrf.mxu2  ;;  %v3743_v37 = vpop.f32.mrf.mxu3  ;;  %v8171_v26 = vld [vmem:[%s8302_s24 + $0x660] sm:$0xff] }
  0xc5   : > { %6488 = vst.msk [vmem:[%s8388_s29 + $0x610] sm:$0xf] %vm6099_vm5, %v5975_v32  ;;  %v3424_v41 = vadd.f32 %v8371_v40, %v3423_v36  ;;  %v3744_v42 = vadd.f32 %v8371_v40, %v3743_v37  ;;  %v2786_v43 = vpop.f32.mrf.mxu0  ;;  %v3106_v44 = vpop.f32.mrf.mxu1 }
  0xc6   : > { %6105 = vst.msk [vmem:[%s8388_s29 + $0x14] sm:$0xf] %vm6099_vm5, %v5592_v33  ;;  %v2787_v47 = vadd.f32 %v8371_v40, %v2786_v43  ;;  %v3107_v48 = vadd.f32 %v8371_v40, %v3106_v44 }
  0xc7   : > { %6233 = vst.msk [vmem:[%s8388_s29 + $0x214] sm:$0xf] %vm6099_vm5, %v5720_v35  ;;  %vm4312_vm12 = vcmp.ge.f32.partialorder %v3424_v41, 0.0  ;;  %v4824_v49 = vmul.f32 0.2, %v3424_v41  ;;  %vm4440_vm13 = vcmp.ge.f32.partialorder %v3744_v42, 0.0 }
  0xc8   : > { %v4952_v50 = vmul.f32 0.2, %v3744_v42  ;;  %vm4057_vm14 = vcmp.ge.f32.partialorder %v2787_v47, 0.0  ;;  %v4569_v51 = vmul.f32 0.2, %v2787_v47  ;;  %vm4185_vm15 = vcmp.ge.f32.partialorder %v3107_v48, 0.0  ;;  %7720 = vmatmul.msk.bf16.gmra.mxu0 %vm1986_vm2, %v7978_v38  ;;  %7784 = vmatmul.msk.bf16.gmra.mxu1 %vm1986_vm2, %v8042_v39 }
  0xc9   : > { %v5336_v52 = vsel %vm4312_vm12, %v3424_v41, %v4824_v49  ;;  %v4697_v53 = vmul.f32 0.2, %v3107_v48  ;;  %7848 = vmatmul.msk.bf16.gmra.mxu2 %vm1986_vm2, %v8106_v45  ;;  %7912 = vmatmul.msk.bf16.gmra.mxu3 %vm1986_vm2, %v8170_v46 }
  0xca   : > { %v5848_v54 = vpack.c.bf16 %v5336_v52, %v5336_v52  ;;  %v5464_v55 = vsel %vm4440_vm13, %v3744_v42, %v4952_v50  ;;  %v5081_v56 = vsel %vm4057_vm14, %v2787_v47, %v4569_v51 }
  0xcb   : > { %v5976_v57 = vpack.c.bf16 %v5464_v55, %v5464_v55  ;;  %v5593_v58 = vpack.c.bf16 %v5081_v56, %v5081_v56  ;;  %v5209_v59 = vsel %vm4185_vm15, %v3107_v48, %v4697_v53 }
  0xcc   : > { %6361 = vst.msk [vmem:[%s8388_s29 + $0x414] sm:$0xf] %vm6099_vm5, %v5848_v54  ;;  %v5721_v60 = vpack.c.bf16 %v5209_v59, %v5209_v59  ;;  %v3426_v61 = vpop.f32.mrf.mxu2  ;;  %v3746_v62 = vpop.f32.mrf.mxu3 }
  0xcd   : > { %6489 = vst.msk [vmem:[%s8388_s29 + $0x614] sm:$0xf] %vm6099_vm5, %v5976_v57  ;;  %v3427_v63 = vadd.f32 %v8371_v40, %v3426_v61  ;;  %v3747_v0 = vadd.f32 %v8371_v40, %v3746_v62  ;;  %v2788_v1 = vpop.f32.mrf.mxu0  ;;  %v3108_v2 = vpop.f32.mrf.mxu1 }
  0xce   : > { %6106 = vst.msk [vmem:[%s8388_s29 + $0x18] sm:$0xf] %vm6099_vm5, %v5593_v58  ;;  %v2789_v3 = vadd.f32 %v8371_v40, %v2788_v1  ;;  %v3109_v4 = vadd.f32 %v8371_v40, %v3108_v2  ;;  %v8044_v1 = vld [vmem:[%s8302_s24 + $0x268] sm:$0xff] }
  0xcf   : > { %6234 = vst.msk [vmem:[%s8388_s29 + $0x218] sm:$0xf] %vm6099_vm5, %v5721_v60  ;;  %vm4313_vm0 = vcmp.ge.f32.partialorder %v3427_v63, 0.0  ;;  %v4825_v5 = vmul.f32 0.2, %v3427_v63  ;;  %vm4441_vm1 = vcmp.ge.f32.partialorder %v3747_v0, 0.0 }
  0xd0   : > { %v4953_v6 = vmul.f32 0.2, %v3747_v0  ;;  %vm4058_vm3 = vcmp.ge.f32.partialorder %v2789_v3, 0.0  ;;  %v4570_v7 = vmul.f32 0.2, %v2789_v3  ;;  %vm4186_vm4 = vcmp.ge.f32.partialorder %v3109_v4, 0.0 }
  0xd1   : > { %v5337_v8 = vsel %vm4313_vm0, %v3427_v63, %v4825_v5  ;;  %v4698_v9 = vmul.f32 0.2, %v3109_v4 }
  0xd2   : > { %v5849_v10 = vpack.c.bf16 %v5337_v8, %v5337_v8  ;;  %v5465_v11 = vsel %vm4441_vm1, %v3747_v0, %v4953_v6  ;;  %v5082_v12 = vsel %vm4058_vm3, %v2789_v3, %v4570_v7  ;;  %v7980_v0 = vld [vmem:[%s8302_s24 + $0x68] sm:$0xff] }
  0xd3   : > { %v5977_v13 = vpack.c.bf16 %v5465_v11, %v5465_v11  ;;  %v5594_v14 = vpack.c.bf16 %v5082_v12, %v5082_v12  ;;  %v5210_v15 = vsel %vm4186_vm4, %v3109_v4, %v4698_v9  ;;  %v8108_v6 = vld [vmem:[%s8302_s24 + $0x468] sm:$0xff] }
  0xd4   : > { %6362 = vst.msk [vmem:[%s8388_s29 + $0x418] sm:$0xf] %vm6099_vm5, %v5849_v10  ;;  %v5722_v16 = vpack.c.bf16 %v5210_v15, %v5210_v15  ;;  %v3428_v17 = vpop.f32.mrf.mxu2  ;;  %v3748_v18 = vpop.f32.mrf.mxu3  ;;  %v8172_v7 = vld [vmem:[%s8302_s24 + $0x668] sm:$0xff] }
  0xd5   : > { %6490 = vst.msk [vmem:[%s8388_s29 + $0x618] sm:$0xf] %vm6099_vm5, %v5977_v13  ;;  %v3429_v21 = vadd.f32 %v8371_v40, %v3428_v17  ;;  %v3749_v22 = vadd.f32 %v8371_v40, %v3748_v18  ;;  %v2791_v23 = vpop.f32.mrf.mxu0  ;;  %v3111_v24 = vpop.f32.mrf.mxu1 }
  0xd6   : > { %6107 = vst.msk [vmem:[%s8388_s29 + $0x1c] sm:$0xf] %vm6099_vm5, %v5594_v14  ;;  %v2792_v27 = vadd.f32 %v8371_v40, %v2791_v23  ;;  %v3112_v28 = vadd.f32 %v8371_v40, %v3111_v24 }
  0xd7   : > { %6235 = vst.msk [vmem:[%s8388_s29 + $0x21c] sm:$0xf] %vm6099_vm5, %v5722_v16  ;;  %vm4314_vm6 = vcmp.ge.f32.partialorder %v3429_v21, 0.0  ;;  %v4826_v29 = vmul.f32 0.2, %v3429_v21  ;;  %vm4442_vm7 = vcmp.ge.f32.partialorder %v3749_v22, 0.0 }
  0xd8   : > { %v4954_v30 = vmul.f32 0.2, %v3749_v22  ;;  %vm4059_vm8 = vcmp.ge.f32.partialorder %v2792_v27, 0.0  ;;  %v4571_v31 = vmul.f32 0.2, %v2792_v27  ;;  %vm4187_vm9 = vcmp.ge.f32.partialorder %v3112_v28, 0.0  ;;  %7721 = vmatmul.msk.bf16.gmra.mxu0 %vm1986_vm2, %v7979_v19  ;;  %7785 = vmatmul.msk.bf16.gmra.mxu1 %vm1986_vm2, %v8043_v20 }
  0xd9   : > { %v5338_v32 = vsel %vm4314_vm6, %v3429_v21, %v4826_v29  ;;  %v4699_v33 = vmul.f32 0.2, %v3112_v28  ;;  %7849 = vmatmul.msk.bf16.gmra.mxu2 %vm1986_vm2, %v8107_v25  ;;  %7913 = vmatmul.msk.bf16.gmra.mxu3 %vm1986_vm2, %v8171_v26 }
  0xda   : > { %v5850_v34 = vpack.c.bf16 %v5338_v32, %v5338_v32  ;;  %v5466_v35 = vsel %vm4442_vm7, %v3749_v22, %v4954_v30  ;;  %v5083_v36 = vsel %vm4059_vm8, %v2792_v27, %v4571_v31 }
  0xdb   : > { %v5978_v37 = vpack.c.bf16 %v5466_v35, %v5466_v35  ;;  %v5595_v38 = vpack.c.bf16 %v5083_v36, %v5083_v36  ;;  %v5211_v39 = vsel %vm4187_vm9, %v3112_v28, %v4699_v33 }
  0xdc   : > { %6363 = vst.msk [vmem:[%s8388_s29 + $0x41c] sm:$0xf] %vm6099_vm5, %v5850_v34  ;;  %v5723_v41 = vpack.c.bf16 %v5211_v39, %v5211_v39  ;;  %v3431_v42 = vpop.f32.mrf.mxu2  ;;  %v3751_v43 = vpop.f32.mrf.mxu3 }
  0xdd   : > { %6491 = vst.msk [vmem:[%s8388_s29 + $0x61c] sm:$0xf] %vm6099_vm5, %v5978_v37  ;;  %v3432_v44 = vadd.f32 %v8371_v40, %v3431_v42  ;;  %v3752_v45 = vadd.f32 %v8371_v40, %v3751_v43  ;;  %v2793_v46 = vpop.f32.mrf.mxu0  ;;  %v3113_v47 = vpop.f32.mrf.mxu1 }
  0xde   : > { %6108 = vst.msk [vmem:[%s8388_s29 + $0x20] sm:$0xf] %vm6099_vm5, %v5595_v38  ;;  %v2794_v48 = vadd.f32 %v8371_v40, %v2793_v46  ;;  %v3114_v49 = vadd.f32 %v8371_v40, %v3113_v47  ;;  %v8045_v46 = vld [vmem:[%s8302_s24 + $0x270] sm:$0xff] }
  0xdf   : > { %6236 = vst.msk [vmem:[%s8388_s29 + $0x220] sm:$0xf] %vm6099_vm5, %v5723_v41  ;;  %vm4315_vm10 = vcmp.ge.f32.partialorder %v3432_v44, 0.0  ;;  %v4827_v50 = vmul.f32 0.2, %v3432_v44  ;;  %vm4443_vm11 = vcmp.ge.f32.partialorder %v3752_v45, 0.0 }
  0xe0   : > { %v4955_v51 = vmul.f32 0.2, %v3752_v45  ;;  %vm4060_vm12 = vcmp.ge.f32.partialorder %v2794_v48, 0.0  ;;  %v4572_v52 = vmul.f32 0.2, %v2794_v48  ;;  %vm4188_vm13 = vcmp.ge.f32.partialorder %v3114_v49, 0.0 }
  0xe1   : > { %v5339_v53 = vsel %vm4315_vm10, %v3432_v44, %v4827_v50  ;;  %v4700_v54 = vmul.f32 0.2, %v3114_v49 }
  0xe2   : > { %v5851_v55 = vpack.c.bf16 %v5339_v53, %v5339_v53  ;;  %v5467_v56 = vsel %vm4443_vm11, %v3752_v45, %v4955_v51  ;;  %v5084_v57 = vsel %vm4060_vm12, %v2794_v48, %v4572_v52  ;;  %v7981_v45 = vld [vmem:[%s8302_s24 + $0x70] sm:$0xff] }
  0xe3   : > { %v5979_v58 = vpack.c.bf16 %v5467_v56, %v5467_v56  ;;  %v5596_v59 = vpack.c.bf16 %v5084_v57, %v5084_v57  ;;  %v5212_v60 = vsel %vm4188_vm13, %v3114_v49, %v4700_v54  ;;  %v8109_v51 = vld [vmem:[%s8302_s24 + $0x470] sm:$0xff] }
  0xe4   : > { %6364 = vst.msk [vmem:[%s8388_s29 + $0x420] sm:$0xf] %vm6099_vm5, %v5851_v55  ;;  %v5724_v61 = vpack.c.bf16 %v5212_v60, %v5212_v60  ;;  %v3433_v62 = vpop.f32.mrf.mxu2  ;;  %v3753_v63 = vpop.f32.mrf.mxu3  ;;  %v8173_v52 = vld [vmem:[%s8302_s24 + $0x670] sm:$0xff] }
  0xe5   : > { %6492 = vst.msk [vmem:[%s8388_s29 + $0x620] sm:$0xf] %vm6099_vm5, %v5979_v58  ;;  %v3434_v2 = vadd.f32 %v8371_v40, %v3433_v62  ;;  %v3754_v3 = vadd.f32 %v8371_v40, %v3753_v63  ;;  %v2796_v4 = vpop.f32.mrf.mxu0  ;;  %v3116_v5 = vpop.f32.mrf.mxu1 }
  0xe6   : > { %6109 = vst.msk [vmem:[%s8388_s29 + $0x24] sm:$0xf] %vm6099_vm5, %v5596_v59  ;;  %v2797_v8 = vadd.f32 %v8371_v40, %v2796_v4  ;;  %v3117_v9 = vadd.f32 %v8371_v40, %v3116_v5 }
  0xe7   : > { %6237 = vst.msk [vmem:[%s8388_s29 + $0x224] sm:$0xf] %vm6099_vm5, %v5724_v61  ;;  %vm4316_vm14 = vcmp.ge.f32.partialorder %v3434_v2, 0.0  ;;  %v4828_v10 = vmul.f32 0.2, %v3434_v2  ;;  %vm4444_vm15 = vcmp.ge.f32.partialorder %v3754_v3, 0.0 }
  0xe8   : > { %v4956_v11 = vmul.f32 0.2, %v3754_v3  ;;  %vm4061_vm0 = vcmp.ge.f32.partialorder %v2797_v8, 0.0  ;;  %v4573_v12 = vmul.f32 0.2, %v2797_v8  ;;  %vm4189_vm1 = vcmp.ge.f32.partialorder %v3117_v9, 0.0  ;;  %7722 = vmatmul.msk.bf16.gmra.mxu0 %vm1986_vm2, %v7980_v0  ;;  %7786 = vmatmul.msk.bf16.gmra.mxu1 %vm1986_vm2, %v8044_v1 }
  0xe9   : > { %v5340_v13 = vsel %vm4316_vm14, %v3434_v2, %v4828_v10  ;;  %v4701_v14 = vmul.f32 0.2, %v3117_v9  ;;  %7850 = vmatmul.msk.bf16.gmra.mxu2 %vm1986_vm2, %v8108_v6  ;;  %7914 = vmatmul.msk.bf16.gmra.mxu3 %vm1986_vm2, %v8172_v7 }
  0xea   : > { %v5852_v15 = vpack.c.bf16 %v5340_v13, %v5340_v13  ;;  %v5468_v16 = vsel %vm4444_vm15, %v3754_v3, %v4956_v11  ;;  %v5085_v17 = vsel %vm4061_vm0, %v2797_v8, %v4573_v12 }
  0xeb   : > { %v5980_v18 = vpack.c.bf16 %v5468_v16, %v5468_v16  ;;  %v5597_v19 = vpack.c.bf16 %v5085_v17, %v5085_v17  ;;  %v5213_v20 = vsel %vm4189_vm1, %v3117_v9, %v4701_v14 }
  0xec   : > { %6365 = vst.msk [vmem:[%s8388_s29 + $0x424] sm:$0xf] %vm6099_vm5, %v5852_v15  ;;  %v5725_v21 = vpack.c.bf16 %v5213_v20, %v5213_v20  ;;  %v3436_v22 = vpop.f32.mrf.mxu2  ;;  %v3756_v23 = vpop.f32.mrf.mxu3 }
  0xed   : > { %6493 = vst.msk [vmem:[%s8388_s29 + $0x624] sm:$0xf] %vm6099_vm5, %v5980_v18  ;;  %v3437_v24 = vadd.f32 %v8371_v40, %v3436_v22  ;;  %v3757_v25 = vadd.f32 %v8371_v40, %v3756_v23  ;;  %v2798_v26 = vpop.f32.mrf.mxu0  ;;  %v3118_v27 = vpop.f32.mrf.mxu1 }
  0xee   : > { %6110 = vst.msk [vmem:[%s8388_s29 + $0x28] sm:$0xf] %vm6099_vm5, %v5597_v19  ;;  %v2799_v28 = vadd.f32 %v8371_v40, %v2798_v26  ;;  %v3119_v29 = vadd.f32 %v8371_v40, %v3118_v27  ;;  %v8046_v26 = vld [vmem:[%s8302_s24 + $0x278] sm:$0xff] }
  0xef   : > { %6238 = vst.msk [vmem:[%s8388_s29 + $0x228] sm:$0xf] %vm6099_vm5, %v5725_v21  ;;  %vm4317_vm3 = vcmp.ge.f32.partialorder %v3437_v24, 0.0  ;;  %v4829_v30 = vmul.f32 0.2, %v3437_v24  ;;  %vm4445_vm4 = vcmp.ge.f32.partialorder %v3757_v25, 0.0 }
  0xf0   : > { %v4957_v31 = vmul.f32 0.2, %v3757_v25  ;;  %vm4062_vm6 = vcmp.ge.f32.partialorder %v2799_v28, 0.0  ;;  %v4574_v32 = vmul.f32 0.2, %v2799_v28  ;;  %vm4190_vm7 = vcmp.ge.f32.partialorder %v3119_v29, 0.0 }
  0xf1   : > { %v5341_v33 = vsel %vm4317_vm3, %v3437_v24, %v4829_v30  ;;  %v4702_v34 = vmul.f32 0.2, %v3119_v29 }
  0xf2   : > { %v5853_v35 = vpack.c.bf16 %v5341_v33, %v5341_v33  ;;  %v5469_v36 = vsel %vm4445_vm4, %v3757_v25, %v4957_v31  ;;  %v5086_v37 = vsel %vm4062_vm6, %v2799_v28, %v4574_v32  ;;  %v7982_v25 = vld [vmem:[%s8302_s24 + $0x78] sm:$0xff] }
  0xf3   : > { %v5981_v38 = vpack.c.bf16 %v5469_v36, %v5469_v36  ;;  %v5598_v39 = vpack.c.bf16 %v5086_v37, %v5086_v37  ;;  %v5214_v41 = vsel %vm4190_vm7, %v3119_v29, %v4702_v34  ;;  %v8110_v31 = vld [vmem:[%s8302_s24 + $0x478] sm:$0xff] }
  0xf4   : > { %6366 = vst.msk [vmem:[%s8388_s29 + $0x428] sm:$0xf] %vm6099_vm5, %v5853_v35  ;;  %v5726_v42 = vpack.c.bf16 %v5214_v41, %v5214_v41  ;;  %v3438_v43 = vpop.f32.mrf.mxu2  ;;  %v3758_v44 = vpop.f32.mrf.mxu3  ;;  %v8174_v32 = vld [vmem:[%s8302_s24 + $0x678] sm:$0xff] }
  0xf5   : > { %6494 = vst.msk [vmem:[%s8388_s29 + $0x628] sm:$0xf] %vm6099_vm5, %v5981_v38  ;;  %v3439_v47 = vadd.f32 %v8371_v40, %v3438_v43  ;;  %v3759_v48 = vadd.f32 %v8371_v40, %v3758_v44  ;;  %v2801_v49 = vpop.f32.mrf.mxu0  ;;  %v3121_v50 = vpop.f32.mrf.mxu1 }
  0xf6   : > { %6111 = vst.msk [vmem:[%s8388_s29 + $0x2c] sm:$0xf] %vm6099_vm5, %v5598_v39  ;;  %v2802_v53 = vadd.f32 %v8371_v40, %v2801_v49  ;;  %v3122_v54 = vadd.f32 %v8371_v40, %v3121_v50 }
  0xf7   : > { %6239 = vst.msk [vmem:[%s8388_s29 + $0x22c] sm:$0xf] %vm6099_vm5, %v5726_v42  ;;  %vm4318_vm8 = vcmp.ge.f32.partialorder %v3439_v47, 0.0  ;;  %v4830_v55 = vmul.f32 0.2, %v3439_v47  ;;  %vm4446_vm9 = vcmp.ge.f32.partialorder %v3759_v48, 0.0 }
  0xf8   : > { %v4958_v56 = vmul.f32 0.2, %v3759_v48  ;;  %vm4063_vm10 = vcmp.ge.f32.partialorder %v2802_v53, 0.0  ;;  %v4575_v57 = vmul.f32 0.2, %v2802_v53  ;;  %vm4191_vm11 = vcmp.ge.f32.partialorder %v3122_v54, 0.0  ;;  %7723 = vmatmul.msk.bf16.gmra.mxu0 %vm1986_vm2, %v7981_v45  ;;  %7787 = vmatmul.msk.bf16.gmra.mxu1 %vm1986_vm2, %v8045_v46 }
  0xf9   : > { %v5342_v58 = vsel %vm4318_vm8, %v3439_v47, %v4830_v55  ;;  %v4703_v59 = vmul.f32 0.2, %v3122_v54  ;;  %7851 = vmatmul.msk.bf16.gmra.mxu2 %vm1986_vm2, %v8109_v51  ;;  %7915 = vmatmul.msk.bf16.gmra.mxu3 %vm1986_vm2, %v8173_v52 }
  0xfa   : > { %v5854_v60 = vpack.c.bf16 %v5342_v58, %v5342_v58  ;;  %v5470_v61 = vsel %vm4446_vm9, %v3759_v48, %v4958_v56  ;;  %v5087_v62 = vsel %vm4063_vm10, %v2802_v53, %v4575_v57 }
  0xfb   : > { %v5982_v63 = vpack.c.bf16 %v5470_v61, %v5470_v61  ;;  %v5599_v0 = vpack.c.bf16 %v5087_v62, %v5087_v62  ;;  %v5215_v1 = vsel %vm4191_vm11, %v3122_v54, %v4703_v59 }
  0xfc   : > { %6367 = vst.msk [vmem:[%s8388_s29 + $0x42c] sm:$0xf] %vm6099_vm5, %v5854_v60  ;;  %v5727_v2 = vpack.c.bf16 %v5215_v1, %v5215_v1  ;;  %v3441_v3 = vpop.f32.mrf.mxu2  ;;  %v3761_v4 = vpop.f32.mrf.mxu3 }
  0xfd   : > { %6495 = vst.msk [vmem:[%s8388_s29 + $0x62c] sm:$0xf] %vm6099_vm5, %v5982_v63  ;;  %v3442_v5 = vadd.f32 %v8371_v40, %v3441_v3  ;;  %v3762_v6 = vadd.f32 %v8371_v40, %v3761_v4  ;;  %v2803_v7 = vpop.f32.mrf.mxu0  ;;  %v3123_v8 = vpop.f32.mrf.mxu1 }
  0xfe   : > { %6112 = vst.msk [vmem:[%s8388_s29 + $0x30] sm:$0xf] %vm6099_vm5, %v5599_v0  ;;  %v2804_v9 = vadd.f32 %v8371_v40, %v2803_v7  ;;  %v3124_v10 = vadd.f32 %v8371_v40, %v3123_v8  ;;  %v8047_v7 = vld [vmem:[%s8302_s24 + $0x280] sm:$0xff] }
  0xff   : > { %6240 = vst.msk [vmem:[%s8388_s29 + $0x230] sm:$0xf] %vm6099_vm5, %v5727_v2  ;;  %vm4319_vm12 = vcmp.ge.f32.partialorder %v3442_v5, 0.0  ;;  %v4831_v11 = vmul.f32 0.2, %v3442_v5  ;;  %vm4447_vm13 = vcmp.ge.f32.partialorder %v3762_v6, 0.0 }
 0x100   : > { %v4959_v12 = vmul.f32 0.2, %v3762_v6  ;;  %vm4064_vm14 = vcmp.ge.f32.partialorder %v2804_v9, 0.0  ;;  %v4576_v13 = vmul.f32 0.2, %v2804_v9  ;;  %vm4192_vm15 = vcmp.ge.f32.partialorder %v3124_v10, 0.0 }
 0x101   : > { %v5343_v14 = vsel %vm4319_vm12, %v3442_v5, %v4831_v11  ;;  %v4704_v15 = vmul.f32 0.2, %v3124_v10 }
 0x102   : > { %v5855_v16 = vpack.c.bf16 %v5343_v14, %v5343_v14  ;;  %v5471_v17 = vsel %vm4447_vm13, %v3762_v6, %v4959_v12  ;;  %v5088_v18 = vsel %vm4064_vm14, %v2804_v9, %v4576_v13  ;;  %v7983_v6 = vld [vmem:[%s8302_s24 + $0x80] sm:$0xff] }
 0x103   : > { %v5983_v19 = vpack.c.bf16 %v5471_v17, %v5471_v17  ;;  %v5600_v20 = vpack.c.bf16 %v5088_v18, %v5088_v18  ;;  %v5216_v21 = vsel %vm4192_vm15, %v3124_v10, %v4704_v15  ;;  %v8111_v12 = vld [vmem:[%s8302_s24 + $0x480] sm:$0xff] }
 0x104   : > { %6368 = vst.msk [vmem:[%s8388_s29 + $0x430] sm:$0xf] %vm6099_vm5, %v5855_v16  ;;  %v5728_v22 = vpack.c.bf16 %v5216_v21, %v5216_v21  ;;  %v3443_v23 = vpop.f32.mrf.mxu2  ;;  %v3763_v24 = vpop.f32.mrf.mxu3  ;;  %v8175_v13 = vld [vmem:[%s8302_s24 + $0x680] sm:$0xff] }
 0x105   : > { %6496 = vst.msk [vmem:[%s8388_s29 + $0x630] sm:$0xf] %vm6099_vm5, %v5983_v19  ;;  %v3444_v27 = vadd.f32 %v8371_v40, %v3443_v23  ;;  %v3764_v28 = vadd.f32 %v8371_v40, %v3763_v24  ;;  %v2806_v29 = vpop.f32.mrf.mxu0  ;;  %v3126_v30 = vpop.f32.mrf.mxu1 }
 0x106   : > { %6113 = vst.msk [vmem:[%s8388_s29 + $0x34] sm:$0xf] %vm6099_vm5, %v5600_v20  ;;  %v2807_v33 = vadd.f32 %v8371_v40, %v2806_v29  ;;  %v3127_v34 = vadd.f32 %v8371_v40, %v3126_v30  ;;  %v8649_v29 = vld [vmem:[%s10404_s2] ss:$0 sm:$0xff] }
 0x107   : > { %6241 = vst.msk [vmem:[%s8388_s29 + $0x234] sm:$0xf] %vm6099_vm5, %v5728_v22  ;;  %vm4320_vm0 = vcmp.ge.f32.partialorder %v3444_v27, 0.0  ;;  %v4832_v35 = vmul.f32 0.2, %v3444_v27  ;;  %vm4448_vm1 = vcmp.ge.f32.partialorder %v3764_v28, 0.0 }
 0x108   : > { %v4960_v36 = vmul.f32 0.2, %v3764_v28  ;;  %vm4065_vm3 = vcmp.ge.f32.partialorder %v2807_v33, 0.0  ;;  %v4577_v37 = vmul.f32 0.2, %v2807_v33  ;;  %vm4193_vm4 = vcmp.ge.f32.partialorder %v3127_v34, 0.0  ;;  %7724 = vmatmul.msk.bf16.gmra.mxu0 %vm1986_vm2, %v7982_v25  ;;  %7788 = vmatmul.msk.bf16.gmra.mxu1 %vm1986_vm2, %v8046_v26 }
 0x109   : > { %v5344_v38 = vsel %vm4320_vm0, %v3444_v27, %v4832_v35  ;;  %v4705_v39 = vmul.f32 0.2, %v3127_v34  ;;  %7852 = vmatmul.msk.bf16.gmra.mxu2 %vm1986_vm2, %v8110_v31  ;;  %7916 = vmatmul.msk.bf16.gmra.mxu3 %vm1986_vm2, %v8174_v32 }
 0x10a   : > { %v5856_v41 = vpack.c.bf16 %v5344_v38, %v5344_v38  ;;  %v5472_v42 = vsel %vm4448_vm1, %v3764_v28, %v4960_v36  ;;  %v5089_v43 = vsel %vm4065_vm3, %v2807_v33, %v4577_v37 }
 0x10b   : > { %v5984_v44 = vpack.c.bf16 %v5472_v42, %v5472_v42  ;;  %v5601_v45 = vpack.c.bf16 %v5089_v43, %v5089_v43  ;;  %v5217_v46 = vsel %vm4193_vm4, %v3127_v34, %v4705_v39 }
 0x10c   : > { %6369 = vst.msk [vmem:[%s8388_s29 + $0x434] sm:$0xf] %vm6099_vm5, %v5856_v41  ;;  %v5729_v47 = vpack.c.bf16 %v5217_v46, %v5217_v46  ;;  %v3446_v48 = vpop.f32.mrf.mxu2  ;;  %v3766_v49 = vpop.f32.mrf.mxu3 }
 0x10d   : > { %6497 = vst.msk [vmem:[%s8388_s29 + $0x634] sm:$0xf] %vm6099_vm5, %v5984_v44  ;;  %v3447_v50 = vadd.f32 %v8371_v40, %v3446_v48  ;;  %v3767_v51 = vadd.f32 %v8371_v40, %v3766_v49  ;;  %v2808_v52 = vpop.f32.mrf.mxu0  ;;  %v3128_v53 = vpop.f32.mrf.mxu1 }
 0x10e   : > { %6114 = vst.msk [vmem:[%s8388_s29 + $0x38] sm:$0xf] %vm6099_vm5, %v5601_v45  ;;  %v2809_v54 = vadd.f32 %v8371_v40, %v2808_v52  ;;  %v3129_v55 = vadd.f32 %v8371_v40, %v3128_v53  ;;  %v8048_v52 = vld [vmem:[%s8302_s24 + $0x288] sm:$0xff] }
 0x10f   : > { %6242 = vst.msk [vmem:[%s8388_s29 + $0x238] sm:$0xf] %vm6099_vm5, %v5729_v47  ;;  %vm4321_vm6 = vcmp.ge.f32.partialorder %v3447_v50, 0.0  ;;  %v4833_v56 = vmul.f32 0.2, %v3447_v50  ;;  %vm4449_vm7 = vcmp.ge.f32.partialorder %v3767_v51, 0.0 }
 0x110   : > { %v4961_v57 = vmul.f32 0.2, %v3767_v51  ;;  %vm4066_vm8 = vcmp.ge.f32.partialorder %v2809_v54, 0.0  ;;  %v4578_v58 = vmul.f32 0.2, %v2809_v54  ;;  %vm4194_vm9 = vcmp.ge.f32.partialorder %v3129_v55, 0.0 }
 0x111   : > { %v5345_v59 = vsel %vm4321_vm6, %v3447_v50, %v4833_v56  ;;  %v4706_v60 = vmul.f32 0.2, %v3129_v55 }
 0x112   : > { %v5857_v61 = vpack.c.bf16 %v5345_v59, %v5345_v59  ;;  %v5473_v62 = vsel %vm4449_vm7, %v3767_v51, %v4961_v57  ;;  %v5090_v63 = vsel %vm4066_vm8, %v2809_v54, %v4578_v58  ;;  %v7984_v51 = vld [vmem:[%s8302_s24 + $0x88] sm:$0xff] }
 0x113   : > { %v5985_v0 = vpack.c.bf16 %v5473_v62, %v5473_v62  ;;  %v5602_v1 = vpack.c.bf16 %v5090_v63, %v5090_v63  ;;  %v5218_v2 = vsel %vm4194_vm9, %v3129_v55, %v4706_v60  ;;  %v8112_v57 = vld [vmem:[%s8302_s24 + $0x488] sm:$0xff] }
 0x114   : > { %6370 = vst.msk [vmem:[%s8388_s29 + $0x438] sm:$0xf] %vm6099_vm5, %v5857_v61  ;;  %v5730_v3 = vpack.c.bf16 %v5218_v2, %v5218_v2  ;;  %v3448_v4 = vpop.f32.mrf.mxu2  ;;  %v3768_v5 = vpop.f32.mrf.mxu3  ;;  %v8176_v58 = vld [vmem:[%s8302_s24 + $0x688] sm:$0xff] }
 0x115   : > { %6498 = vst.msk [vmem:[%s8388_s29 + $0x638] sm:$0xf] %vm6099_vm5, %v5985_v0  ;;  %v3449_v8 = vadd.f32 %v8371_v40, %v3448_v4  ;;  %v3769_v9 = vadd.f32 %v8371_v40, %v3768_v5  ;;  %v2811_v10 = vpop.f32.mrf.mxu0  ;;  %v3131_v11 = vpop.f32.mrf.mxu1 }
 0x116   : > { %6115 = vst.msk [vmem:[%s8388_s29 + $0x3c] sm:$0xf] %vm6099_vm5, %v5602_v1  ;;  %v2812_v14 = vadd.f32 %v8371_v40, %v2811_v10  ;;  %v3132_v15 = vadd.f32 %v8371_v40, %v3131_v11 }
 0x117   : > { %6243 = vst.msk [vmem:[%s8388_s29 + $0x23c] sm:$0xf] %vm6099_vm5, %v5730_v3  ;;  %vm4322_vm10 = vcmp.ge.f32.partialorder %v3449_v8, 0.0  ;;  %v4834_v16 = vmul.f32 0.2, %v3449_v8  ;;  %vm4450_vm11 = vcmp.ge.f32.partialorder %v3769_v9, 0.0 }
 0x118   : > { %v4962_v17 = vmul.f32 0.2, %v3769_v9  ;;  %vm4067_vm12 = vcmp.ge.f32.partialorder %v2812_v14, 0.0  ;;  %v4579_v18 = vmul.f32 0.2, %v2812_v14  ;;  %vm4195_vm13 = vcmp.ge.f32.partialorder %v3132_v15, 0.0  ;;  %7725 = vmatmul.msk.bf16.gmra.mxu0 %vm1986_vm2, %v7983_v6  ;;  %7789 = vmatmul.msk.bf16.gmra.mxu1 %vm1986_vm2, %v8047_v7 }
 0x119   : > { %v5346_v19 = vsel %vm4322_vm10, %v3449_v8, %v4834_v16  ;;  %v4707_v20 = vmul.f32 0.2, %v3132_v15  ;;  %7853 = vmatmul.msk.bf16.gmra.mxu2 %vm1986_vm2, %v8111_v12  ;;  %7917 = vmatmul.msk.bf16.gmra.mxu3 %vm1986_vm2, %v8175_v13 }
 0x11a   : > { %v5858_v40 = vpack.c.bf16 %v5346_v19, %v5346_v19  ;;  %v5474_v21 = vsel %vm4450_vm11, %v3769_v9, %v4962_v17  ;;  %v5091_v22 = vsel %vm4067_vm12, %v2812_v14, %v4579_v18 }
 0x11b   : > { %v5986_v23 = vpack.c.bf16 %v5474_v21, %v5474_v21  ;;  %v5603_v24 = vpack.c.bf16 %v5091_v22, %v5091_v22  ;;  %v5219_v25 = vsel %vm4195_vm13, %v3132_v15, %v4707_v20 }
 0x11c   : > { %6371 = vst.msk [vmem:[%s8388_s29 + $0x43c] sm:$0xf] %vm6099_vm5, %v5858_v40  ;;  %v5731_v26 = vpack.c.bf16 %v5219_v25, %v5219_v25  ;;  %v3451_v27 = vpop.f32.mrf.mxu2  ;;  %v3771_v28 = vpop.f32.mrf.mxu3 }
 0x11d   : > { %6499 = vst.msk [vmem:[%s8388_s29 + $0x63c] sm:$0xf] %vm6099_vm5, %v5986_v23  ;;  %v3452_v30 = vadd.f32 %v8649_v29, %v3451_v27  ;;  %v3772_v31 = vadd.f32 %v8649_v29, %v3771_v28  ;;  %v2813_v32 = vpop.f32.mrf.mxu0  ;;  %v3133_v33 = vpop.f32.mrf.mxu1 }
 0x11e   : > { %6116 = vst.msk [vmem:[%s8388_s29 + $0x40] sm:$0xf] %vm6099_vm5, %v5603_v24  ;;  %v2814_v34 = vadd.f32 %v8649_v29, %v2813_v32  ;;  %v3134_v35 = vadd.f32 %v8649_v29, %v3133_v33  ;;  %v8049_v32 = vld [vmem:[%s8302_s24 + $0x290] sm:$0xff] }
 0x11f   : > { %6244 = vst.msk [vmem:[%s8388_s29 + $0x240] sm:$0xf] %vm6099_vm5, %v5731_v26  ;;  %vm4323_vm14 = vcmp.ge.f32.partialorder %v3452_v30, 0.0  ;;  %v4835_v36 = vmul.f32 0.2, %v3452_v30  ;;  %vm4451_vm15 = vcmp.ge.f32.partialorder %v3772_v31, 0.0 }
 0x120   : > { %v4963_v37 = vmul.f32 0.2, %v3772_v31  ;;  %vm4068_vm0 = vcmp.ge.f32.partialorder %v2814_v34, 0.0  ;;  %v4580_v38 = vmul.f32 0.2, %v2814_v34  ;;  %vm4196_vm1 = vcmp.ge.f32.partialorder %v3134_v35, 0.0 }
 0x121   : > { %v5347_v39 = vsel %vm4323_vm14, %v3452_v30, %v4835_v36  ;;  %v4708_v41 = vmul.f32 0.2, %v3134_v35 }
 0x122   : > { %v5859_v42 = vpack.c.bf16 %v5347_v39, %v5347_v39  ;;  %v5475_v43 = vsel %vm4451_vm15, %v3772_v31, %v4963_v37  ;;  %v5092_v44 = vsel %vm4068_vm0, %v2814_v34, %v4580_v38  ;;  %v7985_v31 = vld [vmem:[%s8302_s24 + $0x90] sm:$0xff] }
 0x123   : > { %v5987_v45 = vpack.c.bf16 %v5475_v43, %v5475_v43  ;;  %v5604_v46 = vpack.c.bf16 %v5092_v44, %v5092_v44  ;;  %v5220_v47 = vsel %vm4196_vm1, %v3134_v35, %v4708_v41  ;;  %v8113_v37 = vld [vmem:[%s8302_s24 + $0x490] sm:$0xff] }
 0x124   : > { %6372 = vst.msk [vmem:[%s8388_s29 + $0x440] sm:$0xf] %vm6099_vm5, %v5859_v42  ;;  %v5732_v48 = vpack.c.bf16 %v5220_v47, %v5220_v47  ;;  %v3453_v49 = vpop.f32.mrf.mxu2  ;;  %v3773_v50 = vpop.f32.mrf.mxu3  ;;  %v8177_v38 = vld [vmem:[%s8302_s24 + $0x690] sm:$0xff] }
 0x125   : > { %6500 = vst.msk [vmem:[%s8388_s29 + $0x640] sm:$0xf] %vm6099_vm5, %v5987_v45  ;;  %v3454_v53 = vadd.f32 %v8649_v29, %v3453_v49  ;;  %v3774_v54 = vadd.f32 %v8649_v29, %v3773_v50  ;;  %v2816_v55 = vpop.f32.mrf.mxu0  ;;  %v3136_v56 = vpop.f32.mrf.mxu1 }
 0x126   : > { %6117 = vst.msk [vmem:[%s8388_s29 + $0x44] sm:$0xf] %vm6099_vm5, %v5604_v46  ;;  %v2817_v59 = vadd.f32 %v8649_v29, %v2816_v55  ;;  %v3137_v60 = vadd.f32 %v8649_v29, %v3136_v56 }
 0x127   : > { %6245 = vst.msk [vmem:[%s8388_s29 + $0x244] sm:$0xf] %vm6099_vm5, %v5732_v48  ;;  %vm4324_vm3 = vcmp.ge.f32.partialorder %v3454_v53, 0.0  ;;  %v4836_v61 = vmul.f32 0.2, %v3454_v53  ;;  %vm4452_vm4 = vcmp.ge.f32.partialorder %v3774_v54, 0.0 }
 0x128   : > { %v4964_v62 = vmul.f32 0.2, %v3774_v54  ;;  %vm4069_vm6 = vcmp.ge.f32.partialorder %v2817_v59, 0.0  ;;  %v4581_v63 = vmul.f32 0.2, %v2817_v59  ;;  %vm4197_vm7 = vcmp.ge.f32.partialorder %v3137_v60, 0.0  ;;  %7726 = vmatmul.msk.bf16.gmra.mxu0 %vm1986_vm2, %v7984_v51  ;;  %7790 = vmatmul.msk.bf16.gmra.mxu1 %vm1986_vm2, %v8048_v52 }
 0x129   : > { %v5348_v0 = vsel %vm4324_vm3, %v3454_v53, %v4836_v61  ;;  %v4709_v1 = vmul.f32 0.2, %v3137_v60  ;;  %7854 = vmatmul.msk.bf16.gmra.mxu2 %vm1986_vm2, %v8112_v57  ;;  %7918 = vmatmul.msk.bf16.gmra.mxu3 %vm1986_vm2, %v8176_v58 }
 0x12a   : > { %v5860_v2 = vpack.c.bf16 %v5348_v0, %v5348_v0  ;;  %v5476_v3 = vsel %vm4452_vm4, %v3774_v54, %v4964_v62  ;;  %v5093_v4 = vsel %vm4069_vm6, %v2817_v59, %v4581_v63 }
 0x12b   : > { %v5988_v5 = vpack.c.bf16 %v5476_v3, %v5476_v3  ;;  %v5605_v6 = vpack.c.bf16 %v5093_v4, %v5093_v4  ;;  %v5221_v7 = vsel %vm4197_vm7, %v3137_v60, %v4709_v1 }
 0x12c   : > { %6373 = vst.msk [vmem:[%s8388_s29 + $0x444] sm:$0xf] %vm6099_vm5, %v5860_v2  ;;  %v5733_v8 = vpack.c.bf16 %v5221_v7, %v5221_v7  ;;  %v3456_v9 = vpop.f32.mrf.mxu2  ;;  %v3776_v10 = vpop.f32.mrf.mxu3 }
 0x12d   : > { %6501 = vst.msk [vmem:[%s8388_s29 + $0x644] sm:$0xf] %vm6099_vm5, %v5988_v5  ;;  %v3457_v11 = vadd.f32 %v8649_v29, %v3456_v9  ;;  %v3777_v12 = vadd.f32 %v8649_v29, %v3776_v10  ;;  %v2818_v13 = vpop.f32.mrf.mxu0  ;;  %v3138_v14 = vpop.f32.mrf.mxu1 }
 0x12e   : > { %6118 = vst.msk [vmem:[%s8388_s29 + $0x48] sm:$0xf] %vm6099_vm5, %v5605_v6  ;;  %v2819_v15 = vadd.f32 %v8649_v29, %v2818_v13  ;;  %v3139_v16 = vadd.f32 %v8649_v29, %v3138_v14  ;;  %v8050_v13 = vld [vmem:[%s8302_s24 + $0x298] sm:$0xff] }
 0x12f   : > { %6246 = vst.msk [vmem:[%s8388_s29 + $0x248] sm:$0xf] %vm6099_vm5, %v5733_v8  ;;  %vm4325_vm8 = vcmp.ge.f32.partialorder %v3457_v11, 0.0  ;;  %v4837_v17 = vmul.f32 0.2, %v3457_v11  ;;  %vm4453_vm9 = vcmp.ge.f32.partialorder %v3777_v12, 0.0 }
 0x130   : > { %v4965_v18 = vmul.f32 0.2, %v3777_v12  ;;  %vm4070_vm10 = vcmp.ge.f32.partialorder %v2819_v15, 0.0  ;;  %v4582_v19 = vmul.f32 0.2, %v2819_v15  ;;  %vm4198_vm11 = vcmp.ge.f32.partialorder %v3139_v16, 0.0 }
 0x131   : > { %v5349_v20 = vsel %vm4325_vm8, %v3457_v11, %v4837_v17  ;;  %v4710_v40 = vmul.f32 0.2, %v3139_v16 }
 0x132   : > { %v5861_v21 = vpack.c.bf16 %v5349_v20, %v5349_v20  ;;  %v5477_v22 = vsel %vm4453_vm9, %v3777_v12, %v4965_v18  ;;  %v5094_v23 = vsel %vm4070_vm10, %v2819_v15, %v4582_v19  ;;  %v7986_v12 = vld [vmem:[%s8302_s24 + $0x98] sm:$0xff] }
 0x133   : > { %v5989_v24 = vpack.c.bf16 %v5477_v22, %v5477_v22  ;;  %v5606_v25 = vpack.c.bf16 %v5094_v23, %v5094_v23  ;;  %v5222_v26 = vsel %vm4198_vm11, %v3139_v16, %v4710_v40  ;;  %v8114_v18 = vld [vmem:[%s8302_s24 + $0x498] sm:$0xff] }
 0x134   : > { %6374 = vst.msk [vmem:[%s8388_s29 + $0x448] sm:$0xf] %vm6099_vm5, %v5861_v21  ;;  %v5734_v27 = vpack.c.bf16 %v5222_v26, %v5222_v26  ;;  %v3458_v28 = vpop.f32.mrf.mxu2  ;;  %v3778_v30 = vpop.f32.mrf.mxu3  ;;  %v8178_v19 = vld [vmem:[%s8302_s24 + $0x698] sm:$0xff] }
 0x135   : > { %6502 = vst.msk [vmem:[%s8388_s29 + $0x648] sm:$0xf] %vm6099_vm5, %v5989_v24  ;;  %v3459_v33 = vadd.f32 %v8649_v29, %v3458_v28  ;;  %v3779_v34 = vadd.f32 %v8649_v29, %v3778_v30  ;;  %v2821_v35 = vpop.f32.mrf.mxu0  ;;  %v3141_v36 = vpop.f32.mrf.mxu1 }
 0x136   : > { %6119 = vst.msk [vmem:[%s8388_s29 + $0x4c] sm:$0xf] %vm6099_vm5, %v5606_v25  ;;  %v2822_v39 = vadd.f32 %v8649_v29, %v2821_v35  ;;  %v3142_v41 = vadd.f32 %v8649_v29, %v3141_v36 }
 0x137   : > { %6247 = vst.msk [vmem:[%s8388_s29 + $0x24c] sm:$0xf] %vm6099_vm5, %v5734_v27  ;;  %vm4326_vm12 = vcmp.ge.f32.partialorder %v3459_v33, 0.0  ;;  %v4838_v42 = vmul.f32 0.2, %v3459_v33  ;;  %vm4454_vm13 = vcmp.ge.f32.partialorder %v3779_v34, 0.0 }
 0x138   : > { %v4966_v43 = vmul.f32 0.2, %v3779_v34  ;;  %vm4071_vm14 = vcmp.ge.f32.partialorder %v2822_v39, 0.0  ;;  %v4583_v44 = vmul.f32 0.2, %v2822_v39  ;;  %vm4199_vm15 = vcmp.ge.f32.partialorder %v3142_v41, 0.0  ;;  %7727 = vmatmul.msk.bf16.gmra.mxu0 %vm1986_vm2, %v7985_v31  ;;  %7791 = vmatmul.msk.bf16.gmra.mxu1 %vm1986_vm2, %v8049_v32 }
 0x139   : > { %v5350_v45 = vsel %vm4326_vm12, %v3459_v33, %v4838_v42  ;;  %v4711_v46 = vmul.f32 0.2, %v3142_v41  ;;  %7855 = vmatmul.msk.bf16.gmra.mxu2 %vm1986_vm2, %v8113_v37  ;;  %7919 = vmatmul.msk.bf16.gmra.mxu3 %vm1986_vm2, %v8177_v38 }
 0x13a   : > { %v5862_v47 = vpack.c.bf16 %v5350_v45, %v5350_v45  ;;  %v5478_v48 = vsel %vm4454_vm13, %v3779_v34, %v4966_v43  ;;  %v5095_v49 = vsel %vm4071_vm14, %v2822_v39, %v4583_v44 }
 0x13b   : > { %v5990_v50 = vpack.c.bf16 %v5478_v48, %v5478_v48  ;;  %v5607_v51 = vpack.c.bf16 %v5095_v49, %v5095_v49  ;;  %v5223_v52 = vsel %vm4199_vm15, %v3142_v41, %v4711_v46 }
 0x13c   : > { %6375 = vst.msk [vmem:[%s8388_s29 + $0x44c] sm:$0xf] %vm6099_vm5, %v5862_v47  ;;  %v5735_v53 = vpack.c.bf16 %v5223_v52, %v5223_v52  ;;  %v3461_v54 = vpop.f32.mrf.mxu2  ;;  %v3781_v55 = vpop.f32.mrf.mxu3 }
 0x13d   : > { %6503 = vst.msk [vmem:[%s8388_s29 + $0x64c] sm:$0xf] %vm6099_vm5, %v5990_v50  ;;  %v3462_v56 = vadd.f32 %v8649_v29, %v3461_v54  ;;  %v3782_v57 = vadd.f32 %v8649_v29, %v3781_v55  ;;  %v2823_v58 = vpop.f32.mrf.mxu0  ;;  %v3143_v59 = vpop.f32.mrf.mxu1 }
 0x13e   : > { %6120 = vst.msk [vmem:[%s8388_s29 + $0x50] sm:$0xf] %vm6099_vm5, %v5607_v51  ;;  %v2824_v60 = vadd.f32 %v8649_v29, %v2823_v58  ;;  %v3144_v61 = vadd.f32 %v8649_v29, %v3143_v59  ;;  %v8051_v58 = vld [vmem:[%s8302_s24 + $0x2a0] sm:$0xff] }
 0x13f   : > { %6248 = vst.msk [vmem:[%s8388_s29 + $0x250] sm:$0xf] %vm6099_vm5, %v5735_v53  ;;  %vm4327_vm0 = vcmp.ge.f32.partialorder %v3462_v56, 0.0  ;;  %v4839_v62 = vmul.f32 0.2, %v3462_v56  ;;  %vm4455_vm1 = vcmp.ge.f32.partialorder %v3782_v57, 0.0 }
 0x140   : > { %v4967_v63 = vmul.f32 0.2, %v3782_v57  ;;  %vm4072_vm3 = vcmp.ge.f32.partialorder %v2824_v60, 0.0  ;;  %v4584_v0 = vmul.f32 0.2, %v2824_v60  ;;  %vm4200_vm4 = vcmp.ge.f32.partialorder %v3144_v61, 0.0 }
 0x141   : > { %v5351_v1 = vsel %vm4327_vm0, %v3462_v56, %v4839_v62  ;;  %v4712_v2 = vmul.f32 0.2, %v3144_v61 }
 0x142   : > { %v5863_v3 = vpack.c.bf16 %v5351_v1, %v5351_v1  ;;  %v5479_v4 = vsel %vm4455_vm1, %v3782_v57, %v4967_v63  ;;  %v5096_v5 = vsel %vm4072_vm3, %v2824_v60, %v4584_v0  ;;  %v7987_v57 = vld [vmem:[%s8302_s24 + $0xa0] sm:$0xff] }
 0x143   : > { %v5991_v6 = vpack.c.bf16 %v5479_v4, %v5479_v4  ;;  %v5608_v7 = vpack.c.bf16 %v5096_v5, %v5096_v5  ;;  %v5224_v8 = vsel %vm4200_vm4, %v3144_v61, %v4712_v2  ;;  %v8115_v63 = vld [vmem:[%s8302_s24 + $0x4a0] sm:$0xff] }
 0x144   : > { %6376 = vst.msk [vmem:[%s8388_s29 + $0x450] sm:$0xf] %vm6099_vm5, %v5863_v3  ;;  %v5736_v9 = vpack.c.bf16 %v5224_v8, %v5224_v8  ;;  %v3463_v10 = vpop.f32.mrf.mxu2  ;;  %v3783_v11 = vpop.f32.mrf.mxu3  ;;  %v8179_v0 = vld [vmem:[%s8302_s24 + $0x6a0] sm:$0xff] }
 0x145   : > { %6504 = vst.msk [vmem:[%s8388_s29 + $0x650] sm:$0xf] %vm6099_vm5, %v5991_v6  ;;  %v3464_v14 = vadd.f32 %v8649_v29, %v3463_v10  ;;  %v3784_v15 = vadd.f32 %v8649_v29, %v3783_v11  ;;  %v2826_v16 = vpop.f32.mrf.mxu0  ;;  %v3146_v17 = vpop.f32.mrf.mxu1 }
 0x146   : > { %6121 = vst.msk [vmem:[%s8388_s29 + $0x54] sm:$0xf] %vm6099_vm5, %v5608_v7  ;;  %v2827_v20 = vadd.f32 %v8649_v29, %v2826_v16  ;;  %v3147_v40 = vadd.f32 %v8649_v29, %v3146_v17 }
 0x147   : > { %6249 = vst.msk [vmem:[%s8388_s29 + $0x254] sm:$0xf] %vm6099_vm5, %v5736_v9  ;;  %vm4328_vm6 = vcmp.ge.f32.partialorder %v3464_v14, 0.0  ;;  %v4840_v21 = vmul.f32 0.2, %v3464_v14  ;;  %vm4456_vm7 = vcmp.ge.f32.partialorder %v3784_v15, 0.0 }
 0x148   : > { %v4968_v22 = vmul.f32 0.2, %v3784_v15  ;;  %vm4073_vm8 = vcmp.ge.f32.partialorder %v2827_v20, 0.0  ;;  %v4585_v23 = vmul.f32 0.2, %v2827_v20  ;;  %vm4201_vm9 = vcmp.ge.f32.partialorder %v3147_v40, 0.0  ;;  %7728 = vmatmul.msk.bf16.gmra.mxu0 %vm1986_vm2, %v7986_v12  ;;  %7792 = vmatmul.msk.bf16.gmra.mxu1 %vm1986_vm2, %v8050_v13 }
 0x149   : > { %v5352_v24 = vsel %vm4328_vm6, %v3464_v14, %v4840_v21  ;;  %v4713_v25 = vmul.f32 0.2, %v3147_v40  ;;  %7856 = vmatmul.msk.bf16.gmra.mxu2 %vm1986_vm2, %v8114_v18  ;;  %7920 = vmatmul.msk.bf16.gmra.mxu3 %vm1986_vm2, %v8178_v19 }
 0x14a   : > { %v5864_v26 = vpack.c.bf16 %v5352_v24, %v5352_v24  ;;  %v5480_v27 = vsel %vm4456_vm7, %v3784_v15, %v4968_v22  ;;  %v5097_v28 = vsel %vm4073_vm8, %v2827_v20, %v4585_v23 }
 0x14b   : > { %v5992_v30 = vpack.c.bf16 %v5480_v27, %v5480_v27  ;;  %v5609_v31 = vpack.c.bf16 %v5097_v28, %v5097_v28  ;;  %v5225_v32 = vsel %vm4201_vm9, %v3147_v40, %v4713_v25 }
 0x14c   : > { %6377 = vst.msk [vmem:[%s8388_s29 + $0x454] sm:$0xf] %vm6099_vm5, %v5864_v26  ;;  %v5737_v33 = vpack.c.bf16 %v5225_v32, %v5225_v32  ;;  %v3466_v34 = vpop.f32.mrf.mxu2  ;;  %v3786_v35 = vpop.f32.mrf.mxu3 }
 0x14d   : > { %6505 = vst.msk [vmem:[%s8388_s29 + $0x654] sm:$0xf] %vm6099_vm5, %v5992_v30  ;;  %v3467_v36 = vadd.f32 %v8649_v29, %v3466_v34  ;;  %v3787_v37 = vadd.f32 %v8649_v29, %v3786_v35  ;;  %v2828_v38 = vpop.f32.mrf.mxu0  ;;  %v3148_v39 = vpop.f32.mrf.mxu1 }
 0x14e   : > { %6122 = vst.msk [vmem:[%s8388_s29 + $0x58] sm:$0xf] %vm6099_vm5, %v5609_v31  ;;  %v2829_v41 = vadd.f32 %v8649_v29, %v2828_v38  ;;  %v3149_v42 = vadd.f32 %v8649_v29, %v3148_v39  ;;  %v8052_v38 = vld [vmem:[%s8302_s24 + $0x2a8] sm:$0xff] }
 0x14f   : > { %6250 = vst.msk [vmem:[%s8388_s29 + $0x258] sm:$0xf] %vm6099_vm5, %v5737_v33  ;;  %vm4329_vm10 = vcmp.ge.f32.partialorder %v3467_v36, 0.0  ;;  %v4841_v43 = vmul.f32 0.2, %v3467_v36  ;;  %vm4457_vm11 = vcmp.ge.f32.partialorder %v3787_v37, 0.0 }
 0x150   : > { %v4969_v44 = vmul.f32 0.2, %v3787_v37  ;;  %vm4074_vm12 = vcmp.ge.f32.partialorder %v2829_v41, 0.0  ;;  %v4586_v45 = vmul.f32 0.2, %v2829_v41  ;;  %vm4202_vm13 = vcmp.ge.f32.partialorder %v3149_v42, 0.0 }
 0x151   : > { %v5353_v46 = vsel %vm4329_vm10, %v3467_v36, %v4841_v43  ;;  %v4714_v47 = vmul.f32 0.2, %v3149_v42 }
 0x152   : > { %v5865_v48 = vpack.c.bf16 %v5353_v46, %v5353_v46  ;;  %v5481_v49 = vsel %vm4457_vm11, %v3787_v37, %v4969_v44  ;;  %v5098_v50 = vsel %vm4074_vm12, %v2829_v41, %v4586_v45  ;;  %v7988_v37 = vld [vmem:[%s8302_s24 + $0xa8] sm:$0xff] }
 0x153   : > { %v5993_v51 = vpack.c.bf16 %v5481_v49, %v5481_v49  ;;  %v5610_v52 = vpack.c.bf16 %v5098_v50, %v5098_v50  ;;  %v5226_v53 = vsel %vm4202_vm13, %v3149_v42, %v4714_v47  ;;  %v8116_v44 = vld [vmem:[%s8302_s24 + $0x4a8] sm:$0xff] }
 0x154   : > { %6378 = vst.msk [vmem:[%s8388_s29 + $0x458] sm:$0xf] %vm6099_vm5, %v5865_v48  ;;  %v5738_v54 = vpack.c.bf16 %v5226_v53, %v5226_v53  ;;  %v3468_v55 = vpop.f32.mrf.mxu2  ;;  %v3788_v56 = vpop.f32.mrf.mxu3  ;;  %v8180_v45 = vld [vmem:[%s8302_s24 + $0x6a8] sm:$0xff] }
 0x155   : > { %6506 = vst.msk [vmem:[%s8388_s29 + $0x658] sm:$0xf] %vm6099_vm5, %v5993_v51  ;;  %v3469_v59 = vadd.f32 %v8649_v29, %v3468_v55  ;;  %v3789_v60 = vadd.f32 %v8649_v29, %v3788_v56  ;;  %v2831_v61 = vpop.f32.mrf.mxu0  ;;  %v3151_v62 = vpop.f32.mrf.mxu1 }
 0x156   : > { %6123 = vst.msk [vmem:[%s8388_s29 + $0x5c] sm:$0xf] %vm6099_vm5, %v5610_v52  ;;  %v2832_v1 = vadd.f32 %v8649_v29, %v2831_v61  ;;  %v3152_v2 = vadd.f32 %v8649_v29, %v3151_v62 }
 0x157   : > { %6251 = vst.msk [vmem:[%s8388_s29 + $0x25c] sm:$0xf] %vm6099_vm5, %v5738_v54  ;;  %vm4330_vm14 = vcmp.ge.f32.partialorder %v3469_v59, 0.0  ;;  %v4842_v3 = vmul.f32 0.2, %v3469_v59  ;;  %vm4458_vm15 = vcmp.ge.f32.partialorder %v3789_v60, 0.0 }
 0x158   : > { %v4970_v4 = vmul.f32 0.2, %v3789_v60  ;;  %vm4075_vm0 = vcmp.ge.f32.partialorder %v2832_v1, 0.0  ;;  %v4587_v5 = vmul.f32 0.2, %v2832_v1  ;;  %vm4203_vm1 = vcmp.ge.f32.partialorder %v3152_v2, 0.0  ;;  %7729 = vmatmul.msk.bf16.gmra.mxu0 %vm1986_vm2, %v7987_v57  ;;  %7793 = vmatmul.msk.bf16.gmra.mxu1 %vm1986_vm2, %v8051_v58 }
 0x159   : > { %v5354_v6 = vsel %vm4330_vm14, %v3469_v59, %v4842_v3  ;;  %v4715_v7 = vmul.f32 0.2, %v3152_v2  ;;  %7857 = vmatmul.msk.bf16.gmra.mxu2 %vm1986_vm2, %v8115_v63  ;;  %7921 = vmatmul.msk.bf16.gmra.mxu3 %vm1986_vm2, %v8179_v0 }
 0x15a   : > { %v5866_v8 = vpack.c.bf16 %v5354_v6, %v5354_v6  ;;  %v5482_v9 = vsel %vm4458_vm15, %v3789_v60, %v4970_v4  ;;  %v5099_v10 = vsel %vm4075_vm0, %v2832_v1, %v4587_v5 }
 0x15b   : > { %v5994_v11 = vpack.c.bf16 %v5482_v9, %v5482_v9  ;;  %v5611_v12 = vpack.c.bf16 %v5099_v10, %v5099_v10  ;;  %v5227_v13 = vsel %vm4203_vm1, %v3152_v2, %v4715_v7 }
 0x15c   : > { %6379 = vst.msk [vmem:[%s8388_s29 + $0x45c] sm:$0xf] %vm6099_vm5, %v5866_v8  ;;  %v5739_v14 = vpack.c.bf16 %v5227_v13, %v5227_v13  ;;  %v3471_v15 = vpop.f32.mrf.mxu2  ;;  %v3791_v16 = vpop.f32.mrf.mxu3 }
 0x15d   : > { %6507 = vst.msk [vmem:[%s8388_s29 + $0x65c] sm:$0xf] %vm6099_vm5, %v5994_v11  ;;  %v3472_v17 = vadd.f32 %v8649_v29, %v3471_v15  ;;  %v3792_v18 = vadd.f32 %v8649_v29, %v3791_v16  ;;  %v2833_v19 = vpop.f32.mrf.mxu0  ;;  %v3153_v20 = vpop.f32.mrf.mxu1 }
 0x15e   : > { %6124 = vst.msk [vmem:[%s8388_s29 + $0x60] sm:$0xf] %vm6099_vm5, %v5611_v12  ;;  %v2834_v40 = vadd.f32 %v8649_v29, %v2833_v19  ;;  %v3154_v21 = vadd.f32 %v8649_v29, %v3153_v20  ;;  %v8053_v19 = vld [vmem:[%s8302_s24 + $0x2b0] sm:$0xff] }
 0x15f   : > { %6252 = vst.msk [vmem:[%s8388_s29 + $0x260] sm:$0xf] %vm6099_vm5, %v5739_v14  ;;  %vm4331_vm3 = vcmp.ge.f32.partialorder %v3472_v17, 0.0  ;;  %v4843_v22 = vmul.f32 0.2, %v3472_v17  ;;  %vm4459_vm4 = vcmp.ge.f32.partialorder %v3792_v18, 0.0 }
 0x160   : > { %v4971_v23 = vmul.f32 0.2, %v3792_v18  ;;  %vm4076_vm6 = vcmp.ge.f32.partialorder %v2834_v40, 0.0  ;;  %v4588_v24 = vmul.f32 0.2, %v2834_v40  ;;  %vm4204_vm7 = vcmp.ge.f32.partialorder %v3154_v21, 0.0 }
 0x161   : > { %v5355_v25 = vsel %vm4331_vm3, %v3472_v17, %v4843_v22  ;;  %v4716_v26 = vmul.f32 0.2, %v3154_v21 }
 0x162   : > { %v5867_v27 = vpack.c.bf16 %v5355_v25, %v5355_v25  ;;  %v5483_v28 = vsel %vm4459_vm4, %v3792_v18, %v4971_v23  ;;  %v5100_v30 = vsel %vm4076_vm6, %v2834_v40, %v4588_v24  ;;  %v7989_v18 = vld [vmem:[%s8302_s24 + $0xb0] sm:$0xff] }
 0x163   : > { %v5995_v31 = vpack.c.bf16 %v5483_v28, %v5483_v28  ;;  %v5612_v32 = vpack.c.bf16 %v5100_v30, %v5100_v30  ;;  %v5228_v33 = vsel %vm4204_vm7, %v3154_v21, %v4716_v26  ;;  %v8117_v23 = vld [vmem:[%s8302_s24 + $0x4b0] sm:$0xff] }
 0x164   : > { %6380 = vst.msk [vmem:[%s8388_s29 + $0x460] sm:$0xf] %vm6099_vm5, %v5867_v27  ;;  %v5740_v34 = vpack.c.bf16 %v5228_v33, %v5228_v33  ;;  %v3473_v35 = vpop.f32.mrf.mxu2  ;;  %v3793_v36 = vpop.f32.mrf.mxu3  ;;  %v8181_v24 = vld [vmem:[%s8302_s24 + $0x6b0] sm:$0xff] }
 0x165   : > { %6508 = vst.msk [vmem:[%s8388_s29 + $0x660] sm:$0xf] %vm6099_vm5, %v5995_v31  ;;  %v3474_v39 = vadd.f32 %v8649_v29, %v3473_v35  ;;  %v3794_v41 = vadd.f32 %v8649_v29, %v3793_v36  ;;  %v2836_v42 = vpop.f32.mrf.mxu0  ;;  %v3156_v43 = vpop.f32.mrf.mxu1 }
 0x166   : > { %6125 = vst.msk [vmem:[%s8388_s29 + $0x64] sm:$0xf] %vm6099_vm5, %v5612_v32  ;;  %v2837_v46 = vadd.f32 %v8649_v29, %v2836_v42  ;;  %v3157_v47 = vadd.f32 %v8649_v29, %v3156_v43 }
 0x167   : > { %6253 = vst.msk [vmem:[%s8388_s29 + $0x264] sm:$0xf] %vm6099_vm5, %v5740_v34  ;;  %vm4332_vm8 = vcmp.ge.f32.partialorder %v3474_v39, 0.0  ;;  %v4844_v48 = vmul.f32 0.2, %v3474_v39  ;;  %vm4460_vm9 = vcmp.ge.f32.partialorder %v3794_v41, 0.0 }
 0x168   : > { %v4972_v49 = vmul.f32 0.2, %v3794_v41  ;;  %vm4077_vm10 = vcmp.ge.f32.partialorder %v2837_v46, 0.0  ;;  %v4589_v50 = vmul.f32 0.2, %v2837_v46  ;;  %vm4205_vm11 = vcmp.ge.f32.partialorder %v3157_v47, 0.0  ;;  %7730 = vmatmul.msk.bf16.gmra.mxu0 %vm1986_vm2, %v7988_v37  ;;  %7794 = vmatmul.msk.bf16.gmra.mxu1 %vm1986_vm2, %v8052_v38 }
 0x169   : > { %v5356_v51 = vsel %vm4332_vm8, %v3474_v39, %v4844_v48  ;;  %v4717_v52 = vmul.f32 0.2, %v3157_v47  ;;  %7858 = vmatmul.msk.bf16.gmra.mxu2 %vm1986_vm2, %v8116_v44  ;;  %7922 = vmatmul.msk.bf16.gmra.mxu3 %vm1986_vm2, %v8180_v45 }
 0x16a   : > { %v5868_v53 = vpack.c.bf16 %v5356_v51, %v5356_v51  ;;  %v5484_v54 = vsel %vm4460_vm9, %v3794_v41, %v4972_v49  ;;  %v5101_v55 = vsel %vm4077_vm10, %v2837_v46, %v4589_v50 }
 0x16b   : > { %v5996_v56 = vpack.c.bf16 %v5484_v54, %v5484_v54  ;;  %v5613_v57 = vpack.c.bf16 %v5101_v55, %v5101_v55  ;;  %v5229_v58 = vsel %vm4205_vm11, %v3157_v47, %v4717_v52 }
 0x16c   : > { %6381 = vst.msk [vmem:[%s8388_s29 + $0x464] sm:$0xf] %vm6099_vm5, %v5868_v53  ;;  %v5741_v59 = vpack.c.bf16 %v5229_v58, %v5229_v58  ;;  %v3476_v60 = vpop.f32.mrf.mxu2  ;;  %v3796_v61 = vpop.f32.mrf.mxu3 }
 0x16d   : > { %6509 = vst.msk [vmem:[%s8388_s29 + $0x664] sm:$0xf] %vm6099_vm5, %v5996_v56  ;;  %v3477_v62 = vadd.f32 %v8649_v29, %v3476_v60  ;;  %v3797_v63 = vadd.f32 %v8649_v29, %v3796_v61  ;;  %v2838_v0 = vpop.f32.mrf.mxu0  ;;  %v3158_v1 = vpop.f32.mrf.mxu1 }
 0x16e   : > { %6126 = vst.msk [vmem:[%s8388_s29 + $0x68] sm:$0xf] %vm6099_vm5, %v5613_v57  ;;  %v2839_v2 = vadd.f32 %v8649_v29, %v2838_v0  ;;  %v3159_v3 = vadd.f32 %v8649_v29, %v3158_v1  ;;  %v8054_v0 = vld [vmem:[%s8302_s24 + $0x2b8] sm:$0xff] }
 0x16f   : > { %6254 = vst.msk [vmem:[%s8388_s29 + $0x268] sm:$0xf] %vm6099_vm5, %v5741_v59  ;;  %vm4333_vm12 = vcmp.ge.f32.partialorder %v3477_v62, 0.0  ;;  %v4845_v4 = vmul.f32 0.2, %v3477_v62  ;;  %vm4461_vm13 = vcmp.ge.f32.partialorder %v3797_v63, 0.0 }
 0x170   : > { %v4973_v5 = vmul.f32 0.2, %v3797_v63  ;;  %vm4078_vm14 = vcmp.ge.f32.partialorder %v2839_v2, 0.0  ;;  %v4590_v6 = vmul.f32 0.2, %v2839_v2  ;;  %vm4206_vm15 = vcmp.ge.f32.partialorder %v3159_v3, 0.0 }
 0x171   : > { %v5357_v7 = vsel %vm4333_vm12, %v3477_v62, %v4845_v4  ;;  %v4718_v8 = vmul.f32 0.2, %v3159_v3 }
 0x172   : > { %v5869_v9 = vpack.c.bf16 %v5357_v7, %v5357_v7  ;;  %v5485_v10 = vsel %vm4461_vm13, %v3797_v63, %v4973_v5  ;;  %v5102_v11 = vsel %vm4078_vm14, %v2839_v2, %v4590_v6  ;;  %v7990_v63 = vld [vmem:[%s8302_s24 + $0xb8] sm:$0xff] }
 0x173   : > { %v5997_v12 = vpack.c.bf16 %v5485_v10, %v5485_v10  ;;  %v5614_v13 = vpack.c.bf16 %v5102_v11, %v5102_v11  ;;  %v5230_v14 = vsel %vm4206_vm15, %v3159_v3, %v4718_v8  ;;  %v8118_v5 = vld [vmem:[%s8302_s24 + $0x4b8] sm:$0xff] }
 0x174   : > { %6382 = vst.msk [vmem:[%s8388_s29 + $0x468] sm:$0xf] %vm6099_vm5, %v5869_v9  ;;  %v5742_v15 = vpack.c.bf16 %v5230_v14, %v5230_v14  ;;  %v3478_v16 = vpop.f32.mrf.mxu2  ;;  %v3798_v17 = vpop.f32.mrf.mxu3  ;;  %v8182_v6 = vld [vmem:[%s8302_s24 + $0x6b8] sm:$0xff] }
 0x175   : > { %6510 = vst.msk [vmem:[%s8388_s29 + $0x668] sm:$0xf] %vm6099_vm5, %v5997_v12  ;;  %v3479_v20 = vadd.f32 %v8649_v29, %v3478_v16  ;;  %v3799_v40 = vadd.f32 %v8649_v29, %v3798_v17  ;;  %v2841_v21 = vpop.f32.mrf.mxu0  ;;  %v3161_v22 = vpop.f32.mrf.mxu1 }
 0x176   : > { %6127 = vst.msk [vmem:[%s8388_s29 + $0x6c] sm:$0xf] %vm6099_vm5, %v5614_v13  ;;  %v2842_v25 = vadd.f32 %v8649_v29, %v2841_v21  ;;  %v3162_v26 = vadd.f32 %v8649_v29, %v3161_v22 }
 0x177   : > { %6255 = vst.msk [vmem:[%s8388_s29 + $0x26c] sm:$0xf] %vm6099_vm5, %v5742_v15  ;;  %vm4334_vm0 = vcmp.ge.f32.partialorder %v3479_v20, 0.0  ;;  %v4846_v27 = vmul.f32 0.2, %v3479_v20  ;;  %vm4462_vm1 = vcmp.ge.f32.partialorder %v3799_v40, 0.0 }
 0x178   : > { %v4974_v28 = vmul.f32 0.2, %v3799_v40  ;;  %vm4079_vm3 = vcmp.ge.f32.partialorder %v2842_v25, 0.0  ;;  %v4591_v30 = vmul.f32 0.2, %v2842_v25  ;;  %vm4207_vm4 = vcmp.ge.f32.partialorder %v3162_v26, 0.0  ;;  %7731 = vmatmul.msk.bf16.gmra.mxu0 %vm1986_vm2, %v7989_v18  ;;  %7795 = vmatmul.msk.bf16.gmra.mxu1 %vm1986_vm2, %v8053_v19 }
 0x179   : > { %v5358_v31 = vsel %vm4334_vm0, %v3479_v20, %v4846_v27  ;;  %v4719_v32 = vmul.f32 0.2, %v3162_v26  ;;  %7859 = vmatmul.msk.bf16.gmra.mxu2 %vm1986_vm2, %v8117_v23  ;;  %7923 = vmatmul.msk.bf16.gmra.mxu3 %vm1986_vm2, %v8181_v24 }
 0x17a   : > { %v5870_v33 = vpack.c.bf16 %v5358_v31, %v5358_v31  ;;  %v5486_v34 = vsel %vm4462_vm1, %v3799_v40, %v4974_v28  ;;  %v5103_v35 = vsel %vm4079_vm3, %v2842_v25, %v4591_v30 }
 0x17b   : > { %v5998_v36 = vpack.c.bf16 %v5486_v34, %v5486_v34  ;;  %v5615_v37 = vpack.c.bf16 %v5103_v35, %v5103_v35  ;;  %v5231_v38 = vsel %vm4207_vm4, %v3162_v26, %v4719_v32 }
 0x17c   : > { %6383 = vst.msk [vmem:[%s8388_s29 + $0x46c] sm:$0xf] %vm6099_vm5, %v5870_v33  ;;  %v5743_v39 = vpack.c.bf16 %v5231_v38, %v5231_v38  ;;  %v3481_v41 = vpop.f32.mrf.mxu2  ;;  %v3801_v42 = vpop.f32.mrf.mxu3 }
 0x17d   : > { %6511 = vst.msk [vmem:[%s8388_s29 + $0x66c] sm:$0xf] %vm6099_vm5, %v5998_v36  ;;  %v3482_v43 = vadd.f32 %v8649_v29, %v3481_v41  ;;  %v3802_v44 = vadd.f32 %v8649_v29, %v3801_v42  ;;  %v2843_v45 = vpop.f32.mrf.mxu0  ;;  %v3163_v46 = vpop.f32.mrf.mxu1 }
 0x17e   : > { %6128 = vst.msk [vmem:[%s8388_s29 + $0x70] sm:$0xf] %vm6099_vm5, %v5615_v37  ;;  %v2844_v47 = vadd.f32 %v8649_v29, %v2843_v45  ;;  %v3164_v48 = vadd.f32 %v8649_v29, %v3163_v46  ;;  %v8055_v45 = vld [vmem:[%s8302_s24 + $0x2c0] sm:$0xff] }
 0x17f   : > { %6256 = vst.msk [vmem:[%s8388_s29 + $0x270] sm:$0xf] %vm6099_vm5, %v5743_v39  ;;  %vm4335_vm6 = vcmp.ge.f32.partialorder %v3482_v43, 0.0  ;;  %v4847_v49 = vmul.f32 0.2, %v3482_v43  ;;  %vm4463_vm7 = vcmp.ge.f32.partialorder %v3802_v44, 0.0 }
 0x180   : > { %v4975_v50 = vmul.f32 0.2, %v3802_v44  ;;  %vm4080_vm8 = vcmp.ge.f32.partialorder %v2844_v47, 0.0  ;;  %v4592_v51 = vmul.f32 0.2, %v2844_v47  ;;  %vm4208_vm9 = vcmp.ge.f32.partialorder %v3164_v48, 0.0 }
 0x181   : > { %v5359_v52 = vsel %vm4335_vm6, %v3482_v43, %v4847_v49  ;;  %v4720_v53 = vmul.f32 0.2, %v3164_v48 }
 0x182   : > { %v5871_v54 = vpack.c.bf16 %v5359_v52, %v5359_v52  ;;  %v5487_v55 = vsel %vm4463_vm7, %v3802_v44, %v4975_v50  ;;  %v5104_v56 = vsel %vm4080_vm8, %v2844_v47, %v4592_v51  ;;  %v7991_v44 = vld [vmem:[%s8302_s24 + $0xc0] sm:$0xff] }
 0x183   : > { %v5999_v57 = vpack.c.bf16 %v5487_v55, %v5487_v55  ;;  %v5616_v58 = vpack.c.bf16 %v5104_v56, %v5104_v56  ;;  %v5232_v59 = vsel %vm4208_vm9, %v3164_v48, %v4720_v53  ;;  %v8119_v50 = vld [vmem:[%s8302_s24 + $0x4c0] sm:$0xff] }
 0x184   : > { %6384 = vst.msk [vmem:[%s8388_s29 + $0x470] sm:$0xf] %vm6099_vm5, %v5871_v54  ;;  %v5744_v60 = vpack.c.bf16 %v5232_v59, %v5232_v59  ;;  %v3483_v61 = vpop.f32.mrf.mxu2  ;;  %v3803_v62 = vpop.f32.mrf.mxu3  ;;  %v8183_v51 = vld [vmem:[%s8302_s24 + $0x6c0] sm:$0xff] }
 0x185   : > { %6512 = vst.msk [vmem:[%s8388_s29 + $0x670] sm:$0xf] %vm6099_vm5, %v5999_v57  ;;  %v3484_v1 = vadd.f32 %v8649_v29, %v3483_v61  ;;  %v3804_v2 = vadd.f32 %v8649_v29, %v3803_v62  ;;  %v2846_v3 = vpop.f32.mrf.mxu0  ;;  %v3166_v4 = vpop.f32.mrf.mxu1 }
 0x186   : > { %6129 = vst.msk [vmem:[%s8388_s29 + $0x74] sm:$0xf] %vm6099_vm5, %v5616_v58  ;;  %v2847_v7 = vadd.f32 %v8649_v29, %v2846_v3  ;;  %v3167_v8 = vadd.f32 %v8649_v29, %v3166_v4  ;;  %v8910_v3 = vld [vmem:[%s10404_s2] ss:$0 sm:$0xff] }
 0x187   : > { %6257 = vst.msk [vmem:[%s8388_s29 + $0x274] sm:$0xf] %vm6099_vm5, %v5744_v60  ;;  %vm4336_vm10 = vcmp.ge.f32.partialorder %v3484_v1, 0.0  ;;  %v4848_v9 = vmul.f32 0.2, %v3484_v1  ;;  %vm4464_vm11 = vcmp.ge.f32.partialorder %v3804_v2, 0.0 }
 0x188   : > { %v4976_v10 = vmul.f32 0.2, %v3804_v2  ;;  %vm4081_vm12 = vcmp.ge.f32.partialorder %v2847_v7, 0.0  ;;  %v4593_v11 = vmul.f32 0.2, %v2847_v7  ;;  %vm4209_vm13 = vcmp.ge.f32.partialorder %v3167_v8, 0.0  ;;  %7732 = vmatmul.msk.bf16.gmra.mxu0 %vm1986_vm2, %v7990_v63  ;;  %7796 = vmatmul.msk.bf16.gmra.mxu1 %vm1986_vm2, %v8054_v0 }
 0x189   : > { %v5360_v12 = vsel %vm4336_vm10, %v3484_v1, %v4848_v9  ;;  %v4721_v13 = vmul.f32 0.2, %v3167_v8  ;;  %7860 = vmatmul.msk.bf16.gmra.mxu2 %vm1986_vm2, %v8118_v5  ;;  %7924 = vmatmul.msk.bf16.gmra.mxu3 %vm1986_vm2, %v8182_v6 }
 0x18a   : > { %v5872_v14 = vpack.c.bf16 %v5360_v12, %v5360_v12  ;;  %v5488_v15 = vsel %vm4464_vm11, %v3804_v2, %v4976_v10  ;;  %v5105_v16 = vsel %vm4081_vm12, %v2847_v7, %v4593_v11 }
 0x18b   : > { %v6000_v17 = vpack.c.bf16 %v5488_v15, %v5488_v15  ;;  %v5617_v18 = vpack.c.bf16 %v5105_v16, %v5105_v16  ;;  %v5233_v19 = vsel %vm4209_vm13, %v3167_v8, %v4721_v13 }
 0x18c   : > { %6385 = vst.msk [vmem:[%s8388_s29 + $0x474] sm:$0xf] %vm6099_vm5, %v5872_v14  ;;  %v5745_v20 = vpack.c.bf16 %v5233_v19, %v5233_v19  ;;  %v3486_v40 = vpop.f32.mrf.mxu2  ;;  %v3806_v21 = vpop.f32.mrf.mxu3 }
 0x18d   : > { %6513 = vst.msk [vmem:[%s8388_s29 + $0x674] sm:$0xf] %vm6099_vm5, %v6000_v17  ;;  %v3487_v22 = vadd.f32 %v8649_v29, %v3486_v40  ;;  %v3807_v23 = vadd.f32 %v8649_v29, %v3806_v21  ;;  %v2848_v24 = vpop.f32.mrf.mxu0  ;;  %v3168_v25 = vpop.f32.mrf.mxu1 }
 0x18e   : > { %6130 = vst.msk [vmem:[%s8388_s29 + $0x78] sm:$0xf] %vm6099_vm5, %v5617_v18  ;;  %v2849_v26 = vadd.f32 %v8649_v29, %v2848_v24  ;;  %v3169_v27 = vadd.f32 %v8649_v29, %v3168_v25  ;;  %v8056_v24 = vld [vmem:[%s8302_s24 + $0x2c8] sm:$0xff] }
 0x18f   : > { %6258 = vst.msk [vmem:[%s8388_s29 + $0x278] sm:$0xf] %vm6099_vm5, %v5745_v20  ;;  %vm4337_vm14 = vcmp.ge.f32.partialorder %v3487_v22, 0.0  ;;  %v4849_v28 = vmul.f32 0.2, %v3487_v22  ;;  %vm4465_vm15 = vcmp.ge.f32.partialorder %v3807_v23, 0.0 }
 0x190   : > { %v4977_v30 = vmul.f32 0.2, %v3807_v23  ;;  %vm4082_vm0 = vcmp.ge.f32.partialorder %v2849_v26, 0.0  ;;  %v4594_v31 = vmul.f32 0.2, %v2849_v26  ;;  %vm4210_vm1 = vcmp.ge.f32.partialorder %v3169_v27, 0.0 }
 0x191   : > { %v5361_v32 = vsel %vm4337_vm14, %v3487_v22, %v4849_v28  ;;  %v4722_v33 = vmul.f32 0.2, %v3169_v27 }
 0x192   : > { %v5873_v34 = vpack.c.bf16 %v5361_v32, %v5361_v32  ;;  %v5489_v35 = vsel %vm4465_vm15, %v3807_v23, %v4977_v30  ;;  %v5106_v36 = vsel %vm4082_vm0, %v2849_v26, %v4594_v31  ;;  %v7992_v23 = vld [vmem:[%s8302_s24 + $0xc8] sm:$0xff] }
 0x193   : > { %v6001_v37 = vpack.c.bf16 %v5489_v35, %v5489_v35  ;;  %v5618_v38 = vpack.c.bf16 %v5106_v36, %v5106_v36  ;;  %v5234_v39 = vsel %vm4210_vm1, %v3169_v27, %v4722_v33  ;;  %v8120_v30 = vld [vmem:[%s8302_s24 + $0x4c8] sm:$0xff] }
 0x194   : > { %6386 = vst.msk [vmem:[%s8388_s29 + $0x478] sm:$0xf] %vm6099_vm5, %v5873_v34  ;;  %v5746_v41 = vpack.c.bf16 %v5234_v39, %v5234_v39  ;;  %v3488_v42 = vpop.f32.mrf.mxu2  ;;  %v3808_v43 = vpop.f32.mrf.mxu3  ;;  %v8184_v31 = vld [vmem:[%s8302_s24 + $0x6c8] sm:$0xff] }
 0x195   : > { %6514 = vst.msk [vmem:[%s8388_s29 + $0x678] sm:$0xf] %vm6099_vm5, %v6001_v37  ;;  %v3489_v46 = vadd.f32 %v8649_v29, %v3488_v42  ;;  %v3809_v47 = vadd.f32 %v8649_v29, %v3808_v43  ;;  %v2851_v48 = vpop.f32.mrf.mxu0  ;;  %v3171_v49 = vpop.f32.mrf.mxu1 }
 0x196   : > { %6131 = vst.msk [vmem:[%s8388_s29 + $0x7c] sm:$0xf] %vm6099_vm5, %v5618_v38  ;;  %v2852_v52 = vadd.f32 %v8649_v29, %v2851_v48  ;;  %v3172_v53 = vadd.f32 %v8649_v29, %v3171_v49 }
 0x197   : > { %6259 = vst.msk [vmem:[%s8388_s29 + $0x27c] sm:$0xf] %vm6099_vm5, %v5746_v41  ;;  %vm4338_vm3 = vcmp.ge.f32.partialorder %v3489_v46, 0.0  ;;  %v4850_v54 = vmul.f32 0.2, %v3489_v46  ;;  %vm4466_vm4 = vcmp.ge.f32.partialorder %v3809_v47, 0.0 }
 0x198   : > { %v4978_v55 = vmul.f32 0.2, %v3809_v47  ;;  %vm4083_vm6 = vcmp.ge.f32.partialorder %v2852_v52, 0.0  ;;  %v4595_v56 = vmul.f32 0.2, %v2852_v52  ;;  %vm4211_vm7 = vcmp.ge.f32.partialorder %v3172_v53, 0.0  ;;  %7733 = vmatmul.msk.bf16.gmra.mxu0 %vm1986_vm2, %v7991_v44  ;;  %7797 = vmatmul.msk.bf16.gmra.mxu1 %vm1986_vm2, %v8055_v45 }
 0x199   : > { %v5362_v57 = vsel %vm4338_vm3, %v3489_v46, %v4850_v54  ;;  %v4723_v58 = vmul.f32 0.2, %v3172_v53  ;;  %7861 = vmatmul.msk.bf16.gmra.mxu2 %vm1986_vm2, %v8119_v50  ;;  %7925 = vmatmul.msk.bf16.gmra.mxu3 %vm1986_vm2, %v8183_v51 }
 0x19a   : > { %v5874_v29 = vpack.c.bf16 %v5362_v57, %v5362_v57  ;;  %v5490_v59 = vsel %vm4466_vm4, %v3809_v47, %v4978_v55  ;;  %v5107_v60 = vsel %vm4083_vm6, %v2852_v52, %v4595_v56 }
 0x19b   : > { %v6002_v61 = vpack.c.bf16 %v5490_v59, %v5490_v59  ;;  %v5619_v62 = vpack.c.bf16 %v5107_v60, %v5107_v60  ;;  %v5235_v63 = vsel %vm4211_vm7, %v3172_v53, %v4723_v58 }
 0x19c   : > { %6387 = vst.msk [vmem:[%s8388_s29 + $0x47c] sm:$0xf] %vm6099_vm5, %v5874_v29  ;;  %v5747_v0 = vpack.c.bf16 %v5235_v63, %v5235_v63  ;;  %v3491_v1 = vpop.f32.mrf.mxu2  ;;  %v3811_v2 = vpop.f32.mrf.mxu3 }
 0x19d   : > { %6515 = vst.msk [vmem:[%s8388_s29 + $0x67c] sm:$0xf] %vm6099_vm5, %v6002_v61  ;;  %v3492_v4 = vadd.f32 %v8910_v3, %v3491_v1  ;;  %v3812_v5 = vadd.f32 %v8910_v3, %v3811_v2  ;;  %v2853_v6 = vpop.f32.mrf.mxu0  ;;  %v3173_v7 = vpop.f32.mrf.mxu1 }
 0x19e   : > { %6132 = vst.msk [vmem:[%s8388_s29 + $0x80] sm:$0xf] %vm6099_vm5, %v5619_v62  ;;  %v2854_v8 = vadd.f32 %v8910_v3, %v2853_v6  ;;  %v3174_v9 = vadd.f32 %v8910_v3, %v3173_v7  ;;  %v8057_v6 = vld [vmem:[%s8302_s24 + $0x2d0] sm:$0xff] }
 0x19f   : > { %6260 = vst.msk [vmem:[%s8388_s29 + $0x280] sm:$0xf] %vm6099_vm5, %v5747_v0  ;;  %vm4339_vm8 = vcmp.ge.f32.partialorder %v3492_v4, 0.0  ;;  %v4851_v10 = vmul.f32 0.2, %v3492_v4  ;;  %vm4467_vm9 = vcmp.ge.f32.partialorder %v3812_v5, 0.0 }
 0x1a0   : > { %v4979_v11 = vmul.f32 0.2, %v3812_v5  ;;  %vm4084_vm10 = vcmp.ge.f32.partialorder %v2854_v8, 0.0  ;;  %v4596_v12 = vmul.f32 0.2, %v2854_v8  ;;  %vm4212_vm11 = vcmp.ge.f32.partialorder %v3174_v9, 0.0 }
 0x1a1   : > { %v5363_v13 = vsel %vm4339_vm8, %v3492_v4, %v4851_v10  ;;  %v4724_v14 = vmul.f32 0.2, %v3174_v9 }
 0x1a2   : > { %v5875_v15 = vpack.c.bf16 %v5363_v13, %v5363_v13  ;;  %v5491_v16 = vsel %vm4467_vm9, %v3812_v5, %v4979_v11  ;;  %v5108_v17 = vsel %vm4084_vm10, %v2854_v8, %v4596_v12  ;;  %v7993_v5 = vld [vmem:[%s8302_s24 + $0xd0] sm:$0xff] }
 0x1a3   : > { %v6003_v18 = vpack.c.bf16 %v5491_v16, %v5491_v16  ;;  %v5620_v19 = vpack.c.bf16 %v5108_v17, %v5108_v17  ;;  %v5236_v20 = vsel %vm4212_vm11, %v3174_v9, %v4724_v14  ;;  %v8121_v11 = vld [vmem:[%s8302_s24 + $0x4d0] sm:$0xff] }
 0x1a4   : > { %6388 = vst.msk [vmem:[%s8388_s29 + $0x480] sm:$0xf] %vm6099_vm5, %v5875_v15  ;;  %v5748_v40 = vpack.c.bf16 %v5236_v20, %v5236_v20  ;;  %v3493_v21 = vpop.f32.mrf.mxu2  ;;  %v3813_v22 = vpop.f32.mrf.mxu3  ;;  %v8185_v12 = vld [vmem:[%s8302_s24 + $0x6d0] sm:$0xff] }
 0x1a5   : > { %6516 = vst.msk [vmem:[%s8388_s29 + $0x680] sm:$0xf] %vm6099_vm5, %v6003_v18  ;;  %v3494_v25 = vadd.f32 %v8910_v3, %v3493_v21  ;;  %v3814_v26 = vadd.f32 %v8910_v3, %v3813_v22  ;;  %v2856_v27 = vpop.f32.mrf.mxu0  ;;  %v3176_v28 = vpop.f32.mrf.mxu1 }
 0x1a6   : > { %6133 = vst.msk [vmem:[%s8388_s29 + $0x84] sm:$0xf] %vm6099_vm5, %v5620_v19  ;;  %v2857_v32 = vadd.f32 %v8910_v3, %v2856_v27  ;;  %v3177_v33 = vadd.f32 %v8910_v3, %v3176_v28 }
 0x1a7   : > { %6261 = vst.msk [vmem:[%s8388_s29 + $0x284] sm:$0xf] %vm6099_vm5, %v5748_v40  ;;  %vm4340_vm12 = vcmp.ge.f32.partialorder %v3494_v25, 0.0  ;;  %v4852_v34 = vmul.f32 0.2, %v3494_v25  ;;  %vm4468_vm13 = vcmp.ge.f32.partialorder %v3814_v26, 0.0 }
 0x1a8   : > { %v4980_v35 = vmul.f32 0.2, %v3814_v26  ;;  %vm4085_vm14 = vcmp.ge.f32.partialorder %v2857_v32, 0.0  ;;  %v4597_v36 = vmul.f32 0.2, %v2857_v32  ;;  %vm4213_vm15 = vcmp.ge.f32.partialorder %v3177_v33, 0.0  ;;  %7734 = vmatmul.msk.bf16.gmra.mxu0 %vm1986_vm2, %v7992_v23  ;;  %7798 = vmatmul.msk.bf16.gmra.mxu1 %vm1986_vm2, %v8056_v24 }
 0x1a9   : > { %v5364_v37 = vsel %vm4340_vm12, %v3494_v25, %v4852_v34  ;;  %v4725_v38 = vmul.f32 0.2, %v3177_v33  ;;  %7862 = vmatmul.msk.bf16.gmra.mxu2 %vm1986_vm2, %v8120_v30  ;;  %7926 = vmatmul.msk.bf16.gmra.mxu3 %vm1986_vm2, %v8184_v31 }
 0x1aa   : > { %v5876_v39 = vpack.c.bf16 %v5364_v37, %v5364_v37  ;;  %v5492_v41 = vsel %vm4468_vm13, %v3814_v26, %v4980_v35  ;;  %v5109_v42 = vsel %vm4085_vm14, %v2857_v32, %v4597_v36 }
 0x1ab   : > { %v6004_v43 = vpack.c.bf16 %v5492_v41, %v5492_v41  ;;  %v5621_v44 = vpack.c.bf16 %v5109_v42, %v5109_v42  ;;  %v5237_v45 = vsel %vm4213_vm15, %v3177_v33, %v4725_v38 }
 0x1ac   : > { %6389 = vst.msk [vmem:[%s8388_s29 + $0x484] sm:$0xf] %vm6099_vm5, %v5876_v39  ;;  %v5749_v46 = vpack.c.bf16 %v5237_v45, %v5237_v45  ;;  %v3496_v47 = vpop.f32.mrf.mxu2  ;;  %v3816_v48 = vpop.f32.mrf.mxu3 }
 0x1ad   : > { %6517 = vst.msk [vmem:[%s8388_s29 + $0x684] sm:$0xf] %vm6099_vm5, %v6004_v43  ;;  %v3497_v49 = vadd.f32 %v8910_v3, %v3496_v47  ;;  %v3817_v50 = vadd.f32 %v8910_v3, %v3816_v48  ;;  %v2858_v51 = vpop.f32.mrf.mxu0  ;;  %v3178_v52 = vpop.f32.mrf.mxu1 }
 0x1ae   : > { %6134 = vst.msk [vmem:[%s8388_s29 + $0x88] sm:$0xf] %vm6099_vm5, %v5621_v44  ;;  %v2859_v53 = vadd.f32 %v8910_v3, %v2858_v51  ;;  %v3179_v54 = vadd.f32 %v8910_v3, %v3178_v52  ;;  %v8058_v51 = vld [vmem:[%s8302_s24 + $0x2d8] sm:$0xff] }
 0x1af   : > { %6262 = vst.msk [vmem:[%s8388_s29 + $0x288] sm:$0xf] %vm6099_vm5, %v5749_v46  ;;  %vm4341_vm0 = vcmp.ge.f32.partialorder %v3497_v49, 0.0  ;;  %v4853_v55 = vmul.f32 0.2, %v3497_v49  ;;  %vm4469_vm1 = vcmp.ge.f32.partialorder %v3817_v50, 0.0 }
 0x1b0   : > { %v4981_v56 = vmul.f32 0.2, %v3817_v50  ;;  %vm4086_vm3 = vcmp.ge.f32.partialorder %v2859_v53, 0.0  ;;  %v4598_v57 = vmul.f32 0.2, %v2859_v53  ;;  %vm4214_vm4 = vcmp.ge.f32.partialorder %v3179_v54, 0.0 }
 0x1b1   : > { %v5365_v58 = vsel %vm4341_vm0, %v3497_v49, %v4853_v55  ;;  %v4726_v29 = vmul.f32 0.2, %v3179_v54 }
 0x1b2   : > { %v5877_v59 = vpack.c.bf16 %v5365_v58, %v5365_v58  ;;  %v5493_v60 = vsel %vm4469_vm1, %v3817_v50, %v4981_v56  ;;  %v5110_v61 = vsel %vm4086_vm3, %v2859_v53, %v4598_v57  ;;  %v7994_v50 = vld [vmem:[%s8302_s24 + $0xd8] sm:$0xff] }
 0x1b3   : > { %v6005_v62 = vpack.c.bf16 %v5493_v60, %v5493_v60  ;;  %v5622_v63 = vpack.c.bf16 %v5110_v61, %v5110_v61  ;;  %v5238_v0 = vsel %vm4214_vm4, %v3179_v54, %v4726_v29  ;;  %v8122_v56 = vld [vmem:[%s8302_s24 + $0x4d8] sm:$0xff] }
 0x1b4   : > { %6390 = vst.msk [vmem:[%s8388_s29 + $0x488] sm:$0xf] %vm6099_vm5, %v5877_v59  ;;  %v5750_v1 = vpack.c.bf16 %v5238_v0, %v5238_v0  ;;  %v3498_v2 = vpop.f32.mrf.mxu2  ;;  %v3818_v4 = vpop.f32.mrf.mxu3  ;;  %v8186_v57 = vld [vmem:[%s8302_s24 + $0x6d8] sm:$0xff] }
 0x1b5   : > { %6518 = vst.msk [vmem:[%s8388_s29 + $0x688] sm:$0xf] %vm6099_vm5, %v6005_v62  ;;  %v3499_v7 = vadd.f32 %v8910_v3, %v3498_v2  ;;  %v3819_v8 = vadd.f32 %v8910_v3, %v3818_v4  ;;  %v2861_v9 = vpop.f32.mrf.mxu0  ;;  %v3181_v10 = vpop.f32.mrf.mxu1 }
 0x1b6   : > { %6135 = vst.msk [vmem:[%s8388_s29 + $0x8c] sm:$0xf] %vm6099_vm5, %v5622_v63  ;;  %v2862_v13 = vadd.f32 %v8910_v3, %v2861_v9  ;;  %v3182_v14 = vadd.f32 %v8910_v3, %v3181_v10 }
 0x1b7   : > { %6263 = vst.msk [vmem:[%s8388_s29 + $0x28c] sm:$0xf] %vm6099_vm5, %v5750_v1  ;;  %vm4342_vm6 = vcmp.ge.f32.partialorder %v3499_v7, 0.0  ;;  %v4854_v15 = vmul.f32 0.2, %v3499_v7  ;;  %vm4470_vm7 = vcmp.ge.f32.partialorder %v3819_v8, 0.0 }
 0x1b8   : > { %v4982_v16 = vmul.f32 0.2, %v3819_v8  ;;  %vm4087_vm8 = vcmp.ge.f32.partialorder %v2862_v13, 0.0  ;;  %v4599_v17 = vmul.f32 0.2, %v2862_v13  ;;  %vm4215_vm9 = vcmp.ge.f32.partialorder %v3182_v14, 0.0  ;;  %7735 = vmatmul.msk.bf16.gmra.mxu0 %vm1986_vm2, %v7993_v5  ;;  %7799 = vmatmul.msk.bf16.gmra.mxu1 %vm1986_vm2, %v8057_v6 }
 0x1b9   : > { %v5366_v18 = vsel %vm4342_vm6, %v3499_v7, %v4854_v15  ;;  %v4727_v19 = vmul.f32 0.2, %v3182_v14  ;;  %7863 = vmatmul.msk.bf16.gmra.mxu2 %vm1986_vm2, %v8121_v11  ;;  %7927 = vmatmul.msk.bf16.gmra.mxu3 %vm1986_vm2, %v8185_v12 }
 0x1ba   : > { %v5878_v20 = vpack.c.bf16 %v5366_v18, %v5366_v18  ;;  %v5494_v40 = vsel %vm4470_vm7, %v3819_v8, %v4982_v16  ;;  %v5111_v21 = vsel %vm4087_vm8, %v2862_v13, %v4599_v17 }
 0x1bb   : > { %v6006_v22 = vpack.c.bf16 %v5494_v40, %v5494_v40  ;;  %v5623_v23 = vpack.c.bf16 %v5111_v21, %v5111_v21  ;;  %v5239_v24 = vsel %vm4215_vm9, %v3182_v14, %v4727_v19 }
 0x1bc   : > { %6391 = vst.msk [vmem:[%s8388_s29 + $0x48c] sm:$0xf] %vm6099_vm5, %v5878_v20  ;;  %v5751_v25 = vpack.c.bf16 %v5239_v24, %v5239_v24  ;;  %v3501_v26 = vpop.f32.mrf.mxu2  ;;  %v3821_v27 = vpop.f32.mrf.mxu3 }
 0x1bd   : > { %6519 = vst.msk [vmem:[%s8388_s29 + $0x68c] sm:$0xf] %vm6099_vm5, %v6006_v22  ;;  %v3502_v28 = vadd.f32 %v8910_v3, %v3501_v26  ;;  %v3822_v30 = vadd.f32 %v8910_v3, %v3821_v27  ;;  %v2863_v31 = vpop.f32.mrf.mxu0  ;;  %v3183_v32 = vpop.f32.mrf.mxu1 }
 0x1be   : > { %6136 = vst.msk [vmem:[%s8388_s29 + $0x90] sm:$0xf] %vm6099_vm5, %v5623_v23  ;;  %v2864_v33 = vadd.f32 %v8910_v3, %v2863_v31  ;;  %v3184_v34 = vadd.f32 %v8910_v3, %v3183_v32  ;;  %v8059_v31 = vld [vmem:[%s8302_s24 + $0x2e0] sm:$0xff] }
 0x1bf   : > { %6264 = vst.msk [vmem:[%s8388_s29 + $0x290] sm:$0xf] %vm6099_vm5, %v5751_v25  ;;  %vm4343_vm10 = vcmp.ge.f32.partialorder %v3502_v28, 0.0  ;;  %v4855_v35 = vmul.f32 0.2, %v3502_v28  ;;  %vm4471_vm11 = vcmp.ge.f32.partialorder %v3822_v30, 0.0 }
 0x1c0   : > { %v4983_v36 = vmul.f32 0.2, %v3822_v30  ;;  %vm4088_vm12 = vcmp.ge.f32.partialorder %v2864_v33, 0.0  ;;  %v4600_v37 = vmul.f32 0.2, %v2864_v33  ;;  %vm4216_vm13 = vcmp.ge.f32.partialorder %v3184_v34, 0.0 }
 0x1c1   : > { %v5367_v38 = vsel %vm4343_vm10, %v3502_v28, %v4855_v35  ;;  %v4728_v39 = vmul.f32 0.2, %v3184_v34 }
 0x1c2   : > { %v5879_v41 = vpack.c.bf16 %v5367_v38, %v5367_v38  ;;  %v5495_v42 = vsel %vm4471_vm11, %v3822_v30, %v4983_v36  ;;  %v5112_v43 = vsel %vm4088_vm12, %v2864_v33, %v4600_v37  ;;  %v7995_v30 = vld [vmem:[%s8302_s24 + $0xe0] sm:$0xff] }
 0x1c3   : > { %v6007_v44 = vpack.c.bf16 %v5495_v42, %v5495_v42  ;;  %v5624_v45 = vpack.c.bf16 %v5112_v43, %v5112_v43  ;;  %v5240_v46 = vsel %vm4216_vm13, %v3184_v34, %v4728_v39  ;;  %v8123_v36 = vld [vmem:[%s8302_s24 + $0x4e0] sm:$0xff] }
 0x1c4   : > { %6392 = vst.msk [vmem:[%s8388_s29 + $0x490] sm:$0xf] %vm6099_vm5, %v5879_v41  ;;  %v5752_v47 = vpack.c.bf16 %v5240_v46, %v5240_v46  ;;  %v3503_v48 = vpop.f32.mrf.mxu2  ;;  %v3823_v49 = vpop.f32.mrf.mxu3  ;;  %v8187_v37 = vld [vmem:[%s8302_s24 + $0x6e0] sm:$0xff] }
 0x1c5   : > { %6520 = vst.msk [vmem:[%s8388_s29 + $0x690] sm:$0xf] %vm6099_vm5, %v6007_v44  ;;  %v3504_v52 = vadd.f32 %v8910_v3, %v3503_v48  ;;  %v3824_v53 = vadd.f32 %v8910_v3, %v3823_v49  ;;  %v2866_v54 = vpop.f32.mrf.mxu0  ;;  %v3186_v55 = vpop.f32.mrf.mxu1 }
 0x1c6   : > { %6137 = vst.msk [vmem:[%s8388_s29 + $0x94] sm:$0xf] %vm6099_vm5, %v5624_v45  ;;  %v2867_v58 = vadd.f32 %v8910_v3, %v2866_v54  ;;  %v3187_v29 = vadd.f32 %v8910_v3, %v3186_v55 }
 0x1c7   : > { %6265 = vst.msk [vmem:[%s8388_s29 + $0x294] sm:$0xf] %vm6099_vm5, %v5752_v47  ;;  %vm4344_vm14 = vcmp.ge.f32.partialorder %v3504_v52, 0.0  ;;  %v4856_v59 = vmul.f32 0.2, %v3504_v52  ;;  %vm4472_vm15 = vcmp.ge.f32.partialorder %v3824_v53, 0.0 }
 0x1c8   : > { %v4984_v60 = vmul.f32 0.2, %v3824_v53  ;;  %vm4089_vm0 = vcmp.ge.f32.partialorder %v2867_v58, 0.0  ;;  %v4601_v61 = vmul.f32 0.2, %v2867_v58  ;;  %vm4217_vm1 = vcmp.ge.f32.partialorder %v3187_v29, 0.0  ;;  %7736 = vmatmul.msk.bf16.gmra.mxu0 %vm1986_vm2, %v7994_v50  ;;  %7800 = vmatmul.msk.bf16.gmra.mxu1 %vm1986_vm2, %v8058_v51 }
 0x1c9   : > { %v5368_v62 = vsel %vm4344_vm14, %v3504_v52, %v4856_v59  ;;  %v4729_v63 = vmul.f32 0.2, %v3187_v29  ;;  %7864 = vmatmul.msk.bf16.gmra.mxu2 %vm1986_vm2, %v8122_v56  ;;  %7928 = vmatmul.msk.bf16.gmra.mxu3 %vm1986_vm2, %v8186_v57 }
 0x1ca   : > { %v5880_v0 = vpack.c.bf16 %v5368_v62, %v5368_v62  ;;  %v5496_v1 = vsel %vm4472_vm15, %v3824_v53, %v4984_v60  ;;  %v5113_v2 = vsel %vm4089_vm0, %v2867_v58, %v4601_v61 }
 0x1cb   : > { %v6008_v4 = vpack.c.bf16 %v5496_v1, %v5496_v1  ;;  %v5625_v5 = vpack.c.bf16 %v5113_v2, %v5113_v2  ;;  %v5241_v6 = vsel %vm4217_vm1, %v3187_v29, %v4729_v63 }
 0x1cc   : > { %6393 = vst.msk [vmem:[%s8388_s29 + $0x494] sm:$0xf] %vm6099_vm5, %v5880_v0  ;;  %v5753_v7 = vpack.c.bf16 %v5241_v6, %v5241_v6  ;;  %v3506_v8 = vpop.f32.mrf.mxu2  ;;  %v3826_v9 = vpop.f32.mrf.mxu3 }
 0x1cd   : > { %6521 = vst.msk [vmem:[%s8388_s29 + $0x694] sm:$0xf] %vm6099_vm5, %v6008_v4  ;;  %v3507_v10 = vadd.f32 %v8910_v3, %v3506_v8  ;;  %v3827_v11 = vadd.f32 %v8910_v3, %v3826_v9  ;;  %v2868_v12 = vpop.f32.mrf.mxu0  ;;  %v3188_v13 = vpop.f32.mrf.mxu1 }
 0x1ce   : > { %6138 = vst.msk [vmem:[%s8388_s29 + $0x98] sm:$0xf] %vm6099_vm5, %v5625_v5  ;;  %v2869_v14 = vadd.f32 %v8910_v3, %v2868_v12  ;;  %v3189_v15 = vadd.f32 %v8910_v3, %v3188_v13  ;;  %v8060_v12 = vld [vmem:[%s8302_s24 + $0x2e8] sm:$0xff] }
 0x1cf   : > { %6266 = vst.msk [vmem:[%s8388_s29 + $0x298] sm:$0xf] %vm6099_vm5, %v5753_v7  ;;  %vm4345_vm3 = vcmp.ge.f32.partialorder %v3507_v10, 0.0  ;;  %v4857_v16 = vmul.f32 0.2, %v3507_v10  ;;  %vm4473_vm4 = vcmp.ge.f32.partialorder %v3827_v11, 0.0 }
 0x1d0   : > { %v4985_v17 = vmul.f32 0.2, %v3827_v11  ;;  %vm4090_vm6 = vcmp.ge.f32.partialorder %v2869_v14, 0.0  ;;  %v4602_v18 = vmul.f32 0.2, %v2869_v14  ;;  %vm4218_vm7 = vcmp.ge.f32.partialorder %v3189_v15, 0.0 }
 0x1d1   : > { %v5369_v19 = vsel %vm4345_vm3, %v3507_v10, %v4857_v16  ;;  %v4730_v20 = vmul.f32 0.2, %v3189_v15 }
 0x1d2   : > { %v5881_v40 = vpack.c.bf16 %v5369_v19, %v5369_v19  ;;  %v5497_v21 = vsel %vm4473_vm4, %v3827_v11, %v4985_v17  ;;  %v5114_v22 = vsel %vm4090_vm6, %v2869_v14, %v4602_v18  ;;  %v7996_v11 = vld [vmem:[%s8302_s24 + $0xe8] sm:$0xff] }
 0x1d3   : > { %v6009_v23 = vpack.c.bf16 %v5497_v21, %v5497_v21  ;;  %v5626_v24 = vpack.c.bf16 %v5114_v22, %v5114_v22  ;;  %v5242_v25 = vsel %vm4218_vm7, %v3189_v15, %v4730_v20  ;;  %v8124_v17 = vld [vmem:[%s8302_s24 + $0x4e8] sm:$0xff] }
 0x1d4   : > { %6394 = vst.msk [vmem:[%s8388_s29 + $0x498] sm:$0xf] %vm6099_vm5, %v5881_v40  ;;  %v5754_v26 = vpack.c.bf16 %v5242_v25, %v5242_v25  ;;  %v3508_v27 = vpop.f32.mrf.mxu2  ;;  %v3828_v28 = vpop.f32.mrf.mxu3  ;;  %v8188_v18 = vld [vmem:[%s8302_s24 + $0x6e8] sm:$0xff] }
 0x1d5   : > { %6522 = vst.msk [vmem:[%s8388_s29 + $0x698] sm:$0xf] %vm6099_vm5, %v6009_v23  ;;  %v3509_v32 = vadd.f32 %v8910_v3, %v3508_v27  ;;  %v3829_v33 = vadd.f32 %v8910_v3, %v3828_v28  ;;  %v2871_v34 = vpop.f32.mrf.mxu0  ;;  %v3191_v35 = vpop.f32.mrf.mxu1 }
 0x1d6   : > { %6139 = vst.msk [vmem:[%s8388_s29 + $0x9c] sm:$0xf] %vm6099_vm5, %v5626_v24  ;;  %v2872_v38 = vadd.f32 %v8910_v3, %v2871_v34  ;;  %v3192_v39 = vadd.f32 %v8910_v3, %v3191_v35 }
 0x1d7   : > { %6267 = vst.msk [vmem:[%s8388_s29 + $0x29c] sm:$0xf] %vm6099_vm5, %v5754_v26  ;;  %vm4346_vm8 = vcmp.ge.f32.partialorder %v3509_v32, 0.0  ;;  %v4858_v41 = vmul.f32 0.2, %v3509_v32  ;;  %vm4474_vm9 = vcmp.ge.f32.partialorder %v3829_v33, 0.0 }
 0x1d8   : > { %v4986_v42 = vmul.f32 0.2, %v3829_v33  ;;  %vm4091_vm10 = vcmp.ge.f32.partialorder %v2872_v38, 0.0  ;;  %v4603_v43 = vmul.f32 0.2, %v2872_v38  ;;  %vm4219_vm11 = vcmp.ge.f32.partialorder %v3192_v39, 0.0  ;;  %7737 = vmatmul.msk.bf16.gmra.mxu0 %vm1986_vm2, %v7995_v30  ;;  %7801 = vmatmul.msk.bf16.gmra.mxu1 %vm1986_vm2, %v8059_v31 }
 0x1d9   : > { %v5370_v44 = vsel %vm4346_vm8, %v3509_v32, %v4858_v41  ;;  %v4731_v45 = vmul.f32 0.2, %v3192_v39  ;;  %7865 = vmatmul.msk.bf16.gmra.mxu2 %vm1986_vm2, %v8123_v36  ;;  %7929 = vmatmul.msk.bf16.gmra.mxu3 %vm1986_vm2, %v8187_v37 }
 0x1da   : > { %v5882_v46 = vpack.c.bf16 %v5370_v44, %v5370_v44  ;;  %v5498_v47 = vsel %vm4474_vm9, %v3829_v33, %v4986_v42  ;;  %v5115_v48 = vsel %vm4091_vm10, %v2872_v38, %v4603_v43 }
 0x1db   : > { %v6010_v49 = vpack.c.bf16 %v5498_v47, %v5498_v47  ;;  %v5627_v50 = vpack.c.bf16 %v5115_v48, %v5115_v48  ;;  %v5243_v51 = vsel %vm4219_vm11, %v3192_v39, %v4731_v45 }
 0x1dc   : > { %6395 = vst.msk [vmem:[%s8388_s29 + $0x49c] sm:$0xf] %vm6099_vm5, %v5882_v46  ;;  %v5755_v52 = vpack.c.bf16 %v5243_v51, %v5243_v51  ;;  %v3511_v53 = vpop.f32.mrf.mxu2  ;;  %v3831_v54 = vpop.f32.mrf.mxu3 }
 0x1dd   : > { %6523 = vst.msk [vmem:[%s8388_s29 + $0x69c] sm:$0xf] %vm6099_vm5, %v6010_v49  ;;  %v3512_v55 = vadd.f32 %v8910_v3, %v3511_v53  ;;  %v3832_v56 = vadd.f32 %v8910_v3, %v3831_v54  ;;  %v2873_v57 = vpop.f32.mrf.mxu0  ;;  %v3193_v58 = vpop.f32.mrf.mxu1 }
 0x1de   : > { %6140 = vst.msk [vmem:[%s8388_s29 + $0xa0] sm:$0xf] %vm6099_vm5, %v5627_v50  ;;  %v2874_v29 = vadd.f32 %v8910_v3, %v2873_v57  ;;  %v3194_v59 = vadd.f32 %v8910_v3, %v3193_v58  ;;  %v8061_v57 = vld [vmem:[%s8302_s24 + $0x2f0] sm:$0xff] }
 0x1df   : > { %6268 = vst.msk [vmem:[%s8388_s29 + $0x2a0] sm:$0xf] %vm6099_vm5, %v5755_v52  ;;  %vm4347_vm12 = vcmp.ge.f32.partialorder %v3512_v55, 0.0  ;;  %v4859_v60 = vmul.f32 0.2, %v3512_v55  ;;  %vm4475_vm13 = vcmp.ge.f32.partialorder %v3832_v56, 0.0 }
 0x1e0   : > { %v4987_v61 = vmul.f32 0.2, %v3832_v56  ;;  %vm4092_vm14 = vcmp.ge.f32.partialorder %v2874_v29, 0.0  ;;  %v4604_v62 = vmul.f32 0.2, %v2874_v29  ;;  %vm4220_vm15 = vcmp.ge.f32.partialorder %v3194_v59, 0.0 }
 0x1e1   : > { %v5371_v63 = vsel %vm4347_vm12, %v3512_v55, %v4859_v60  ;;  %v4732_v0 = vmul.f32 0.2, %v3194_v59 }
 0x1e2   : > { %v5883_v1 = vpack.c.bf16 %v5371_v63, %v5371_v63  ;;  %v5499_v2 = vsel %vm4475_vm13, %v3832_v56, %v4987_v61  ;;  %v5116_v4 = vsel %vm4092_vm14, %v2874_v29, %v4604_v62  ;;  %v7997_v56 = vld [vmem:[%s8302_s24 + $0xf0] sm:$0xff] }
 0x1e3   : > { %v6011_v5 = vpack.c.bf16 %v5499_v2, %v5499_v2  ;;  %v5628_v6 = vpack.c.bf16 %v5116_v4, %v5116_v4  ;;  %v5244_v7 = vsel %vm4220_vm15, %v3194_v59, %v4732_v0  ;;  %v8125_v61 = vld [vmem:[%s8302_s24 + $0x4f0] sm:$0xff] }
 0x1e4   : > { %6396 = vst.msk [vmem:[%s8388_s29 + $0x4a0] sm:$0xf] %vm6099_vm5, %v5883_v1  ;;  %v5756_v8 = vpack.c.bf16 %v5244_v7, %v5244_v7  ;;  %v3513_v9 = vpop.f32.mrf.mxu2  ;;  %v3833_v10 = vpop.f32.mrf.mxu3  ;;  %v8189_v62 = vld [vmem:[%s8302_s24 + $0x6f0] sm:$0xff] }
 0x1e5   : > { %6524 = vst.msk [vmem:[%s8388_s29 + $0x6a0] sm:$0xf] %vm6099_vm5, %v6011_v5  ;;  %v3514_v13 = vadd.f32 %v8910_v3, %v3513_v9  ;;  %v3834_v14 = vadd.f32 %v8910_v3, %v3833_v10  ;;  %v2876_v15 = vpop.f32.mrf.mxu0  ;;  %v3196_v16 = vpop.f32.mrf.mxu1 }
 0x1e6   : > { %6141 = vst.msk [vmem:[%s8388_s29 + $0xa4] sm:$0xf] %vm6099_vm5, %v5628_v6  ;;  %v2877_v19 = vadd.f32 %v8910_v3, %v2876_v15  ;;  %v3197_v20 = vadd.f32 %v8910_v3, %v3196_v16 }
 0x1e7   : > { %6269 = vst.msk [vmem:[%s8388_s29 + $0x2a4] sm:$0xf] %vm6099_vm5, %v5756_v8  ;;  %vm4348_vm0 = vcmp.ge.f32.partialorder %v3514_v13, 0.0  ;;  %v4860_v40 = vmul.f32 0.2, %v3514_v13  ;;  %vm4476_vm1 = vcmp.ge.f32.partialorder %v3834_v14, 0.0 }
 0x1e8   : > { %v4988_v21 = vmul.f32 0.2, %v3834_v14  ;;  %vm4093_vm3 = vcmp.ge.f32.partialorder %v2877_v19, 0.0  ;;  %v4605_v22 = vmul.f32 0.2, %v2877_v19  ;;  %vm4221_vm4 = vcmp.ge.f32.partialorder %v3197_v20, 0.0  ;;  %7738 = vmatmul.msk.bf16.gmra.mxu0 %vm1986_vm2, %v7996_v11  ;;  %7802 = vmatmul.msk.bf16.gmra.mxu1 %vm1986_vm2, %v8060_v12 }
 0x1e9   : > { %v5372_v23 = vsel %vm4348_vm0, %v3514_v13, %v4860_v40  ;;  %v4733_v24 = vmul.f32 0.2, %v3197_v20  ;;  %7866 = vmatmul.msk.bf16.gmra.mxu2 %vm1986_vm2, %v8124_v17  ;;  %7930 = vmatmul.msk.bf16.gmra.mxu3 %vm1986_vm2, %v8188_v18 }
 0x1ea   : > { %v5884_v25 = vpack.c.bf16 %v5372_v23, %v5372_v23  ;;  %v5500_v26 = vsel %vm4476_vm1, %v3834_v14, %v4988_v21  ;;  %v5117_v27 = vsel %vm4093_vm3, %v2877_v19, %v4605_v22 }
 0x1eb   : > { %v6012_v28 = vpack.c.bf16 %v5500_v26, %v5500_v26  ;;  %v5629_v30 = vpack.c.bf16 %v5117_v27, %v5117_v27  ;;  %v5245_v31 = vsel %vm4221_vm4, %v3197_v20, %v4733_v24 }
 0x1ec   : > { %6397 = vst.msk [vmem:[%s8388_s29 + $0x4a4] sm:$0xf] %vm6099_vm5, %v5884_v25  ;;  %v5757_v32 = vpack.c.bf16 %v5245_v31, %v5245_v31  ;;  %v3516_v33 = vpop.f32.mrf.mxu2  ;;  %v3836_v34 = vpop.f32.mrf.mxu3 }
 0x1ed   : > { %6525 = vst.msk [vmem:[%s8388_s29 + $0x6a4] sm:$0xf] %vm6099_vm5, %v6012_v28  ;;  %v3517_v35 = vadd.f32 %v8910_v3, %v3516_v33  ;;  %v3837_v36 = vadd.f32 %v8910_v3, %v3836_v34  ;;  %v2878_v37 = vpop.f32.mrf.mxu0  ;;  %v3198_v38 = vpop.f32.mrf.mxu1 }
 0x1ee   : > { %6142 = vst.msk [vmem:[%s8388_s29 + $0xa8] sm:$0xf] %vm6099_vm5, %v5629_v30  ;;  %v2879_v39 = vadd.f32 %v8910_v3, %v2878_v37  ;;  %v3199_v41 = vadd.f32 %v8910_v3, %v3198_v38  ;;  %v8062_v37 = vld [vmem:[%s8302_s24 + $0x2f8] sm:$0xff] }
 0x1ef   : > { %6270 = vst.msk [vmem:[%s8388_s29 + $0x2a8] sm:$0xf] %vm6099_vm5, %v5757_v32  ;;  %vm4349_vm6 = vcmp.ge.f32.partialorder %v3517_v35, 0.0  ;;  %v4861_v42 = vmul.f32 0.2, %v3517_v35  ;;  %vm4477_vm7 = vcmp.ge.f32.partialorder %v3837_v36, 0.0 }
 0x1f0   : > { %v4989_v43 = vmul.f32 0.2, %v3837_v36  ;;  %vm4094_vm8 = vcmp.ge.f32.partialorder %v2879_v39, 0.0  ;;  %v4606_v44 = vmul.f32 0.2, %v2879_v39  ;;  %vm4222_vm9 = vcmp.ge.f32.partialorder %v3199_v41, 0.0 }
 0x1f1   : > { %v5373_v45 = vsel %vm4349_vm6, %v3517_v35, %v4861_v42  ;;  %v4734_v46 = vmul.f32 0.2, %v3199_v41 }
 0x1f2   : > { %v5885_v47 = vpack.c.bf16 %v5373_v45, %v5373_v45  ;;  %v5501_v48 = vsel %vm4477_vm7, %v3837_v36, %v4989_v43  ;;  %v5118_v49 = vsel %vm4094_vm8, %v2879_v39, %v4606_v44  ;;  %v7998_v36 = vld [vmem:[%s8302_s24 + $0xf8] sm:$0xff] }
 0x1f3   : > { %v6013_v50 = vpack.c.bf16 %v5501_v48, %v5501_v48  ;;  %v5630_v51 = vpack.c.bf16 %v5118_v49, %v5118_v49  ;;  %v5246_v52 = vsel %vm4222_vm9, %v3199_v41, %v4734_v46  ;;  %v8126_v43 = vld [vmem:[%s8302_s24 + $0x4f8] sm:$0xff] }
 0x1f4   : > { %6398 = vst.msk [vmem:[%s8388_s29 + $0x4a8] sm:$0xf] %vm6099_vm5, %v5885_v47  ;;  %v5758_v53 = vpack.c.bf16 %v5246_v52, %v5246_v52  ;;  %v3518_v54 = vpop.f32.mrf.mxu2  ;;  %v3838_v55 = vpop.f32.mrf.mxu3  ;;  %v8190_v44 = vld [vmem:[%s8302_s24 + $0x6f8] sm:$0xff] }
 0x1f5   : > { %6526 = vst.msk [vmem:[%s8388_s29 + $0x6a8] sm:$0xf] %vm6099_vm5, %v6013_v50  ;;  %v3519_v58 = vadd.f32 %v8910_v3, %v3518_v54  ;;  %v3839_v29 = vadd.f32 %v8910_v3, %v3838_v55  ;;  %v2881_v59 = vpop.f32.mrf.mxu0  ;;  %v3201_v60 = vpop.f32.mrf.mxu1 }
 0x1f6   : > { %6143 = vst.msk [vmem:[%s8388_s29 + $0xac] sm:$0xf] %vm6099_vm5, %v5630_v51  ;;  %v2882_v63 = vadd.f32 %v8910_v3, %v2881_v59  ;;  %v3202_v0 = vadd.f32 %v8910_v3, %v3201_v60 }
 0x1f7   : > { %6271 = vst.msk [vmem:[%s8388_s29 + $0x2ac] sm:$0xf] %vm6099_vm5, %v5758_v53  ;;  %vm4350_vm10 = vcmp.ge.f32.partialorder %v3519_v58, 0.0  ;;  %v4862_v1 = vmul.f32 0.2, %v3519_v58  ;;  %vm4478_vm11 = vcmp.ge.f32.partialorder %v3839_v29, 0.0 }
 0x1f8   : > { %v4990_v2 = vmul.f32 0.2, %v3839_v29  ;;  %vm4095_vm12 = vcmp.ge.f32.partialorder %v2882_v63, 0.0  ;;  %v4607_v4 = vmul.f32 0.2, %v2882_v63  ;;  %vm4223_vm13 = vcmp.ge.f32.partialorder %v3202_v0, 0.0  ;;  %7739 = vmatmul.msk.bf16.gmra.mxu0 %vm1986_vm2, %v7997_v56  ;;  %7803 = vmatmul.msk.bf16.gmra.mxu1 %vm1986_vm2, %v8061_v57 }
 0x1f9   : > { %v5374_v5 = vsel %vm4350_vm10, %v3519_v58, %v4862_v1  ;;  %v4735_v6 = vmul.f32 0.2, %v3202_v0  ;;  %7867 = vmatmul.msk.bf16.gmra.mxu2 %vm1986_vm2, %v8125_v61  ;;  %7931 = vmatmul.msk.bf16.gmra.mxu3 %vm1986_vm2, %v8189_v62 }
 0x1fa   : > { %v5886_v7 = vpack.c.bf16 %v5374_v5, %v5374_v5  ;;  %v5502_v8 = vsel %vm4478_vm11, %v3839_v29, %v4990_v2  ;;  %v5119_v9 = vsel %vm4095_vm12, %v2882_v63, %v4607_v4 }
 0x1fb   : > { %v6014_v10 = vpack.c.bf16 %v5502_v8, %v5502_v8  ;;  %v5631_v11 = vpack.c.bf16 %v5119_v9, %v5119_v9  ;;  %v5247_v12 = vsel %vm4223_vm13, %v3202_v0, %v4735_v6 }
 0x1fc   : > { %6399 = vst.msk [vmem:[%s8388_s29 + $0x4ac] sm:$0xf] %vm6099_vm5, %v5886_v7  ;;  %v5759_v13 = vpack.c.bf16 %v5247_v12, %v5247_v12  ;;  %v3521_v14 = vpop.f32.mrf.mxu2  ;;  %v3841_v15 = vpop.f32.mrf.mxu3 }
 0x1fd   : > { %6527 = vst.msk [vmem:[%s8388_s29 + $0x6ac] sm:$0xf] %vm6099_vm5, %v6014_v10  ;;  %v3522_v16 = vadd.f32 %v8910_v3, %v3521_v14  ;;  %v3842_v17 = vadd.f32 %v8910_v3, %v3841_v15  ;;  %v2883_v18 = vpop.f32.mrf.mxu0  ;;  %v3203_v19 = vpop.f32.mrf.mxu1 }
 0x1fe   : > { %6144 = vst.msk [vmem:[%s8388_s29 + $0xb0] sm:$0xf] %vm6099_vm5, %v5631_v11  ;;  %v2884_v20 = vadd.f32 %v8910_v3, %v2883_v18  ;;  %v3204_v40 = vadd.f32 %v8910_v3, %v3203_v19  ;;  %v8063_v18 = vld [vmem:[%s8302_s24 + $0x300] sm:$0xff] }
 0x1ff   : > { %6272 = vst.msk [vmem:[%s8388_s29 + $0x2b0] sm:$0xf] %vm6099_vm5, %v5759_v13  ;;  %vm4351_vm14 = vcmp.ge.f32.partialorder %v3522_v16, 0.0  ;;  %v4863_v21 = vmul.f32 0.2, %v3522_v16  ;;  %vm4479_vm15 = vcmp.ge.f32.partialorder %v3842_v17, 0.0 }
 0x200   : > { %v4991_v22 = vmul.f32 0.2, %v3842_v17  ;;  %vm4096_vm0 = vcmp.ge.f32.partialorder %v2884_v20, 0.0  ;;  %v4608_v23 = vmul.f32 0.2, %v2884_v20  ;;  %vm4224_vm1 = vcmp.ge.f32.partialorder %v3204_v40, 0.0 }
 0x201   : > { %v5375_v24 = vsel %vm4351_vm14, %v3522_v16, %v4863_v21  ;;  %v4736_v25 = vmul.f32 0.2, %v3204_v40 }
 0x202   : > { %v5887_v26 = vpack.c.bf16 %v5375_v24, %v5375_v24  ;;  %v5503_v27 = vsel %vm4479_vm15, %v3842_v17, %v4991_v22  ;;  %v5120_v28 = vsel %vm4096_vm0, %v2884_v20, %v4608_v23  ;;  %v7999_v17 = vld [vmem:[%s8302_s24 + $0x100] sm:$0xff] }
 0x203   : > { %v6015_v30 = vpack.c.bf16 %v5503_v27, %v5503_v27  ;;  %v5632_v31 = vpack.c.bf16 %v5120_v28, %v5120_v28  ;;  %v5248_v32 = vsel %vm4224_vm1, %v3204_v40, %v4736_v25  ;;  %v8127_v22 = vld [vmem:[%s8302_s24 + $0x500] sm:$0xff] }
 0x204   : > { %6400 = vst.msk [vmem:[%s8388_s29 + $0x4b0] sm:$0xf] %vm6099_vm5, %v5887_v26  ;;  %v5760_v33 = vpack.c.bf16 %v5248_v32, %v5248_v32  ;;  %v3523_v34 = vpop.f32.mrf.mxu2  ;;  %v3843_v35 = vpop.f32.mrf.mxu3  ;;  %v8191_v23 = vld [vmem:[%s8302_s24 + $0x700] sm:$0xff] }
 0x205   : > { %6528 = vst.msk [vmem:[%s8388_s29 + $0x6b0] sm:$0xf] %vm6099_vm5, %v6015_v30  ;;  %v3524_v38 = vadd.f32 %v8910_v3, %v3523_v34  ;;  %v3844_v39 = vadd.f32 %v8910_v3, %v3843_v35  ;;  %v2886_v41 = vpop.f32.mrf.mxu0  ;;  %v3206_v42 = vpop.f32.mrf.mxu1 }
 0x206   : > { %6145 = vst.msk [vmem:[%s8388_s29 + $0xb4] sm:$0xf] %vm6099_vm5, %v5632_v31  ;;  %v2887_v45 = vadd.f32 %v8910_v3, %v2886_v41  ;;  %v3207_v46 = vadd.f32 %v8910_v3, %v3206_v42  ;;  %v9171_v41 = vld [vmem:[%s10404_s2] ss:$0 sm:$0xff] }
 0x207   : > { %6273 = vst.msk [vmem:[%s8388_s29 + $0x2b4] sm:$0xf] %vm6099_vm5, %v5760_v33  ;;  %vm4352_vm3 = vcmp.ge.f32.partialorder %v3524_v38, 0.0  ;;  %v4864_v47 = vmul.f32 0.2, %v3524_v38  ;;  %vm4480_vm4 = vcmp.ge.f32.partialorder %v3844_v39, 0.0 }
 0x208   : > { %v4992_v48 = vmul.f32 0.2, %v3844_v39  ;;  %vm4097_vm6 = vcmp.ge.f32.partialorder %v2887_v45, 0.0  ;;  %v4609_v49 = vmul.f32 0.2, %v2887_v45  ;;  %vm4225_vm7 = vcmp.ge.f32.partialorder %v3207_v46, 0.0  ;;  %7740 = vmatmul.msk.bf16.gmra.mxu0 %vm1986_vm2, %v7998_v36  ;;  %7804 = vmatmul.msk.bf16.gmra.mxu1 %vm1986_vm2, %v8062_v37 }
 0x209   : > { %v5376_v50 = vsel %vm4352_vm3, %v3524_v38, %v4864_v47  ;;  %v4737_v51 = vmul.f32 0.2, %v3207_v46  ;;  %7868 = vmatmul.msk.bf16.gmra.mxu2 %vm1986_vm2, %v8126_v43  ;;  %7932 = vmatmul.msk.bf16.gmra.mxu3 %vm1986_vm2, %v8190_v44 }
 0x20a   : > { %v5888_v52 = vpack.c.bf16 %v5376_v50, %v5376_v50  ;;  %v5504_v53 = vsel %vm4480_vm4, %v3844_v39, %v4992_v48  ;;  %v5121_v54 = vsel %vm4097_vm6, %v2887_v45, %v4609_v49 }
 0x20b   : > { %v6016_v55 = vpack.c.bf16 %v5504_v53, %v5504_v53  ;;  %v5633_v56 = vpack.c.bf16 %v5121_v54, %v5121_v54  ;;  %v5249_v57 = vsel %vm4225_vm7, %v3207_v46, %v4737_v51 }
 0x20c   : > { %6401 = vst.msk [vmem:[%s8388_s29 + $0x4b4] sm:$0xf] %vm6099_vm5, %v5888_v52  ;;  %v5761_v58 = vpack.c.bf16 %v5249_v57, %v5249_v57  ;;  %v3526_v29 = vpop.f32.mrf.mxu2  ;;  %v3846_v59 = vpop.f32.mrf.mxu3 }
 0x20d   : > { %6529 = vst.msk [vmem:[%s8388_s29 + $0x6b4] sm:$0xf] %vm6099_vm5, %v6016_v55  ;;  %v3527_v60 = vadd.f32 %v8910_v3, %v3526_v29  ;;  %v3847_v61 = vadd.f32 %v8910_v3, %v3846_v59  ;;  %v2888_v62 = vpop.f32.mrf.mxu0  ;;  %v3208_v63 = vpop.f32.mrf.mxu1 }
 0x20e   : > { %6146 = vst.msk [vmem:[%s8388_s29 + $0xb8] sm:$0xf] %vm6099_vm5, %v5633_v56  ;;  %v2889_v0 = vadd.f32 %v8910_v3, %v2888_v62  ;;  %v3209_v1 = vadd.f32 %v8910_v3, %v3208_v63  ;;  %v8064_v62 = vld [vmem:[%s8302_s24 + $0x308] sm:$0xff] }
 0x20f   : > { %6274 = vst.msk [vmem:[%s8388_s29 + $0x2b8] sm:$0xf] %vm6099_vm5, %v5761_v58  ;;  %vm4353_vm8 = vcmp.ge.f32.partialorder %v3527_v60, 0.0  ;;  %v4865_v2 = vmul.f32 0.2, %v3527_v60  ;;  %vm4481_vm9 = vcmp.ge.f32.partialorder %v3847_v61, 0.0 }
 0x210   : > { %v4993_v4 = vmul.f32 0.2, %v3847_v61  ;;  %vm4098_vm10 = vcmp.ge.f32.partialorder %v2889_v0, 0.0  ;;  %v4610_v5 = vmul.f32 0.2, %v2889_v0  ;;  %vm4226_vm11 = vcmp.ge.f32.partialorder %v3209_v1, 0.0 }
 0x211   : > { %v5377_v6 = vsel %vm4353_vm8, %v3527_v60, %v4865_v2  ;;  %v4738_v7 = vmul.f32 0.2, %v3209_v1 }
 0x212   : > { %v5889_v8 = vpack.c.bf16 %v5377_v6, %v5377_v6  ;;  %v5505_v9 = vsel %vm4481_vm9, %v3847_v61, %v4993_v4  ;;  %v5122_v10 = vsel %vm4098_vm10, %v2889_v0, %v4610_v5  ;;  %v8000_v61 = vld [vmem:[%s8302_s24 + $0x108] sm:$0xff] }
 0x213   : > { %v6017_v11 = vpack.c.bf16 %v5505_v9, %v5505_v9  ;;  %v5634_v12 = vpack.c.bf16 %v5122_v10, %v5122_v10  ;;  %v5250_v13 = vsel %vm4226_vm11, %v3209_v1, %v4738_v7  ;;  %v8128_v4 = vld [vmem:[%s8302_s24 + $0x508] sm:$0xff] }
 0x214   : > { %6402 = vst.msk [vmem:[%s8388_s29 + $0x4b8] sm:$0xf] %vm6099_vm5, %v5889_v8  ;;  %v5762_v14 = vpack.c.bf16 %v5250_v13, %v5250_v13  ;;  %v3528_v15 = vpop.f32.mrf.mxu2  ;;  %v3848_v16 = vpop.f32.mrf.mxu3  ;;  %v8192_v5 = vld [vmem:[%s8302_s24 + $0x708] sm:$0xff] }
 0x215   : > { %6530 = vst.msk [vmem:[%s8388_s29 + $0x6b8] sm:$0xf] %vm6099_vm5, %v6017_v11  ;;  %v3529_v19 = vadd.f32 %v8910_v3, %v3528_v15  ;;  %v3849_v20 = vadd.f32 %v8910_v3, %v3848_v16  ;;  %v2891_v40 = vpop.f32.mrf.mxu0  ;;  %v3211_v21 = vpop.f32.mrf.mxu1 }
 0x216   : > { %6147 = vst.msk [vmem:[%s8388_s29 + $0xbc] sm:$0xf] %vm6099_vm5, %v5634_v12  ;;  %v2892_v24 = vadd.f32 %v8910_v3, %v2891_v40  ;;  %v3212_v25 = vadd.f32 %v8910_v3, %v3211_v21 }
 0x217   : > { %6275 = vst.msk [vmem:[%s8388_s29 + $0x2bc] sm:$0xf] %vm6099_vm5, %v5762_v14  ;;  %vm4354_vm12 = vcmp.ge.f32.partialorder %v3529_v19, 0.0  ;;  %v4866_v26 = vmul.f32 0.2, %v3529_v19  ;;  %vm4482_vm13 = vcmp.ge.f32.partialorder %v3849_v20, 0.0 }
 0x218   : > { %v4994_v27 = vmul.f32 0.2, %v3849_v20  ;;  %vm4099_vm14 = vcmp.ge.f32.partialorder %v2892_v24, 0.0  ;;  %v4611_v28 = vmul.f32 0.2, %v2892_v24  ;;  %vm4227_vm15 = vcmp.ge.f32.partialorder %v3212_v25, 0.0  ;;  %7741 = vmatmul.msk.bf16.gmra.mxu0 %vm1986_vm2, %v7999_v17  ;;  %7805 = vmatmul.msk.bf16.gmra.mxu1 %vm1986_vm2, %v8063_v18 }
 0x219   : > { %v5378_v30 = vsel %vm4354_vm12, %v3529_v19, %v4866_v26  ;;  %v4739_v31 = vmul.f32 0.2, %v3212_v25  ;;  %7869 = vmatmul.msk.bf16.gmra.mxu2 %vm1986_vm2, %v8127_v22  ;;  %7933 = vmatmul.msk.bf16.gmra.mxu3 %vm1986_vm2, %v8191_v23 }
 0x21a   : > { %v5890_v3 = vpack.c.bf16 %v5378_v30, %v5378_v30  ;;  %v5506_v32 = vsel %vm4482_vm13, %v3849_v20, %v4994_v27  ;;  %v5123_v33 = vsel %vm4099_vm14, %v2892_v24, %v4611_v28 }
 0x21b   : > { %v6018_v34 = vpack.c.bf16 %v5506_v32, %v5506_v32  ;;  %v5635_v35 = vpack.c.bf16 %v5123_v33, %v5123_v33  ;;  %v5251_v36 = vsel %vm4227_vm15, %v3212_v25, %v4739_v31 }
 0x21c   : > { %6403 = vst.msk [vmem:[%s8388_s29 + $0x4bc] sm:$0xf] %vm6099_vm5, %v5890_v3  ;;  %v5763_v37 = vpack.c.bf16 %v5251_v36, %v5251_v36  ;;  %v3531_v38 = vpop.f32.mrf.mxu2  ;;  %v3851_v39 = vpop.f32.mrf.mxu3 }
 0x21d   : > { %6531 = vst.msk [vmem:[%s8388_s29 + $0x6bc] sm:$0xf] %vm6099_vm5, %v6018_v34  ;;  %v3532_v42 = vadd.f32 %v9171_v41, %v3531_v38  ;;  %v3852_v43 = vadd.f32 %v9171_v41, %v3851_v39  ;;  %v2893_v44 = vpop.f32.mrf.mxu0  ;;  %v3213_v45 = vpop.f32.mrf.mxu1 }
 0x21e   : > { %6148 = vst.msk [vmem:[%s8388_s29 + $0xc0] sm:$0xf] %vm6099_vm5, %v5635_v35  ;;  %v2894_v46 = vadd.f32 %v9171_v41, %v2893_v44  ;;  %v3214_v47 = vadd.f32 %v9171_v41, %v3213_v45  ;;  %v8065_v44 = vld [vmem:[%s8302_s24 + $0x310] sm:$0xff] }
 0x21f   : > { %6276 = vst.msk [vmem:[%s8388_s29 + $0x2c0] sm:$0xf] %vm6099_vm5, %v5763_v37  ;;  %vm4355_vm0 = vcmp.ge.f32.partialorder %v3532_v42, 0.0  ;;  %v4867_v48 = vmul.f32 0.2, %v3532_v42  ;;  %vm4483_vm1 = vcmp.ge.f32.partialorder %v3852_v43, 0.0 }
 0x220   : > { %v4995_v49 = vmul.f32 0.2, %v3852_v43  ;;  %vm4100_vm3 = vcmp.ge.f32.partialorder %v2894_v46, 0.0  ;;  %v4612_v50 = vmul.f32 0.2, %v2894_v46  ;;  %vm4228_vm4 = vcmp.ge.f32.partialorder %v3214_v47, 0.0 }
 0x221   : > { %v5379_v51 = vsel %vm4355_vm0, %v3532_v42, %v4867_v48  ;;  %v4740_v52 = vmul.f32 0.2, %v3214_v47 }
 0x222   : > { %v5891_v53 = vpack.c.bf16 %v5379_v51, %v5379_v51  ;;  %v5507_v54 = vsel %vm4483_vm1, %v3852_v43, %v4995_v49  ;;  %v5124_v55 = vsel %vm4100_vm3, %v2894_v46, %v4612_v50  ;;  %v8001_v43 = vld [vmem:[%s8302_s24 + $0x110] sm:$0xff] }
 0x223   : > { %v6019_v56 = vpack.c.bf16 %v5507_v54, %v5507_v54  ;;  %v5636_v57 = vpack.c.bf16 %v5124_v55, %v5124_v55  ;;  %v5252_v58 = vsel %vm4228_vm4, %v3214_v47, %v4740_v52  ;;  %v8129_v49 = vld [vmem:[%s8302_s24 + $0x510] sm:$0xff] }
 0x224   : > { %6404 = vst.msk [vmem:[%s8388_s29 + $0x4c0] sm:$0xf] %vm6099_vm5, %v5891_v53  ;;  %v5764_v29 = vpack.c.bf16 %v5252_v58, %v5252_v58  ;;  %v3533_v59 = vpop.f32.mrf.mxu2  ;;  %v3853_v60 = vpop.f32.mrf.mxu3  ;;  %v8193_v50 = vld [vmem:[%s8302_s24 + $0x710] sm:$0xff] }
 0x225   : > { %6532 = vst.msk [vmem:[%s8388_s29 + $0x6c0] sm:$0xf] %vm6099_vm5, %v6019_v56  ;;  %v3534_v63 = vadd.f32 %v9171_v41, %v3533_v59  ;;  %v3854_v0 = vadd.f32 %v9171_v41, %v3853_v60  ;;  %v2896_v1 = vpop.f32.mrf.mxu0  ;;  %v3216_v2 = vpop.f32.mrf.mxu1 }
 0x226   : > { %6149 = vst.msk [vmem:[%s8388_s29 + $0xc4] sm:$0xf] %vm6099_vm5, %v5636_v57  ;;  %v2897_v6 = vadd.f32 %v9171_v41, %v2896_v1  ;;  %v3217_v7 = vadd.f32 %v9171_v41, %v3216_v2 }
 0x227   : > { %6277 = vst.msk [vmem:[%s8388_s29 + $0x2c4] sm:$0xf] %vm6099_vm5, %v5764_v29  ;;  %vm4356_vm6 = vcmp.ge.f32.partialorder %v3534_v63, 0.0  ;;  %v4868_v8 = vmul.f32 0.2, %v3534_v63  ;;  %vm4484_vm7 = vcmp.ge.f32.partialorder %v3854_v0, 0.0 }
 0x228   : > { %v4996_v9 = vmul.f32 0.2, %v3854_v0  ;;  %vm4101_vm8 = vcmp.ge.f32.partialorder %v2897_v6, 0.0  ;;  %v4613_v10 = vmul.f32 0.2, %v2897_v6  ;;  %vm4229_vm9 = vcmp.ge.f32.partialorder %v3217_v7, 0.0  ;;  %7742 = vmatmul.msk.bf16.gmra.mxu0 %vm1986_vm2, %v8000_v61  ;;  %7806 = vmatmul.msk.bf16.gmra.mxu1 %vm1986_vm2, %v8064_v62 }
 0x229   : > { %v5380_v11 = vsel %vm4356_vm6, %v3534_v63, %v4868_v8  ;;  %v4741_v12 = vmul.f32 0.2, %v3217_v7  ;;  %7870 = vmatmul.msk.bf16.gmra.mxu2 %vm1986_vm2, %v8128_v4  ;;  %7934 = vmatmul.msk.bf16.gmra.mxu3 %vm1986_vm2, %v8192_v5 }
 0x22a   : > { %v5892_v13 = vpack.c.bf16 %v5380_v11, %v5380_v11  ;;  %v5508_v14 = vsel %vm4484_vm7, %v3854_v0, %v4996_v9  ;;  %v5125_v15 = vsel %vm4101_vm8, %v2897_v6, %v4613_v10 }
 0x22b   : > { %v6020_v16 = vpack.c.bf16 %v5508_v14, %v5508_v14  ;;  %v5637_v17 = vpack.c.bf16 %v5125_v15, %v5125_v15  ;;  %v5253_v18 = vsel %vm4229_vm9, %v3217_v7, %v4741_v12 }
 0x22c   : > { %6405 = vst.msk [vmem:[%s8388_s29 + $0x4c4] sm:$0xf] %vm6099_vm5, %v5892_v13  ;;  %v5765_v19 = vpack.c.bf16 %v5253_v18, %v5253_v18  ;;  %v3536_v20 = vpop.f32.mrf.mxu2  ;;  %v3856_v40 = vpop.f32.mrf.mxu3 }
 0x22d   : > { %6533 = vst.msk [vmem:[%s8388_s29 + $0x6c4] sm:$0xf] %vm6099_vm5, %v6020_v16  ;;  %v3537_v21 = vadd.f32 %v9171_v41, %v3536_v20  ;;  %v3857_v22 = vadd.f32 %v9171_v41, %v3856_v40  ;;  %v2898_v23 = vpop.f32.mrf.mxu0  ;;  %v3218_v24 = vpop.f32.mrf.mxu1 }
 0x22e   : > { %6150 = vst.msk [vmem:[%s8388_s29 + $0xc8] sm:$0xf] %vm6099_vm5, %v5637_v17  ;;  %v2899_v25 = vadd.f32 %v9171_v41, %v2898_v23  ;;  %v3219_v26 = vadd.f32 %v9171_v41, %v3218_v24  ;;  %v8066_v23 = vld [vmem:[%s8302_s24 + $0x318] sm:$0xff] }
 0x22f   : > { %6278 = vst.msk [vmem:[%s8388_s29 + $0x2c8] sm:$0xf] %vm6099_vm5, %v5765_v19  ;;  %vm4357_vm10 = vcmp.ge.f32.partialorder %v3537_v21, 0.0  ;;  %v4869_v27 = vmul.f32 0.2, %v3537_v21  ;;  %vm4485_vm11 = vcmp.ge.f32.partialorder %v3857_v22, 0.0 }
 0x230   : > { %v4997_v28 = vmul.f32 0.2, %v3857_v22  ;;  %vm4102_vm12 = vcmp.ge.f32.partialorder %v2899_v25, 0.0  ;;  %v4614_v30 = vmul.f32 0.2, %v2899_v25  ;;  %vm4230_vm13 = vcmp.ge.f32.partialorder %v3219_v26, 0.0 }
 0x231   : > { %v5381_v31 = vsel %vm4357_vm10, %v3537_v21, %v4869_v27  ;;  %v4742_v3 = vmul.f32 0.2, %v3219_v26 }
 0x232   : > { %v5893_v32 = vpack.c.bf16 %v5381_v31, %v5381_v31  ;;  %v5509_v33 = vsel %vm4485_vm11, %v3857_v22, %v4997_v28  ;;  %v5126_v34 = vsel %vm4102_vm12, %v2899_v25, %v4614_v30  ;;  %v8002_v22 = vld [vmem:[%s8302_s24 + $0x118] sm:$0xff] }
 0x233   : > { %v6021_v35 = vpack.c.bf16 %v5509_v33, %v5509_v33  ;;  %v5638_v36 = vpack.c.bf16 %v5126_v34, %v5126_v34  ;;  %v5254_v37 = vsel %vm4230_vm13, %v3219_v26, %v4742_v3  ;;  %v8130_v28 = vld [vmem:[%s8302_s24 + $0x518] sm:$0xff] }
 0x234   : > { %6406 = vst.msk [vmem:[%s8388_s29 + $0x4c8] sm:$0xf] %vm6099_vm5, %v5893_v32  ;;  %v5766_v38 = vpack.c.bf16 %v5254_v37, %v5254_v37  ;;  %v3538_v39 = vpop.f32.mrf.mxu2  ;;  %v3858_v42 = vpop.f32.mrf.mxu3  ;;  %v8194_v30 = vld [vmem:[%s8302_s24 + $0x718] sm:$0xff] }
 0x235   : > { %6534 = vst.msk [vmem:[%s8388_s29 + $0x6c8] sm:$0xf] %vm6099_vm5, %v6021_v35  ;;  %v3539_v45 = vadd.f32 %v9171_v41, %v3538_v39  ;;  %v3859_v46 = vadd.f32 %v9171_v41, %v3858_v42  ;;  %v2901_v47 = vpop.f32.mrf.mxu0  ;;  %v3221_v48 = vpop.f32.mrf.mxu1 }
 0x236   : > { %6151 = vst.msk [vmem:[%s8388_s29 + $0xcc] sm:$0xf] %vm6099_vm5, %v5638_v36  ;;  %v2902_v51 = vadd.f32 %v9171_v41, %v2901_v47  ;;  %v3222_v52 = vadd.f32 %v9171_v41, %v3221_v48 }
 0x237   : > { %6279 = vst.msk [vmem:[%s8388_s29 + $0x2cc] sm:$0xf] %vm6099_vm5, %v5766_v38  ;;  %vm4358_vm14 = vcmp.ge.f32.partialorder %v3539_v45, 0.0  ;;  %v4870_v53 = vmul.f32 0.2, %v3539_v45  ;;  %vm4486_vm15 = vcmp.ge.f32.partialorder %v3859_v46, 0.0 }
 0x238   : > { %v4998_v54 = vmul.f32 0.2, %v3859_v46  ;;  %vm4103_vm0 = vcmp.ge.f32.partialorder %v2902_v51, 0.0  ;;  %v4615_v55 = vmul.f32 0.2, %v2902_v51  ;;  %vm4231_vm1 = vcmp.ge.f32.partialorder %v3222_v52, 0.0  ;;  %7743 = vmatmul.msk.bf16.gmra.mxu0 %vm1986_vm2, %v8001_v43  ;;  %7807 = vmatmul.msk.bf16.gmra.mxu1 %vm1986_vm2, %v8065_v44 }
 0x239   : > { %v5382_v56 = vsel %vm4358_vm14, %v3539_v45, %v4870_v53  ;;  %v4743_v57 = vmul.f32 0.2, %v3222_v52  ;;  %7871 = vmatmul.msk.bf16.gmra.mxu2 %vm1986_vm2, %v8129_v49  ;;  %7935 = vmatmul.msk.bf16.gmra.mxu3 %vm1986_vm2, %v8193_v50 }
 0x23a   : > { %v5894_v58 = vpack.c.bf16 %v5382_v56, %v5382_v56  ;;  %v5510_v29 = vsel %vm4486_vm15, %v3859_v46, %v4998_v54  ;;  %v5127_v59 = vsel %vm4103_vm0, %v2902_v51, %v4615_v55 }
 0x23b   : > { %v6022_v60 = vpack.c.bf16 %v5510_v29, %v5510_v29  ;;  %v5639_v61 = vpack.c.bf16 %v5127_v59, %v5127_v59  ;;  %v5255_v62 = vsel %vm4231_vm1, %v3222_v52, %v4743_v57 }
 0x23c   : > { %6407 = vst.msk [vmem:[%s8388_s29 + $0x4cc] sm:$0xf] %vm6099_vm5, %v5894_v58  ;;  %v5767_v63 = vpack.c.bf16 %v5255_v62, %v5255_v62  ;;  %v3541_v0 = vpop.f32.mrf.mxu2  ;;  %v3861_v1 = vpop.f32.mrf.mxu3 }
 0x23d   : > { %6535 = vst.msk [vmem:[%s8388_s29 + $0x6cc] sm:$0xf] %vm6099_vm5, %v6022_v60  ;;  %v3542_v2 = vadd.f32 %v9171_v41, %v3541_v0  ;;  %v3862_v4 = vadd.f32 %v9171_v41, %v3861_v1  ;;  %v2903_v5 = vpop.f32.mrf.mxu0  ;;  %v3223_v6 = vpop.f32.mrf.mxu1 }
 0x23e   : > { %6152 = vst.msk [vmem:[%s8388_s29 + $0xd0] sm:$0xf] %vm6099_vm5, %v5639_v61  ;;  %v2904_v7 = vadd.f32 %v9171_v41, %v2903_v5  ;;  %v3224_v8 = vadd.f32 %v9171_v41, %v3223_v6  ;;  %v8067_v5 = vld [vmem:[%s8302_s24 + $0x320] sm:$0xff] }
 0x23f   : > { %6280 = vst.msk [vmem:[%s8388_s29 + $0x2d0] sm:$0xf] %vm6099_vm5, %v5767_v63  ;;  %vm4359_vm3 = vcmp.ge.f32.partialorder %v3542_v2, 0.0  ;;  %v4871_v9 = vmul.f32 0.2, %v3542_v2  ;;  %vm4487_vm4 = vcmp.ge.f32.partialorder %v3862_v4, 0.0 }
 0x240   : > { %v4999_v10 = vmul.f32 0.2, %v3862_v4  ;;  %vm4104_vm6 = vcmp.ge.f32.partialorder %v2904_v7, 0.0  ;;  %v4616_v11 = vmul.f32 0.2, %v2904_v7  ;;  %vm4232_vm7 = vcmp.ge.f32.partialorder %v3224_v8, 0.0 }
 0x241   : > { %v5383_v12 = vsel %vm4359_vm3, %v3542_v2, %v4871_v9  ;;  %v4744_v13 = vmul.f32 0.2, %v3224_v8 }
 0x242   : > { %v5895_v14 = vpack.c.bf16 %v5383_v12, %v5383_v12  ;;  %v5511_v15 = vsel %vm4487_vm4, %v3862_v4, %v4999_v10  ;;  %v5128_v16 = vsel %vm4104_vm6, %v2904_v7, %v4616_v11  ;;  %v8003_v4 = vld [vmem:[%s8302_s24 + $0x120] sm:$0xff] }
 0x243   : > { %v6023_v17 = vpack.c.bf16 %v5511_v15, %v5511_v15  ;;  %v5640_v18 = vpack.c.bf16 %v5128_v16, %v5128_v16  ;;  %v5256_v19 = vsel %vm4232_vm7, %v3224_v8, %v4744_v13  ;;  %v8131_v10 = vld [vmem:[%s8302_s24 + $0x520] sm:$0xff] }
 0x244   : > { %6408 = vst.msk [vmem:[%s8388_s29 + $0x4d0] sm:$0xf] %vm6099_vm5, %v5895_v14  ;;  %v5768_v20 = vpack.c.bf16 %v5256_v19, %v5256_v19  ;;  %v3543_v40 = vpop.f32.mrf.mxu2  ;;  %v3863_v21 = vpop.f32.mrf.mxu3  ;;  %v8195_v11 = vld [vmem:[%s8302_s24 + $0x720] sm:$0xff] }
 0x245   : > { %6536 = vst.msk [vmem:[%s8388_s29 + $0x6d0] sm:$0xf] %vm6099_vm5, %v6023_v17  ;;  %v3544_v24 = vadd.f32 %v9171_v41, %v3543_v40  ;;  %v3864_v25 = vadd.f32 %v9171_v41, %v3863_v21  ;;  %v2906_v26 = vpop.f32.mrf.mxu0  ;;  %v3226_v27 = vpop.f32.mrf.mxu1 }
 0x246   : > { %6153 = vst.msk [vmem:[%s8388_s29 + $0xd4] sm:$0xf] %vm6099_vm5, %v5640_v18  ;;  %v2907_v31 = vadd.f32 %v9171_v41, %v2906_v26  ;;  %v3227_v3 = vadd.f32 %v9171_v41, %v3226_v27 }
 0x247   : > { %6281 = vst.msk [vmem:[%s8388_s29 + $0x2d4] sm:$0xf] %vm6099_vm5, %v5768_v20  ;;  %vm4360_vm8 = vcmp.ge.f32.partialorder %v3544_v24, 0.0  ;;  %v4872_v32 = vmul.f32 0.2, %v3544_v24  ;;  %vm4488_vm9 = vcmp.ge.f32.partialorder %v3864_v25, 0.0 }
 0x248   : > { %v5000_v33 = vmul.f32 0.2, %v3864_v25  ;;  %vm4105_vm10 = vcmp.ge.f32.partialorder %v2907_v31, 0.0  ;;  %v4617_v34 = vmul.f32 0.2, %v2907_v31  ;;  %vm4233_vm11 = vcmp.ge.f32.partialorder %v3227_v3, 0.0  ;;  %7744 = vmatmul.msk.bf16.gmra.mxu0 %vm1986_vm2, %v8002_v22  ;;  %7808 = vmatmul.msk.bf16.gmra.mxu1 %vm1986_vm2, %v8066_v23 }
 0x249   : > { %v5384_v35 = vsel %vm4360_vm8, %v3544_v24, %v4872_v32  ;;  %v4745_v36 = vmul.f32 0.2, %v3227_v3  ;;  %7872 = vmatmul.msk.bf16.gmra.mxu2 %vm1986_vm2, %v8130_v28  ;;  %7936 = vmatmul.msk.bf16.gmra.mxu3 %vm1986_vm2, %v8194_v30 }
 0x24a   : > { %v5896_v37 = vpack.c.bf16 %v5384_v35, %v5384_v35  ;;  %v5512_v38 = vsel %vm4488_vm9, %v3864_v25, %v5000_v33  ;;  %v5129_v39 = vsel %vm4105_vm10, %v2907_v31, %v4617_v34 }
 0x24b   : > { %v6024_v42 = vpack.c.bf16 %v5512_v38, %v5512_v38  ;;  %v5641_v43 = vpack.c.bf16 %v5129_v39, %v5129_v39  ;;  %v5257_v44 = vsel %vm4233_vm11, %v3227_v3, %v4745_v36 }
 0x24c   : > { %6409 = vst.msk [vmem:[%s8388_s29 + $0x4d4] sm:$0xf] %vm6099_vm5, %v5896_v37  ;;  %v5769_v45 = vpack.c.bf16 %v5257_v44, %v5257_v44  ;;  %v3546_v46 = vpop.f32.mrf.mxu2  ;;  %v3866_v47 = vpop.f32.mrf.mxu3 }
 0x24d   : > { %6537 = vst.msk [vmem:[%s8388_s29 + $0x6d4] sm:$0xf] %vm6099_vm5, %v6024_v42  ;;  %v3547_v48 = vadd.f32 %v9171_v41, %v3546_v46  ;;  %v3867_v49 = vadd.f32 %v9171_v41, %v3866_v47  ;;  %v2908_v50 = vpop.f32.mrf.mxu0  ;;  %v3228_v51 = vpop.f32.mrf.mxu1 }
 0x24e   : > { %6154 = vst.msk [vmem:[%s8388_s29 + $0xd8] sm:$0xf] %vm6099_vm5, %v5641_v43  ;;  %v2909_v52 = vadd.f32 %v9171_v41, %v2908_v50  ;;  %v3229_v53 = vadd.f32 %v9171_v41, %v3228_v51  ;;  %v8068_v50 = vld [vmem:[%s8302_s24 + $0x328] sm:$0xff] }
 0x24f   : > { %6282 = vst.msk [vmem:[%s8388_s29 + $0x2d8] sm:$0xf] %vm6099_vm5, %v5769_v45  ;;  %vm4361_vm12 = vcmp.ge.f32.partialorder %v3547_v48, 0.0  ;;  %v4873_v54 = vmul.f32 0.2, %v3547_v48  ;;  %vm4489_vm13 = vcmp.ge.f32.partialorder %v3867_v49, 0.0 }
 0x250   : > { %v5001_v55 = vmul.f32 0.2, %v3867_v49  ;;  %vm4106_vm14 = vcmp.ge.f32.partialorder %v2909_v52, 0.0  ;;  %v4618_v56 = vmul.f32 0.2, %v2909_v52  ;;  %vm4234_vm15 = vcmp.ge.f32.partialorder %v3229_v53, 0.0 }
 0x251   : > { %v5385_v57 = vsel %vm4361_vm12, %v3547_v48, %v4873_v54  ;;  %v4746_v58 = vmul.f32 0.2, %v3229_v53 }
 0x252   : > { %v5897_v29 = vpack.c.bf16 %v5385_v57, %v5385_v57  ;;  %v5513_v59 = vsel %vm4489_vm13, %v3867_v49, %v5001_v55  ;;  %v5130_v60 = vsel %vm4106_vm14, %v2909_v52, %v4618_v56  ;;  %v8004_v49 = vld [vmem:[%s8302_s24 + $0x128] sm:$0xff] }
 0x253   : > { %v6025_v61 = vpack.c.bf16 %v5513_v59, %v5513_v59  ;;  %v5642_v62 = vpack.c.bf16 %v5130_v60, %v5130_v60  ;;  %v5258_v63 = vsel %vm4234_vm15, %v3229_v53, %v4746_v58  ;;  %v8132_v55 = vld [vmem:[%s8302_s24 + $0x528] sm:$0xff] }
 0x254   : > { %6410 = vst.msk [vmem:[%s8388_s29 + $0x4d8] sm:$0xf] %vm6099_vm5, %v5897_v29  ;;  %v5770_v0 = vpack.c.bf16 %v5258_v63, %v5258_v63  ;;  %v3548_v1 = vpop.f32.mrf.mxu2  ;;  %v3868_v2 = vpop.f32.mrf.mxu3  ;;  %v8196_v56 = vld [vmem:[%s8302_s24 + $0x728] sm:$0xff] }
 0x255   : > { %6538 = vst.msk [vmem:[%s8388_s29 + $0x6d8] sm:$0xf] %vm6099_vm5, %v6025_v61  ;;  %v3549_v6 = vadd.f32 %v9171_v41, %v3548_v1  ;;  %v3869_v7 = vadd.f32 %v9171_v41, %v3868_v2  ;;  %v2911_v8 = vpop.f32.mrf.mxu0  ;;  %v3231_v9 = vpop.f32.mrf.mxu1 }
 0x256   : > { %6155 = vst.msk [vmem:[%s8388_s29 + $0xdc] sm:$0xf] %vm6099_vm5, %v5642_v62  ;;  %v2912_v12 = vadd.f32 %v9171_v41, %v2911_v8  ;;  %v3232_v13 = vadd.f32 %v9171_v41, %v3231_v9 }
 0x257   : > { %6283 = vst.msk [vmem:[%s8388_s29 + $0x2dc] sm:$0xf] %vm6099_vm5, %v5770_v0  ;;  %vm4362_vm0 = vcmp.ge.f32.partialorder %v3549_v6, 0.0  ;;  %v4874_v14 = vmul.f32 0.2, %v3549_v6  ;;  %vm4490_vm1 = vcmp.ge.f32.partialorder %v3869_v7, 0.0 }
 0x258   : > { %v5002_v15 = vmul.f32 0.2, %v3869_v7  ;;  %vm4107_vm3 = vcmp.ge.f32.partialorder %v2912_v12, 0.0  ;;  %v4619_v16 = vmul.f32 0.2, %v2912_v12  ;;  %vm4235_vm4 = vcmp.ge.f32.partialorder %v3232_v13, 0.0  ;;  %7745 = vmatmul.msk.bf16.gmra.mxu0 %vm1986_vm2, %v8003_v4  ;;  %7809 = vmatmul.msk.bf16.gmra.mxu1 %vm1986_vm2, %v8067_v5 }
 0x259   : > { %v5386_v17 = vsel %vm4362_vm0, %v3549_v6, %v4874_v14  ;;  %v4747_v18 = vmul.f32 0.2, %v3232_v13  ;;  %7873 = vmatmul.msk.bf16.gmra.mxu2 %vm1986_vm2, %v8131_v10  ;;  %7937 = vmatmul.msk.bf16.gmra.mxu3 %vm1986_vm2, %v8195_v11 }
 0x25a   : > { %v5898_v19 = vpack.c.bf16 %v5386_v17, %v5386_v17  ;;  %v5514_v20 = vsel %vm4490_vm1, %v3869_v7, %v5002_v15  ;;  %v5131_v40 = vsel %vm4107_vm3, %v2912_v12, %v4619_v16 }
 0x25b   : > { %v6026_v21 = vpack.c.bf16 %v5514_v20, %v5514_v20  ;;  %v5643_v22 = vpack.c.bf16 %v5131_v40, %v5131_v40  ;;  %v5259_v23 = vsel %vm4235_vm4, %v3232_v13, %v4747_v18 }
 0x25c   : > { %6411 = vst.msk [vmem:[%s8388_s29 + $0x4dc] sm:$0xf] %vm6099_vm5, %v5898_v19  ;;  %v5771_v24 = vpack.c.bf16 %v5259_v23, %v5259_v23  ;;  %v3551_v25 = vpop.f32.mrf.mxu2  ;;  %v3871_v26 = vpop.f32.mrf.mxu3 }
 0x25d   : > { %6539 = vst.msk [vmem:[%s8388_s29 + $0x6dc] sm:$0xf] %vm6099_vm5, %v6026_v21  ;;  %v3552_v27 = vadd.f32 %v9171_v41, %v3551_v25  ;;  %v3872_v28 = vadd.f32 %v9171_v41, %v3871_v26  ;;  %v2913_v30 = vpop.f32.mrf.mxu0  ;;  %v3233_v31 = vpop.f32.mrf.mxu1 }
 0x25e   : > { %6156 = vst.msk [vmem:[%s8388_s29 + $0xe0] sm:$0xf] %vm6099_vm5, %v5643_v22  ;;  %v2914_v3 = vadd.f32 %v9171_v41, %v2913_v30  ;;  %v3234_v32 = vadd.f32 %v9171_v41, %v3233_v31  ;;  %v8069_v30 = vld [vmem:[%s8302_s24 + $0x330] sm:$0xff] }
 0x25f   : > { %6284 = vst.msk [vmem:[%s8388_s29 + $0x2e0] sm:$0xf] %vm6099_vm5, %v5771_v24  ;;  %vm4363_vm6 = vcmp.ge.f32.partialorder %v3552_v27, 0.0  ;;  %v4875_v33 = vmul.f32 0.2, %v3552_v27  ;;  %vm4491_vm7 = vcmp.ge.f32.partialorder %v3872_v28, 0.0 }
 0x260   : > { %v5003_v34 = vmul.f32 0.2, %v3872_v28  ;;  %vm4108_vm8 = vcmp.ge.f32.partialorder %v2914_v3, 0.0  ;;  %v4620_v35 = vmul.f32 0.2, %v2914_v3  ;;  %vm4236_vm9 = vcmp.ge.f32.partialorder %v3234_v32, 0.0 }
 0x261   : > { %v5387_v36 = vsel %vm4363_vm6, %v3552_v27, %v4875_v33  ;;  %v4748_v37 = vmul.f32 0.2, %v3234_v32 }
 0x262   : > { %v5899_v38 = vpack.c.bf16 %v5387_v36, %v5387_v36  ;;  %v5515_v39 = vsel %vm4491_vm7, %v3872_v28, %v5003_v34  ;;  %v5132_v42 = vsel %vm4108_vm8, %v2914_v3, %v4620_v35  ;;  %v8005_v28 = vld [vmem:[%s8302_s24 + $0x130] sm:$0xff] }
 0x263   : > { %v6027_v43 = vpack.c.bf16 %v5515_v39, %v5515_v39  ;;  %v5644_v44 = vpack.c.bf16 %v5132_v42, %v5132_v42  ;;  %v5260_v45 = vsel %vm4236_vm9, %v3234_v32, %v4748_v37  ;;  %v8133_v34 = vld [vmem:[%s8302_s24 + $0x530] sm:$0xff] }
 0x264   : > { %6412 = vst.msk [vmem:[%s8388_s29 + $0x4e0] sm:$0xf] %vm6099_vm5, %v5899_v38  ;;  %v5772_v46 = vpack.c.bf16 %v5260_v45, %v5260_v45  ;;  %v3553_v47 = vpop.f32.mrf.mxu2  ;;  %v3873_v48 = vpop.f32.mrf.mxu3  ;;  %v8197_v35 = vld [vmem:[%s8302_s24 + $0x730] sm:$0xff] }
 0x265   : > { %6540 = vst.msk [vmem:[%s8388_s29 + $0x6e0] sm:$0xf] %vm6099_vm5, %v6027_v43  ;;  %v3554_v51 = vadd.f32 %v9171_v41, %v3553_v47  ;;  %v3874_v52 = vadd.f32 %v9171_v41, %v3873_v48  ;;  %v2916_v53 = vpop.f32.mrf.mxu0  ;;  %v3236_v54 = vpop.f32.mrf.mxu1 }
 0x266   : > { %6157 = vst.msk [vmem:[%s8388_s29 + $0xe4] sm:$0xf] %vm6099_vm5, %v5644_v44  ;;  %v2917_v57 = vadd.f32 %v9171_v41, %v2916_v53  ;;  %v3237_v58 = vadd.f32 %v9171_v41, %v3236_v54 }
 0x267   : > { %6285 = vst.msk [vmem:[%s8388_s29 + $0x2e4] sm:$0xf] %vm6099_vm5, %v5772_v46  ;;  %vm4364_vm10 = vcmp.ge.f32.partialorder %v3554_v51, 0.0  ;;  %v4876_v29 = vmul.f32 0.2, %v3554_v51  ;;  %vm4492_vm11 = vcmp.ge.f32.partialorder %v3874_v52, 0.0 }
 0x268   : > { %v5004_v59 = vmul.f32 0.2, %v3874_v52  ;;  %vm4109_vm12 = vcmp.ge.f32.partialorder %v2917_v57, 0.0  ;;  %v4621_v60 = vmul.f32 0.2, %v2917_v57  ;;  %vm4237_vm13 = vcmp.ge.f32.partialorder %v3237_v58, 0.0  ;;  %7746 = vmatmul.msk.bf16.gmra.mxu0 %vm1986_vm2, %v8004_v49  ;;  %7810 = vmatmul.msk.bf16.gmra.mxu1 %vm1986_vm2, %v8068_v50 }
 0x269   : > { %v5388_v61 = vsel %vm4364_vm10, %v3554_v51, %v4876_v29  ;;  %v4749_v62 = vmul.f32 0.2, %v3237_v58  ;;  %7874 = vmatmul.msk.bf16.gmra.mxu2 %vm1986_vm2, %v8132_v55  ;;  %7938 = vmatmul.msk.bf16.gmra.mxu3 %vm1986_vm2, %v8196_v56 }
 0x26a   : > { %v5900_v63 = vpack.c.bf16 %v5388_v61, %v5388_v61  ;;  %v5516_v0 = vsel %vm4492_vm11, %v3874_v52, %v5004_v59  ;;  %v5133_v1 = vsel %vm4109_vm12, %v2917_v57, %v4621_v60 }
 0x26b   : > { %v6028_v2 = vpack.c.bf16 %v5516_v0, %v5516_v0  ;;  %v5645_v4 = vpack.c.bf16 %v5133_v1, %v5133_v1  ;;  %v5261_v5 = vsel %vm4237_vm13, %v3237_v58, %v4749_v62 }
 0x26c   : > { %6413 = vst.msk [vmem:[%s8388_s29 + $0x4e4] sm:$0xf] %vm6099_vm5, %v5900_v63  ;;  %v5773_v6 = vpack.c.bf16 %v5261_v5, %v5261_v5  ;;  %v3556_v7 = vpop.f32.mrf.mxu2  ;;  %v3876_v8 = vpop.f32.mrf.mxu3 }
 0x26d   : > { %6541 = vst.msk [vmem:[%s8388_s29 + $0x6e4] sm:$0xf] %vm6099_vm5, %v6028_v2  ;;  %v3557_v9 = vadd.f32 %v9171_v41, %v3556_v7  ;;  %v3877_v10 = vadd.f32 %v9171_v41, %v3876_v8  ;;  %v2918_v11 = vpop.f32.mrf.mxu0  ;;  %v3238_v12 = vpop.f32.mrf.mxu1 }
 0x26e   : > { %6158 = vst.msk [vmem:[%s8388_s29 + $0xe8] sm:$0xf] %vm6099_vm5, %v5645_v4  ;;  %v2919_v13 = vadd.f32 %v9171_v41, %v2918_v11  ;;  %v3239_v14 = vadd.f32 %v9171_v41, %v3238_v12  ;;  %v8070_v11 = vld [vmem:[%s8302_s24 + $0x338] sm:$0xff] }
 0x26f   : > { %6286 = vst.msk [vmem:[%s8388_s29 + $0x2e8] sm:$0xf] %vm6099_vm5, %v5773_v6  ;;  %vm4365_vm14 = vcmp.ge.f32.partialorder %v3557_v9, 0.0  ;;  %v4877_v15 = vmul.f32 0.2, %v3557_v9  ;;  %vm4493_vm15 = vcmp.ge.f32.partialorder %v3877_v10, 0.0 }
 0x270   : > { %v5005_v16 = vmul.f32 0.2, %v3877_v10  ;;  %vm4110_vm0 = vcmp.ge.f32.partialorder %v2919_v13, 0.0  ;;  %v4622_v17 = vmul.f32 0.2, %v2919_v13  ;;  %vm4238_vm1 = vcmp.ge.f32.partialorder %v3239_v14, 0.0 }
 0x271   : > { %v5389_v18 = vsel %vm4365_vm14, %v3557_v9, %v4877_v15  ;;  %v4750_v19 = vmul.f32 0.2, %v3239_v14 }
 0x272   : > { %v5901_v20 = vpack.c.bf16 %v5389_v18, %v5389_v18  ;;  %v5517_v40 = vsel %vm4493_vm15, %v3877_v10, %v5005_v16  ;;  %v5134_v21 = vsel %vm4110_vm0, %v2919_v13, %v4622_v17  ;;  %v8006_v10 = vld [vmem:[%s8302_s24 + $0x138] sm:$0xff] }
 0x273   : > { %v6029_v22 = vpack.c.bf16 %v5517_v40, %v5517_v40  ;;  %v5646_v23 = vpack.c.bf16 %v5134_v21, %v5134_v21  ;;  %v5262_v24 = vsel %vm4238_vm1, %v3239_v14, %v4750_v19  ;;  %v8134_v16 = vld [vmem:[%s8302_s24 + $0x538] sm:$0xff] }
 0x274   : > { %6414 = vst.msk [vmem:[%s8388_s29 + $0x4e8] sm:$0xf] %vm6099_vm5, %v5901_v20  ;;  %v5774_v25 = vpack.c.bf16 %v5262_v24, %v5262_v24  ;;  %v3558_v26 = vpop.f32.mrf.mxu2  ;;  %v3878_v27 = vpop.f32.mrf.mxu3  ;;  %v8198_v17 = vld [vmem:[%s8302_s24 + $0x738] sm:$0xff] }
 0x275   : > { %6542 = vst.msk [vmem:[%s8388_s29 + $0x6e8] sm:$0xf] %vm6099_vm5, %v6029_v22  ;;  %v3559_v31 = vadd.f32 %v9171_v41, %v3558_v26  ;;  %v3879_v3 = vadd.f32 %v9171_v41, %v3878_v27  ;;  %v2921_v32 = vpop.f32.mrf.mxu0  ;;  %v3241_v33 = vpop.f32.mrf.mxu1 }
 0x276   : > { %6159 = vst.msk [vmem:[%s8388_s29 + $0xec] sm:$0xf] %vm6099_vm5, %v5646_v23  ;;  %v2922_v36 = vadd.f32 %v9171_v41, %v2921_v32  ;;  %v3242_v37 = vadd.f32 %v9171_v41, %v3241_v33 }
 0x277   : > { %6287 = vst.msk [vmem:[%s8388_s29 + $0x2ec] sm:$0xf] %vm6099_vm5, %v5774_v25  ;;  %vm4366_vm3 = vcmp.ge.f32.partialorder %v3559_v31, 0.0  ;;  %v4878_v38 = vmul.f32 0.2, %v3559_v31  ;;  %vm4494_vm4 = vcmp.ge.f32.partialorder %v3879_v3, 0.0 }
 0x278   : > { %v5006_v39 = vmul.f32 0.2, %v3879_v3  ;;  %vm4111_vm6 = vcmp.ge.f32.partialorder %v2922_v36, 0.0  ;;  %v4623_v42 = vmul.f32 0.2, %v2922_v36  ;;  %vm4239_vm7 = vcmp.ge.f32.partialorder %v3242_v37, 0.0  ;;  %7747 = vmatmul.msk.bf16.gmra.mxu0 %vm1986_vm2, %v8005_v28  ;;  %7811 = vmatmul.msk.bf16.gmra.mxu1 %vm1986_vm2, %v8069_v30 }
 0x279   : > { %v5390_v43 = vsel %vm4366_vm3, %v3559_v31, %v4878_v38  ;;  %v4751_v44 = vmul.f32 0.2, %v3242_v37  ;;  %7875 = vmatmul.msk.bf16.gmra.mxu2 %vm1986_vm2, %v8133_v34  ;;  %7939 = vmatmul.msk.bf16.gmra.mxu3 %vm1986_vm2, %v8197_v35 }
 0x27a   : > { %v5902_v45 = vpack.c.bf16 %v5390_v43, %v5390_v43  ;;  %v5518_v46 = vsel %vm4494_vm4, %v3879_v3, %v5006_v39  ;;  %v5135_v47 = vsel %vm4111_vm6, %v2922_v36, %v4623_v42 }
 0x27b   : > { %v6030_v48 = vpack.c.bf16 %v5518_v46, %v5518_v46  ;;  %v5647_v49 = vpack.c.bf16 %v5135_v47, %v5135_v47  ;;  %v5263_v50 = vsel %vm4239_vm7, %v3242_v37, %v4751_v44 }
 0x27c   : > { %6415 = vst.msk [vmem:[%s8388_s29 + $0x4ec] sm:$0xf] %vm6099_vm5, %v5902_v45  ;;  %v5775_v51 = vpack.c.bf16 %v5263_v50, %v5263_v50  ;;  %v3561_v52 = vpop.f32.mrf.mxu2  ;;  %v3881_v53 = vpop.f32.mrf.mxu3 }
 0x27d   : > { %6543 = vst.msk [vmem:[%s8388_s29 + $0x6ec] sm:$0xf] %vm6099_vm5, %v6030_v48  ;;  %v3562_v54 = vadd.f32 %v9171_v41, %v3561_v52  ;;  %v3882_v55 = vadd.f32 %v9171_v41, %v3881_v53  ;;  %v2923_v56 = vpop.f32.mrf.mxu0  ;;  %v3243_v57 = vpop.f32.mrf.mxu1 }
 0x27e   : > { %6160 = vst.msk [vmem:[%s8388_s29 + $0xf0] sm:$0xf] %vm6099_vm5, %v5647_v49  ;;  %v2924_v58 = vadd.f32 %v9171_v41, %v2923_v56  ;;  %v3244_v29 = vadd.f32 %v9171_v41, %v3243_v57  ;;  %v8071_v56 = vld [vmem:[%s8302_s24 + $0x340] sm:$0xff] }
 0x27f   : > { %6288 = vst.msk [vmem:[%s8388_s29 + $0x2f0] sm:$0xf] %vm6099_vm5, %v5775_v51  ;;  %vm4367_vm8 = vcmp.ge.f32.partialorder %v3562_v54, 0.0  ;;  %v4879_v59 = vmul.f32 0.2, %v3562_v54  ;;  %vm4495_vm9 = vcmp.ge.f32.partialorder %v3882_v55, 0.0 }
 0x280   : > { %v5007_v60 = vmul.f32 0.2, %v3882_v55  ;;  %vm4112_vm10 = vcmp.ge.f32.partialorder %v2924_v58, 0.0  ;;  %v4624_v61 = vmul.f32 0.2, %v2924_v58  ;;  %vm4240_vm11 = vcmp.ge.f32.partialorder %v3244_v29, 0.0 }
 0x281   : > { %v5391_v62 = vsel %vm4367_vm8, %v3562_v54, %v4879_v59  ;;  %v4752_v63 = vmul.f32 0.2, %v3244_v29 }
 0x282   : > { %v5903_v0 = vpack.c.bf16 %v5391_v62, %v5391_v62  ;;  %v5519_v1 = vsel %vm4495_vm9, %v3882_v55, %v5007_v60  ;;  %v5136_v2 = vsel %vm4112_vm10, %v2924_v58, %v4624_v61  ;;  %v8007_v55 = vld [vmem:[%s8302_s24 + $0x140] sm:$0xff] }
 0x283   : > { %v6031_v4 = vpack.c.bf16 %v5519_v1, %v5519_v1  ;;  %v5648_v5 = vpack.c.bf16 %v5136_v2, %v5136_v2  ;;  %v5264_v6 = vsel %vm4240_vm11, %v3244_v29, %v4752_v63  ;;  %v8135_v60 = vld [vmem:[%s8302_s24 + $0x540] sm:$0xff] }
 0x284   : > { %6416 = vst.msk [vmem:[%s8388_s29 + $0x4f0] sm:$0xf] %vm6099_vm5, %v5903_v0  ;;  %v5776_v7 = vpack.c.bf16 %v5264_v6, %v5264_v6  ;;  %v3563_v8 = vpop.f32.mrf.mxu2  ;;  %v3883_v9 = vpop.f32.mrf.mxu3  ;;  %v8199_v61 = vld [vmem:[%s8302_s24 + $0x740] sm:$0xff] }
 0x285   : > { %6544 = vst.msk [vmem:[%s8388_s29 + $0x6f0] sm:$0xf] %vm6099_vm5, %v6031_v4  ;;  %v3564_v12 = vadd.f32 %v9171_v41, %v3563_v8  ;;  %v3884_v13 = vadd.f32 %v9171_v41, %v3883_v9  ;;  %v2926_v14 = vpop.f32.mrf.mxu0  ;;  %v3246_v15 = vpop.f32.mrf.mxu1 }
 0x286   : > { %6161 = vst.msk [vmem:[%s8388_s29 + $0xf4] sm:$0xf] %vm6099_vm5, %v5648_v5  ;;  %v2927_v18 = vadd.f32 %v9171_v41, %v2926_v14  ;;  %v3247_v19 = vadd.f32 %v9171_v41, %v3246_v15  ;;  %v9432_v14 = vld [vmem:[%s10404_s2] ss:$0 sm:$0xff] }
 0x287   : > { %6289 = vst.msk [vmem:[%s8388_s29 + $0x2f4] sm:$0xf] %vm6099_vm5, %v5776_v7  ;;  %vm4368_vm12 = vcmp.ge.f32.partialorder %v3564_v12, 0.0  ;;  %v4880_v20 = vmul.f32 0.2, %v3564_v12  ;;  %vm4496_vm13 = vcmp.ge.f32.partialorder %v3884_v13, 0.0 }
 0x288   : > { %v5008_v40 = vmul.f32 0.2, %v3884_v13  ;;  %vm4113_vm14 = vcmp.ge.f32.partialorder %v2927_v18, 0.0  ;;  %v4625_v21 = vmul.f32 0.2, %v2927_v18  ;;  %vm4241_vm15 = vcmp.ge.f32.partialorder %v3247_v19, 0.0  ;;  %7748 = vmatmul.msk.bf16.gmra.mxu0 %vm1986_vm2, %v8006_v10  ;;  %7812 = vmatmul.msk.bf16.gmra.mxu1 %vm1986_vm2, %v8070_v11 }
 0x289   : > { %v5392_v22 = vsel %vm4368_vm12, %v3564_v12, %v4880_v20  ;;  %v4753_v23 = vmul.f32 0.2, %v3247_v19  ;;  %7876 = vmatmul.msk.bf16.gmra.mxu2 %vm1986_vm2, %v8134_v16  ;;  %7940 = vmatmul.msk.bf16.gmra.mxu3 %vm1986_vm2, %v8198_v17 }
 0x28a   : > { %v5904_v24 = vpack.c.bf16 %v5392_v22, %v5392_v22  ;;  %v5520_v25 = vsel %vm4496_vm13, %v3884_v13, %v5008_v40  ;;  %v5137_v26 = vsel %vm4113_vm14, %v2927_v18, %v4625_v21 }
 0x28b   : > { %v6032_v27 = vpack.c.bf16 %v5520_v25, %v5520_v25  ;;  %v5649_v28 = vpack.c.bf16 %v5137_v26, %v5137_v26  ;;  %v5265_v30 = vsel %vm4241_vm15, %v3247_v19, %v4753_v23 }
 0x28c   : > { %6417 = vst.msk [vmem:[%s8388_s29 + $0x4f4] sm:$0xf] %vm6099_vm5, %v5904_v24  ;;  %v5777_v31 = vpack.c.bf16 %v5265_v30, %v5265_v30  ;;  %v3566_v3 = vpop.f32.mrf.mxu2  ;;  %v3886_v32 = vpop.f32.mrf.mxu3 }
 0x28d   : > { %6545 = vst.msk [vmem:[%s8388_s29 + $0x6f4] sm:$0xf] %vm6099_vm5, %v6032_v27  ;;  %v3567_v33 = vadd.f32 %v9171_v41, %v3566_v3  ;;  %v3887_v34 = vadd.f32 %v9171_v41, %v3886_v32  ;;  %v2928_v35 = vpop.f32.mrf.mxu0  ;;  %v3248_v36 = vpop.f32.mrf.mxu1 }
 0x28e   : > { %6162 = vst.msk [vmem:[%s8388_s29 + $0xf8] sm:$0xf] %vm6099_vm5, %v5649_v28  ;;  %v2929_v37 = vadd.f32 %v9171_v41, %v2928_v35  ;;  %v3249_v38 = vadd.f32 %v9171_v41, %v3248_v36  ;;  %v8072_v35 = vld [vmem:[%s8302_s24 + $0x348] sm:$0xff] }
 0x28f   : > { %6290 = vst.msk [vmem:[%s8388_s29 + $0x2f8] sm:$0xf] %vm6099_vm5, %v5777_v31  ;;  %vm4369_vm0 = vcmp.ge.f32.partialorder %v3567_v33, 0.0  ;;  %v4881_v39 = vmul.f32 0.2, %v3567_v33  ;;  %vm4497_vm1 = vcmp.ge.f32.partialorder %v3887_v34, 0.0 }
 0x290   : > { %v5009_v42 = vmul.f32 0.2, %v3887_v34  ;;  %vm4114_vm3 = vcmp.ge.f32.partialorder %v2929_v37, 0.0  ;;  %v4626_v43 = vmul.f32 0.2, %v2929_v37  ;;  %vm4242_vm4 = vcmp.ge.f32.partialorder %v3249_v38, 0.0 }
 0x291   : > { %v5393_v44 = vsel %vm4369_vm0, %v3567_v33, %v4881_v39  ;;  %v4754_v45 = vmul.f32 0.2, %v3249_v38 }
 0x292   : > { %v5905_v46 = vpack.c.bf16 %v5393_v44, %v5393_v44  ;;  %v5521_v47 = vsel %vm4497_vm1, %v3887_v34, %v5009_v42  ;;  %v5138_v48 = vsel %vm4114_vm3, %v2929_v37, %v4626_v43  ;;  %v8008_v34 = vld [vmem:[%s8302_s24 + $0x148] sm:$0xff] }
 0x293   : > { %v6033_v49 = vpack.c.bf16 %v5521_v47, %v5521_v47  ;;  %v5650_v50 = vpack.c.bf16 %v5138_v48, %v5138_v48  ;;  %v5266_v51 = vsel %vm4242_vm4, %v3249_v38, %v4754_v45  ;;  %v8136_v42 = vld [vmem:[%s8302_s24 + $0x548] sm:$0xff] }
 0x294   : > { %6418 = vst.msk [vmem:[%s8388_s29 + $0x4f8] sm:$0xf] %vm6099_vm5, %v5905_v46  ;;  %v5778_v52 = vpack.c.bf16 %v5266_v51, %v5266_v51  ;;  %v3568_v53 = vpop.f32.mrf.mxu2  ;;  %v3888_v54 = vpop.f32.mrf.mxu3  ;;  %v8200_v43 = vld [vmem:[%s8302_s24 + $0x748] sm:$0xff] }
 0x295   : > { %6546 = vst.msk [vmem:[%s8388_s29 + $0x6f8] sm:$0xf] %vm6099_vm5, %v6033_v49  ;;  %v3569_v57 = vadd.f32 %v9171_v41, %v3568_v53  ;;  %v3889_v58 = vadd.f32 %v9171_v41, %v3888_v54  ;;  %v2931_v29 = vpop.f32.mrf.mxu0  ;;  %v3251_v59 = vpop.f32.mrf.mxu1 }
 0x296   : > { %6163 = vst.msk [vmem:[%s8388_s29 + $0xfc] sm:$0xf] %vm6099_vm5, %v5650_v50  ;;  %v2932_v62 = vadd.f32 %v9171_v41, %v2931_v29  ;;  %v3252_v63 = vadd.f32 %v9171_v41, %v3251_v59 }
 0x297   : > { %6291 = vst.msk [vmem:[%s8388_s29 + $0x2fc] sm:$0xf] %vm6099_vm5, %v5778_v52  ;;  %vm4370_vm6 = vcmp.ge.f32.partialorder %v3569_v57, 0.0  ;;  %v4882_v0 = vmul.f32 0.2, %v3569_v57  ;;  %vm4498_vm7 = vcmp.ge.f32.partialorder %v3889_v58, 0.0 }
 0x298   : > { %v5010_v1 = vmul.f32 0.2, %v3889_v58  ;;  %vm4115_vm8 = vcmp.ge.f32.partialorder %v2932_v62, 0.0  ;;  %v4627_v2 = vmul.f32 0.2, %v2932_v62  ;;  %vm4243_vm9 = vcmp.ge.f32.partialorder %v3252_v63, 0.0  ;;  %7749 = vmatmul.msk.bf16.gmra.mxu0 %vm1986_vm2, %v8007_v55  ;;  %7813 = vmatmul.msk.bf16.gmra.mxu1 %vm1986_vm2, %v8071_v56 }
 0x299   : > { %v5394_v4 = vsel %vm4370_vm6, %v3569_v57, %v4882_v0  ;;  %v4755_v5 = vmul.f32 0.2, %v3252_v63  ;;  %7877 = vmatmul.msk.bf16.gmra.mxu2 %vm1986_vm2, %v8135_v60  ;;  %7941 = vmatmul.msk.bf16.gmra.mxu3 %vm1986_vm2, %v8199_v61 }
 0x29a   : > { %v5906_v41 = vpack.c.bf16 %v5394_v4, %v5394_v4  ;;  %v5522_v6 = vsel %vm4498_vm7, %v3889_v58, %v5010_v1  ;;  %v5139_v7 = vsel %vm4115_vm8, %v2932_v62, %v4627_v2 }
 0x29b   : > { %v6034_v8 = vpack.c.bf16 %v5522_v6, %v5522_v6  ;;  %v5651_v9 = vpack.c.bf16 %v5139_v7, %v5139_v7  ;;  %v5267_v10 = vsel %vm4243_vm9, %v3252_v63, %v4755_v5 }
 0x29c   : > { %6419 = vst.msk [vmem:[%s8388_s29 + $0x4fc] sm:$0xf] %vm6099_vm5, %v5906_v41  ;;  %v5779_v11 = vpack.c.bf16 %v5267_v10, %v5267_v10  ;;  %v3571_v12 = vpop.f32.mrf.mxu2  ;;  %v3891_v13 = vpop.f32.mrf.mxu3 }
 0x29d   : > { %6547 = vst.msk [vmem:[%s8388_s29 + $0x6fc] sm:$0xf] %vm6099_vm5, %v6034_v8  ;;  %v3572_v15 = vadd.f32 %v9432_v14, %v3571_v12  ;;  %v3892_v16 = vadd.f32 %v9432_v14, %v3891_v13  ;;  %v2933_v17 = vpop.f32.mrf.mxu0  ;;  %v3253_v18 = vpop.f32.mrf.mxu1 }
 0x29e   : > { %6164 = vst.msk [vmem:[%s8388_s29 + $0x100] sm:$0xf] %vm6099_vm5, %v5651_v9  ;;  %v2934_v19 = vadd.f32 %v9432_v14, %v2933_v17  ;;  %v3254_v20 = vadd.f32 %v9432_v14, %v3253_v18  ;;  %v8073_v17 = vld [vmem:[%s8302_s24 + $0x350] sm:$0xff] }
 0x29f   : > { %6292 = vst.msk [vmem:[%s8388_s29 + $0x300] sm:$0xf] %vm6099_vm5, %v5779_v11  ;;  %vm4371_vm10 = vcmp.ge.f32.partialorder %v3572_v15, 0.0  ;;  %v4883_v40 = vmul.f32 0.2, %v3572_v15  ;;  %vm4499_vm11 = vcmp.ge.f32.partialorder %v3892_v16, 0.0 }
 0x2a0   : > { %v5011_v21 = vmul.f32 0.2, %v3892_v16  ;;  %vm4116_vm12 = vcmp.ge.f32.partialorder %v2934_v19, 0.0  ;;  %v4628_v22 = vmul.f32 0.2, %v2934_v19  ;;  %vm4244_vm13 = vcmp.ge.f32.partialorder %v3254_v20, 0.0 }
 0x2a1   : > { %v5395_v23 = vsel %vm4371_vm10, %v3572_v15, %v4883_v40  ;;  %v4756_v24 = vmul.f32 0.2, %v3254_v20 }
 0x2a2   : > { %v5907_v25 = vpack.c.bf16 %v5395_v23, %v5395_v23  ;;  %v5523_v26 = vsel %vm4499_vm11, %v3892_v16, %v5011_v21  ;;  %v5140_v27 = vsel %vm4116_vm12, %v2934_v19, %v4628_v22  ;;  %v8009_v16 = vld [vmem:[%s8302_s24 + $0x150] sm:$0xff] }
 0x2a3   : > { %v6035_v28 = vpack.c.bf16 %v5523_v26, %v5523_v26  ;;  %v5652_v30 = vpack.c.bf16 %v5140_v27, %v5140_v27  ;;  %v5268_v31 = vsel %vm4244_vm13, %v3254_v20, %v4756_v24  ;;  %v8137_v21 = vld [vmem:[%s8302_s24 + $0x550] sm:$0xff] }
 0x2a4   : > { %6420 = vst.msk [vmem:[%s8388_s29 + $0x500] sm:$0xf] %vm6099_vm5, %v5907_v25  ;;  %v5780_v3 = vpack.c.bf16 %v5268_v31, %v5268_v31  ;;  %v3573_v32 = vpop.f32.mrf.mxu2  ;;  %v3893_v33 = vpop.f32.mrf.mxu3  ;;  %v8201_v22 = vld [vmem:[%s8302_s24 + $0x750] sm:$0xff] }
 0x2a5   : > { %6548 = vst.msk [vmem:[%s8388_s29 + $0x700] sm:$0xf] %vm6099_vm5, %v6035_v28  ;;  %v3574_v36 = vadd.f32 %v9432_v14, %v3573_v32  ;;  %v3894_v37 = vadd.f32 %v9432_v14, %v3893_v33  ;;  %v2936_v38 = vpop.f32.mrf.mxu0  ;;  %v3256_v39 = vpop.f32.mrf.mxu1 }
 0x2a6   : > { %6165 = vst.msk [vmem:[%s8388_s29 + $0x104] sm:$0xf] %vm6099_vm5, %v5652_v30  ;;  %v2937_v44 = vadd.f32 %v9432_v14, %v2936_v38  ;;  %v3257_v45 = vadd.f32 %v9432_v14, %v3256_v39 }
 0x2a7   : > { %6293 = vst.msk [vmem:[%s8388_s29 + $0x304] sm:$0xf] %vm6099_vm5, %v5780_v3  ;;  %vm4372_vm14 = vcmp.ge.f32.partialorder %v3574_v36, 0.0  ;;  %v4884_v46 = vmul.f32 0.2, %v3574_v36  ;;  %vm4500_vm15 = vcmp.ge.f32.partialorder %v3894_v37, 0.0 }
 0x2a8   : > { %v5012_v47 = vmul.f32 0.2, %v3894_v37  ;;  %vm4117_vm0 = vcmp.ge.f32.partialorder %v2937_v44, 0.0  ;;  %v4629_v48 = vmul.f32 0.2, %v2937_v44  ;;  %vm4245_vm1 = vcmp.ge.f32.partialorder %v3257_v45, 0.0  ;;  %7750 = vmatmul.msk.bf16.gmra.mxu0 %vm1986_vm2, %v8008_v34  ;;  %7814 = vmatmul.msk.bf16.gmra.mxu1 %vm1986_vm2, %v8072_v35 }
 0x2a9   : > { %v5396_v49 = vsel %vm4372_vm14, %v3574_v36, %v4884_v46  ;;  %v4757_v50 = vmul.f32 0.2, %v3257_v45  ;;  %7878 = vmatmul.msk.bf16.gmra.mxu2 %vm1986_vm2, %v8136_v42  ;;  %7942 = vmatmul.msk.bf16.gmra.mxu3 %vm1986_vm2, %v8200_v43 }
 0x2aa   : > { %v5908_v51 = vpack.c.bf16 %v5396_v49, %v5396_v49  ;;  %v5524_v52 = vsel %vm4500_vm15, %v3894_v37, %v5012_v47  ;;  %v5141_v53 = vsel %vm4117_vm0, %v2937_v44, %v4629_v48 }
 0x2ab   : > { %v6036_v54 = vpack.c.bf16 %v5524_v52, %v5524_v52  ;;  %v5653_v55 = vpack.c.bf16 %v5141_v53, %v5141_v53  ;;  %v5269_v56 = vsel %vm4245_vm1, %v3257_v45, %v4757_v50 }
 0x2ac   : > { %6421 = vst.msk [vmem:[%s8388_s29 + $0x504] sm:$0xf] %vm6099_vm5, %v5908_v51  ;;  %v5781_v57 = vpack.c.bf16 %v5269_v56, %v5269_v56  ;;  %v3576_v58 = vpop.f32.mrf.mxu2  ;;  %v3896_v29 = vpop.f32.mrf.mxu3 }
 0x2ad   : > { %6549 = vst.msk [vmem:[%s8388_s29 + $0x704] sm:$0xf] %vm6099_vm5, %v6036_v54  ;;  %v3577_v59 = vadd.f32 %v9432_v14, %v3576_v58  ;;  %v3897_v60 = vadd.f32 %v9432_v14, %v3896_v29  ;;  %v2938_v61 = vpop.f32.mrf.mxu0  ;;  %v3258_v62 = vpop.f32.mrf.mxu1 }
 0x2ae   : > { %6166 = vst.msk [vmem:[%s8388_s29 + $0x108] sm:$0xf] %vm6099_vm5, %v5653_v55  ;;  %v2939_v63 = vadd.f32 %v9432_v14, %v2938_v61  ;;  %v3259_v0 = vadd.f32 %v9432_v14, %v3258_v62  ;;  %v8074_v61 = vld [vmem:[%s8302_s24 + $0x358] sm:$0xff] }
 0x2af   : > { %6294 = vst.msk [vmem:[%s8388_s29 + $0x308] sm:$0xf] %vm6099_vm5, %v5781_v57  ;;  %vm4373_vm3 = vcmp.ge.f32.partialorder %v3577_v59, 0.0  ;;  %v4885_v1 = vmul.f32 0.2, %v3577_v59  ;;  %vm4501_vm4 = vcmp.ge.f32.partialorder %v3897_v60, 0.0 }
 0x2b0   : > { %v5013_v2 = vmul.f32 0.2, %v3897_v60  ;;  %vm4118_vm6 = vcmp.ge.f32.partialorder %v2939_v63, 0.0  ;;  %v4630_v4 = vmul.f32 0.2, %v2939_v63  ;;  %vm4246_vm7 = vcmp.ge.f32.partialorder %v3259_v0, 0.0 }
 0x2b1   : > { %v5397_v5 = vsel %vm4373_vm3, %v3577_v59, %v4885_v1  ;;  %v4758_v41 = vmul.f32 0.2, %v3259_v0 }
 0x2b2   : > { %v5909_v6 = vpack.c.bf16 %v5397_v5, %v5397_v5  ;;  %v5525_v7 = vsel %vm4501_vm4, %v3897_v60, %v5013_v2  ;;  %v5142_v8 = vsel %vm4118_vm6, %v2939_v63, %v4630_v4  ;;  %v8010_v60 = vld [vmem:[%s8302_s24 + $0x158] sm:$0xff] }
 0x2b3   : > { %v6037_v9 = vpack.c.bf16 %v5525_v7, %v5525_v7  ;;  %v5654_v10 = vpack.c.bf16 %v5142_v8, %v5142_v8  ;;  %v5270_v11 = vsel %vm4246_vm7, %v3259_v0, %v4758_v41  ;;  %v8138_v2 = vld [vmem:[%s8302_s24 + $0x558] sm:$0xff] }
 0x2b4   : > { %6422 = vst.msk [vmem:[%s8388_s29 + $0x508] sm:$0xf] %vm6099_vm5, %v5909_v6  ;;  %v5782_v12 = vpack.c.bf16 %v5270_v11, %v5270_v11  ;;  %v3578_v13 = vpop.f32.mrf.mxu2  ;;  %v3898_v15 = vpop.f32.mrf.mxu3  ;;  %v8202_v4 = vld [vmem:[%s8302_s24 + $0x758] sm:$0xff] }
 0x2b5   : > { %6550 = vst.msk [vmem:[%s8388_s29 + $0x708] sm:$0xf] %vm6099_vm5, %v6037_v9  ;;  %v3579_v18 = vadd.f32 %v9432_v14, %v3578_v13  ;;  %v3899_v19 = vadd.f32 %v9432_v14, %v3898_v15  ;;  %v2941_v20 = vpop.f32.mrf.mxu0  ;;  %v3261_v40 = vpop.f32.mrf.mxu1 }
 0x2b6   : > { %6167 = vst.msk [vmem:[%s8388_s29 + $0x10c] sm:$0xf] %vm6099_vm5, %v5654_v10  ;;  %v2942_v23 = vadd.f32 %v9432_v14, %v2941_v20  ;;  %v3262_v24 = vadd.f32 %v9432_v14, %v3261_v40 }
 0x2b7   : > { %6295 = vst.msk [vmem:[%s8388_s29 + $0x30c] sm:$0xf] %vm6099_vm5, %v5782_v12  ;;  %vm4374_vm8 = vcmp.ge.f32.partialorder %v3579_v18, 0.0  ;;  %v4886_v25 = vmul.f32 0.2, %v3579_v18  ;;  %vm4502_vm9 = vcmp.ge.f32.partialorder %v3899_v19, 0.0 }
 0x2b8   : > { %v5014_v26 = vmul.f32 0.2, %v3899_v19  ;;  %vm4119_vm10 = vcmp.ge.f32.partialorder %v2942_v23, 0.0  ;;  %v4631_v27 = vmul.f32 0.2, %v2942_v23  ;;  %vm4247_vm11 = vcmp.ge.f32.partialorder %v3262_v24, 0.0  ;;  %7751 = vmatmul.msk.bf16.gmra.mxu0 %vm1986_vm2, %v8009_v16  ;;  %7815 = vmatmul.msk.bf16.gmra.mxu1 %vm1986_vm2, %v8073_v17 }
 0x2b9   : > { %v5398_v28 = vsel %vm4374_vm8, %v3579_v18, %v4886_v25  ;;  %v4759_v30 = vmul.f32 0.2, %v3262_v24  ;;  %7879 = vmatmul.msk.bf16.gmra.mxu2 %vm1986_vm2, %v8137_v21  ;;  %7943 = vmatmul.msk.bf16.gmra.mxu3 %vm1986_vm2, %v8201_v22 }
 0x2ba   : > { %v5910_v31 = vpack.c.bf16 %v5398_v28, %v5398_v28  ;;  %v5526_v3 = vsel %vm4502_vm9, %v3899_v19, %v5014_v26  ;;  %v5143_v32 = vsel %vm4119_vm10, %v2942_v23, %v4631_v27 }
 0x2bb   : > { %v6038_v33 = vpack.c.bf16 %v5526_v3, %v5526_v3  ;;  %v5655_v34 = vpack.c.bf16 %v5143_v32, %v5143_v32  ;;  %v5271_v35 = vsel %vm4247_vm11, %v3262_v24, %v4759_v30 }
 0x2bc   : > { %6423 = vst.msk [vmem:[%s8388_s29 + $0x50c] sm:$0xf] %vm6099_vm5, %v5910_v31  ;;  %v5783_v36 = vpack.c.bf16 %v5271_v35, %v5271_v35  ;;  %v3581_v37 = vpop.f32.mrf.mxu2  ;;  %v3901_v38 = vpop.f32.mrf.mxu3 }
 0x2bd   : > { %6551 = vst.msk [vmem:[%s8388_s29 + $0x70c] sm:$0xf] %vm6099_vm5, %v6038_v33  ;;  %v3582_v39 = vadd.f32 %v9432_v14, %v3581_v37  ;;  %v3902_v42 = vadd.f32 %v9432_v14, %v3901_v38  ;;  %v2943_v43 = vpop.f32.mrf.mxu0  ;;  %v3263_v44 = vpop.f32.mrf.mxu1 }
 0x2be   : > { %6168 = vst.msk [vmem:[%s8388_s29 + $0x110] sm:$0xf] %vm6099_vm5, %v5655_v34  ;;  %v2944_v45 = vadd.f32 %v9432_v14, %v2943_v43  ;;  %v3264_v46 = vadd.f32 %v9432_v14, %v3263_v44  ;;  %v8075_v43 = vld [vmem:[%s8302_s24 + $0x360] sm:$0xff] }
 0x2bf   : > { %6296 = vst.msk [vmem:[%s8388_s29 + $0x310] sm:$0xf] %vm6099_vm5, %v5783_v36  ;;  %vm4375_vm12 = vcmp.ge.f32.partialorder %v3582_v39, 0.0  ;;  %v4887_v47 = vmul.f32 0.2, %v3582_v39  ;;  %vm4503_vm13 = vcmp.ge.f32.partialorder %v3902_v42, 0.0 }
 0x2c0   : > { %v5015_v48 = vmul.f32 0.2, %v3902_v42  ;;  %vm4120_vm14 = vcmp.ge.f32.partialorder %v2944_v45, 0.0  ;;  %v4632_v49 = vmul.f32 0.2, %v2944_v45  ;;  %vm4248_vm15 = vcmp.ge.f32.partialorder %v3264_v46, 0.0 }
 0x2c1   : > { %v5399_v50 = vsel %vm4375_vm12, %v3582_v39, %v4887_v47  ;;  %v4760_v51 = vmul.f32 0.2, %v3264_v46 }
 0x2c2   : > { %v5911_v52 = vpack.c.bf16 %v5399_v50, %v5399_v50  ;;  %v5527_v53 = vsel %vm4503_vm13, %v3902_v42, %v5015_v48  ;;  %v5144_v54 = vsel %vm4120_vm14, %v2944_v45, %v4632_v49  ;;  %v8011_v42 = vld [vmem:[%s8302_s24 + $0x160] sm:$0xff] }
 0x2c3   : > { %v6039_v55 = vpack.c.bf16 %v5527_v53, %v5527_v53  ;;  %v5656_v56 = vpack.c.bf16 %v5144_v54, %v5144_v54  ;;  %v5272_v57 = vsel %vm4248_vm15, %v3264_v46, %v4760_v51  ;;  %v8139_v48 = vld [vmem:[%s8302_s24 + $0x560] sm:$0xff] }
 0x2c4   : > { %6424 = vst.msk [vmem:[%s8388_s29 + $0x510] sm:$0xf] %vm6099_vm5, %v5911_v52  ;;  %v5784_v58 = vpack.c.bf16 %v5272_v57, %v5272_v57  ;;  %v3583_v29 = vpop.f32.mrf.mxu2  ;;  %v3903_v59 = vpop.f32.mrf.mxu3  ;;  %v8203_v49 = vld [vmem:[%s8302_s24 + $0x760] sm:$0xff] }
 0x2c5   : > { %6552 = vst.msk [vmem:[%s8388_s29 + $0x710] sm:$0xf] %vm6099_vm5, %v6039_v55  ;;  %v3584_v62 = vadd.f32 %v9432_v14, %v3583_v29  ;;  %v3904_v63 = vadd.f32 %v9432_v14, %v3903_v59  ;;  %v2946_v0 = vpop.f32.mrf.mxu0  ;;  %v3266_v1 = vpop.f32.mrf.mxu1 }
 0x2c6   : > { %6169 = vst.msk [vmem:[%s8388_s29 + $0x114] sm:$0xf] %vm6099_vm5, %v5656_v56  ;;  %v2947_v5 = vadd.f32 %v9432_v14, %v2946_v0  ;;  %v3267_v41 = vadd.f32 %v9432_v14, %v3266_v1 }
 0x2c7   : > { %6297 = vst.msk [vmem:[%s8388_s29 + $0x314] sm:$0xf] %vm6099_vm5, %v5784_v58  ;;  %vm4376_vm0 = vcmp.ge.f32.partialorder %v3584_v62, 0.0  ;;  %v4888_v6 = vmul.f32 0.2, %v3584_v62  ;;  %vm4504_vm1 = vcmp.ge.f32.partialorder %v3904_v63, 0.0 }
 0x2c8   : > { %v5016_v7 = vmul.f32 0.2, %v3904_v63  ;;  %vm4121_vm3 = vcmp.ge.f32.partialorder %v2947_v5, 0.0  ;;  %v4633_v8 = vmul.f32 0.2, %v2947_v5  ;;  %vm4249_vm4 = vcmp.ge.f32.partialorder %v3267_v41, 0.0  ;;  %7752 = vmatmul.msk.bf16.gmra.mxu0 %vm1986_vm2, %v8010_v60  ;;  %7816 = vmatmul.msk.bf16.gmra.mxu1 %vm1986_vm2, %v8074_v61 }
 0x2c9   : > { %v5400_v9 = vsel %vm4376_vm0, %v3584_v62, %v4888_v6  ;;  %v4761_v10 = vmul.f32 0.2, %v3267_v41  ;;  %7880 = vmatmul.msk.bf16.gmra.mxu2 %vm1986_vm2, %v8138_v2  ;;  %7944 = vmatmul.msk.bf16.gmra.mxu3 %vm1986_vm2, %v8202_v4 }
 0x2ca   : > { %v5912_v11 = vpack.c.bf16 %v5400_v9, %v5400_v9  ;;  %v5528_v12 = vsel %vm4504_vm1, %v3904_v63, %v5016_v7  ;;  %v5145_v13 = vsel %vm4121_vm3, %v2947_v5, %v4633_v8 }
 0x2cb   : > { %v6040_v15 = vpack.c.bf16 %v5528_v12, %v5528_v12  ;;  %v5657_v16 = vpack.c.bf16 %v5145_v13, %v5145_v13  ;;  %v5273_v17 = vsel %vm4249_vm4, %v3267_v41, %v4761_v10 }
 0x2cc   : > { %6425 = vst.msk [vmem:[%s8388_s29 + $0x514] sm:$0xf] %vm6099_vm5, %v5912_v11  ;;  %v5785_v18 = vpack.c.bf16 %v5273_v17, %v5273_v17  ;;  %v3586_v19 = vpop.f32.mrf.mxu2  ;;  %v3906_v20 = vpop.f32.mrf.mxu3 }
 0x2cd   : > { %6553 = vst.msk [vmem:[%s8388_s29 + $0x714] sm:$0xf] %vm6099_vm5, %v6040_v15  ;;  %v3587_v40 = vadd.f32 %v9432_v14, %v3586_v19  ;;  %v3907_v21 = vadd.f32 %v9432_v14, %v3906_v20  ;;  %v2948_v22 = vpop.f32.mrf.mxu0  ;;  %v3268_v23 = vpop.f32.mrf.mxu1 }
 0x2ce   : > { %6170 = vst.msk [vmem:[%s8388_s29 + $0x118] sm:$0xf] %vm6099_vm5, %v5657_v16  ;;  %v2949_v24 = vadd.f32 %v9432_v14, %v2948_v22  ;;  %v3269_v25 = vadd.f32 %v9432_v14, %v3268_v23  ;;  %v8076_v22 = vld [vmem:[%s8302_s24 + $0x368] sm:$0xff] }
 0x2cf   : > { %6298 = vst.msk [vmem:[%s8388_s29 + $0x318] sm:$0xf] %vm6099_vm5, %v5785_v18  ;;  %vm4377_vm6 = vcmp.ge.f32.partialorder %v3587_v40, 0.0  ;;  %v4889_v26 = vmul.f32 0.2, %v3587_v40  ;;  %vm4505_vm7 = vcmp.ge.f32.partialorder %v3907_v21, 0.0 }
 0x2d0   : > { %v5017_v27 = vmul.f32 0.2, %v3907_v21  ;;  %vm4122_vm8 = vcmp.ge.f32.partialorder %v2949_v24, 0.0  ;;  %v4634_v28 = vmul.f32 0.2, %v2949_v24  ;;  %vm4250_vm9 = vcmp.ge.f32.partialorder %v3269_v25, 0.0 }
 0x2d1   : > { %v5401_v30 = vsel %vm4377_vm6, %v3587_v40, %v4889_v26  ;;  %v4762_v31 = vmul.f32 0.2, %v3269_v25 }
 0x2d2   : > { %v5913_v3 = vpack.c.bf16 %v5401_v30, %v5401_v30  ;;  %v5529_v32 = vsel %vm4505_vm7, %v3907_v21, %v5017_v27  ;;  %v5146_v33 = vsel %vm4122_vm8, %v2949_v24, %v4634_v28  ;;  %v8012_v21 = vld [vmem:[%s8302_s24 + $0x168] sm:$0xff] }
 0x2d3   : > { %v6041_v34 = vpack.c.bf16 %v5529_v32, %v5529_v32  ;;  %v5658_v35 = vpack.c.bf16 %v5146_v33, %v5146_v33  ;;  %v5274_v36 = vsel %vm4250_vm9, %v3269_v25, %v4762_v31  ;;  %v8140_v27 = vld [vmem:[%s8302_s24 + $0x568] sm:$0xff] }
 0x2d4   : > { %6426 = vst.msk [vmem:[%s8388_s29 + $0x518] sm:$0xf] %vm6099_vm5, %v5913_v3  ;;  %v5786_v37 = vpack.c.bf16 %v5274_v36, %v5274_v36  ;;  %v3588_v38 = vpop.f32.mrf.mxu2  ;;  %v3908_v39 = vpop.f32.mrf.mxu3  ;;  %v8204_v28 = vld [vmem:[%s8302_s24 + $0x768] sm:$0xff] }
 0x2d5   : > { %6554 = vst.msk [vmem:[%s8388_s29 + $0x718] sm:$0xf] %vm6099_vm5, %v6041_v34  ;;  %v3589_v44 = vadd.f32 %v9432_v14, %v3588_v38  ;;  %v3909_v45 = vadd.f32 %v9432_v14, %v3908_v39  ;;  %v2951_v46 = vpop.f32.mrf.mxu0  ;;  %v3271_v47 = vpop.f32.mrf.mxu1 }
 0x2d6   : > { %6171 = vst.msk [vmem:[%s8388_s29 + $0x11c] sm:$0xf] %vm6099_vm5, %v5658_v35  ;;  %v2952_v50 = vadd.f32 %v9432_v14, %v2951_v46  ;;  %v3272_v51 = vadd.f32 %v9432_v14, %v3271_v47 }
 0x2d7   : > { %6299 = vst.msk [vmem:[%s8388_s29 + $0x31c] sm:$0xf] %vm6099_vm5, %v5786_v37  ;;  %vm4378_vm10 = vcmp.ge.f32.partialorder %v3589_v44, 0.0  ;;  %v4890_v52 = vmul.f32 0.2, %v3589_v44  ;;  %vm4506_vm11 = vcmp.ge.f32.partialorder %v3909_v45, 0.0 }
 0x2d8   : > { %v5018_v53 = vmul.f32 0.2, %v3909_v45  ;;  %vm4123_vm12 = vcmp.ge.f32.partialorder %v2952_v50, 0.0  ;;  %v4635_v54 = vmul.f32 0.2, %v2952_v50  ;;  %vm4251_vm13 = vcmp.ge.f32.partialorder %v3272_v51, 0.0  ;;  %7753 = vmatmul.msk.bf16.gmra.mxu0 %vm1986_vm2, %v8011_v42  ;;  %7817 = vmatmul.msk.bf16.gmra.mxu1 %vm1986_vm2, %v8075_v43 }
 0x2d9   : > { %v5402_v55 = vsel %vm4378_vm10, %v3589_v44, %v4890_v52  ;;  %v4763_v56 = vmul.f32 0.2, %v3272_v51  ;;  %7881 = vmatmul.msk.bf16.gmra.mxu2 %vm1986_vm2, %v8139_v48  ;;  %7945 = vmatmul.msk.bf16.gmra.mxu3 %vm1986_vm2, %v8203_v49 }
 0x2da   : > { %v5914_v57 = vpack.c.bf16 %v5402_v55, %v5402_v55  ;;  %v5530_v58 = vsel %vm4506_vm11, %v3909_v45, %v5018_v53  ;;  %v5147_v29 = vsel %vm4123_vm12, %v2952_v50, %v4635_v54 }
 0x2db   : > { %v6042_v59 = vpack.c.bf16 %v5530_v58, %v5530_v58  ;;  %v5659_v60 = vpack.c.bf16 %v5147_v29, %v5147_v29  ;;  %v5275_v61 = vsel %vm4251_vm13, %v3272_v51, %v4763_v56 }
 0x2dc   : > { %6427 = vst.msk [vmem:[%s8388_s29 + $0x51c] sm:$0xf] %vm6099_vm5, %v5914_v57  ;;  %v5787_v62 = vpack.c.bf16 %v5275_v61, %v5275_v61  ;;  %v3591_v63 = vpop.f32.mrf.mxu2  ;;  %v3911_v0 = vpop.f32.mrf.mxu3 }
 0x2dd   : > { %6555 = vst.msk [vmem:[%s8388_s29 + $0x71c] sm:$0xf] %vm6099_vm5, %v6042_v59  ;;  %v3592_v1 = vadd.f32 %v9432_v14, %v3591_v63  ;;  %v3912_v2 = vadd.f32 %v9432_v14, %v3911_v0  ;;  %v2953_v4 = vpop.f32.mrf.mxu0  ;;  %v3273_v5 = vpop.f32.mrf.mxu1 }
 0x2de   : > { %6172 = vst.msk [vmem:[%s8388_s29 + $0x120] sm:$0xf] %vm6099_vm5, %v5659_v60  ;;  %v2954_v41 = vadd.f32 %v9432_v14, %v2953_v4  ;;  %v3274_v6 = vadd.f32 %v9432_v14, %v3273_v5  ;;  %v8077_v4 = vld [vmem:[%s8302_s24 + $0x370] sm:$0xff] }
 0x2df   : > { %6300 = vst.msk [vmem:[%s8388_s29 + $0x320] sm:$0xf] %vm6099_vm5, %v5787_v62  ;;  %vm4379_vm14 = vcmp.ge.f32.partialorder %v3592_v1, 0.0  ;;  %v4891_v7 = vmul.f32 0.2, %v3592_v1  ;;  %vm4507_vm15 = vcmp.ge.f32.partialorder %v3912_v2, 0.0 }
 0x2e0   : > { %v5019_v8 = vmul.f32 0.2, %v3912_v2  ;;  %vm4124_vm0 = vcmp.ge.f32.partialorder %v2954_v41, 0.0  ;;  %v4636_v9 = vmul.f32 0.2, %v2954_v41  ;;  %vm4252_vm1 = vcmp.ge.f32.partialorder %v3274_v6, 0.0 }
 0x2e1   : > { %v5403_v10 = vsel %vm4379_vm14, %v3592_v1, %v4891_v7  ;;  %v4764_v11 = vmul.f32 0.2, %v3274_v6 }
 0x2e2   : > { %v5915_v12 = vpack.c.bf16 %v5403_v10, %v5403_v10  ;;  %v5531_v13 = vsel %vm4507_vm15, %v3912_v2, %v5019_v8  ;;  %v5148_v15 = vsel %vm4124_vm0, %v2954_v41, %v4636_v9  ;;  %v8013_v2 = vld [vmem:[%s8302_s24 + $0x170] sm:$0xff] }
 0x2e3   : > { %v6043_v16 = vpack.c.bf16 %v5531_v13, %v5531_v13  ;;  %v5660_v17 = vpack.c.bf16 %v5148_v15, %v5148_v15  ;;  %v5276_v18 = vsel %vm4252_vm1, %v3274_v6, %v4764_v11  ;;  %v8141_v8 = vld [vmem:[%s8302_s24 + $0x570] sm:$0xff] }
 0x2e4   : > { %6428 = vst.msk [vmem:[%s8388_s29 + $0x520] sm:$0xf] %vm6099_vm5, %v5915_v12  ;;  %v5788_v19 = vpack.c.bf16 %v5276_v18, %v5276_v18  ;;  %v3593_v20 = vpop.f32.mrf.mxu2  ;;  %v3913_v40 = vpop.f32.mrf.mxu3  ;;  %v8205_v9 = vld [vmem:[%s8302_s24 + $0x770] sm:$0xff] }
 0x2e5   : > { %6556 = vst.msk [vmem:[%s8388_s29 + $0x720] sm:$0xf] %vm6099_vm5, %v6043_v16  ;;  %v3594_v23 = vadd.f32 %v9432_v14, %v3593_v20  ;;  %v3914_v24 = vadd.f32 %v9432_v14, %v3913_v40  ;;  %v2956_v25 = vpop.f32.mrf.mxu0  ;;  %v3276_v26 = vpop.f32.mrf.mxu1 }
 0x2e6   : > { %6173 = vst.msk [vmem:[%s8388_s29 + $0x124] sm:$0xf] %vm6099_vm5, %v5660_v17  ;;  %v2957_v30 = vadd.f32 %v9432_v14, %v2956_v25  ;;  %v3277_v31 = vadd.f32 %v9432_v14, %v3276_v26 }
 0x2e7   : > { %6301 = vst.msk [vmem:[%s8388_s29 + $0x324] sm:$0xf] %vm6099_vm5, %v5788_v19  ;;  %vm4380_vm3 = vcmp.ge.f32.partialorder %v3594_v23, 0.0  ;;  %v4892_v3 = vmul.f32 0.2, %v3594_v23  ;;  %vm4508_vm4 = vcmp.ge.f32.partialorder %v3914_v24, 0.0 }
 0x2e8   : > { %v5020_v32 = vmul.f32 0.2, %v3914_v24  ;;  %vm4125_vm6 = vcmp.ge.f32.partialorder %v2957_v30, 0.0  ;;  %v4637_v33 = vmul.f32 0.2, %v2957_v30  ;;  %vm4253_vm7 = vcmp.ge.f32.partialorder %v3277_v31, 0.0  ;;  %7754 = vmatmul.msk.bf16.gmra.mxu0 %vm1986_vm2, %v8012_v21  ;;  %7818 = vmatmul.msk.bf16.gmra.mxu1 %vm1986_vm2, %v8076_v22 }
 0x2e9   : > { %v5404_v34 = vsel %vm4380_vm3, %v3594_v23, %v4892_v3  ;;  %v4765_v35 = vmul.f32 0.2, %v3277_v31  ;;  %7882 = vmatmul.msk.bf16.gmra.mxu2 %vm1986_vm2, %v8140_v27  ;;  %7946 = vmatmul.msk.bf16.gmra.mxu3 %vm1986_vm2, %v8204_v28 }
 0x2ea   : > { %v5916_v36 = vpack.c.bf16 %v5404_v34, %v5404_v34  ;;  %v5532_v37 = vsel %vm4508_vm4, %v3914_v24, %v5020_v32  ;;  %v5149_v38 = vsel %vm4125_vm6, %v2957_v30, %v4637_v33 }
 0x2eb   : > { %v6044_v39 = vpack.c.bf16 %v5532_v37, %v5532_v37  ;;  %v5661_v42 = vpack.c.bf16 %v5149_v38, %v5149_v38  ;;  %v5277_v43 = vsel %vm4253_vm7, %v3277_v31, %v4765_v35 }
 0x2ec   : > { %6429 = vst.msk [vmem:[%s8388_s29 + $0x524] sm:$0xf] %vm6099_vm5, %v5916_v36  ;;  %v5789_v44 = vpack.c.bf16 %v5277_v43, %v5277_v43  ;;  %v3596_v45 = vpop.f32.mrf.mxu2  ;;  %v3916_v46 = vpop.f32.mrf.mxu3 }
 0x2ed   : > { %6557 = vst.msk [vmem:[%s8388_s29 + $0x724] sm:$0xf] %vm6099_vm5, %v6044_v39  ;;  %v3597_v47 = vadd.f32 %v9432_v14, %v3596_v45  ;;  %v3917_v48 = vadd.f32 %v9432_v14, %v3916_v46  ;;  %v2958_v49 = vpop.f32.mrf.mxu0  ;;  %v3278_v50 = vpop.f32.mrf.mxu1 }
 0x2ee   : > { %6174 = vst.msk [vmem:[%s8388_s29 + $0x128] sm:$0xf] %vm6099_vm5, %v5661_v42  ;;  %v2959_v51 = vadd.f32 %v9432_v14, %v2958_v49  ;;  %v3279_v52 = vadd.f32 %v9432_v14, %v3278_v50  ;;  %v8078_v49 = vld [vmem:[%s8302_s24 + $0x378] sm:$0xff] }
 0x2ef   : > { %6302 = vst.msk [vmem:[%s8388_s29 + $0x328] sm:$0xf] %vm6099_vm5, %v5789_v44  ;;  %vm4381_vm8 = vcmp.ge.f32.partialorder %v3597_v47, 0.0  ;;  %v4893_v53 = vmul.f32 0.2, %v3597_v47  ;;  %vm4509_vm9 = vcmp.ge.f32.partialorder %v3917_v48, 0.0 }
 0x2f0   : > { %v5021_v54 = vmul.f32 0.2, %v3917_v48  ;;  %vm4126_vm10 = vcmp.ge.f32.partialorder %v2959_v51, 0.0  ;;  %v4638_v55 = vmul.f32 0.2, %v2959_v51  ;;  %vm4254_vm11 = vcmp.ge.f32.partialorder %v3279_v52, 0.0 }
 0x2f1   : > { %v5405_v56 = vsel %vm4381_vm8, %v3597_v47, %v4893_v53  ;;  %v4766_v57 = vmul.f32 0.2, %v3279_v52 }
 0x2f2   : > { %v5917_v58 = vpack.c.bf16 %v5405_v56, %v5405_v56  ;;  %v5533_v29 = vsel %vm4509_vm9, %v3917_v48, %v5021_v54  ;;  %v5150_v59 = vsel %vm4126_vm10, %v2959_v51, %v4638_v55  ;;  %v8014_v48 = vld [vmem:[%s8302_s24 + $0x178] sm:$0xff] }
 0x2f3   : > { %v6045_v60 = vpack.c.bf16 %v5533_v29, %v5533_v29  ;;  %v5662_v61 = vpack.c.bf16 %v5150_v59, %v5150_v59  ;;  %v5278_v62 = vsel %vm4254_vm11, %v3279_v52, %v4766_v57  ;;  %v8142_v54 = vld [vmem:[%s8302_s24 + $0x578] sm:$0xff] }
 0x2f4   : > { %6430 = vst.msk [vmem:[%s8388_s29 + $0x528] sm:$0xf] %vm6099_vm5, %v5917_v58  ;;  %v5790_v63 = vpack.c.bf16 %v5278_v62, %v5278_v62  ;;  %v3598_v0 = vpop.f32.mrf.mxu2  ;;  %v3918_v1 = vpop.f32.mrf.mxu3  ;;  %v8206_v55 = vld [vmem:[%s8302_s24 + $0x778] sm:$0xff] }
 0x2f5   : > { %6558 = vst.msk [vmem:[%s8388_s29 + $0x728] sm:$0xf] %vm6099_vm5, %v6045_v60  ;;  %v3599_v5 = vadd.f32 %v9432_v14, %v3598_v0  ;;  %v3919_v41 = vadd.f32 %v9432_v14, %v3918_v1  ;;  %v2961_v6 = vpop.f32.mrf.mxu0  ;;  %v3281_v7 = vpop.f32.mrf.mxu1 }
 0x2f6   : > { %6175 = vst.msk [vmem:[%s8388_s29 + $0x12c] sm:$0xf] %vm6099_vm5, %v5662_v61  ;;  %v2962_v10 = vadd.f32 %v9432_v14, %v2961_v6  ;;  %v3282_v11 = vadd.f32 %v9432_v14, %v3281_v7 }
 0x2f7   : > { %6303 = vst.msk [vmem:[%s8388_s29 + $0x32c] sm:$0xf] %vm6099_vm5, %v5790_v63  ;;  %vm4382_vm12 = vcmp.ge.f32.partialorder %v3599_v5, 0.0  ;;  %v4894_v12 = vmul.f32 0.2, %v3599_v5  ;;  %vm4510_vm13 = vcmp.ge.f32.partialorder %v3919_v41, 0.0 }
 0x2f8   : > { %v5022_v13 = vmul.f32 0.2, %v3919_v41  ;;  %vm4127_vm14 = vcmp.ge.f32.partialorder %v2962_v10, 0.0  ;;  %v4639_v15 = vmul.f32 0.2, %v2962_v10  ;;  %vm4255_vm15 = vcmp.ge.f32.partialorder %v3282_v11, 0.0  ;;  %7755 = vmatmul.msk.bf16.gmra.mxu0 %vm1986_vm2, %v8013_v2  ;;  %7819 = vmatmul.msk.bf16.gmra.mxu1 %vm1986_vm2, %v8077_v4 }
 0x2f9   : > { %v5406_v16 = vsel %vm4382_vm12, %v3599_v5, %v4894_v12  ;;  %v4767_v17 = vmul.f32 0.2, %v3282_v11  ;;  %7883 = vmatmul.msk.bf16.gmra.mxu2 %vm1986_vm2, %v8141_v8  ;;  %7947 = vmatmul.msk.bf16.gmra.mxu3 %vm1986_vm2, %v8205_v9 }
 0x2fa   : > { %v5918_v18 = vpack.c.bf16 %v5406_v16, %v5406_v16  ;;  %v5534_v19 = vsel %vm4510_vm13, %v3919_v41, %v5022_v13  ;;  %v5151_v20 = vsel %vm4127_vm14, %v2962_v10, %v4639_v15 }
 0x2fb   : > { %v6046_v40 = vpack.c.bf16 %v5534_v19, %v5534_v19  ;;  %v5663_v21 = vpack.c.bf16 %v5151_v20, %v5151_v20  ;;  %v5279_v22 = vsel %vm4255_vm15, %v3282_v11, %v4767_v17 }
 0x2fc   : > { %6431 = vst.msk [vmem:[%s8388_s29 + $0x52c] sm:$0xf] %vm6099_vm5, %v5918_v18  ;;  %v5791_v23 = vpack.c.bf16 %v5279_v22, %v5279_v22  ;;  %v3601_v24 = vpop.f32.mrf.mxu2  ;;  %v3921_v25 = vpop.f32.mrf.mxu3 }
 0x2fd   : > { %6559 = vst.msk [vmem:[%s8388_s29 + $0x72c] sm:$0xf] %vm6099_vm5, %v6046_v40  ;;  %v3602_v26 = vadd.f32 %v9432_v14, %v3601_v24  ;;  %v3922_v27 = vadd.f32 %v9432_v14, %v3921_v25  ;;  %v2963_v28 = vpop.f32.mrf.mxu0  ;;  %v3283_v30 = vpop.f32.mrf.mxu1 }
 0x2fe   : > { %6176 = vst.msk [vmem:[%s8388_s29 + $0x130] sm:$0xf] %vm6099_vm5, %v5663_v21  ;;  %v2964_v31 = vadd.f32 %v9432_v14, %v2963_v28  ;;  %v3284_v3 = vadd.f32 %v9432_v14, %v3283_v30  ;;  %v8079_v28 = vld [vmem:[%s8302_s24 + $0x380] sm:$0xff] }
 0x2ff   : > { %6304 = vst.msk [vmem:[%s8388_s29 + $0x330] sm:$0xf] %vm6099_vm5, %v5791_v23  ;;  %vm4383_vm0 = vcmp.ge.f32.partialorder %v3602_v26, 0.0  ;;  %v4895_v32 = vmul.f32 0.2, %v3602_v26  ;;  %vm4511_vm1 = vcmp.ge.f32.partialorder %v3922_v27, 0.0 }
 0x300   : > { %v5023_v33 = vmul.f32 0.2, %v3922_v27  ;;  %vm4128_vm3 = vcmp.ge.f32.partialorder %v2964_v31, 0.0  ;;  %v4640_v34 = vmul.f32 0.2, %v2964_v31  ;;  %vm4256_vm4 = vcmp.ge.f32.partialorder %v3284_v3, 0.0 }
 0x301   : > { %v5407_v35 = vsel %vm4383_vm0, %v3602_v26, %v4895_v32  ;;  %v4768_v36 = vmul.f32 0.2, %v3284_v3 }
 0x302   : > { %v5919_v37 = vpack.c.bf16 %v5407_v35, %v5407_v35  ;;  %v5535_v38 = vsel %vm4511_vm1, %v3922_v27, %v5023_v33  ;;  %v5152_v39 = vsel %vm4128_vm3, %v2964_v31, %v4640_v34  ;;  %v8015_v27 = vld [vmem:[%s8302_s24 + $0x180] sm:$0xff] }
 0x303   : > { %v6047_v42 = vpack.c.bf16 %v5535_v38, %v5535_v38  ;;  %v5664_v43 = vpack.c.bf16 %v5152_v39, %v5152_v39  ;;  %v5280_v44 = vsel %vm4256_vm4, %v3284_v3, %v4768_v36  ;;  %v8143_v33 = vld [vmem:[%s8302_s24 + $0x580] sm:$0xff] }
 0x304   : > { %6432 = vst.msk [vmem:[%s8388_s29 + $0x530] sm:$0xf] %vm6099_vm5, %v5919_v37  ;;  %v5792_v45 = vpack.c.bf16 %v5280_v44, %v5280_v44  ;;  %v3603_v46 = vpop.f32.mrf.mxu2  ;;  %v3923_v47 = vpop.f32.mrf.mxu3  ;;  %v8207_v34 = vld [vmem:[%s8302_s24 + $0x780] sm:$0xff] }
 0x305   : > { %6560 = vst.msk [vmem:[%s8388_s29 + $0x730] sm:$0xf] %vm6099_vm5, %v6047_v42  ;;  %v3604_v50 = vadd.f32 %v9432_v14, %v3603_v46  ;;  %v3924_v51 = vadd.f32 %v9432_v14, %v3923_v47  ;;  %v2966_v52 = vpop.f32.mrf.mxu0  ;;  %v3286_v53 = vpop.f32.mrf.mxu1 }
 0x306   : > { %6177 = vst.msk [vmem:[%s8388_s29 + $0x134] sm:$0xf] %vm6099_vm5, %v5664_v43  ;;  %v2967_v56 = vadd.f32 %v9432_v14, %v2966_v52  ;;  %v3287_v57 = vadd.f32 %v9432_v14, %v3286_v53  ;;  %v9693_v52 = vld [vmem:[%s10404_s2] ss:$0 sm:$0xff] }
 0x307   : > { %6305 = vst.msk [vmem:[%s8388_s29 + $0x334] sm:$0xf] %vm6099_vm5, %v5792_v45  ;;  %vm4384_vm6 = vcmp.ge.f32.partialorder %v3604_v50, 0.0  ;;  %v4896_v58 = vmul.f32 0.2, %v3604_v50  ;;  %vm4512_vm7 = vcmp.ge.f32.partialorder %v3924_v51, 0.0 }
 0x308   : > { %v5024_v29 = vmul.f32 0.2, %v3924_v51  ;;  %vm4129_vm8 = vcmp.ge.f32.partialorder %v2967_v56, 0.0  ;;  %v4641_v59 = vmul.f32 0.2, %v2967_v56  ;;  %vm4257_vm9 = vcmp.ge.f32.partialorder %v3287_v57, 0.0  ;;  %7756 = vmatmul.msk.bf16.gmra.mxu0 %vm1986_vm2, %v8014_v48  ;;  %7820 = vmatmul.msk.bf16.gmra.mxu1 %vm1986_vm2, %v8078_v49 }
 0x309   : > { %v5408_v60 = vsel %vm4384_vm6, %v3604_v50, %v4896_v58  ;;  %v4769_v61 = vmul.f32 0.2, %v3287_v57  ;;  %7884 = vmatmul.msk.bf16.gmra.mxu2 %vm1986_vm2, %v8142_v54  ;;  %7948 = vmatmul.msk.bf16.gmra.mxu3 %vm1986_vm2, %v8206_v55 }
 0x30a   : > { %v5920_v62 = vpack.c.bf16 %v5408_v60, %v5408_v60  ;;  %v5536_v63 = vsel %vm4512_vm7, %v3924_v51, %v5024_v29  ;;  %v5153_v0 = vsel %vm4129_vm8, %v2967_v56, %v4641_v59 }
 0x30b   : > { %v6048_v1 = vpack.c.bf16 %v5536_v63, %v5536_v63  ;;  %v5665_v2 = vpack.c.bf16 %v5153_v0, %v5153_v0  ;;  %v5281_v4 = vsel %vm4257_vm9, %v3287_v57, %v4769_v61 }
 0x30c   : > { %6433 = vst.msk [vmem:[%s8388_s29 + $0x534] sm:$0xf] %vm6099_vm5, %v5920_v62  ;;  %v5793_v5 = vpack.c.bf16 %v5281_v4, %v5281_v4  ;;  %v3606_v41 = vpop.f32.mrf.mxu2  ;;  %v3926_v6 = vpop.f32.mrf.mxu3 }
 0x30d   : > { %6561 = vst.msk [vmem:[%s8388_s29 + $0x734] sm:$0xf] %vm6099_vm5, %v6048_v1  ;;  %v3607_v7 = vadd.f32 %v9432_v14, %v3606_v41  ;;  %v3927_v8 = vadd.f32 %v9432_v14, %v3926_v6  ;;  %v2968_v9 = vpop.f32.mrf.mxu0  ;;  %v3288_v10 = vpop.f32.mrf.mxu1 }
 0x30e   : > { %6178 = vst.msk [vmem:[%s8388_s29 + $0x138] sm:$0xf] %vm6099_vm5, %v5665_v2  ;;  %v2969_v11 = vadd.f32 %v9432_v14, %v2968_v9  ;;  %v3289_v12 = vadd.f32 %v9432_v14, %v3288_v10  ;;  %v8080_v9 = vld [vmem:[%s8302_s24 + $0x388] sm:$0xff] }
 0x30f   : > { %6306 = vst.msk [vmem:[%s8388_s29 + $0x338] sm:$0xf] %vm6099_vm5, %v5793_v5  ;;  %vm4385_vm10 = vcmp.ge.f32.partialorder %v3607_v7, 0.0  ;;  %v4897_v13 = vmul.f32 0.2, %v3607_v7  ;;  %vm4513_vm11 = vcmp.ge.f32.partialorder %v3927_v8, 0.0 }
 0x310   : > { %v5025_v15 = vmul.f32 0.2, %v3927_v8  ;;  %vm4130_vm12 = vcmp.ge.f32.partialorder %v2969_v11, 0.0  ;;  %v4642_v16 = vmul.f32 0.2, %v2969_v11  ;;  %vm4258_vm13 = vcmp.ge.f32.partialorder %v3289_v12, 0.0 }
 0x311   : > { %v5409_v17 = vsel %vm4385_vm10, %v3607_v7, %v4897_v13  ;;  %v4770_v18 = vmul.f32 0.2, %v3289_v12 }
 0x312   : > { %v5921_v19 = vpack.c.bf16 %v5409_v17, %v5409_v17  ;;  %v5537_v20 = vsel %vm4513_vm11, %v3927_v8, %v5025_v15  ;;  %v5154_v40 = vsel %vm4130_vm12, %v2969_v11, %v4642_v16  ;;  %v8016_v8 = vld [vmem:[%s8302_s24 + $0x188] sm:$0xff] }
 0x313   : > { %v6049_v21 = vpack.c.bf16 %v5537_v20, %v5537_v20  ;;  %v5666_v22 = vpack.c.bf16 %v5154_v40, %v5154_v40  ;;  %v5282_v23 = vsel %vm4258_vm13, %v3289_v12, %v4770_v18  ;;  %v8144_v15 = vld [vmem:[%s8302_s24 + $0x588] sm:$0xff] }
 0x314   : > { %6434 = vst.msk [vmem:[%s8388_s29 + $0x538] sm:$0xf] %vm6099_vm5, %v5921_v19  ;;  %v5794_v24 = vpack.c.bf16 %v5282_v23, %v5282_v23  ;;  %v3608_v25 = vpop.f32.mrf.mxu2  ;;  %v3928_v26 = vpop.f32.mrf.mxu3  ;;  %v8208_v16 = vld [vmem:[%s8302_s24 + $0x788] sm:$0xff] }
 0x315   : > { %6562 = vst.msk [vmem:[%s8388_s29 + $0x738] sm:$0xf] %vm6099_vm5, %v6049_v21  ;;  %v3609_v30 = vadd.f32 %v9432_v14, %v3608_v25  ;;  %v3929_v31 = vadd.f32 %v9432_v14, %v3928_v26  ;;  %v2971_v3 = vpop.f32.mrf.mxu0  ;;  %v3291_v32 = vpop.f32.mrf.mxu1 }
 0x316   : > { %6179 = vst.msk [vmem:[%s8388_s29 + $0x13c] sm:$0xf] %vm6099_vm5, %v5666_v22  ;;  %v2972_v35 = vadd.f32 %v9432_v14, %v2971_v3  ;;  %v3292_v36 = vadd.f32 %v9432_v14, %v3291_v32 }
 0x317   : > { %6307 = vst.msk [vmem:[%s8388_s29 + $0x33c] sm:$0xf] %vm6099_vm5, %v5794_v24  ;;  %vm4386_vm14 = vcmp.ge.f32.partialorder %v3609_v30, 0.0  ;;  %v4898_v37 = vmul.f32 0.2, %v3609_v30  ;;  %vm4514_vm15 = vcmp.ge.f32.partialorder %v3929_v31, 0.0 }
 0x318   : > { %v5026_v38 = vmul.f32 0.2, %v3929_v31  ;;  %vm4131_vm0 = vcmp.ge.f32.partialorder %v2972_v35, 0.0  ;;  %v4643_v39 = vmul.f32 0.2, %v2972_v35  ;;  %vm4259_vm1 = vcmp.ge.f32.partialorder %v3292_v36, 0.0  ;;  %7757 = vmatmul.msk.bf16.gmra.mxu0 %vm1986_vm2, %v8015_v27  ;;  %7821 = vmatmul.msk.bf16.gmra.mxu1 %vm1986_vm2, %v8079_v28 }
 0x319   : > { %v5410_v42 = vsel %vm4386_vm14, %v3609_v30, %v4898_v37  ;;  %v4771_v43 = vmul.f32 0.2, %v3292_v36  ;;  %7885 = vmatmul.msk.bf16.gmra.mxu2 %vm1986_vm2, %v8143_v33  ;;  %7949 = vmatmul.msk.bf16.gmra.mxu3 %vm1986_vm2, %v8207_v34 }
 0x31a   : > { %v5922_v14 = vpack.c.bf16 %v5410_v42, %v5410_v42  ;;  %v5538_v44 = vsel %vm4514_vm15, %v3929_v31, %v5026_v38  ;;  %v5155_v45 = vsel %vm4131_vm0, %v2972_v35, %v4643_v39 }
 0x31b   : > { %v6050_v46 = vpack.c.bf16 %v5538_v44, %v5538_v44  ;;  %v5667_v47 = vpack.c.bf16 %v5155_v45, %v5155_v45  ;;  %v5283_v48 = vsel %vm4259_vm1, %v3292_v36, %v4771_v43 }
 0x31c   : > { %6435 = vst.msk [vmem:[%s8388_s29 + $0x53c] sm:$0xf] %vm6099_vm5, %v5922_v14  ;;  %v5795_v49 = vpack.c.bf16 %v5283_v48, %v5283_v48  ;;  %v3611_v50 = vpop.f32.mrf.mxu2  ;;  %v3931_v51 = vpop.f32.mrf.mxu3 }
 0x31d   : > { %6563 = vst.msk [vmem:[%s8388_s29 + $0x73c] sm:$0xf] %vm6099_vm5, %v6050_v46  ;;  %v3612_v53 = vadd.f32 %v9693_v52, %v3611_v50  ;;  %v3932_v54 = vadd.f32 %v9693_v52, %v3931_v51  ;;  %v2973_v55 = vpop.f32.mrf.mxu0  ;;  %v3293_v56 = vpop.f32.mrf.mxu1 }
 0x31e   : > { %6180 = vst.msk [vmem:[%s8388_s29 + $0x140] sm:$0xf] %vm6099_vm5, %v5667_v47  ;;  %v2974_v57 = vadd.f32 %v9693_v52, %v2973_v55  ;;  %v3294_v58 = vadd.f32 %v9693_v52, %v3293_v56  ;;  %v8081_v55 = vld [vmem:[%s8302_s24 + $0x390] sm:$0xff] }
 0x31f   : > { %6308 = vst.msk [vmem:[%s8388_s29 + $0x340] sm:$0xf] %vm6099_vm5, %v5795_v49  ;;  %vm4387_vm3 = vcmp.ge.f32.partialorder %v3612_v53, 0.0  ;;  %v4899_v29 = vmul.f32 0.2, %v3612_v53  ;;  %vm4515_vm4 = vcmp.ge.f32.partialorder %v3932_v54, 0.0 }
 0x320   : > { %v5027_v59 = vmul.f32 0.2, %v3932_v54  ;;  %vm4132_vm6 = vcmp.ge.f32.partialorder %v2974_v57, 0.0  ;;  %v4644_v60 = vmul.f32 0.2, %v2974_v57  ;;  %vm4260_vm7 = vcmp.ge.f32.partialorder %v3294_v58, 0.0 }
 0x321   : > { %v5411_v61 = vsel %vm4387_vm3, %v3612_v53, %v4899_v29  ;;  %v4772_v62 = vmul.f32 0.2, %v3294_v58 }
 0x322   : > { %v5923_v63 = vpack.c.bf16 %v5411_v61, %v5411_v61  ;;  %v5539_v0 = vsel %vm4515_vm4, %v3932_v54, %v5027_v59  ;;  %v5156_v1 = vsel %vm4132_vm6, %v2974_v57, %v4644_v60  ;;  %v8017_v54 = vld [vmem:[%s8302_s24 + $0x190] sm:$0xff] }
 0x323   : > { %v6051_v2 = vpack.c.bf16 %v5539_v0, %v5539_v0  ;;  %v5668_v4 = vpack.c.bf16 %v5156_v1, %v5156_v1  ;;  %v5284_v5 = vsel %vm4260_vm7, %v3294_v58, %v4772_v62  ;;  %v8145_v59 = vld [vmem:[%s8302_s24 + $0x590] sm:$0xff] }
 0x324   : > { %6436 = vst.msk [vmem:[%s8388_s29 + $0x540] sm:$0xf] %vm6099_vm5, %v5923_v63  ;;  %v5796_v41 = vpack.c.bf16 %v5284_v5, %v5284_v5  ;;  %v3613_v6 = vpop.f32.mrf.mxu2  ;;  %v3933_v7 = vpop.f32.mrf.mxu3  ;;  %v8209_v60 = vld [vmem:[%s8302_s24 + $0x790] sm:$0xff] }
 0x325   : > { %6564 = vst.msk [vmem:[%s8388_s29 + $0x740] sm:$0xf] %vm6099_vm5, %v6051_v2  ;;  %v3614_v10 = vadd.f32 %v9693_v52, %v3613_v6  ;;  %v3934_v11 = vadd.f32 %v9693_v52, %v3933_v7  ;;  %v2976_v12 = vpop.f32.mrf.mxu0  ;;  %v3296_v13 = vpop.f32.mrf.mxu1 }
 0x326   : > { %6181 = vst.msk [vmem:[%s8388_s29 + $0x144] sm:$0xf] %vm6099_vm5, %v5668_v4  ;;  %v2977_v17 = vadd.f32 %v9693_v52, %v2976_v12  ;;  %v3297_v18 = vadd.f32 %v9693_v52, %v3296_v13 }
 0x327   : > { %6309 = vst.msk [vmem:[%s8388_s29 + $0x344] sm:$0xf] %vm6099_vm5, %v5796_v41  ;;  %vm4388_vm8 = vcmp.ge.f32.partialorder %v3614_v10, 0.0  ;;  %v4900_v19 = vmul.f32 0.2, %v3614_v10  ;;  %vm4516_vm9 = vcmp.ge.f32.partialorder %v3934_v11, 0.0 }
 0x328   : > { %v5028_v20 = vmul.f32 0.2, %v3934_v11  ;;  %vm4133_vm10 = vcmp.ge.f32.partialorder %v2977_v17, 0.0  ;;  %v4645_v40 = vmul.f32 0.2, %v2977_v17  ;;  %vm4261_vm11 = vcmp.ge.f32.partialorder %v3297_v18, 0.0  ;;  %7758 = vmatmul.msk.bf16.gmra.mxu0 %vm1986_vm2, %v8016_v8  ;;  %7822 = vmatmul.msk.bf16.gmra.mxu1 %vm1986_vm2, %v8080_v9 }
 0x329   : > { %v5412_v21 = vsel %vm4388_vm8, %v3614_v10, %v4900_v19  ;;  %v4773_v22 = vmul.f32 0.2, %v3297_v18  ;;  %7886 = vmatmul.msk.bf16.gmra.mxu2 %vm1986_vm2, %v8144_v15  ;;  %7950 = vmatmul.msk.bf16.gmra.mxu3 %vm1986_vm2, %v8208_v16 }
 0x32a   : > { %v5924_v23 = vpack.c.bf16 %v5412_v21, %v5412_v21  ;;  %v5540_v24 = vsel %vm4516_vm9, %v3934_v11, %v5028_v20  ;;  %v5157_v25 = vsel %vm4133_vm10, %v2977_v17, %v4645_v40 }
 0x32b   : > { %v6052_v26 = vpack.c.bf16 %v5540_v24, %v5540_v24  ;;  %v5669_v27 = vpack.c.bf16 %v5157_v25, %v5157_v25  ;;  %v5285_v28 = vsel %vm4261_vm11, %v3297_v18, %v4773_v22 }
 0x32c   : > { %6437 = vst.msk [vmem:[%s8388_s29 + $0x544] sm:$0xf] %vm6099_vm5, %v5924_v23  ;;  %v5797_v30 = vpack.c.bf16 %v5285_v28, %v5285_v28  ;;  %v3616_v31 = vpop.f32.mrf.mxu2  ;;  %v3936_v3 = vpop.f32.mrf.mxu3 }
 0x32d   : > { %6565 = vst.msk [vmem:[%s8388_s29 + $0x744] sm:$0xf] %vm6099_vm5, %v6052_v26  ;;  %v3617_v32 = vadd.f32 %v9693_v52, %v3616_v31  ;;  %v3937_v33 = vadd.f32 %v9693_v52, %v3936_v3  ;;  %v2978_v34 = vpop.f32.mrf.mxu0  ;;  %v3298_v35 = vpop.f32.mrf.mxu1 }
 0x32e   : > { %6182 = vst.msk [vmem:[%s8388_s29 + $0x148] sm:$0xf] %vm6099_vm5, %v5669_v27  ;;  %v2979_v36 = vadd.f32 %v9693_v52, %v2978_v34  ;;  %v3299_v37 = vadd.f32 %v9693_v52, %v3298_v35  ;;  %v8082_v34 = vld [vmem:[%s8302_s24 + $0x398] sm:$0xff] }
 0x32f   : > { %6310 = vst.msk [vmem:[%s8388_s29 + $0x348] sm:$0xf] %vm6099_vm5, %v5797_v30  ;;  %vm4389_vm12 = vcmp.ge.f32.partialorder %v3617_v32, 0.0  ;;  %v4901_v38 = vmul.f32 0.2, %v3617_v32  ;;  %vm4517_vm13 = vcmp.ge.f32.partialorder %v3937_v33, 0.0 }
 0x330   : > { %v5029_v39 = vmul.f32 0.2, %v3937_v33  ;;  %vm4134_vm14 = vcmp.ge.f32.partialorder %v2979_v36, 0.0  ;;  %v4646_v42 = vmul.f32 0.2, %v2979_v36  ;;  %vm4262_vm15 = vcmp.ge.f32.partialorder %v3299_v37, 0.0 }
 0x331   : > { %v5413_v43 = vsel %vm4389_vm12, %v3617_v32, %v4901_v38  ;;  %v4774_v14 = vmul.f32 0.2, %v3299_v37 }
 0x332   : > { %v5925_v44 = vpack.c.bf16 %v5413_v43, %v5413_v43  ;;  %v5541_v45 = vsel %vm4517_vm13, %v3937_v33, %v5029_v39  ;;  %v5158_v46 = vsel %vm4134_vm14, %v2979_v36, %v4646_v42  ;;  %v8018_v33 = vld [vmem:[%s8302_s24 + $0x198] sm:$0xff] }
 0x333   : > { %v6053_v47 = vpack.c.bf16 %v5541_v45, %v5541_v45  ;;  %v5670_v48 = vpack.c.bf16 %v5158_v46, %v5158_v46  ;;  %v5286_v49 = vsel %vm4262_vm15, %v3299_v37, %v4774_v14  ;;  %v8146_v39 = vld [vmem:[%s8302_s24 + $0x598] sm:$0xff] }
 0x334   : > { %6438 = vst.msk [vmem:[%s8388_s29 + $0x548] sm:$0xf] %vm6099_vm5, %v5925_v44  ;;  %v5798_v50 = vpack.c.bf16 %v5286_v49, %v5286_v49  ;;  %v3618_v51 = vpop.f32.mrf.mxu2  ;;  %v3938_v53 = vpop.f32.mrf.mxu3  ;;  %v8210_v42 = vld [vmem:[%s8302_s24 + $0x798] sm:$0xff] }
 0x335   : > { %6566 = vst.msk [vmem:[%s8388_s29 + $0x748] sm:$0xf] %vm6099_vm5, %v6053_v47  ;;  %v3619_v56 = vadd.f32 %v9693_v52, %v3618_v51  ;;  %v3939_v57 = vadd.f32 %v9693_v52, %v3938_v53  ;;  %v2981_v58 = vpop.f32.mrf.mxu0  ;;  %v3301_v29 = vpop.f32.mrf.mxu1 }
 0x336   : > { %6183 = vst.msk [vmem:[%s8388_s29 + $0x14c] sm:$0xf] %vm6099_vm5, %v5670_v48  ;;  %v2982_v61 = vadd.f32 %v9693_v52, %v2981_v58  ;;  %v3302_v62 = vadd.f32 %v9693_v52, %v3301_v29 }
 0x337   : > { %6311 = vst.msk [vmem:[%s8388_s29 + $0x34c] sm:$0xf] %vm6099_vm5, %v5798_v50  ;;  %vm4390_vm0 = vcmp.ge.f32.partialorder %v3619_v56, 0.0  ;;  %v4902_v63 = vmul.f32 0.2, %v3619_v56  ;;  %vm4518_vm1 = vcmp.ge.f32.partialorder %v3939_v57, 0.0 }
 0x338   : > { %v5030_v0 = vmul.f32 0.2, %v3939_v57  ;;  %vm4135_vm3 = vcmp.ge.f32.partialorder %v2982_v61, 0.0  ;;  %v4647_v1 = vmul.f32 0.2, %v2982_v61  ;;  %vm4263_vm4 = vcmp.ge.f32.partialorder %v3302_v62, 0.0  ;;  %7759 = vmatmul.msk.bf16.gmra.mxu0 %vm1986_vm2, %v8017_v54  ;;  %7823 = vmatmul.msk.bf16.gmra.mxu1 %vm1986_vm2, %v8081_v55 }
 0x339   : > { %v5414_v2 = vsel %vm4390_vm0, %v3619_v56, %v4902_v63  ;;  %v4775_v4 = vmul.f32 0.2, %v3302_v62  ;;  %7887 = vmatmul.msk.bf16.gmra.mxu2 %vm1986_vm2, %v8145_v59  ;;  %7951 = vmatmul.msk.bf16.gmra.mxu3 %vm1986_vm2, %v8209_v60 }
 0x33a   : > { %v5926_v5 = vpack.c.bf16 %v5414_v2, %v5414_v2  ;;  %v5542_v41 = vsel %vm4518_vm1, %v3939_v57, %v5030_v0  ;;  %v5159_v6 = vsel %vm4135_vm3, %v2982_v61, %v4647_v1 }
 0x33b   : > { %v6054_v7 = vpack.c.bf16 %v5542_v41, %v5542_v41  ;;  %v5671_v8 = vpack.c.bf16 %v5159_v6, %v5159_v6  ;;  %v5287_v9 = vsel %vm4263_vm4, %v3302_v62, %v4775_v4 }
 0x33c   : > { %6439 = vst.msk [vmem:[%s8388_s29 + $0x54c] sm:$0xf] %vm6099_vm5, %v5926_v5  ;;  %v5799_v10 = vpack.c.bf16 %v5287_v9, %v5287_v9  ;;  %v3621_v11 = vpop.f32.mrf.mxu2  ;;  %v3941_v12 = vpop.f32.mrf.mxu3 }
 0x33d   : > { %6567 = vst.msk [vmem:[%s8388_s29 + $0x74c] sm:$0xf] %vm6099_vm5, %v6054_v7  ;;  %v3622_v13 = vadd.f32 %v9693_v52, %v3621_v11  ;;  %v3942_v15 = vadd.f32 %v9693_v52, %v3941_v12  ;;  %v2983_v16 = vpop.f32.mrf.mxu0  ;;  %v3303_v17 = vpop.f32.mrf.mxu1 }
 0x33e   : > { %6184 = vst.msk [vmem:[%s8388_s29 + $0x150] sm:$0xf] %vm6099_vm5, %v5671_v8  ;;  %v2984_v18 = vadd.f32 %v9693_v52, %v2983_v16  ;;  %v3304_v19 = vadd.f32 %v9693_v52, %v3303_v17  ;;  %v8083_v16 = vld [vmem:[%s8302_s24 + $0x3a0] sm:$0xff] }
 0x33f   : > { %6312 = vst.msk [vmem:[%s8388_s29 + $0x350] sm:$0xf] %vm6099_vm5, %v5799_v10  ;;  %vm4391_vm6 = vcmp.ge.f32.partialorder %v3622_v13, 0.0  ;;  %v4903_v20 = vmul.f32 0.2, %v3622_v13  ;;  %vm4519_vm7 = vcmp.ge.f32.partialorder %v3942_v15, 0.0 }
 0x340   : > { %v5031_v40 = vmul.f32 0.2, %v3942_v15  ;;  %vm4136_vm8 = vcmp.ge.f32.partialorder %v2984_v18, 0.0  ;;  %v4648_v21 = vmul.f32 0.2, %v2984_v18  ;;  %vm4264_vm9 = vcmp.ge.f32.partialorder %v3304_v19, 0.0 }
 0x341   : > { %v5415_v22 = vsel %vm4391_vm6, %v3622_v13, %v4903_v20  ;;  %v4776_v23 = vmul.f32 0.2, %v3304_v19 }
 0x342   : > { %v5927_v24 = vpack.c.bf16 %v5415_v22, %v5415_v22  ;;  %v5543_v25 = vsel %vm4519_vm7, %v3942_v15, %v5031_v40  ;;  %v5160_v26 = vsel %vm4136_vm8, %v2984_v18, %v4648_v21  ;;  %v8019_v15 = vld [vmem:[%s8302_s24 + $0x1a0] sm:$0xff] }
 0x343   : > { %v6055_v27 = vpack.c.bf16 %v5543_v25, %v5543_v25  ;;  %v5672_v28 = vpack.c.bf16 %v5160_v26, %v5160_v26  ;;  %v5288_v30 = vsel %vm4264_vm9, %v3304_v19, %v4776_v23  ;;  %v8147_v40 = vld [vmem:[%s8302_s24 + $0x5a0] sm:$0xff] }
 0x344   : > { %6440 = vst.msk [vmem:[%s8388_s29 + $0x550] sm:$0xf] %vm6099_vm5, %v5927_v24  ;;  %v5800_v31 = vpack.c.bf16 %v5288_v30, %v5288_v30  ;;  %v3623_v3 = vpop.f32.mrf.mxu2  ;;  %v3943_v32 = vpop.f32.mrf.mxu3  ;;  %v8211_v21 = vld [vmem:[%s8302_s24 + $0x7a0] sm:$0xff] }
 0x345   : > { %6568 = vst.msk [vmem:[%s8388_s29 + $0x750] sm:$0xf] %vm6099_vm5, %v6055_v27  ;;  %v3624_v35 = vadd.f32 %v9693_v52, %v3623_v3  ;;  %v3944_v36 = vadd.f32 %v9693_v52, %v3943_v32  ;;  %v2986_v37 = vpop.f32.mrf.mxu0  ;;  %v3306_v38 = vpop.f32.mrf.mxu1 }
 0x346   : > { %6185 = vst.msk [vmem:[%s8388_s29 + $0x154] sm:$0xf] %vm6099_vm5, %v5672_v28  ;;  %v2987_v43 = vadd.f32 %v9693_v52, %v2986_v37  ;;  %v3307_v14 = vadd.f32 %v9693_v52, %v3306_v38 }
 0x347   : > { %6313 = vst.msk [vmem:[%s8388_s29 + $0x354] sm:$0xf] %vm6099_vm5, %v5800_v31  ;;  %vm4392_vm10 = vcmp.ge.f32.partialorder %v3624_v35, 0.0  ;;  %v4904_v44 = vmul.f32 0.2, %v3624_v35  ;;  %vm4520_vm11 = vcmp.ge.f32.partialorder %v3944_v36, 0.0 }
 0x348   : > { %v5032_v45 = vmul.f32 0.2, %v3944_v36  ;;  %vm4137_vm12 = vcmp.ge.f32.partialorder %v2987_v43, 0.0  ;;  %v4649_v46 = vmul.f32 0.2, %v2987_v43  ;;  %vm4265_vm13 = vcmp.ge.f32.partialorder %v3307_v14, 0.0  ;;  %7760 = vmatmul.msk.bf16.gmra.mxu0 %vm1986_vm2, %v8018_v33  ;;  %7824 = vmatmul.msk.bf16.gmra.mxu1 %vm1986_vm2, %v8082_v34 }
 0x349   : > { %v5416_v47 = vsel %vm4392_vm10, %v3624_v35, %v4904_v44  ;;  %v4777_v48 = vmul.f32 0.2, %v3307_v14  ;;  %7888 = vmatmul.msk.bf16.gmra.mxu2 %vm1986_vm2, %v8146_v39  ;;  %7952 = vmatmul.msk.bf16.gmra.mxu3 %vm1986_vm2, %v8210_v42 }
 0x34a   : > { %v5928_v49 = vpack.c.bf16 %v5416_v47, %v5416_v47  ;;  %v5544_v50 = vsel %vm4520_vm11, %v3944_v36, %v5032_v45  ;;  %v5161_v51 = vsel %vm4137_vm12, %v2987_v43, %v4649_v46 }
 0x34b   : > { %v6056_v53 = vpack.c.bf16 %v5544_v50, %v5544_v50  ;;  %v5673_v54 = vpack.c.bf16 %v5161_v51, %v5161_v51  ;;  %v5289_v55 = vsel %vm4265_vm13, %v3307_v14, %v4777_v48 }
 0x34c   : > { %6441 = vst.msk [vmem:[%s8388_s29 + $0x554] sm:$0xf] %vm6099_vm5, %v5928_v49  ;;  %v5801_v56 = vpack.c.bf16 %v5289_v55, %v5289_v55  ;;  %v3626_v57 = vpop.f32.mrf.mxu2  ;;  %v3946_v58 = vpop.f32.mrf.mxu3 }
 0x34d   : > { %6569 = vst.msk [vmem:[%s8388_s29 + $0x754] sm:$0xf] %vm6099_vm5, %v6056_v53  ;;  %v3627_v29 = vadd.f32 %v9693_v52, %v3626_v57  ;;  %v3947_v59 = vadd.f32 %v9693_v52, %v3946_v58  ;;  %v2988_v60 = vpop.f32.mrf.mxu0  ;;  %v3308_v61 = vpop.f32.mrf.mxu1 }
 0x34e   : > { %6186 = vst.msk [vmem:[%s8388_s29 + $0x158] sm:$0xf] %vm6099_vm5, %v5673_v54  ;;  %v2989_v62 = vadd.f32 %v9693_v52, %v2988_v60  ;;  %v3309_v63 = vadd.f32 %v9693_v52, %v3308_v61  ;;  %v8084_v60 = vld [vmem:[%s8302_s24 + $0x3a8] sm:$0xff] }
 0x34f   : > { %6314 = vst.msk [vmem:[%s8388_s29 + $0x358] sm:$0xf] %vm6099_vm5, %v5801_v56  ;;  %vm4393_vm14 = vcmp.ge.f32.partialorder %v3627_v29, 0.0  ;;  %v4905_v0 = vmul.f32 0.2, %v3627_v29  ;;  %vm4521_vm15 = vcmp.ge.f32.partialorder %v3947_v59, 0.0 }
 0x350   : > { %v5033_v1 = vmul.f32 0.2, %v3947_v59  ;;  %vm4138_vm0 = vcmp.ge.f32.partialorder %v2989_v62, 0.0  ;;  %v4650_v2 = vmul.f32 0.2, %v2989_v62  ;;  %vm4266_vm1 = vcmp.ge.f32.partialorder %v3309_v63, 0.0 }
 0x351   : > { %v5417_v4 = vsel %vm4393_vm14, %v3627_v29, %v4905_v0  ;;  %v4778_v5 = vmul.f32 0.2, %v3309_v63 }
 0x352   : > { %v5929_v41 = vpack.c.bf16 %v5417_v4, %v5417_v4  ;;  %v5545_v6 = vsel %vm4521_vm15, %v3947_v59, %v5033_v1  ;;  %v5162_v7 = vsel %vm4138_vm0, %v2989_v62, %v4650_v2  ;;  %v8020_v59 = vld [vmem:[%s8302_s24 + $0x1a8] sm:$0xff] }
 0x353   : > { %v6057_v8 = vpack.c.bf16 %v5545_v6, %v5545_v6  ;;  %v5674_v9 = vpack.c.bf16 %v5162_v7, %v5162_v7  ;;  %v5290_v10 = vsel %vm4266_vm1, %v3309_v63, %v4778_v5  ;;  %v8148_v1 = vld [vmem:[%s8302_s24 + $0x5a8] sm:$0xff] }
 0x354   : > { %6442 = vst.msk [vmem:[%s8388_s29 + $0x558] sm:$0xf] %vm6099_vm5, %v5929_v41  ;;  %v5802_v11 = vpack.c.bf16 %v5290_v10, %v5290_v10  ;;  %v3628_v12 = vpop.f32.mrf.mxu2  ;;  %v3948_v13 = vpop.f32.mrf.mxu3  ;;  %v8212_v2 = vld [vmem:[%s8302_s24 + $0x7a8] sm:$0xff] }
 0x355   : > { %6570 = vst.msk [vmem:[%s8388_s29 + $0x758] sm:$0xf] %vm6099_vm5, %v6057_v8  ;;  %v3629_v17 = vadd.f32 %v9693_v52, %v3628_v12  ;;  %v3949_v18 = vadd.f32 %v9693_v52, %v3948_v13  ;;  %v2991_v19 = vpop.f32.mrf.mxu0  ;;  %v3311_v20 = vpop.f32.mrf.mxu1 }
 0x356   : > { %6187 = vst.msk [vmem:[%s8388_s29 + $0x15c] sm:$0xf] %vm6099_vm5, %v5674_v9  ;;  %v2992_v22 = vadd.f32 %v9693_v52, %v2991_v19  ;;  %v3312_v23 = vadd.f32 %v9693_v52, %v3311_v20 }
 0x357   : > { %6315 = vst.msk [vmem:[%s8388_s29 + $0x35c] sm:$0xf] %vm6099_vm5, %v5802_v11  ;;  %vm4394_vm3 = vcmp.ge.f32.partialorder %v3629_v17, 0.0  ;;  %v4906_v24 = vmul.f32 0.2, %v3629_v17  ;;  %vm4522_vm4 = vcmp.ge.f32.partialorder %v3949_v18, 0.0 }
 0x358   : > { %v5034_v25 = vmul.f32 0.2, %v3949_v18  ;;  %vm4139_vm6 = vcmp.ge.f32.partialorder %v2992_v22, 0.0  ;;  %v4651_v26 = vmul.f32 0.2, %v2992_v22  ;;  %vm4267_vm7 = vcmp.ge.f32.partialorder %v3312_v23, 0.0  ;;  %7761 = vmatmul.msk.bf16.gmra.mxu0 %vm1986_vm2, %v8019_v15  ;;  %7825 = vmatmul.msk.bf16.gmra.mxu1 %vm1986_vm2, %v8083_v16 }
 0x359   : > { %v5418_v27 = vsel %vm4394_vm3, %v3629_v17, %v4906_v24  ;;  %v4779_v28 = vmul.f32 0.2, %v3312_v23  ;;  %7889 = vmatmul.msk.bf16.gmra.mxu2 %vm1986_vm2, %v8147_v40  ;;  %7953 = vmatmul.msk.bf16.gmra.mxu3 %vm1986_vm2, %v8211_v21 }
 0x35a   : > { %v5930_v30 = vpack.c.bf16 %v5418_v27, %v5418_v27  ;;  %v5546_v31 = vsel %vm4522_vm4, %v3949_v18, %v5034_v25  ;;  %v5163_v3 = vsel %vm4139_vm6, %v2992_v22, %v4651_v26 }
 0x35b   : > { %v6058_v32 = vpack.c.bf16 %v5546_v31, %v5546_v31  ;;  %v5675_v33 = vpack.c.bf16 %v5163_v3, %v5163_v3  ;;  %v5291_v34 = vsel %vm4267_vm7, %v3312_v23, %v4779_v28 }
 0x35c   : > { %6443 = vst.msk [vmem:[%s8388_s29 + $0x55c] sm:$0xf] %vm6099_vm5, %v5930_v30  ;;  %v5803_v35 = vpack.c.bf16 %v5291_v34, %v5291_v34  ;;  %v3631_v36 = vpop.f32.mrf.mxu2  ;;  %v3951_v37 = vpop.f32.mrf.mxu3 }
 0x35d   : > { %6571 = vst.msk [vmem:[%s8388_s29 + $0x75c] sm:$0xf] %vm6099_vm5, %v6058_v32  ;;  %v3632_v38 = vadd.f32 %v9693_v52, %v3631_v36  ;;  %v3952_v39 = vadd.f32 %v9693_v52, %v3951_v37  ;;  %v2993_v42 = vpop.f32.mrf.mxu0  ;;  %v3313_v43 = vpop.f32.mrf.mxu1 }
 0x35e   : > { %6188 = vst.msk [vmem:[%s8388_s29 + $0x160] sm:$0xf] %vm6099_vm5, %v5675_v33  ;;  %v2994_v14 = vadd.f32 %v9693_v52, %v2993_v42  ;;  %v3314_v44 = vadd.f32 %v9693_v52, %v3313_v43  ;;  %v8085_v42 = vld [vmem:[%s8302_s24 + $0x3b0] sm:$0xff] }
 0x35f   : > { %6316 = vst.msk [vmem:[%s8388_s29 + $0x360] sm:$0xf] %vm6099_vm5, %v5803_v35  ;;  %vm4395_vm8 = vcmp.ge.f32.partialorder %v3632_v38, 0.0  ;;  %v4907_v45 = vmul.f32 0.2, %v3632_v38  ;;  %vm4523_vm9 = vcmp.ge.f32.partialorder %v3952_v39, 0.0 }
 0x360   : > { %v5035_v46 = vmul.f32 0.2, %v3952_v39  ;;  %vm4140_vm10 = vcmp.ge.f32.partialorder %v2994_v14, 0.0  ;;  %v4652_v47 = vmul.f32 0.2, %v2994_v14  ;;  %vm4268_vm11 = vcmp.ge.f32.partialorder %v3314_v44, 0.0 }
 0x361   : > { %v5419_v48 = vsel %vm4395_vm8, %v3632_v38, %v4907_v45  ;;  %v4780_v49 = vmul.f32 0.2, %v3314_v44 }
 0x362   : > { %v5931_v50 = vpack.c.bf16 %v5419_v48, %v5419_v48  ;;  %v5547_v51 = vsel %vm4523_vm9, %v3952_v39, %v5035_v46  ;;  %v5164_v53 = vsel %vm4140_vm10, %v2994_v14, %v4652_v47  ;;  %v8021_v39 = vld [vmem:[%s8302_s24 + $0x1b0] sm:$0xff] }
 0x363   : > { %v6059_v54 = vpack.c.bf16 %v5547_v51, %v5547_v51  ;;  %v5676_v55 = vpack.c.bf16 %v5164_v53, %v5164_v53  ;;  %v5292_v56 = vsel %vm4268_vm11, %v3314_v44, %v4780_v49  ;;  %v8149_v46 = vld [vmem:[%s8302_s24 + $0x5b0] sm:$0xff] }
 0x364   : > { %6444 = vst.msk [vmem:[%s8388_s29 + $0x560] sm:$0xf] %vm6099_vm5, %v5931_v50  ;;  %v5804_v57 = vpack.c.bf16 %v5292_v56, %v5292_v56  ;;  %v3633_v58 = vpop.f32.mrf.mxu2  ;;  %v3953_v29 = vpop.f32.mrf.mxu3  ;;  %v8213_v47 = vld [vmem:[%s8302_s24 + $0x7b0] sm:$0xff] }
 0x365   : > { %6572 = vst.msk [vmem:[%s8388_s29 + $0x760] sm:$0xf] %vm6099_vm5, %v6059_v54  ;;  %v3634_v61 = vadd.f32 %v9693_v52, %v3633_v58  ;;  %v3954_v62 = vadd.f32 %v9693_v52, %v3953_v29  ;;  %v2996_v63 = vpop.f32.mrf.mxu0  ;;  %v3316_v0 = vpop.f32.mrf.mxu1 }
 0x366   : > { %6189 = vst.msk [vmem:[%s8388_s29 + $0x164] sm:$0xf] %vm6099_vm5, %v5676_v55  ;;  %v2997_v4 = vadd.f32 %v9693_v52, %v2996_v63  ;;  %v3317_v5 = vadd.f32 %v9693_v52, %v3316_v0 }
 0x367   : > { %6317 = vst.msk [vmem:[%s8388_s29 + $0x364] sm:$0xf] %vm6099_vm5, %v5804_v57  ;;  %vm4396_vm12 = vcmp.ge.f32.partialorder %v3634_v61, 0.0  ;;  %v4908_v41 = vmul.f32 0.2, %v3634_v61  ;;  %vm4524_vm13 = vcmp.ge.f32.partialorder %v3954_v62, 0.0 }
 0x368   : > { %v5036_v6 = vmul.f32 0.2, %v3954_v62  ;;  %vm4141_vm14 = vcmp.ge.f32.partialorder %v2997_v4, 0.0  ;;  %v4653_v7 = vmul.f32 0.2, %v2997_v4  ;;  %vm4269_vm15 = vcmp.ge.f32.partialorder %v3317_v5, 0.0  ;;  %7762 = vmatmul.msk.bf16.gmra.mxu0 %vm1986_vm2, %v8020_v59  ;;  %7826 = vmatmul.msk.bf16.gmra.mxu1 %vm1986_vm2, %v8084_v60 }
 0x369   : > { %v5420_v8 = vsel %vm4396_vm12, %v3634_v61, %v4908_v41  ;;  %v4781_v9 = vmul.f32 0.2, %v3317_v5  ;;  %7890 = vmatmul.msk.bf16.gmra.mxu2 %vm1986_vm2, %v8148_v1  ;;  %7954 = vmatmul.msk.bf16.gmra.mxu3 %vm1986_vm2, %v8212_v2 }
 0x36a   : > { %v5932_v10 = vpack.c.bf16 %v5420_v8, %v5420_v8  ;;  %v5548_v11 = vsel %vm4524_vm13, %v3954_v62, %v5036_v6  ;;  %v5165_v12 = vsel %vm4141_vm14, %v2997_v4, %v4653_v7 }
 0x36b   : > { %v6060_v13 = vpack.c.bf16 %v5548_v11, %v5548_v11  ;;  %v5677_v15 = vpack.c.bf16 %v5165_v12, %v5165_v12  ;;  %v5293_v16 = vsel %vm4269_vm15, %v3317_v5, %v4781_v9 }
 0x36c   : > { %6445 = vst.msk [vmem:[%s8388_s29 + $0x564] sm:$0xf] %vm6099_vm5, %v5932_v10  ;;  %v5805_v17 = vpack.c.bf16 %v5293_v16, %v5293_v16  ;;  %v3636_v18 = vpop.f32.mrf.mxu2  ;;  %v3956_v19 = vpop.f32.mrf.mxu3 }
 0x36d   : > { %6573 = vst.msk [vmem:[%s8388_s29 + $0x764] sm:$0xf] %vm6099_vm5, %v6060_v13  ;;  %v3637_v20 = vadd.f32 %v9693_v52, %v3636_v18  ;;  %v3957_v40 = vadd.f32 %v9693_v52, %v3956_v19  ;;  %v2998_v21 = vpop.f32.mrf.mxu0  ;;  %v3318_v22 = vpop.f32.mrf.mxu1 }
 0x36e   : > { %6190 = vst.msk [vmem:[%s8388_s29 + $0x168] sm:$0xf] %vm6099_vm5, %v5677_v15  ;;  %v2999_v23 = vadd.f32 %v9693_v52, %v2998_v21  ;;  %v3319_v24 = vadd.f32 %v9693_v52, %v3318_v22  ;;  %v8086_v21 = vld [vmem:[%s8302_s24 + $0x3b8] sm:$0xff] }
 0x36f   : > { %6318 = vst.msk [vmem:[%s8388_s29 + $0x368] sm:$0xf] %vm6099_vm5, %v5805_v17  ;;  %vm4397_vm0 = vcmp.ge.f32.partialorder %v3637_v20, 0.0  ;;  %v4909_v25 = vmul.f32 0.2, %v3637_v20  ;;  %vm4525_vm1 = vcmp.ge.f32.partialorder %v3957_v40, 0.0 }
 0x370   : > { %v5037_v26 = vmul.f32 0.2, %v3957_v40  ;;  %vm4142_vm3 = vcmp.ge.f32.partialorder %v2999_v23, 0.0  ;;  %v4654_v27 = vmul.f32 0.2, %v2999_v23  ;;  %vm4270_vm4 = vcmp.ge.f32.partialorder %v3319_v24, 0.0 }
 0x371   : > { %v5421_v28 = vsel %vm4397_vm0, %v3637_v20, %v4909_v25  ;;  %v4782_v30 = vmul.f32 0.2, %v3319_v24 }
 0x372   : > { %v5933_v31 = vpack.c.bf16 %v5421_v28, %v5421_v28  ;;  %v5549_v3 = vsel %vm4525_vm1, %v3957_v40, %v5037_v26  ;;  %v5166_v32 = vsel %vm4142_vm3, %v2999_v23, %v4654_v27  ;;  %v8022_v40 = vld [vmem:[%s8302_s24 + $0x1b8] sm:$0xff] }
 0x373   : > { %v6061_v33 = vpack.c.bf16 %v5549_v3, %v5549_v3  ;;  %v5678_v34 = vpack.c.bf16 %v5166_v32, %v5166_v32  ;;  %v5294_v35 = vsel %vm4270_vm4, %v3319_v24, %v4782_v30  ;;  %v8150_v26 = vld [vmem:[%s8302_s24 + $0x5b8] sm:$0xff] }
 0x374   : > { %6446 = vst.msk [vmem:[%s8388_s29 + $0x568] sm:$0xf] %vm6099_vm5, %v5933_v31  ;;  %v5806_v36 = vpack.c.bf16 %v5294_v35, %v5294_v35  ;;  %v3638_v37 = vpop.f32.mrf.mxu2  ;;  %v3958_v38 = vpop.f32.mrf.mxu3  ;;  %v8214_v27 = vld [vmem:[%s8302_s24 + $0x7b8] sm:$0xff] }
 0x375   : > { %6574 = vst.msk [vmem:[%s8388_s29 + $0x768] sm:$0xf] %vm6099_vm5, %v6061_v33  ;;  %v3639_v43 = vadd.f32 %v9693_v52, %v3638_v37  ;;  %v3959_v14 = vadd.f32 %v9693_v52, %v3958_v38  ;;  %v3001_v44 = vpop.f32.mrf.mxu0  ;;  %v3321_v45 = vpop.f32.mrf.mxu1 }
 0x376   : > { %6191 = vst.msk [vmem:[%s8388_s29 + $0x16c] sm:$0xf] %vm6099_vm5, %v5678_v34  ;;  %v3002_v48 = vadd.f32 %v9693_v52, %v3001_v44  ;;  %v3322_v49 = vadd.f32 %v9693_v52, %v3321_v45 }
 0x377   : > { %6319 = vst.msk [vmem:[%s8388_s29 + $0x36c] sm:$0xf] %vm6099_vm5, %v5806_v36  ;;  %vm4398_vm6 = vcmp.ge.f32.partialorder %v3639_v43, 0.0  ;;  %v4910_v50 = vmul.f32 0.2, %v3639_v43  ;;  %vm4526_vm7 = vcmp.ge.f32.partialorder %v3959_v14, 0.0 }
 0x378   : > { %v5038_v51 = vmul.f32 0.2, %v3959_v14  ;;  %vm4143_vm8 = vcmp.ge.f32.partialorder %v3002_v48, 0.0  ;;  %v4655_v53 = vmul.f32 0.2, %v3002_v48  ;;  %vm4271_vm9 = vcmp.ge.f32.partialorder %v3322_v49, 0.0  ;;  %7763 = vmatmul.msk.bf16.gmra.mxu0 %vm1986_vm2, %v8021_v39  ;;  %7827 = vmatmul.msk.bf16.gmra.mxu1 %vm1986_vm2, %v8085_v42 }
 0x379   : > { %v5422_v54 = vsel %vm4398_vm6, %v3639_v43, %v4910_v50  ;;  %v4783_v55 = vmul.f32 0.2, %v3322_v49  ;;  %7891 = vmatmul.msk.bf16.gmra.mxu2 %vm1986_vm2, %v8149_v46  ;;  %7955 = vmatmul.msk.bf16.gmra.mxu3 %vm1986_vm2, %v8213_v47 }
 0x37a   : > { %v5934_v56 = vpack.c.bf16 %v5422_v54, %v5422_v54  ;;  %v5550_v57 = vsel %vm4526_vm7, %v3959_v14, %v5038_v51  ;;  %v5167_v58 = vsel %vm4143_vm8, %v3002_v48, %v4655_v53 }
 0x37b   : > { %v6062_v29 = vpack.c.bf16 %v5550_v57, %v5550_v57  ;;  %v5679_v59 = vpack.c.bf16 %v5167_v58, %v5167_v58  ;;  %v5295_v60 = vsel %vm4271_vm9, %v3322_v49, %v4783_v55 }
 0x37c   : > { %6447 = vst.msk [vmem:[%s8388_s29 + $0x56c] sm:$0xf] %vm6099_vm5, %v5934_v56  ;;  %v5807_v61 = vpack.c.bf16 %v5295_v60, %v5295_v60  ;;  %v3641_v62 = vpop.f32.mrf.mxu2  ;;  %v3961_v63 = vpop.f32.mrf.mxu3 }
 0x37d   : > { %6575 = vst.msk [vmem:[%s8388_s29 + $0x76c] sm:$0xf] %vm6099_vm5, %v6062_v29  ;;  %v3642_v0 = vadd.f32 %v9693_v52, %v3641_v62  ;;  %v3962_v1 = vadd.f32 %v9693_v52, %v3961_v63  ;;  %v3003_v2 = vpop.f32.mrf.mxu0  ;;  %v3323_v4 = vpop.f32.mrf.mxu1 }
 0x37e   : > { %6192 = vst.msk [vmem:[%s8388_s29 + $0x170] sm:$0xf] %vm6099_vm5, %v5679_v59  ;;  %v3004_v5 = vadd.f32 %v9693_v52, %v3003_v2  ;;  %v3324_v41 = vadd.f32 %v9693_v52, %v3323_v4  ;;  %v8087_v2 = vld [vmem:[%s8302_s24 + $0x3c0] sm:$0xff] }
 0x37f   : > { %6320 = vst.msk [vmem:[%s8388_s29 + $0x370] sm:$0xf] %vm6099_vm5, %v5807_v61  ;;  %vm4399_vm10 = vcmp.ge.f32.partialorder %v3642_v0, 0.0  ;;  %v4911_v6 = vmul.f32 0.2, %v3642_v0  ;;  %vm4527_vm11 = vcmp.ge.f32.partialorder %v3962_v1, 0.0 }
 0x380   : > { %v5039_v7 = vmul.f32 0.2, %v3962_v1  ;;  %vm4144_vm12 = vcmp.ge.f32.partialorder %v3004_v5, 0.0  ;;  %v4656_v8 = vmul.f32 0.2, %v3004_v5  ;;  %vm4272_vm13 = vcmp.ge.f32.partialorder %v3324_v41, 0.0 }
 0x381   : > { %v5423_v9 = vsel %vm4399_vm10, %v3642_v0, %v4911_v6  ;;  %v4784_v10 = vmul.f32 0.2, %v3324_v41 }
 0x382   : > { %v5935_v11 = vpack.c.bf16 %v5423_v9, %v5423_v9  ;;  %v5551_v12 = vsel %vm4527_vm11, %v3962_v1, %v5039_v7  ;;  %v5168_v13 = vsel %vm4144_vm12, %v3004_v5, %v4656_v8  ;;  %v8023_v1 = vld [vmem:[%s8302_s24 + $0x1c0] sm:$0xff] }
 0x383   : > { %v6063_v15 = vpack.c.bf16 %v5551_v12, %v5551_v12  ;;  %v5680_v16 = vpack.c.bf16 %v5168_v13, %v5168_v13  ;;  %v5296_v17 = vsel %vm4272_vm13, %v3324_v41, %v4784_v10  ;;  %v8151_v7 = vld [vmem:[%s8302_s24 + $0x5c0] sm:$0xff] }
 0x384   : > { %6448 = vst.msk [vmem:[%s8388_s29 + $0x570] sm:$0xf] %vm6099_vm5, %v5935_v11  ;;  %v5808_v18 = vpack.c.bf16 %v5296_v17, %v5296_v17  ;;  %v3643_v19 = vpop.f32.mrf.mxu2  ;;  %v3963_v20 = vpop.f32.mrf.mxu3  ;;  %v8215_v8 = vld [vmem:[%s8302_s24 + $0x7c0] sm:$0xff] }
 0x385   : > { %6576 = vst.msk [vmem:[%s8388_s29 + $0x770] sm:$0xf] %vm6099_vm5, %v6063_v15  ;;  %v3644_v22 = vadd.f32 %v9693_v52, %v3643_v19  ;;  %v3964_v23 = vadd.f32 %v9693_v52, %v3963_v20  ;;  %v3006_v24 = vpop.f32.mrf.mxu0  ;;  %v3326_v25 = vpop.f32.mrf.mxu1 }
 0x386   : > { %6193 = vst.msk [vmem:[%s8388_s29 + $0x174] sm:$0xf] %vm6099_vm5, %v5680_v16  ;;  %v3007_v28 = vadd.f32 %v9693_v52, %v3006_v24  ;;  %v3327_v30 = vadd.f32 %v9693_v52, %v3326_v25  ;;  %v9954_v24 = vld [vmem:[%s10404_s2] ss:$0 sm:$0xff] }
 0x387   : > { %6321 = vst.msk [vmem:[%s8388_s29 + $0x374] sm:$0xf] %vm6099_vm5, %v5808_v18  ;;  %vm4400_vm14 = vcmp.ge.f32.partialorder %v3644_v22, 0.0  ;;  %v4912_v31 = vmul.f32 0.2, %v3644_v22  ;;  %vm4528_vm15 = vcmp.ge.f32.partialorder %v3964_v23, 0.0 }
 0x388   : > { %v5040_v3 = vmul.f32 0.2, %v3964_v23  ;;  %vm4145_vm0 = vcmp.ge.f32.partialorder %v3007_v28, 0.0  ;;  %v4657_v32 = vmul.f32 0.2, %v3007_v28  ;;  %vm4273_vm1 = vcmp.ge.f32.partialorder %v3327_v30, 0.0  ;;  %7764 = vmatmul.msk.bf16.gmra.mxu0 %vm1986_vm2, %v8022_v40  ;;  %7828 = vmatmul.msk.bf16.gmra.mxu1 %vm1986_vm2, %v8086_v21 }
 0x389   : > { %v5424_v33 = vsel %vm4400_vm14, %v3644_v22, %v4912_v31  ;;  %v4785_v34 = vmul.f32 0.2, %v3327_v30  ;;  %7892 = vmatmul.msk.bf16.gmra.mxu2 %vm1986_vm2, %v8150_v26  ;;  %7956 = vmatmul.msk.bf16.gmra.mxu3 %vm1986_vm2, %v8214_v27 }
 0x38a   : > { %v5936_v35 = vpack.c.bf16 %v5424_v33, %v5424_v33  ;;  %v5552_v36 = vsel %vm4528_vm15, %v3964_v23, %v5040_v3  ;;  %v5169_v37 = vsel %vm4145_vm0, %v3007_v28, %v4657_v32 }
 0x38b   : > { %v6064_v38 = vpack.c.bf16 %v5552_v36, %v5552_v36  ;;  %v5681_v39 = vpack.c.bf16 %v5169_v37, %v5169_v37  ;;  %v5297_v42 = vsel %vm4273_vm1, %v3327_v30, %v4785_v34 }
 0x38c   : > { %6449 = vst.msk [vmem:[%s8388_s29 + $0x574] sm:$0xf] %vm6099_vm5, %v5936_v35  ;;  %v5809_v43 = vpack.c.bf16 %v5297_v42, %v5297_v42  ;;  %v3646_v14 = vpop.f32.mrf.mxu2  ;;  %v3966_v44 = vpop.f32.mrf.mxu3 }
 0x38d   : > { %6577 = vst.msk [vmem:[%s8388_s29 + $0x774] sm:$0xf] %vm6099_vm5, %v6064_v38  ;;  %v3647_v45 = vadd.f32 %v9693_v52, %v3646_v14  ;;  %v3967_v46 = vadd.f32 %v9693_v52, %v3966_v44  ;;  %v3008_v47 = vpop.f32.mrf.mxu0  ;;  %v3328_v48 = vpop.f32.mrf.mxu1 }
 0x38e   : > { %6194 = vst.msk [vmem:[%s8388_s29 + $0x178] sm:$0xf] %vm6099_vm5, %v5681_v39  ;;  %v3009_v49 = vadd.f32 %v9693_v52, %v3008_v47  ;;  %v3329_v50 = vadd.f32 %v9693_v52, %v3328_v48  ;;  %v8088_v47 = vld [vmem:[%s8302_s24 + $0x3c8] sm:$0xff] }
 0x38f   : > { %6322 = vst.msk [vmem:[%s8388_s29 + $0x378] sm:$0xf] %vm6099_vm5, %v5809_v43  ;;  %vm4401_vm3 = vcmp.ge.f32.partialorder %v3647_v45, 0.0  ;;  %v4913_v51 = vmul.f32 0.2, %v3647_v45  ;;  %vm4529_vm4 = vcmp.ge.f32.partialorder %v3967_v46, 0.0 }
 0x390   : > { %v5041_v53 = vmul.f32 0.2, %v3967_v46  ;;  %vm4146_vm6 = vcmp.ge.f32.partialorder %v3009_v49, 0.0  ;;  %v4658_v54 = vmul.f32 0.2, %v3009_v49  ;;  %vm4274_vm7 = vcmp.ge.f32.partialorder %v3329_v50, 0.0 }
 0x391   : > { %v5425_v55 = vsel %vm4401_vm3, %v3647_v45, %v4913_v51  ;;  %v4786_v56 = vmul.f32 0.2, %v3329_v50 }
 0x392   : > { %v5937_v57 = vpack.c.bf16 %v5425_v55, %v5425_v55  ;;  %v5553_v58 = vsel %vm4529_vm4, %v3967_v46, %v5041_v53  ;;  %v5170_v29 = vsel %vm4146_vm6, %v3009_v49, %v4658_v54  ;;  %v8024_v46 = vld [vmem:[%s8302_s24 + $0x1c8] sm:$0xff] }
 0x393   : > { %v6065_v59 = vpack.c.bf16 %v5553_v58, %v5553_v58  ;;  %v5682_v60 = vpack.c.bf16 %v5170_v29, %v5170_v29  ;;  %v5298_v61 = vsel %vm4274_vm7, %v3329_v50, %v4786_v56  ;;  %v8152_v53 = vld [vmem:[%s8302_s24 + $0x5c8] sm:$0xff] }
 0x394   : > { %6450 = vst.msk [vmem:[%s8388_s29 + $0x578] sm:$0xf] %vm6099_vm5, %v5937_v57  ;;  %v5810_v62 = vpack.c.bf16 %v5298_v61, %v5298_v61  ;;  %v3648_v63 = vpop.f32.mrf.mxu2  ;;  %v3968_v0 = vpop.f32.mrf.mxu3  ;;  %v8216_v54 = vld [vmem:[%s8302_s24 + $0x7c8] sm:$0xff] }
 0x395   : > { %6578 = vst.msk [vmem:[%s8388_s29 + $0x778] sm:$0xf] %vm6099_vm5, %v6065_v59  ;;  %v3649_v4 = vadd.f32 %v9693_v52, %v3648_v63  ;;  %v3969_v5 = vadd.f32 %v9693_v52, %v3968_v0  ;;  %v3011_v41 = vpop.f32.mrf.mxu0  ;;  %v3331_v6 = vpop.f32.mrf.mxu1 }
 0x396   : > { %6195 = vst.msk [vmem:[%s8388_s29 + $0x17c] sm:$0xf] %vm6099_vm5, %v5682_v60  ;;  %v3012_v9 = vadd.f32 %v9693_v52, %v3011_v41  ;;  %v3332_v10 = vadd.f32 %v9693_v52, %v3331_v6 }
 0x397   : > { %6323 = vst.msk [vmem:[%s8388_s29 + $0x37c] sm:$0xf] %vm6099_vm5, %v5810_v62  ;;  %vm4402_vm8 = vcmp.ge.f32.partialorder %v3649_v4, 0.0  ;;  %v4914_v11 = vmul.f32 0.2, %v3649_v4  ;;  %vm4530_vm9 = vcmp.ge.f32.partialorder %v3969_v5, 0.0 }
 0x398   : > { %v5042_v12 = vmul.f32 0.2, %v3969_v5  ;;  %vm4147_vm10 = vcmp.ge.f32.partialorder %v3012_v9, 0.0  ;;  %v4659_v13 = vmul.f32 0.2, %v3012_v9  ;;  %vm4275_vm11 = vcmp.ge.f32.partialorder %v3332_v10, 0.0  ;;  %7765 = vmatmul.msk.bf16.gmra.mxu0 %vm1986_vm2, %v8023_v1  ;;  %7829 = vmatmul.msk.bf16.gmra.mxu1 %vm1986_vm2, %v8087_v2 }
 0x399   : > { %v5426_v15 = vsel %vm4402_vm8, %v3649_v4, %v4914_v11  ;;  %v4787_v16 = vmul.f32 0.2, %v3332_v10  ;;  %7893 = vmatmul.msk.bf16.gmra.mxu2 %vm1986_vm2, %v8151_v7  ;;  %7957 = vmatmul.msk.bf16.gmra.mxu3 %vm1986_vm2, %v8215_v8 }
 0x39a   : > { %v5938_v52 = vpack.c.bf16 %v5426_v15, %v5426_v15  ;;  %v5554_v17 = vsel %vm4530_vm9, %v3969_v5, %v5042_v12  ;;  %v5171_v18 = vsel %vm4147_vm10, %v3012_v9, %v4659_v13 }
 0x39b   : > { %v6066_v19 = vpack.c.bf16 %v5554_v17, %v5554_v17  ;;  %v5683_v20 = vpack.c.bf16 %v5171_v18, %v5171_v18  ;;  %v5299_v40 = vsel %vm4275_vm11, %v3332_v10, %v4787_v16 }
 0x39c   : > { %6451 = vst.msk [vmem:[%s8388_s29 + $0x57c] sm:$0xf] %vm6099_vm5, %v5938_v52  ;;  %v5811_v21 = vpack.c.bf16 %v5299_v40, %v5299_v40  ;;  %v3651_v22 = vpop.f32.mrf.mxu2  ;;  %v3971_v23 = vpop.f32.mrf.mxu3 }
 0x39d   : > { %6579 = vst.msk [vmem:[%s8388_s29 + $0x77c] sm:$0xf] %vm6099_vm5, %v6066_v19  ;;  %v3652_v25 = vadd.f32 %v9954_v24, %v3651_v22  ;;  %v3972_v26 = vadd.f32 %v9954_v24, %v3971_v23  ;;  %v3013_v27 = vpop.f32.mrf.mxu0  ;;  %v3333_v28 = vpop.f32.mrf.mxu1 }
 0x39e   : > { %6196 = vst.msk [vmem:[%s8388_s29 + $0x180] sm:$0xf] %vm6099_vm5, %v5683_v20  ;;  %v3014_v30 = vadd.f32 %v9954_v24, %v3013_v27  ;;  %v3334_v31 = vadd.f32 %v9954_v24, %v3333_v28  ;;  %v8089_v27 = vld [vmem:[%s8302_s24 + $0x3d0] sm:$0xff] }
 0x39f   : > { %6324 = vst.msk [vmem:[%s8388_s29 + $0x380] sm:$0xf] %vm6099_vm5, %v5811_v21  ;;  %vm4403_vm12 = vcmp.ge.f32.partialorder %v3652_v25, 0.0  ;;  %v4915_v3 = vmul.f32 0.2, %v3652_v25  ;;  %vm4531_vm13 = vcmp.ge.f32.partialorder %v3972_v26, 0.0 }
 0x3a0   : > { %v5043_v32 = vmul.f32 0.2, %v3972_v26  ;;  %vm4148_vm14 = vcmp.ge.f32.partialorder %v3014_v30, 0.0  ;;  %v4660_v33 = vmul.f32 0.2, %v3014_v30  ;;  %vm4276_vm15 = vcmp.ge.f32.partialorder %v3334_v31, 0.0 }
 0x3a1   : > { %v5427_v34 = vsel %vm4403_vm12, %v3652_v25, %v4915_v3  ;;  %v4788_v35 = vmul.f32 0.2, %v3334_v31 }
 0x3a2   : > { %v5939_v36 = vpack.c.bf16 %v5427_v34, %v5427_v34  ;;  %v5555_v37 = vsel %vm4531_vm13, %v3972_v26, %v5043_v32  ;;  %v5172_v38 = vsel %vm4148_vm14, %v3014_v30, %v4660_v33  ;;  %v8025_v26 = vld [vmem:[%s8302_s24 + $0x1d0] sm:$0xff] }
 0x3a3   : > { %v6067_v39 = vpack.c.bf16 %v5555_v37, %v5555_v37  ;;  %v5684_v42 = vpack.c.bf16 %v5172_v38, %v5172_v38  ;;  %v5300_v43 = vsel %vm4276_vm15, %v3334_v31, %v4788_v35  ;;  %v8153_v32 = vld [vmem:[%s8302_s24 + $0x5d0] sm:$0xff] }
 0x3a4   : > { %6452 = vst.msk [vmem:[%s8388_s29 + $0x580] sm:$0xf] %vm6099_vm5, %v5939_v36  ;;  %v5812_v14 = vpack.c.bf16 %v5300_v43, %v5300_v43  ;;  %v3653_v44 = vpop.f32.mrf.mxu2  ;;  %v3973_v45 = vpop.f32.mrf.mxu3  ;;  %v8217_v33 = vld [vmem:[%s8302_s24 + $0x7d0] sm:$0xff] }
 0x3a5   : > { %6580 = vst.msk [vmem:[%s8388_s29 + $0x780] sm:$0xf] %vm6099_vm5, %v6067_v39  ;;  %v3654_v48 = vadd.f32 %v9954_v24, %v3653_v44  ;;  %v3974_v49 = vadd.f32 %v9954_v24, %v3973_v45  ;;  %v3016_v50 = vpop.f32.mrf.mxu0  ;;  %v3336_v51 = vpop.f32.mrf.mxu1 }
 0x3a6   : > { %6197 = vst.msk [vmem:[%s8388_s29 + $0x184] sm:$0xf] %vm6099_vm5, %v5684_v42  ;;  %v3017_v55 = vadd.f32 %v9954_v24, %v3016_v50  ;;  %v3337_v56 = vadd.f32 %v9954_v24, %v3336_v51 }
 0x3a7   : > { %6325 = vst.msk [vmem:[%s8388_s29 + $0x384] sm:$0xf] %vm6099_vm5, %v5812_v14  ;;  %vm4404_vm0 = vcmp.ge.f32.partialorder %v3654_v48, 0.0  ;;  %v4916_v57 = vmul.f32 0.2, %v3654_v48  ;;  %vm4532_vm1 = vcmp.ge.f32.partialorder %v3974_v49, 0.0 }
 0x3a8   : > { %v5044_v58 = vmul.f32 0.2, %v3974_v49  ;;  %vm4149_vm3 = vcmp.ge.f32.partialorder %v3017_v55, 0.0  ;;  %v4661_v29 = vmul.f32 0.2, %v3017_v55  ;;  %vm4277_vm4 = vcmp.ge.f32.partialorder %v3337_v56, 0.0  ;;  %7766 = vmatmul.msk.bf16.gmra.mxu0 %vm1986_vm2, %v8024_v46  ;;  %7830 = vmatmul.msk.bf16.gmra.mxu1 %vm1986_vm2, %v8088_v47 }
 0x3a9   : > { %v5428_v59 = vsel %vm4404_vm0, %v3654_v48, %v4916_v57  ;;  %v4789_v60 = vmul.f32 0.2, %v3337_v56  ;;  %7894 = vmatmul.msk.bf16.gmra.mxu2 %vm1986_vm2, %v8152_v53  ;;  %7958 = vmatmul.msk.bf16.gmra.mxu3 %vm1986_vm2, %v8216_v54 }
 0x3aa   : > { %v5940_v61 = vpack.c.bf16 %v5428_v59, %v5428_v59  ;;  %v5556_v62 = vsel %vm4532_vm1, %v3974_v49, %v5044_v58  ;;  %v5173_v63 = vsel %vm4149_vm3, %v3017_v55, %v4661_v29 }
 0x3ab   : > { %v6068_v0 = vpack.c.bf16 %v5556_v62, %v5556_v62  ;;  %v5685_v1 = vpack.c.bf16 %v5173_v63, %v5173_v63  ;;  %v5301_v2 = vsel %vm4277_vm4, %v3337_v56, %v4789_v60 }
 0x3ac   : > { %6453 = vst.msk [vmem:[%s8388_s29 + $0x584] sm:$0xf] %vm6099_vm5, %v5940_v61  ;;  %v5813_v4 = vpack.c.bf16 %v5301_v2, %v5301_v2  ;;  %v3656_v5 = vpop.f32.mrf.mxu2  ;;  %v3976_v41 = vpop.f32.mrf.mxu3 }
 0x3ad   : > { %6581 = vst.msk [vmem:[%s8388_s29 + $0x784] sm:$0xf] %vm6099_vm5, %v6068_v0  ;;  %v3657_v6 = vadd.f32 %v9954_v24, %v3656_v5  ;;  %v3977_v7 = vadd.f32 %v9954_v24, %v3976_v41  ;;  %v3018_v8 = vpop.f32.mrf.mxu0  ;;  %v3338_v9 = vpop.f32.mrf.mxu1 }
 0x3ae   : > { %6198 = vst.msk [vmem:[%s8388_s29 + $0x188] sm:$0xf] %vm6099_vm5, %v5685_v1  ;;  %v3019_v10 = vadd.f32 %v9954_v24, %v3018_v8  ;;  %v3339_v11 = vadd.f32 %v9954_v24, %v3338_v9  ;;  %v8090_v8 = vld [vmem:[%s8302_s24 + $0x3d8] sm:$0xff] }
 0x3af   : > { %6326 = vst.msk [vmem:[%s8388_s29 + $0x388] sm:$0xf] %vm6099_vm5, %v5813_v4  ;;  %vm4405_vm6 = vcmp.ge.f32.partialorder %v3657_v6, 0.0  ;;  %v4917_v12 = vmul.f32 0.2, %v3657_v6  ;;  %vm4533_vm7 = vcmp.ge.f32.partialorder %v3977_v7, 0.0 }
 0x3b0   : > { %v5045_v13 = vmul.f32 0.2, %v3977_v7  ;;  %vm4150_vm8 = vcmp.ge.f32.partialorder %v3019_v10, 0.0  ;;  %v4662_v15 = vmul.f32 0.2, %v3019_v10  ;;  %vm4278_vm9 = vcmp.ge.f32.partialorder %v3339_v11, 0.0 }
 0x3b1   : > { %v5429_v16 = vsel %vm4405_vm6, %v3657_v6, %v4917_v12  ;;  %v4790_v52 = vmul.f32 0.2, %v3339_v11 }
 0x3b2   : > { %v5941_v17 = vpack.c.bf16 %v5429_v16, %v5429_v16  ;;  %v5557_v18 = vsel %vm4533_vm7, %v3977_v7, %v5045_v13  ;;  %v5174_v19 = vsel %vm4150_vm8, %v3019_v10, %v4662_v15  ;;  %v8026_v7 = vld [vmem:[%s8302_s24 + $0x1d8] sm:$0xff] }
 0x3b3   : > { %v6069_v20 = vpack.c.bf16 %v5557_v18, %v5557_v18  ;;  %v5686_v40 = vpack.c.bf16 %v5174_v19, %v5174_v19  ;;  %v5302_v21 = vsel %vm4278_vm9, %v3339_v11, %v4790_v52  ;;  %v8154_v13 = vld [vmem:[%s8302_s24 + $0x5d8] sm:$0xff] }
 0x3b4   : > { %6454 = vst.msk [vmem:[%s8388_s29 + $0x588] sm:$0xf] %vm6099_vm5, %v5941_v17  ;;  %v5814_v22 = vpack.c.bf16 %v5302_v21, %v5302_v21  ;;  %v3658_v23 = vpop.f32.mrf.mxu2  ;;  %v3978_v25 = vpop.f32.mrf.mxu3  ;;  %v8218_v15 = vld [vmem:[%s8302_s24 + $0x7d8] sm:$0xff] }
 0x3b5   : > { %6582 = vst.msk [vmem:[%s8388_s29 + $0x788] sm:$0xf] %vm6099_vm5, %v6069_v20  ;;  %v3659_v28 = vadd.f32 %v9954_v24, %v3658_v23  ;;  %v3979_v30 = vadd.f32 %v9954_v24, %v3978_v25  ;;  %v3021_v31 = vpop.f32.mrf.mxu0  ;;  %v3341_v3 = vpop.f32.mrf.mxu1 }
 0x3b6   : > { %6199 = vst.msk [vmem:[%s8388_s29 + $0x18c] sm:$0xf] %vm6099_vm5, %v5686_v40  ;;  %v3022_v34 = vadd.f32 %v9954_v24, %v3021_v31  ;;  %v3342_v35 = vadd.f32 %v9954_v24, %v3341_v3 }
 0x3b7   : > { %6327 = vst.msk [vmem:[%s8388_s29 + $0x38c] sm:$0xf] %vm6099_vm5, %v5814_v22  ;;  %vm4406_vm10 = vcmp.ge.f32.partialorder %v3659_v28, 0.0  ;;  %v4918_v36 = vmul.f32 0.2, %v3659_v28  ;;  %vm4534_vm11 = vcmp.ge.f32.partialorder %v3979_v30, 0.0 }
 0x3b8   : > { %v5046_v37 = vmul.f32 0.2, %v3979_v30  ;;  %vm4151_vm12 = vcmp.ge.f32.partialorder %v3022_v34, 0.0  ;;  %v4663_v38 = vmul.f32 0.2, %v3022_v34  ;;  %vm4279_vm13 = vcmp.ge.f32.partialorder %v3342_v35, 0.0  ;;  %7767 = vmatmul.msk.bf16.gmra.mxu0 %vm1986_vm2, %v8025_v26  ;;  %7831 = vmatmul.msk.bf16.gmra.mxu1 %vm1986_vm2, %v8089_v27 }
 0x3b9   : > { %v5430_v39 = vsel %vm4406_vm10, %v3659_v28, %v4918_v36  ;;  %v4791_v42 = vmul.f32 0.2, %v3342_v35  ;;  %7895 = vmatmul.msk.bf16.gmra.mxu2 %vm1986_vm2, %v8153_v32  ;;  %7959 = vmatmul.msk.bf16.gmra.mxu3 %vm1986_vm2, %v8217_v33 }
 0x3ba   : > { %v5942_v43 = vpack.c.bf16 %v5430_v39, %v5430_v39  ;;  %v5558_v14 = vsel %vm4534_vm11, %v3979_v30, %v5046_v37  ;;  %v5175_v44 = vsel %vm4151_vm12, %v3022_v34, %v4663_v38 }
 0x3bb   : > { %v6070_v45 = vpack.c.bf16 %v5558_v14, %v5558_v14  ;;  %v5687_v46 = vpack.c.bf16 %v5175_v44, %v5175_v44  ;;  %v5303_v47 = vsel %vm4279_vm13, %v3342_v35, %v4791_v42 }
 0x3bc   : > { %6455 = vst.msk [vmem:[%s8388_s29 + $0x58c] sm:$0xf] %vm6099_vm5, %v5942_v43  ;;  %v5815_v48 = vpack.c.bf16 %v5303_v47, %v5303_v47  ;;  %v3661_v49 = vpop.f32.mrf.mxu2  ;;  %v3981_v50 = vpop.f32.mrf.mxu3 }
 0x3bd   : > { %6583 = vst.msk [vmem:[%s8388_s29 + $0x78c] sm:$0xf] %vm6099_vm5, %v6070_v45  ;;  %v3662_v51 = vadd.f32 %v9954_v24, %v3661_v49  ;;  %v3982_v53 = vadd.f32 %v9954_v24, %v3981_v50  ;;  %v3023_v54 = vpop.f32.mrf.mxu0  ;;  %v3343_v55 = vpop.f32.mrf.mxu1 }
 0x3be   : > { %6200 = vst.msk [vmem:[%s8388_s29 + $0x190] sm:$0xf] %vm6099_vm5, %v5687_v46  ;;  %v3024_v56 = vadd.f32 %v9954_v24, %v3023_v54  ;;  %v3344_v57 = vadd.f32 %v9954_v24, %v3343_v55  ;;  %v8091_v54 = vld [vmem:[%s8302_s24 + $0x3e0] sm:$0xff] }
 0x3bf   : > { %6328 = vst.msk [vmem:[%s8388_s29 + $0x390] sm:$0xf] %vm6099_vm5, %v5815_v48  ;;  %vm4407_vm14 = vcmp.ge.f32.partialorder %v3662_v51, 0.0  ;;  %v4919_v58 = vmul.f32 0.2, %v3662_v51  ;;  %vm4535_vm15 = vcmp.ge.f32.partialorder %v3982_v53, 0.0 }
 0x3c0   : > { %v5047_v29 = vmul.f32 0.2, %v3982_v53  ;;  %vm4152_vm0 = vcmp.ge.f32.partialorder %v3024_v56, 0.0  ;;  %v4664_v59 = vmul.f32 0.2, %v3024_v56  ;;  %vm4280_vm1 = vcmp.ge.f32.partialorder %v3344_v57, 0.0 }
 0x3c1   : > { %v5431_v60 = vsel %vm4407_vm14, %v3662_v51, %v4919_v58  ;;  %v4792_v61 = vmul.f32 0.2, %v3344_v57 }
 0x3c2   : > { %v5943_v62 = vpack.c.bf16 %v5431_v60, %v5431_v60  ;;  %v5559_v63 = vsel %vm4535_vm15, %v3982_v53, %v5047_v29  ;;  %v5176_v0 = vsel %vm4152_vm0, %v3024_v56, %v4664_v59  ;;  %v8027_v53 = vld [vmem:[%s8302_s24 + $0x1e0] sm:$0xff] }
 0x3c3   : > { %v6071_v1 = vpack.c.bf16 %v5559_v63, %v5559_v63  ;;  %v5688_v2 = vpack.c.bf16 %v5176_v0, %v5176_v0  ;;  %v5304_v4 = vsel %vm4280_vm1, %v3344_v57, %v4792_v61  ;;  %v8155_v29 = vld [vmem:[%s8302_s24 + $0x5e0] sm:$0xff] }
 0x3c4   : > { %6456 = vst.msk [vmem:[%s8388_s29 + $0x590] sm:$0xf] %vm6099_vm5, %v5943_v62  ;;  %v5816_v5 = vpack.c.bf16 %v5304_v4, %v5304_v4  ;;  %v3663_v41 = vpop.f32.mrf.mxu2  ;;  %v3983_v6 = vpop.f32.mrf.mxu3  ;;  %v8219_v59 = vld [vmem:[%s8302_s24 + $0x7e0] sm:$0xff] }
 0x3c5   : > { %6584 = vst.msk [vmem:[%s8388_s29 + $0x790] sm:$0xf] %vm6099_vm5, %v6071_v1  ;;  %v3664_v9 = vadd.f32 %v9954_v24, %v3663_v41  ;;  %v3984_v10 = vadd.f32 %v9954_v24, %v3983_v6  ;;  %v3026_v11 = vpop.f32.mrf.mxu0  ;;  %v3346_v12 = vpop.f32.mrf.mxu1 }
 0x3c6   : > { %6201 = vst.msk [vmem:[%s8388_s29 + $0x194] sm:$0xf] %vm6099_vm5, %v5688_v2  ;;  %v3027_v16 = vadd.f32 %v9954_v24, %v3026_v11  ;;  %v3347_v52 = vadd.f32 %v9954_v24, %v3346_v12 }
 0x3c7   : > { %6329 = vst.msk [vmem:[%s8388_s29 + $0x394] sm:$0xf] %vm6099_vm5, %v5816_v5  ;;  %vm4408_vm3 = vcmp.ge.f32.partialorder %v3664_v9, 0.0  ;;  %v4920_v17 = vmul.f32 0.2, %v3664_v9  ;;  %vm4536_vm4 = vcmp.ge.f32.partialorder %v3984_v10, 0.0 }
 0x3c8   : > { %v5048_v18 = vmul.f32 0.2, %v3984_v10  ;;  %vm4153_vm6 = vcmp.ge.f32.partialorder %v3027_v16, 0.0  ;;  %v4665_v19 = vmul.f32 0.2, %v3027_v16  ;;  %vm4281_vm7 = vcmp.ge.f32.partialorder %v3347_v52, 0.0  ;;  %7768 = vmatmul.msk.bf16.gmra.mxu0 %vm1986_vm2, %v8026_v7  ;;  %7832 = vmatmul.msk.bf16.gmra.mxu1 %vm1986_vm2, %v8090_v8 }
 0x3c9   : > { %v5432_v20 = vsel %vm4408_vm3, %v3664_v9, %v4920_v17  ;;  %v4793_v40 = vmul.f32 0.2, %v3347_v52  ;;  %7896 = vmatmul.msk.bf16.gmra.mxu2 %vm1986_vm2, %v8154_v13  ;;  %7960 = vmatmul.msk.bf16.gmra.mxu3 %vm1986_vm2, %v8218_v15 }
 0x3ca   : > { %v5944_v21 = vpack.c.bf16 %v5432_v20, %v5432_v20  ;;  %v5560_v22 = vsel %vm4536_vm4, %v3984_v10, %v5048_v18  ;;  %v5177_v23 = vsel %vm4153_vm6, %v3027_v16, %v4665_v19 }
 0x3cb   : > { %v6072_v25 = vpack.c.bf16 %v5560_v22, %v5560_v22  ;;  %v5689_v26 = vpack.c.bf16 %v5177_v23, %v5177_v23  ;;  %v5305_v27 = vsel %vm4281_vm7, %v3347_v52, %v4793_v40 }
 0x3cc   : > { %6457 = vst.msk [vmem:[%s8388_s29 + $0x594] sm:$0xf] %vm6099_vm5, %v5944_v21  ;;  %v5817_v28 = vpack.c.bf16 %v5305_v27, %v5305_v27  ;;  %v3666_v30 = vpop.f32.mrf.mxu2  ;;  %v3986_v31 = vpop.f32.mrf.mxu3 }
 0x3cd   : > { %6585 = vst.msk [vmem:[%s8388_s29 + $0x794] sm:$0xf] %vm6099_vm5, %v6072_v25  ;;  %v3667_v3 = vadd.f32 %v9954_v24, %v3666_v30  ;;  %v3987_v32 = vadd.f32 %v9954_v24, %v3986_v31  ;;  %v3028_v33 = vpop.f32.mrf.mxu0  ;;  %v3348_v34 = vpop.f32.mrf.mxu1 }
 0x3ce   : > { %6202 = vst.msk [vmem:[%s8388_s29 + $0x198] sm:$0xf] %vm6099_vm5, %v5689_v26  ;;  %v3029_v35 = vadd.f32 %v9954_v24, %v3028_v33  ;;  %v3349_v36 = vadd.f32 %v9954_v24, %v3348_v34  ;;  %v8092_v33 = vld [vmem:[%s8302_s24 + $0x3e8] sm:$0xff] }
 0x3cf   : > { %6330 = vst.msk [vmem:[%s8388_s29 + $0x398] sm:$0xf] %vm6099_vm5, %v5817_v28  ;;  %vm4409_vm8 = vcmp.ge.f32.partialorder %v3667_v3, 0.0  ;;  %v4921_v37 = vmul.f32 0.2, %v3667_v3  ;;  %vm4537_vm9 = vcmp.ge.f32.partialorder %v3987_v32, 0.0 }
 0x3d0   : > { %v5049_v38 = vmul.f32 0.2, %v3987_v32  ;;  %vm4154_vm10 = vcmp.ge.f32.partialorder %v3029_v35, 0.0  ;;  %v4666_v39 = vmul.f32 0.2, %v3029_v35  ;;  %vm4282_vm11 = vcmp.ge.f32.partialorder %v3349_v36, 0.0 }
 0x3d1   : > { %v5433_v42 = vsel %vm4409_vm8, %v3667_v3, %v4921_v37  ;;  %v4794_v43 = vmul.f32 0.2, %v3349_v36 }
 0x3d2   : > { %v5945_v14 = vpack.c.bf16 %v5433_v42, %v5433_v42  ;;  %v5561_v44 = vsel %vm4537_vm9, %v3987_v32, %v5049_v38  ;;  %v5178_v45 = vsel %vm4154_vm10, %v3029_v35, %v4666_v39  ;;  %v8028_v32 = vld [vmem:[%s8302_s24 + $0x1e8] sm:$0xff] }
 0x3d3   : > { %v6073_v46 = vpack.c.bf16 %v5561_v44, %v5561_v44  ;;  %v5690_v47 = vpack.c.bf16 %v5178_v45, %v5178_v45  ;;  %v5306_v48 = vsel %vm4282_vm11, %v3349_v36, %v4794_v43  ;;  %v8156_v38 = vld [vmem:[%s8302_s24 + $0x5e8] sm:$0xff] }
 0x3d4   : > { %6458 = vst.msk [vmem:[%s8388_s29 + $0x598] sm:$0xf] %vm6099_vm5, %v5945_v14  ;;  %v5818_v49 = vpack.c.bf16 %v5306_v48, %v5306_v48  ;;  %v3668_v50 = vpop.f32.mrf.mxu2  ;;  %v3988_v51 = vpop.f32.mrf.mxu3  ;;  %v8220_v39 = vld [vmem:[%s8302_s24 + $0x7e8] sm:$0xff] }
 0x3d5   : > { %6586 = vst.msk [vmem:[%s8388_s29 + $0x798] sm:$0xf] %vm6099_vm5, %v6073_v46  ;;  %v3669_v55 = vadd.f32 %v9954_v24, %v3668_v50  ;;  %v3989_v56 = vadd.f32 %v9954_v24, %v3988_v51  ;;  %v3031_v57 = vpop.f32.mrf.mxu0  ;;  %v3351_v58 = vpop.f32.mrf.mxu1 }
 0x3d6   : > { %6203 = vst.msk [vmem:[%s8388_s29 + $0x19c] sm:$0xf] %vm6099_vm5, %v5690_v47  ;;  %v3032_v60 = vadd.f32 %v9954_v24, %v3031_v57  ;;  %v3352_v61 = vadd.f32 %v9954_v24, %v3351_v58 }
 0x3d7   : > { %6331 = vst.msk [vmem:[%s8388_s29 + $0x39c] sm:$0xf] %vm6099_vm5, %v5818_v49  ;;  %vm4410_vm12 = vcmp.ge.f32.partialorder %v3669_v55, 0.0  ;;  %v4922_v62 = vmul.f32 0.2, %v3669_v55  ;;  %vm4538_vm13 = vcmp.ge.f32.partialorder %v3989_v56, 0.0 }
 0x3d8   : > { %v5050_v63 = vmul.f32 0.2, %v3989_v56  ;;  %vm4155_vm14 = vcmp.ge.f32.partialorder %v3032_v60, 0.0  ;;  %v4667_v0 = vmul.f32 0.2, %v3032_v60  ;;  %vm4283_vm15 = vcmp.ge.f32.partialorder %v3352_v61, 0.0  ;;  %7769 = vmatmul.msk.bf16.gmra.mxu0 %vm1986_vm2, %v8027_v53  ;;  %7833 = vmatmul.msk.bf16.gmra.mxu1 %vm1986_vm2, %v8091_v54 }
 0x3d9   : > { %v5434_v1 = vsel %vm4410_vm12, %v3669_v55, %v4922_v62  ;;  %v4795_v2 = vmul.f32 0.2, %v3352_v61  ;;  %7897 = vmatmul.msk.bf16.gmra.mxu2 %vm1986_vm2, %v8155_v29  ;;  %7961 = vmatmul.msk.bf16.gmra.mxu3 %vm1986_vm2, %v8219_v59 }
 0x3da   : > { %v5946_v4 = vpack.c.bf16 %v5434_v1, %v5434_v1  ;;  %v5562_v5 = vsel %vm4538_vm13, %v3989_v56, %v5050_v63  ;;  %v5179_v41 = vsel %vm4155_vm14, %v3032_v60, %v4667_v0 }
 0x3db   : > { %v6074_v6 = vpack.c.bf16 %v5562_v5, %v5562_v5  ;;  %v5691_v7 = vpack.c.bf16 %v5179_v41, %v5179_v41  ;;  %v5307_v8 = vsel %vm4283_vm15, %v3352_v61, %v4795_v2 }
 0x3dc   : > { %6459 = vst.msk [vmem:[%s8388_s29 + $0x59c] sm:$0xf] %vm6099_vm5, %v5946_v4  ;;  %v5819_v9 = vpack.c.bf16 %v5307_v8, %v5307_v8  ;;  %v3671_v10 = vpop.f32.mrf.mxu2  ;;  %v3991_v11 = vpop.f32.mrf.mxu3 }
 0x3dd   : > { %6587 = vst.msk [vmem:[%s8388_s29 + $0x79c] sm:$0xf] %vm6099_vm5, %v6074_v6  ;;  %v3672_v12 = vadd.f32 %v9954_v24, %v3671_v10  ;;  %v3992_v13 = vadd.f32 %v9954_v24, %v3991_v11  ;;  %v3033_v15 = vpop.f32.mrf.mxu0  ;;  %v3353_v16 = vpop.f32.mrf.mxu1 }
 0x3de   : > { %6204 = vst.msk [vmem:[%s8388_s29 + $0x1a0] sm:$0xf] %vm6099_vm5, %v5691_v7  ;;  %v3034_v52 = vadd.f32 %v9954_v24, %v3033_v15  ;;  %v3354_v17 = vadd.f32 %v9954_v24, %v3353_v16  ;;  %v8093_v15 = vld [vmem:[%s8302_s24 + $0x3f0] sm:$0xff] }
 0x3df   : > { %6332 = vst.msk [vmem:[%s8388_s29 + $0x3a0] sm:$0xf] %vm6099_vm5, %v5819_v9  ;;  %vm4411_vm0 = vcmp.ge.f32.partialorder %v3672_v12, 0.0  ;;  %v4923_v18 = vmul.f32 0.2, %v3672_v12  ;;  %vm4539_vm1 = vcmp.ge.f32.partialorder %v3992_v13, 0.0 }
 0x3e0   : > { %v5051_v19 = vmul.f32 0.2, %v3992_v13  ;;  %vm4156_vm3 = vcmp.ge.f32.partialorder %v3034_v52, 0.0  ;;  %v4668_v20 = vmul.f32 0.2, %v3034_v52  ;;  %vm4284_vm4 = vcmp.ge.f32.partialorder %v3354_v17, 0.0 }
 0x3e1   : > { %v5435_v40 = vsel %vm4411_vm0, %v3672_v12, %v4923_v18  ;;  %v4796_v21 = vmul.f32 0.2, %v3354_v17 }
 0x3e2   : > { %v5947_v22 = vpack.c.bf16 %v5435_v40, %v5435_v40  ;;  %v5563_v23 = vsel %vm4539_vm1, %v3992_v13, %v5051_v19  ;;  %v5180_v25 = vsel %vm4156_vm3, %v3034_v52, %v4668_v20  ;;  %v8029_v13 = vld [vmem:[%s8302_s24 + $0x1f0] sm:$0xff] }
 0x3e3   : > { %v6075_v26 = vpack.c.bf16 %v5563_v23, %v5563_v23  ;;  %v5692_v27 = vpack.c.bf16 %v5180_v25, %v5180_v25  ;;  %v5308_v28 = vsel %vm4284_vm4, %v3354_v17, %v4796_v21  ;;  %v8157_v19 = vld [vmem:[%s8302_s24 + $0x5f0] sm:$0xff] }
 0x3e4   : > { %6460 = vst.msk [vmem:[%s8388_s29 + $0x5a0] sm:$0xf] %vm6099_vm5, %v5947_v22  ;;  %v5820_v30 = vpack.c.bf16 %v5308_v28, %v5308_v28  ;;  %v3673_v31 = vpop.f32.mrf.mxu2  ;;  %v3993_v3 = vpop.f32.mrf.mxu3  ;;  %v8221_v20 = vld [vmem:[%s8302_s24 + $0x7f0] sm:$0xff] }
 0x3e5   : > { %6588 = vst.msk [vmem:[%s8388_s29 + $0x7a0] sm:$0xf] %vm6099_vm5, %v6075_v26  ;;  %v3674_v34 = vadd.f32 %v9954_v24, %v3673_v31  ;;  %v3994_v35 = vadd.f32 %v9954_v24, %v3993_v3  ;;  %v3036_v36 = vpop.f32.mrf.mxu0  ;;  %v3356_v37 = vpop.f32.mrf.mxu1 }
 0x3e6   : > { %6205 = vst.msk [vmem:[%s8388_s29 + $0x1a4] sm:$0xf] %vm6099_vm5, %v5692_v27  ;;  %v3037_v42 = vadd.f32 %v9954_v24, %v3036_v36  ;;  %v3357_v43 = vadd.f32 %v9954_v24, %v3356_v37 }
 0x3e7   : > { %6333 = vst.msk [vmem:[%s8388_s29 + $0x3a4] sm:$0xf] %vm6099_vm5, %v5820_v30  ;;  %vm4412_vm6 = vcmp.ge.f32.partialorder %v3674_v34, 0.0  ;;  %v4924_v14 = vmul.f32 0.2, %v3674_v34  ;;  %vm4540_vm7 = vcmp.ge.f32.partialorder %v3994_v35, 0.0 }
 0x3e8   : > { %v5052_v44 = vmul.f32 0.2, %v3994_v35  ;;  %vm4157_vm8 = vcmp.ge.f32.partialorder %v3037_v42, 0.0  ;;  %v4669_v45 = vmul.f32 0.2, %v3037_v42  ;;  %vm4285_vm9 = vcmp.ge.f32.partialorder %v3357_v43, 0.0  ;;  %7770 = vmatmul.msk.bf16.gmra.mxu0 %vm1986_vm2, %v8028_v32  ;;  %7834 = vmatmul.msk.bf16.gmra.mxu1 %vm1986_vm2, %v8092_v33 }
 0x3e9   : > { %v5436_v46 = vsel %vm4412_vm6, %v3674_v34, %v4924_v14  ;;  %v4797_v47 = vmul.f32 0.2, %v3357_v43  ;;  %7898 = vmatmul.msk.bf16.gmra.mxu2 %vm1986_vm2, %v8156_v38  ;;  %7962 = vmatmul.msk.bf16.gmra.mxu3 %vm1986_vm2, %v8220_v39 }
 0x3ea   : > { %v5948_v48 = vpack.c.bf16 %v5436_v46, %v5436_v46  ;;  %v5564_v49 = vsel %vm4540_vm7, %v3994_v35, %v5052_v44  ;;  %v5181_v50 = vsel %vm4157_vm8, %v3037_v42, %v4669_v45 }
 0x3eb   : > { %v6076_v51 = vpack.c.bf16 %v5564_v49, %v5564_v49  ;;  %v5693_v53 = vpack.c.bf16 %v5181_v50, %v5181_v50  ;;  %v5309_v54 = vsel %vm4285_vm9, %v3357_v43, %v4797_v47 }
 0x3ec   : > { %6461 = vst.msk [vmem:[%s8388_s29 + $0x5a4] sm:$0xf] %vm6099_vm5, %v5948_v48  ;;  %v5821_v55 = vpack.c.bf16 %v5309_v54, %v5309_v54  ;;  %v3676_v56 = vpop.f32.mrf.mxu2  ;;  %v3996_v57 = vpop.f32.mrf.mxu3 }
 0x3ed   : > { %6589 = vst.msk [vmem:[%s8388_s29 + $0x7a4] sm:$0xf] %vm6099_vm5, %v6076_v51  ;;  %v3677_v58 = vadd.f32 %v9954_v24, %v3676_v56  ;;  %v3997_v29 = vadd.f32 %v9954_v24, %v3996_v57  ;;  %v3038_v59 = vpop.f32.mrf.mxu0  ;;  %v3358_v60 = vpop.f32.mrf.mxu1 }
 0x3ee   : > { %6206 = vst.msk [vmem:[%s8388_s29 + $0x1a8] sm:$0xf] %vm6099_vm5, %v5693_v53  ;;  %v3039_v61 = vadd.f32 %v9954_v24, %v3038_v59  ;;  %v3359_v62 = vadd.f32 %v9954_v24, %v3358_v60  ;;  %v8094_v59 = vld [vmem:[%s8302_s24 + $0x3f8] sm:$0xff] }
 0x3ef   : > { %6334 = vst.msk [vmem:[%s8388_s29 + $0x3a8] sm:$0xf] %vm6099_vm5, %v5821_v55  ;;  %vm4413_vm10 = vcmp.ge.f32.partialorder %v3677_v58, 0.0  ;;  %v4925_v63 = vmul.f32 0.2, %v3677_v58  ;;  %vm4541_vm11 = vcmp.ge.f32.partialorder %v3997_v29, 0.0 }
 0x3f0   : > { %v5053_v0 = vmul.f32 0.2, %v3997_v29  ;;  %vm4158_vm12 = vcmp.ge.f32.partialorder %v3039_v61, 0.0  ;;  %v4670_v1 = vmul.f32 0.2, %v3039_v61  ;;  %vm4286_vm13 = vcmp.ge.f32.partialorder %v3359_v62, 0.0 }
 0x3f1   : > { %v5437_v2 = vsel %vm4413_vm10, %v3677_v58, %v4925_v63  ;;  %v4798_v4 = vmul.f32 0.2, %v3359_v62 }
 0x3f2   : > { %v5949_v5 = vpack.c.bf16 %v5437_v2, %v5437_v2  ;;  %v5565_v41 = vsel %vm4541_vm11, %v3997_v29, %v5053_v0  ;;  %v5182_v6 = vsel %vm4158_vm12, %v3039_v61, %v4670_v1  ;;  %v8030_v29 = vld [vmem:[%s8302_s24 + $0x1f8] sm:$0xff] }
 0x3f3   : > { %v6077_v7 = vpack.c.bf16 %v5565_v41, %v5565_v41  ;;  %v5694_v8 = vpack.c.bf16 %v5182_v6, %v5182_v6  ;;  %v5310_v9 = vsel %vm4286_vm13, %v3359_v62, %v4798_v4  ;;  %v8158_v0 = vld [vmem:[%s8302_s24 + $0x5f8] sm:$0xff] }
 0x3f4   : > { %6462 = vst.msk [vmem:[%s8388_s29 + $0x5a8] sm:$0xf] %vm6099_vm5, %v5949_v5  ;;  %v5822_v10 = vpack.c.bf16 %v5310_v9, %v5310_v9  ;;  %v3678_v11 = vpop.f32.mrf.mxu2  ;;  %v3998_v12 = vpop.f32.mrf.mxu3  ;;  %v8222_v1 = vld [vmem:[%s8302_s24 + $0x7f8] sm:$0xff] }
 0x3f5   : > { %6590 = vst.msk [vmem:[%s8388_s29 + $0x7a8] sm:$0xf] %vm6099_vm5, %v6077_v7  ;;  %v3679_v16 = vadd.f32 %v9954_v24, %v3678_v11  ;;  %v3999_v52 = vadd.f32 %v9954_v24, %v3998_v12  ;;  %v3041_v17 = vpop.f32.mrf.mxu0  ;;  %v3361_v18 = vpop.f32.mrf.mxu1 }
 0x3f6   : > { %6207 = vst.msk [vmem:[%s8388_s29 + $0x1ac] sm:$0xf] %vm6099_vm5, %v5694_v8  ;;  %v3042_v40 = vadd.f32 %v9954_v24, %v3041_v17  ;;  %v3362_v21 = vadd.f32 %v9954_v24, %v3361_v18 }
 0x3f7   : > { %6335 = vst.msk [vmem:[%s8388_s29 + $0x3ac] sm:$0xf] %vm6099_vm5, %v5822_v10  ;;  %vm4414_vm14 = vcmp.ge.f32.partialorder %v3679_v16, 0.0  ;;  %v4926_v22 = vmul.f32 0.2, %v3679_v16  ;;  %vm4542_vm15 = vcmp.ge.f32.partialorder %v3999_v52, 0.0 }
 0x3f8   : > { %v5054_v23 = vmul.f32 0.2, %v3999_v52  ;;  %vm4159_vm0 = vcmp.ge.f32.partialorder %v3042_v40, 0.0  ;;  %v4671_v25 = vmul.f32 0.2, %v3042_v40  ;;  %vm4287_vm1 = vcmp.ge.f32.partialorder %v3362_v21, 0.0  ;;  %7771 = vmatmul.msk.bf16.gmra.mxu0 %vm1986_vm2, %v8029_v13  ;;  %7835 = vmatmul.msk.bf16.gmra.mxu1 %vm1986_vm2, %v8093_v15 }
 0x3f9   : > { %v5438_v26 = vsel %vm4414_vm14, %v3679_v16, %v4926_v22  ;;  %v4799_v27 = vmul.f32 0.2, %v3362_v21  ;;  %7899 = vmatmul.msk.bf16.gmra.mxu2 %vm1986_vm2, %v8157_v19  ;;  %7963 = vmatmul.msk.bf16.gmra.mxu3 %vm1986_vm2, %v8221_v20 }
 0x3fa   : > { %v5950_v28 = vpack.c.bf16 %v5438_v26, %v5438_v26  ;;  %v5566_v30 = vsel %vm4542_vm15, %v3999_v52, %v5054_v23  ;;  %v5183_v31 = vsel %vm4159_vm0, %v3042_v40, %v4671_v25 }
 0x3fb   : > { %v6078_v3 = vpack.c.bf16 %v5566_v30, %v5566_v30  ;;  %v5695_v32 = vpack.c.bf16 %v5183_v31, %v5183_v31  ;;  %v5311_v33 = vsel %vm4287_vm1, %v3362_v21, %v4799_v27 }
 0x3fc   : > { %6463 = vst.msk [vmem:[%s8388_s29 + $0x5ac] sm:$0xf] %vm6099_vm5, %v5950_v28  ;;  %v5823_v34 = vpack.c.bf16 %v5311_v33, %v5311_v33  ;;  %v3681_v35 = vpop.f32.mrf.mxu2  ;;  %v4001_v36 = vpop.f32.mrf.mxu3 }
 0x3fd   : > { %6591 = vst.msk [vmem:[%s8388_s29 + $0x7ac] sm:$0xf] %vm6099_vm5, %v6078_v3  ;;  %v3682_v37 = vadd.f32 %v9954_v24, %v3681_v35  ;;  %v4002_v38 = vadd.f32 %v9954_v24, %v4001_v36  ;;  %v3043_v39 = vpop.f32.mrf.mxu0  ;;  %v3363_v42 = vpop.f32.mrf.mxu1 }
 0x3fe   : > { %6208 = vst.msk [vmem:[%s8388_s29 + $0x1b0] sm:$0xf] %vm6099_vm5, %v5695_v32  ;;  %v3044_v43 = vadd.f32 %v9954_v24, %v3043_v39  ;;  %v3364_v14 = vadd.f32 %v9954_v24, %v3363_v42 }
 0x3ff   : > { %6336 = vst.msk [vmem:[%s8388_s29 + $0x3b0] sm:$0xf] %vm6099_vm5, %v5823_v34  ;;  %vm4415_vm3 = vcmp.ge.f32.partialorder %v3682_v37, 0.0  ;;  %v4927_v44 = vmul.f32 0.2, %v3682_v37  ;;  %vm4543_vm4 = vcmp.ge.f32.partialorder %v4002_v38, 0.0 }
 0x400   : > { %v5055_v45 = vmul.f32 0.2, %v4002_v38  ;;  %vm4160_vm6 = vcmp.ge.f32.partialorder %v3044_v43, 0.0  ;;  %v4672_v46 = vmul.f32 0.2, %v3044_v43  ;;  %vm4288_vm7 = vcmp.ge.f32.partialorder %v3364_v14, 0.0 }
 0x401   : > { %v5439_v47 = vsel %vm4415_vm3, %v3682_v37, %v4927_v44  ;;  %v4800_v48 = vmul.f32 0.2, %v3364_v14 }
 0x402   : > { %v5951_v49 = vpack.c.bf16 %v5439_v47, %v5439_v47  ;;  %v5567_v50 = vsel %vm4543_vm4, %v4002_v38, %v5055_v45  ;;  %v5184_v51 = vsel %vm4160_vm6, %v3044_v43, %v4672_v46 }
 0x403   : > { %v6079_v53 = vpack.c.bf16 %v5567_v50, %v5567_v50  ;;  %v5696_v54 = vpack.c.bf16 %v5184_v51, %v5184_v51  ;;  %v5312_v55 = vsel %vm4288_vm7, %v3364_v14, %v4800_v48 }
 0x404   : > { %6464 = vst.msk [vmem:[%s8388_s29 + $0x5b0] sm:$0xf] %vm6099_vm5, %v5951_v49  ;;  %v5824_v56 = vpack.c.bf16 %v5312_v55, %v5312_v55  ;;  %v3683_v57 = vpop.f32.mrf.mxu2  ;;  %v4003_v58 = vpop.f32.mrf.mxu3 }
 0x405   : > { %6592 = vst.msk [vmem:[%s8388_s29 + $0x7b0] sm:$0xf] %vm6099_vm5, %v6079_v53  ;;  %v3684_v60 = vadd.f32 %v9954_v24, %v3683_v57  ;;  %v4004_v61 = vadd.f32 %v9954_v24, %v4003_v58  ;;  %v3046_v62 = vpop.f32.mrf.mxu0  ;;  %v3366_v63 = vpop.f32.mrf.mxu1 }
 0x406   : > { %6209 = vst.msk [vmem:[%s8388_s29 + $0x1b4] sm:$0xf] %vm6099_vm5, %v5696_v54  ;;  %v3047_v2 = vadd.f32 %v9954_v24, %v3046_v62  ;;  %v3367_v4 = vadd.f32 %v9954_v24, %v3366_v63 }
 0x407   : > { %6337 = vst.msk [vmem:[%s8388_s29 + $0x3b4] sm:$0xf] %vm6099_vm5, %v5824_v56  ;;  %vm4416_vm8 = vcmp.ge.f32.partialorder %v3684_v60, 0.0  ;;  %v4928_v5 = vmul.f32 0.2, %v3684_v60  ;;  %vm4544_vm9 = vcmp.ge.f32.partialorder %v4004_v61, 0.0 }
 0x408   : > { %v5056_v41 = vmul.f32 0.2, %v4004_v61  ;;  %vm4161_vm10 = vcmp.ge.f32.partialorder %v3047_v2, 0.0  ;;  %v4673_v6 = vmul.f32 0.2, %v3047_v2  ;;  %vm4289_vm11 = vcmp.ge.f32.partialorder %v3367_v4, 0.0  ;;  %7772 = vmatmul.msk.bf16.gmra.mxu0 %vm1986_vm2, %v8030_v29  ;;  %7836 = vmatmul.msk.bf16.gmra.mxu1 %vm1986_vm2, %v8094_v59 }
 0x409   : > { %v5440_v7 = vsel %vm4416_vm8, %v3684_v60, %v4928_v5  ;;  %v4801_v8 = vmul.f32 0.2, %v3367_v4  ;;  %7900 = vmatmul.msk.bf16.gmra.mxu2 %vm1986_vm2, %v8158_v0  ;;  %7964 = vmatmul.msk.bf16.gmra.mxu3 %vm1986_vm2, %v8222_v1 }
 0x40a   : > { %v5952_v9 = vpack.c.bf16 %v5440_v7, %v5440_v7  ;;  %v5568_v10 = vsel %vm4544_vm9, %v4004_v61, %v5056_v41  ;;  %v5185_v11 = vsel %vm4161_vm10, %v3047_v2, %v4673_v6 }
 0x40b   : > { %v6080_v12 = vpack.c.bf16 %v5568_v10, %v5568_v10  ;;  %v5697_v13 = vpack.c.bf16 %v5185_v11, %v5185_v11  ;;  %v5313_v15 = vsel %vm4289_vm11, %v3367_v4, %v4801_v8 }
 0x40c   : > { %6465 = vst.msk [vmem:[%s8388_s29 + $0x5b4] sm:$0xf] %vm6099_vm5, %v5952_v9  ;;  %v5825_v16 = vpack.c.bf16 %v5313_v15, %v5313_v15  ;;  %v3686_v52 = vpop.f32.mrf.mxu2  ;;  %v4006_v17 = vpop.f32.mrf.mxu3  ;;  %v10219_v15 = vld [vmem:[%s10404_s2] ss:$0 sm:$0xff] }
 0x40d   : > { %6593 = vst.msk [vmem:[%s8388_s29 + $0x7b4] sm:$0xf] %vm6099_vm5, %v6080_v12  ;;  %v3687_v18 = vadd.f32 %v9954_v24, %v3686_v52  ;;  %v4007_v19 = vadd.f32 %v9954_v24, %v4006_v17  ;;  %v3048_v20 = vpop.f32.mrf.mxu0  ;;  %v3368_v40 = vpop.f32.mrf.mxu1 }
 0x40e   : > { %6210 = vst.msk [vmem:[%s8388_s29 + $0x1b8] sm:$0xf] %vm6099_vm5, %v5697_v13  ;;  %v3049_v21 = vadd.f32 %v9954_v24, %v3048_v20  ;;  %v3369_v22 = vadd.f32 %v9954_v24, %v3368_v40 }
 0x40f   : > { %6338 = vst.msk [vmem:[%s8388_s29 + $0x3b8] sm:$0xf] %vm6099_vm5, %v5825_v16  ;;  %vm4417_vm2 = vcmp.ge.f32.partialorder %v3687_v18, 0.0  ;;  %v4929_v23 = vmul.f32 0.2, %v3687_v18  ;;  %vm4545_vm12 = vcmp.ge.f32.partialorder %v4007_v19, 0.0 }
 0x410   : > { %v5057_v25 = vmul.f32 0.2, %v4007_v19  ;;  %vm4162_vm13 = vcmp.ge.f32.partialorder %v3049_v21, 0.0  ;;  %v4674_v26 = vmul.f32 0.2, %v3049_v21  ;;  %vm4290_vm14 = vcmp.ge.f32.partialorder %v3369_v22, 0.0 }
 0x411   : > { %v5441_v27 = vsel %vm4417_vm2, %v3687_v18, %v4929_v23  ;;  %v4802_v28 = vmul.f32 0.2, %v3369_v22 }
 0x412   : > { %v5953_v30 = vpack.c.bf16 %v5441_v27, %v5441_v27  ;;  %v5569_v31 = vsel %vm4545_vm12, %v4007_v19, %v5057_v25  ;;  %v5186_v3 = vsel %vm4162_vm13, %v3049_v21, %v4674_v26 }
 0x413   : > { %v6081_v32 = vpack.c.bf16 %v5569_v31, %v5569_v31  ;;  %v5698_v33 = vpack.c.bf16 %v5186_v3, %v5186_v3  ;;  %v5314_v34 = vsel %vm4290_vm14, %v3369_v22, %v4802_v28 }
 0x414   : > { %6466 = vst.msk [vmem:[%s8388_s29 + $0x5b8] sm:$0xf] %vm6099_vm5, %v5953_v30  ;;  %v5826_v35 = vpack.c.bf16 %v5314_v34, %v5314_v34  ;;  %v3688_v36 = vpop.f32.mrf.mxu2  ;;  %v4008_v37 = vpop.f32.mrf.mxu3 }
 0x415   : > { %6594 = vst.msk [vmem:[%s8388_s29 + $0x7b8] sm:$0xf] %vm6099_vm5, %v6081_v32  ;;  %v3689_v38 = vadd.f32 %v9954_v24, %v3688_v36  ;;  %v4009_v39 = vadd.f32 %v9954_v24, %v4008_v37  ;;  %v3051_v42 = vpop.f32.mrf.mxu0  ;;  %v3371_v43 = vpop.f32.mrf.mxu1 }
 0x416   : > { %6211 = vst.msk [vmem:[%s8388_s29 + $0x1bc] sm:$0xf] %vm6099_vm5, %v5698_v33  ;;  %v3052_v14 = vadd.f32 %v9954_v24, %v3051_v42  ;;  %v3372_v44 = vadd.f32 %v9954_v24, %v3371_v43 }
 0x417   : > { %6339 = vst.msk [vmem:[%s8388_s29 + $0x3bc] sm:$0xf] %vm6099_vm5, %v5826_v35  ;;  %vm4418_vm15 = vcmp.ge.f32.partialorder %v3689_v38, 0.0  ;;  %v4930_v45 = vmul.f32 0.2, %v3689_v38  ;;  %vm4546_vm0 = vcmp.ge.f32.partialorder %v4009_v39, 0.0 }
 0x418   : > { %v5058_v46 = vmul.f32 0.2, %v4009_v39  ;;  %vm4163_vm1 = vcmp.ge.f32.partialorder %v3052_v14, 0.0  ;;  %v4675_v47 = vmul.f32 0.2, %v3052_v14  ;;  %vm4291_vm3 = vcmp.ge.f32.partialorder %v3372_v44, 0.0 }
 0x419   : > { %v5442_v48 = vsel %vm4418_vm15, %v3689_v38, %v4930_v45  ;;  %v4803_v49 = vmul.f32 0.2, %v3372_v44 }
 0x41a   : > { %v5954_v50 = vpack.c.bf16 %v5442_v48, %v5442_v48  ;;  %v5570_v51 = vsel %vm4546_vm0, %v4009_v39, %v5058_v46  ;;  %v5187_v53 = vsel %vm4163_vm1, %v3052_v14, %v4675_v47 }
 0x41b   : > { %v6082_v54 = vpack.c.bf16 %v5570_v51, %v5570_v51  ;;  %v5699_v55 = vpack.c.bf16 %v5187_v53, %v5187_v53  ;;  %v5315_v56 = vsel %vm4291_vm3, %v3372_v44, %v4803_v49 }
 0x41c   : > { %6467 = vst.msk [vmem:[%s8388_s29 + $0x5bc] sm:$0xf] %vm6099_vm5, %v5954_v50  ;;  %v5827_v57 = vpack.c.bf16 %v5315_v56, %v5315_v56  ;;  %v3691_v58 = vpop.f32.mrf.mxu2  ;;  %v4011_v29 = vpop.f32.mrf.mxu3 }
 0x41d   : > { %6595 = vst.msk [vmem:[%s8388_s29 + $0x7bc] sm:$0xf] %vm6099_vm5, %v6082_v54  ;;  %v3692_v59 = vadd.f32 %v9954_v24, %v3691_v58  ;;  %v4012_v60 = vadd.f32 %v9954_v24, %v4011_v29  ;;  %v3053_v61 = vpop.f32.mrf.mxu0  ;;  %v3373_v62 = vpop.f32.mrf.mxu1 }
 0x41e   : > { %6212 = vst.msk [vmem:[%s8388_s29 + $0x1c0] sm:$0xf] %vm6099_vm5, %v5699_v55  ;;  %v3054_v63 = vadd.f32 %v9954_v24, %v3053_v61  ;;  %v3374_v0 = vadd.f32 %v9954_v24, %v3373_v62 }
 0x41f   : > { %6340 = vst.msk [vmem:[%s8388_s29 + $0x3c0] sm:$0xf] %vm6099_vm5, %v5827_v57  ;;  %vm4419_vm4 = vcmp.ge.f32.partialorder %v3692_v59, 0.0  ;;  %v4931_v1 = vmul.f32 0.2, %v3692_v59  ;;  %vm4547_vm6 = vcmp.ge.f32.partialorder %v4012_v60, 0.0 }
 0x420   : > { %v5059_v2 = vmul.f32 0.2, %v4012_v60  ;;  %vm4164_vm7 = vcmp.ge.f32.partialorder %v3054_v63, 0.0  ;;  %v4676_v4 = vmul.f32 0.2, %v3054_v63  ;;  %vm4292_vm8 = vcmp.ge.f32.partialorder %v3374_v0, 0.0 }
 0x421   : > { %v5443_v5 = vsel %vm4419_vm4, %v3692_v59, %v4931_v1  ;;  %v4804_v41 = vmul.f32 0.2, %v3374_v0 }
 0x422   : > { %v5955_v6 = vpack.c.bf16 %v5443_v5, %v5443_v5  ;;  %v5571_v7 = vsel %vm4547_vm6, %v4012_v60, %v5059_v2  ;;  %v5188_v8 = vsel %vm4164_vm7, %v3054_v63, %v4676_v4 }
 0x423   : > { %v6083_v9 = vpack.c.bf16 %v5571_v7, %v5571_v7  ;;  %v5700_v24 = vpack.c.bf16 %v5188_v8, %v5188_v8  ;;  %v5316_v10 = vsel %vm4292_vm8, %v3374_v0, %v4804_v41 }
 0x424   : > { %6468 = vst.msk [vmem:[%s8388_s29 + $0x5c0] sm:$0xf] %vm6099_vm5, %v5955_v6  ;;  %v5828_v11 = vpack.c.bf16 %v5316_v10, %v5316_v10  ;;  %v3693_v12 = vpop.f32.mrf.mxu2  ;;  %v4013_v13 = vpop.f32.mrf.mxu3 }
 0x425   : > { %6596 = vst.msk [vmem:[%s8388_s29 + $0x7c0] sm:$0xf] %vm6099_vm5, %v6083_v9  ;;  %v3694_v16 = vadd.f32 %v10219_v15, %v3693_v12  ;;  %v4014_v52 = vadd.f32 %v10219_v15, %v4013_v13  ;;  %v3056_v17 = vpop.f32.mrf.mxu0  ;;  %v3376_v18 = vpop.f32.mrf.mxu1 }
 0x426   : > { %6213 = vst.msk [vmem:[%s8388_s29 + $0x1c4] sm:$0xf] %vm6099_vm5, %v5700_v24  ;;  %v3057_v19 = vadd.f32 %v10219_v15, %v3056_v17  ;;  %v3377_v20 = vadd.f32 %v10219_v15, %v3376_v18 }
 0x427   : > { %6341 = vst.msk [vmem:[%s8388_s29 + $0x3c4] sm:$0xf] %vm6099_vm5, %v5828_v11  ;;  %vm4420_vm9 = vcmp.ge.f32.partialorder %v3694_v16, 0.0  ;;  %v4932_v40 = vmul.f32 0.2, %v3694_v16  ;;  %vm4548_vm10 = vcmp.ge.f32.partialorder %v4014_v52, 0.0 }
 0x428   : > { %v5060_v21 = vmul.f32 0.2, %v4014_v52  ;;  %vm4165_vm11 = vcmp.ge.f32.partialorder %v3057_v19, 0.0  ;;  %v4677_v22 = vmul.f32 0.2, %v3057_v19  ;;  %vm4293_vm2 = vcmp.ge.f32.partialorder %v3377_v20, 0.0 }
 0x429   : > { %v5444_v23 = vsel %vm4420_vm9, %v3694_v16, %v4932_v40  ;;  %v4805_v25 = vmul.f32 0.2, %v3377_v20 }
 0x42a   : > { %v5956_v26 = vpack.c.bf16 %v5444_v23, %v5444_v23  ;;  %v5572_v27 = vsel %vm4548_vm10, %v4014_v52, %v5060_v21  ;;  %v5189_v28 = vsel %vm4165_vm11, %v3057_v19, %v4677_v22 }
 0x42b   : > { %v6084_v30 = vpack.c.bf16 %v5572_v27, %v5572_v27  ;;  %v5701_v31 = vpack.c.bf16 %v5189_v28, %v5189_v28  ;;  %v5317_v3 = vsel %vm4293_vm2, %v3377_v20, %v4805_v25 }
 0x42c   : > { %6469 = vst.msk [vmem:[%s8388_s29 + $0x5c4] sm:$0xf] %vm6099_vm5, %v5956_v26  ;;  %v5829_v32 = vpack.c.bf16 %v5317_v3, %v5317_v3  ;;  %v3696_v33 = vpop.f32.mrf.mxu2  ;;  %v4016_v34 = vpop.f32.mrf.mxu3 }
 0x42d   : > { %6597 = vst.msk [vmem:[%s8388_s29 + $0x7c4] sm:$0xf] %vm6099_vm5, %v6084_v30  ;;  %v3697_v35 = vadd.f32 %v10219_v15, %v3696_v33  ;;  %v4017_v36 = vadd.f32 %v10219_v15, %v4016_v34  ;;  %v3058_v37 = vpop.f32.mrf.mxu0  ;;  %v3378_v38 = vpop.f32.mrf.mxu1 }
 0x42e   : > { %6214 = vst.msk [vmem:[%s8388_s29 + $0x1c8] sm:$0xf] %vm6099_vm5, %v5701_v31  ;;  %v3059_v39 = vadd.f32 %v10219_v15, %v3058_v37  ;;  %v3379_v42 = vadd.f32 %v10219_v15, %v3378_v38 }
 0x42f   : > { %6342 = vst.msk [vmem:[%s8388_s29 + $0x3c8] sm:$0xf] %vm6099_vm5, %v5829_v32  ;;  %vm4421_vm12 = vcmp.ge.f32.partialorder %v3697_v35, 0.0  ;;  %v4933_v43 = vmul.f32 0.2, %v3697_v35  ;;  %vm4549_vm13 = vcmp.ge.f32.partialorder %v4017_v36, 0.0 }
 0x430   : > { %v5061_v14 = vmul.f32 0.2, %v4017_v36  ;;  %vm4166_vm14 = vcmp.ge.f32.partialorder %v3059_v39, 0.0  ;;  %v4678_v44 = vmul.f32 0.2, %v3059_v39  ;;  %vm4294_vm15 = vcmp.ge.f32.partialorder %v3379_v42, 0.0 }
 0x431   : > { %v5445_v45 = vsel %vm4421_vm12, %v3697_v35, %v4933_v43  ;;  %v4806_v46 = vmul.f32 0.2, %v3379_v42 }
 0x432   : > { %v5957_v47 = vpack.c.bf16 %v5445_v45, %v5445_v45  ;;  %v5573_v48 = vsel %vm4549_vm13, %v4017_v36, %v5061_v14  ;;  %v5190_v49 = vsel %vm4166_vm14, %v3059_v39, %v4678_v44 }
 0x433   : > { %v6085_v50 = vpack.c.bf16 %v5573_v48, %v5573_v48  ;;  %v5702_v51 = vpack.c.bf16 %v5190_v49, %v5190_v49  ;;  %v5318_v53 = vsel %vm4294_vm15, %v3379_v42, %v4806_v46 }
 0x434   : > { %6470 = vst.msk [vmem:[%s8388_s29 + $0x5c8] sm:$0xf] %vm6099_vm5, %v5957_v47  ;;  %v5830_v54 = vpack.c.bf16 %v5318_v53, %v5318_v53  ;;  %v3698_v55 = vpop.f32.mrf.mxu2  ;;  %v4018_v56 = vpop.f32.mrf.mxu3 }
 0x435   : > { %6598 = vst.msk [vmem:[%s8388_s29 + $0x7c8] sm:$0xf] %vm6099_vm5, %v6085_v50  ;;  %v3699_v57 = vadd.f32 %v10219_v15, %v3698_v55  ;;  %v4019_v58 = vadd.f32 %v10219_v15, %v4018_v56  ;;  %v3061_v29 = vpop.f32.mrf.mxu0  ;;  %v3381_v59 = vpop.f32.mrf.mxu1 }
 0x436   : > { %6215 = vst.msk [vmem:[%s8388_s29 + $0x1cc] sm:$0xf] %vm6099_vm5, %v5702_v51  ;;  %v3062_v60 = vadd.f32 %v10219_v15, %v3061_v29  ;;  %v3382_v61 = vadd.f32 %v10219_v15, %v3381_v59 }
 0x437   : > { %6343 = vst.msk [vmem:[%s8388_s29 + $0x3cc] sm:$0xf] %vm6099_vm5, %v5830_v54  ;;  %vm4422_vm0 = vcmp.ge.f32.partialorder %v3699_v57, 0.0  ;;  %v4934_v62 = vmul.f32 0.2, %v3699_v57  ;;  %vm4550_vm1 = vcmp.ge.f32.partialorder %v4019_v58, 0.0 }
 0x438   : > { %v5062_v63 = vmul.f32 0.2, %v4019_v58  ;;  %vm4167_vm3 = vcmp.ge.f32.partialorder %v3062_v60, 0.0  ;;  %v4679_v0 = vmul.f32 0.2, %v3062_v60  ;;  %vm4295_vm4 = vcmp.ge.f32.partialorder %v3382_v61, 0.0 }
 0x439   : > { %v5446_v1 = vsel %vm4422_vm0, %v3699_v57, %v4934_v62  ;;  %v4807_v2 = vmul.f32 0.2, %v3382_v61 }
 0x43a   : > { %v5958_v4 = vpack.c.bf16 %v5446_v1, %v5446_v1  ;;  %v5574_v5 = vsel %vm4550_vm1, %v4019_v58, %v5062_v63  ;;  %v5191_v41 = vsel %vm4167_vm3, %v3062_v60, %v4679_v0 }
 0x43b   : > { %v6086_v6 = vpack.c.bf16 %v5574_v5, %v5574_v5  ;;  %v5703_v7 = vpack.c.bf16 %v5191_v41, %v5191_v41  ;;  %v5319_v8 = vsel %vm4295_vm4, %v3382_v61, %v4807_v2 }
 0x43c   : > { %6471 = vst.msk [vmem:[%s8388_s29 + $0x5cc] sm:$0xf] %vm6099_vm5, %v5958_v4  ;;  %v5831_v9 = vpack.c.bf16 %v5319_v8, %v5319_v8  ;;  %v3701_v24 = vpop.f32.mrf.mxu2  ;;  %v4021_v10 = vpop.f32.mrf.mxu3 }
 0x43d   : > { %6599 = vst.msk [vmem:[%s8388_s29 + $0x7cc] sm:$0xf] %vm6099_vm5, %v6086_v6  ;;  %v3702_v11 = vadd.f32 %v10219_v15, %v3701_v24  ;;  %v4022_v12 = vadd.f32 %v10219_v15, %v4021_v10  ;;  %v3063_v13 = vpop.f32.mrf.mxu0  ;;  %v3383_v16 = vpop.f32.mrf.mxu1 }
 0x43e   : > { %6216 = vst.msk [vmem:[%s8388_s29 + $0x1d0] sm:$0xf] %vm6099_vm5, %v5703_v7  ;;  %v3064_v52 = vadd.f32 %v10219_v15, %v3063_v13  ;;  %v3384_v17 = vadd.f32 %v10219_v15, %v3383_v16 }
 0x43f   : > { %6344 = vst.msk [vmem:[%s8388_s29 + $0x3d0] sm:$0xf] %vm6099_vm5, %v5831_v9  ;;  %vm4423_vm6 = vcmp.ge.f32.partialorder %v3702_v11, 0.0  ;;  %v4935_v18 = vmul.f32 0.2, %v3702_v11  ;;  %vm4551_vm7 = vcmp.ge.f32.partialorder %v4022_v12, 0.0 }
 0x440   : > { %v5063_v19 = vmul.f32 0.2, %v4022_v12  ;;  %vm4168_vm8 = vcmp.ge.f32.partialorder %v3064_v52, 0.0  ;;  %v4680_v20 = vmul.f32 0.2, %v3064_v52  ;;  %vm4296_vm9 = vcmp.ge.f32.partialorder %v3384_v17, 0.0 }
 0x441   : > { %v5447_v40 = vsel %vm4423_vm6, %v3702_v11, %v4935_v18  ;;  %v4808_v21 = vmul.f32 0.2, %v3384_v17 }
 0x442   : > { %v5959_v22 = vpack.c.bf16 %v5447_v40, %v5447_v40  ;;  %v5575_v23 = vsel %vm4551_vm7, %v4022_v12, %v5063_v19  ;;  %v5192_v25 = vsel %vm4168_vm8, %v3064_v52, %v4680_v20 }
 0x443   : > { %v6087_v26 = vpack.c.bf16 %v5575_v23, %v5575_v23  ;;  %v5704_v27 = vpack.c.bf16 %v5192_v25, %v5192_v25  ;;  %v5320_v28 = vsel %vm4296_vm9, %v3384_v17, %v4808_v21 }
 0x444   : > { %6472 = vst.msk [vmem:[%s8388_s29 + $0x5d0] sm:$0xf] %vm6099_vm5, %v5959_v22  ;;  %v5832_v30 = vpack.c.bf16 %v5320_v28, %v5320_v28  ;;  %v3703_v31 = vpop.f32.mrf.mxu2  ;;  %v4023_v3 = vpop.f32.mrf.mxu3 }
 0x445   : > { %6600 = vst.msk [vmem:[%s8388_s29 + $0x7d0] sm:$0xf] %vm6099_vm5, %v6087_v26  ;;  %v3704_v32 = vadd.f32 %v10219_v15, %v3703_v31  ;;  %v4024_v33 = vadd.f32 %v10219_v15, %v4023_v3  ;;  %v3066_v34 = vpop.f32.mrf.mxu0  ;;  %v3386_v35 = vpop.f32.mrf.mxu1 }
 0x446   : > { %6217 = vst.msk [vmem:[%s8388_s29 + $0x1d4] sm:$0xf] %vm6099_vm5, %v5704_v27  ;;  %v3067_v36 = vadd.f32 %v10219_v15, %v3066_v34  ;;  %v3387_v37 = vadd.f32 %v10219_v15, %v3386_v35 }
 0x447   : > { %6345 = vst.msk [vmem:[%s8388_s29 + $0x3d4] sm:$0xf] %vm6099_vm5, %v5832_v30  ;;  %vm4424_vm10 = vcmp.ge.f32.partialorder %v3704_v32, 0.0  ;;  %v4936_v38 = vmul.f32 0.2, %v3704_v32  ;;  %vm4552_vm11 = vcmp.ge.f32.partialorder %v4024_v33, 0.0 }
 0x448   : > { %v5064_v39 = vmul.f32 0.2, %v4024_v33  ;;  %vm4169_vm2 = vcmp.ge.f32.partialorder %v3067_v36, 0.0  ;;  %v4681_v42 = vmul.f32 0.2, %v3067_v36  ;;  %vm4297_vm12 = vcmp.ge.f32.partialorder %v3387_v37, 0.0 }
 0x449   : > { %v5448_v43 = vsel %vm4424_vm10, %v3704_v32, %v4936_v38  ;;  %v4809_v14 = vmul.f32 0.2, %v3387_v37 }
 0x44a   : > { %v5960_v44 = vpack.c.bf16 %v5448_v43, %v5448_v43  ;;  %v5576_v45 = vsel %vm4552_vm11, %v4024_v33, %v5064_v39  ;;  %v5193_v46 = vsel %vm4169_vm2, %v3067_v36, %v4681_v42 }
 0x44b   : > { %v6088_v47 = vpack.c.bf16 %v5576_v45, %v5576_v45  ;;  %v5705_v48 = vpack.c.bf16 %v5193_v46, %v5193_v46  ;;  %v5321_v49 = vsel %vm4297_vm12, %v3387_v37, %v4809_v14 }
 0x44c   : > { %6473 = vst.msk [vmem:[%s8388_s29 + $0x5d4] sm:$0xf] %vm6099_vm5, %v5960_v44  ;;  %v5833_v50 = vpack.c.bf16 %v5321_v49, %v5321_v49  ;;  %v3706_v51 = vpop.f32.mrf.mxu2  ;;  %v4026_v53 = vpop.f32.mrf.mxu3 }
 0x44d   : > { %6601 = vst.msk [vmem:[%s8388_s29 + $0x7d4] sm:$0xf] %vm6099_vm5, %v6088_v47  ;;  %v3707_v54 = vadd.f32 %v10219_v15, %v3706_v51  ;;  %v4027_v55 = vadd.f32 %v10219_v15, %v4026_v53  ;;  %v3068_v56 = vpop.f32.mrf.mxu0  ;;  %v3388_v57 = vpop.f32.mrf.mxu1 }
 0x44e   : > { %6218 = vst.msk [vmem:[%s8388_s29 + $0x1d8] sm:$0xf] %vm6099_vm5, %v5705_v48  ;;  %v3069_v58 = vadd.f32 %v10219_v15, %v3068_v56  ;;  %v3389_v29 = vadd.f32 %v10219_v15, %v3388_v57 }
 0x44f   : > { %6346 = vst.msk [vmem:[%s8388_s29 + $0x3d8] sm:$0xf] %vm6099_vm5, %v5833_v50  ;;  %vm4425_vm13 = vcmp.ge.f32.partialorder %v3707_v54, 0.0  ;;  %v4937_v59 = vmul.f32 0.2, %v3707_v54  ;;  %vm4553_vm14 = vcmp.ge.f32.partialorder %v4027_v55, 0.0 }
 0x450   : > { %v5065_v60 = vmul.f32 0.2, %v4027_v55  ;;  %vm4170_vm15 = vcmp.ge.f32.partialorder %v3069_v58, 0.0  ;;  %v4682_v61 = vmul.f32 0.2, %v3069_v58  ;;  %vm4298_vm0 = vcmp.ge.f32.partialorder %v3389_v29, 0.0 }
 0x451   : > { %v5449_v62 = vsel %vm4425_vm13, %v3707_v54, %v4937_v59  ;;  %v4810_v63 = vmul.f32 0.2, %v3389_v29 }
 0x452   : > { %v5961_v0 = vpack.c.bf16 %v5449_v62, %v5449_v62  ;;  %v5577_v1 = vsel %vm4553_vm14, %v4027_v55, %v5065_v60  ;;  %v5194_v2 = vsel %vm4170_vm15, %v3069_v58, %v4682_v61 }
 0x453   : > { %v6089_v4 = vpack.c.bf16 %v5577_v1, %v5577_v1  ;;  %v5706_v5 = vpack.c.bf16 %v5194_v2, %v5194_v2  ;;  %v5322_v41 = vsel %vm4298_vm0, %v3389_v29, %v4810_v63 }
 0x454   : > { %6474 = vst.msk [vmem:[%s8388_s29 + $0x5d8] sm:$0xf] %vm6099_vm5, %v5961_v0  ;;  %v5834_v6 = vpack.c.bf16 %v5322_v41, %v5322_v41  ;;  %v3708_v7 = vpop.f32.mrf.mxu2  ;;  %v4028_v8 = vpop.f32.mrf.mxu3 }
 0x455   : > { %6602 = vst.msk [vmem:[%s8388_s29 + $0x7d8] sm:$0xf] %vm6099_vm5, %v6089_v4  ;;  %v3709_v9 = vadd.f32 %v10219_v15, %v3708_v7  ;;  %v4029_v24 = vadd.f32 %v10219_v15, %v4028_v8  ;;  %v3071_v10 = vpop.f32.mrf.mxu0  ;;  %v3391_v11 = vpop.f32.mrf.mxu1 }
 0x456   : > { %6219 = vst.msk [vmem:[%s8388_s29 + $0x1dc] sm:$0xf] %vm6099_vm5, %v5706_v5  ;;  %v3072_v12 = vadd.f32 %v10219_v15, %v3071_v10  ;;  %v3392_v13 = vadd.f32 %v10219_v15, %v3391_v11 }
 0x457   : > { %6347 = vst.msk [vmem:[%s8388_s29 + $0x3dc] sm:$0xf] %vm6099_vm5, %v5834_v6  ;;  %vm4426_vm1 = vcmp.ge.f32.partialorder %v3709_v9, 0.0  ;;  %v4938_v16 = vmul.f32 0.2, %v3709_v9  ;;  %vm4554_vm3 = vcmp.ge.f32.partialorder %v4029_v24, 0.0 }
 0x458   : > { %v5066_v52 = vmul.f32 0.2, %v4029_v24  ;;  %vm4171_vm4 = vcmp.ge.f32.partialorder %v3072_v12, 0.0  ;;  %v4683_v17 = vmul.f32 0.2, %v3072_v12  ;;  %vm4299_vm6 = vcmp.ge.f32.partialorder %v3392_v13, 0.0 }
 0x459   : > { %v5450_v18 = vsel %vm4426_vm1, %v3709_v9, %v4938_v16  ;;  %v4811_v19 = vmul.f32 0.2, %v3392_v13 }
 0x45a   : > { %v5962_v20 = vpack.c.bf16 %v5450_v18, %v5450_v18  ;;  %v5578_v40 = vsel %vm4554_vm3, %v4029_v24, %v5066_v52  ;;  %v5195_v21 = vsel %vm4171_vm4, %v3072_v12, %v4683_v17 }
 0x45b   : > { %v6090_v22 = vpack.c.bf16 %v5578_v40, %v5578_v40  ;;  %v5707_v23 = vpack.c.bf16 %v5195_v21, %v5195_v21  ;;  %v5323_v25 = vsel %vm4299_vm6, %v3392_v13, %v4811_v19 }
 0x45c   : > { %6475 = vst.msk [vmem:[%s8388_s29 + $0x5dc] sm:$0xf] %vm6099_vm5, %v5962_v20  ;;  %v5835_v26 = vpack.c.bf16 %v5323_v25, %v5323_v25  ;;  %v3711_v27 = vpop.f32.mrf.mxu2  ;;  %v4031_v28 = vpop.f32.mrf.mxu3 }
 0x45d   : > { %6603 = vst.msk [vmem:[%s8388_s29 + $0x7dc] sm:$0xf] %vm6099_vm5, %v6090_v22  ;;  %v3712_v30 = vadd.f32 %v10219_v15, %v3711_v27  ;;  %v4032_v31 = vadd.f32 %v10219_v15, %v4031_v28  ;;  %v3073_v3 = vpop.f32.mrf.mxu0  ;;  %v3393_v32 = vpop.f32.mrf.mxu1 }
 0x45e   : > { %6220 = vst.msk [vmem:[%s8388_s29 + $0x1e0] sm:$0xf] %vm6099_vm5, %v5707_v23  ;;  %v3074_v33 = vadd.f32 %v10219_v15, %v3073_v3  ;;  %v3394_v34 = vadd.f32 %v10219_v15, %v3393_v32 }
 0x45f   : > { %6348 = vst.msk [vmem:[%s8388_s29 + $0x3e0] sm:$0xf] %vm6099_vm5, %v5835_v26  ;;  %vm4427_vm7 = vcmp.ge.f32.partialorder %v3712_v30, 0.0  ;;  %v4939_v35 = vmul.f32 0.2, %v3712_v30  ;;  %vm4555_vm8 = vcmp.ge.f32.partialorder %v4032_v31, 0.0 }
 0x460   : > { %v5067_v36 = vmul.f32 0.2, %v4032_v31  ;;  %vm4172_vm9 = vcmp.ge.f32.partialorder %v3074_v33, 0.0  ;;  %v4684_v37 = vmul.f32 0.2, %v3074_v33  ;;  %vm4300_vm10 = vcmp.ge.f32.partialorder %v3394_v34, 0.0 }
 0x461   : > { %v5451_v38 = vsel %vm4427_vm7, %v3712_v30, %v4939_v35  ;;  %v4812_v39 = vmul.f32 0.2, %v3394_v34 }
 0x462   : > { %v5963_v42 = vpack.c.bf16 %v5451_v38, %v5451_v38  ;;  %v5579_v43 = vsel %vm4555_vm8, %v4032_v31, %v5067_v36  ;;  %v5196_v14 = vsel %vm4172_vm9, %v3074_v33, %v4684_v37 }
 0x463   : > { %v6091_v44 = vpack.c.bf16 %v5579_v43, %v5579_v43  ;;  %v5708_v45 = vpack.c.bf16 %v5196_v14, %v5196_v14  ;;  %v5324_v46 = vsel %vm4300_vm10, %v3394_v34, %v4812_v39 }
 0x464   : > { %6476 = vst.msk [vmem:[%s8388_s29 + $0x5e0] sm:$0xf] %vm6099_vm5, %v5963_v42  ;;  %v5836_v47 = vpack.c.bf16 %v5324_v46, %v5324_v46  ;;  %v3713_v48 = vpop.f32.mrf.mxu2  ;;  %v4033_v49 = vpop.f32.mrf.mxu3 }
 0x465   : > { %6604 = vst.msk [vmem:[%s8388_s29 + $0x7e0] sm:$0xf] %vm6099_vm5, %v6091_v44  ;;  %v3714_v50 = vadd.f32 %v10219_v15, %v3713_v48  ;;  %v4034_v51 = vadd.f32 %v10219_v15, %v4033_v49  ;;  %v3076_v53 = vpop.f32.mrf.mxu0  ;;  %v3396_v54 = vpop.f32.mrf.mxu1 }
 0x466   : > { %6221 = vst.msk [vmem:[%s8388_s29 + $0x1e4] sm:$0xf] %vm6099_vm5, %v5708_v45  ;;  %v3077_v55 = vadd.f32 %v10219_v15, %v3076_v53  ;;  %v3397_v56 = vadd.f32 %v10219_v15, %v3396_v54 }
 0x467   : > { %6349 = vst.msk [vmem:[%s8388_s29 + $0x3e4] sm:$0xf] %vm6099_vm5, %v5836_v47  ;;  %vm4428_vm11 = vcmp.ge.f32.partialorder %v3714_v50, 0.0  ;;  %v4940_v57 = vmul.f32 0.2, %v3714_v50  ;;  %vm4556_vm2 = vcmp.ge.f32.partialorder %v4034_v51, 0.0 }
 0x468   : > { %v5068_v58 = vmul.f32 0.2, %v4034_v51  ;;  %vm4173_vm12 = vcmp.ge.f32.partialorder %v3077_v55, 0.0  ;;  %v4685_v29 = vmul.f32 0.2, %v3077_v55  ;;  %vm4301_vm13 = vcmp.ge.f32.partialorder %v3397_v56, 0.0 }
 0x469   : > { %v5452_v59 = vsel %vm4428_vm11, %v3714_v50, %v4940_v57  ;;  %v4813_v60 = vmul.f32 0.2, %v3397_v56 }
 0x46a   : > { %v5964_v61 = vpack.c.bf16 %v5452_v59, %v5452_v59  ;;  %v5580_v62 = vsel %vm4556_vm2, %v4034_v51, %v5068_v58  ;;  %v5197_v63 = vsel %vm4173_vm12, %v3077_v55, %v4685_v29 }
 0x46b   : > { %v6092_v0 = vpack.c.bf16 %v5580_v62, %v5580_v62  ;;  %v5709_v1 = vpack.c.bf16 %v5197_v63, %v5197_v63  ;;  %v5325_v2 = vsel %vm4301_vm13, %v3397_v56, %v4813_v60 }
 0x46c   : > { %6477 = vst.msk [vmem:[%s8388_s29 + $0x5e4] sm:$0xf] %vm6099_vm5, %v5964_v61  ;;  %v5837_v4 = vpack.c.bf16 %v5325_v2, %v5325_v2  ;;  %v3716_v5 = vpop.f32.mrf.mxu2  ;;  %v4036_v41 = vpop.f32.mrf.mxu3 }
 0x46d   : > { %6605 = vst.msk [vmem:[%s8388_s29 + $0x7e4] sm:$0xf] %vm6099_vm5, %v6092_v0  ;;  %v3717_v6 = vadd.f32 %v10219_v15, %v3716_v5  ;;  %v4037_v7 = vadd.f32 %v10219_v15, %v4036_v41  ;;  %v3078_v8 = vpop.f32.mrf.mxu0  ;;  %v3398_v9 = vpop.f32.mrf.mxu1 }
 0x46e   : > { %6222 = vst.msk [vmem:[%s8388_s29 + $0x1e8] sm:$0xf] %vm6099_vm5, %v5709_v1  ;;  %v3079_v24 = vadd.f32 %v10219_v15, %v3078_v8  ;;  %v3399_v10 = vadd.f32 %v10219_v15, %v3398_v9 }
 0x46f   : > { %6350 = vst.msk [vmem:[%s8388_s29 + $0x3e8] sm:$0xf] %vm6099_vm5, %v5837_v4  ;;  %vm4429_vm14 = vcmp.ge.f32.partialorder %v3717_v6, 0.0  ;;  %v4941_v11 = vmul.f32 0.2, %v3717_v6  ;;  %vm4557_vm15 = vcmp.ge.f32.partialorder %v4037_v7, 0.0 }
 0x470   : > { %v5069_v12 = vmul.f32 0.2, %v4037_v7  ;;  %vm4174_vm0 = vcmp.ge.f32.partialorder %v3079_v24, 0.0  ;;  %v4686_v13 = vmul.f32 0.2, %v3079_v24  ;;  %vm4302_vm1 = vcmp.ge.f32.partialorder %v3399_v10, 0.0 }
 0x471   : > { %v5453_v16 = vsel %vm4429_vm14, %v3717_v6, %v4941_v11  ;;  %v4814_v52 = vmul.f32 0.2, %v3399_v10 }
 0x472   : > { %v5965_v17 = vpack.c.bf16 %v5453_v16, %v5453_v16  ;;  %v5581_v18 = vsel %vm4557_vm15, %v4037_v7, %v5069_v12  ;;  %v5198_v19 = vsel %vm4174_vm0, %v3079_v24, %v4686_v13 }
 0x473   : > { %v6093_v20 = vpack.c.bf16 %v5581_v18, %v5581_v18  ;;  %v5710_v40 = vpack.c.bf16 %v5198_v19, %v5198_v19  ;;  %v5326_v21 = vsel %vm4302_vm1, %v3399_v10, %v4814_v52 }
 0x474   : > { %6478 = vst.msk [vmem:[%s8388_s29 + $0x5e8] sm:$0xf] %vm6099_vm5, %v5965_v17  ;;  %v5838_v22 = vpack.c.bf16 %v5326_v21, %v5326_v21  ;;  %v3718_v23 = vpop.f32.mrf.mxu2  ;;  %v4038_v25 = vpop.f32.mrf.mxu3 }
 0x475   : > { %6606 = vst.msk [vmem:[%s8388_s29 + $0x7e8] sm:$0xf] %vm6099_vm5, %v6093_v20  ;;  %v3719_v26 = vadd.f32 %v10219_v15, %v3718_v23  ;;  %v4039_v27 = vadd.f32 %v10219_v15, %v4038_v25  ;;  %v3081_v28 = vpop.f32.mrf.mxu0  ;;  %v3401_v30 = vpop.f32.mrf.mxu1 }
 0x476   : > { %6223 = vst.msk [vmem:[%s8388_s29 + $0x1ec] sm:$0xf] %vm6099_vm5, %v5710_v40  ;;  %v3082_v31 = vadd.f32 %v10219_v15, %v3081_v28  ;;  %v3402_v3 = vadd.f32 %v10219_v15, %v3401_v30 }
 0x477   : > { %6351 = vst.msk [vmem:[%s8388_s29 + $0x3ec] sm:$0xf] %vm6099_vm5, %v5838_v22  ;;  %vm4430_vm3 = vcmp.ge.f32.partialorder %v3719_v26, 0.0  ;;  %v4942_v32 = vmul.f32 0.2, %v3719_v26  ;;  %vm4558_vm4 = vcmp.ge.f32.partialorder %v4039_v27, 0.0 }
 0x478   : > { %v5070_v33 = vmul.f32 0.2, %v4039_v27  ;;  %vm4175_vm6 = vcmp.ge.f32.partialorder %v3082_v31, 0.0  ;;  %v4687_v34 = vmul.f32 0.2, %v3082_v31  ;;  %vm4303_vm7 = vcmp.ge.f32.partialorder %v3402_v3, 0.0 }
 0x479   : > { %v5454_v35 = vsel %vm4430_vm3, %v3719_v26, %v4942_v32  ;;  %v4815_v36 = vmul.f32 0.2, %v3402_v3 }
 0x47a   : > { %v5966_v37 = vpack.c.bf16 %v5454_v35, %v5454_v35  ;;  %v5582_v38 = vsel %vm4558_vm4, %v4039_v27, %v5070_v33  ;;  %v5199_v39 = vsel %vm4175_vm6, %v3082_v31, %v4687_v34 }
 0x47b   : > { %v6094_v42 = vpack.c.bf16 %v5582_v38, %v5582_v38  ;;  %v5711_v43 = vpack.c.bf16 %v5199_v39, %v5199_v39  ;;  %v5327_v14 = vsel %vm4303_vm7, %v3402_v3, %v4815_v36 }
 0x47c   : > { %6479 = vst.msk [vmem:[%s8388_s29 + $0x5ec] sm:$0xf] %vm6099_vm5, %v5966_v37  ;;  %v5839_v44 = vpack.c.bf16 %v5327_v14, %v5327_v14  ;;  %v3721_v45 = vpop.f32.mrf.mxu2  ;;  %v4041_v46 = vpop.f32.mrf.mxu3 }
 0x47d   : > { %6607 = vst.msk [vmem:[%s8388_s29 + $0x7ec] sm:$0xf] %vm6099_vm5, %v6094_v42  ;;  %v3722_v47 = vadd.f32 %v10219_v15, %v3721_v45  ;;  %v4042_v48 = vadd.f32 %v10219_v15, %v4041_v46  ;;  %v3083_v49 = vpop.f32.mrf.mxu0  ;;  %v3403_v50 = vpop.f32.mrf.mxu1 }
 0x47e   : > { %6224 = vst.msk [vmem:[%s8388_s29 + $0x1f0] sm:$0xf] %vm6099_vm5, %v5711_v43  ;;  %v3084_v51 = vadd.f32 %v10219_v15, %v3083_v49  ;;  %v3404_v53 = vadd.f32 %v10219_v15, %v3403_v50 }
 0x47f   : > { %6352 = vst.msk [vmem:[%s8388_s29 + $0x3f0] sm:$0xf] %vm6099_vm5, %v5839_v44  ;;  %vm4431_vm8 = vcmp.ge.f32.partialorder %v3722_v47, 0.0  ;;  %v4943_v54 = vmul.f32 0.2, %v3722_v47  ;;  %vm4559_vm9 = vcmp.ge.f32.partialorder %v4042_v48, 0.0 }
 0x480   : > { %v5071_v55 = vmul.f32 0.2, %v4042_v48  ;;  %vm4176_vm10 = vcmp.ge.f32.partialorder %v3084_v51, 0.0  ;;  %v4688_v56 = vmul.f32 0.2, %v3084_v51  ;;  %vm4304_vm11 = vcmp.ge.f32.partialorder %v3404_v53, 0.0 }
 0x481   : > { %v5455_v57 = vsel %vm4431_vm8, %v3722_v47, %v4943_v54  ;;  %v4816_v58 = vmul.f32 0.2, %v3404_v53 }
 0x482   : > { %v5967_v29 = vpack.c.bf16 %v5455_v57, %v5455_v57  ;;  %v5583_v59 = vsel %vm4559_vm9, %v4042_v48, %v5071_v55  ;;  %v5200_v60 = vsel %vm4176_vm10, %v3084_v51, %v4688_v56 }
 0x483   : > { %v6095_v61 = vpack.c.bf16 %v5583_v59, %v5583_v59  ;;  %v5712_v62 = vpack.c.bf16 %v5200_v60, %v5200_v60  ;;  %v5328_v63 = vsel %vm4304_vm11, %v3404_v53, %v4816_v58 }
 0x484   : > { %6480 = vst.msk [vmem:[%s8388_s29 + $0x5f0] sm:$0xf] %vm6099_vm5, %v5967_v29  ;;  %v5840_v0 = vpack.c.bf16 %v5328_v63, %v5328_v63  ;;  %v3723_v1 = vpop.f32.mrf.mxu2  ;;  %v4043_v2 = vpop.f32.mrf.mxu3 }
 0x485   : > { %6608 = vst.msk [vmem:[%s8388_s29 + $0x7f0] sm:$0xf] %vm6099_vm5, %v6095_v61  ;;  %v3724_v4 = vadd.f32 %v10219_v15, %v3723_v1  ;;  %v4044_v5 = vadd.f32 %v10219_v15, %v4043_v2  ;;  %v3086_v41 = vpop.f32.mrf.mxu0  ;;  %v3406_v6 = vpop.f32.mrf.mxu1 }
 0x486   : > { %6225 = vst.msk [vmem:[%s8388_s29 + $0x1f4] sm:$0xf] %vm6099_vm5, %v5712_v62  ;;  %v3087_v7 = vadd.f32 %v10219_v15, %v3086_v41  ;;  %v3407_v8 = vadd.f32 %v10219_v15, %v3406_v6 }
 0x487   : > { %6353 = vst.msk [vmem:[%s8388_s29 + $0x3f4] sm:$0xf] %vm6099_vm5, %v5840_v0  ;;  %vm4432_vm2 = vcmp.ge.f32.partialorder %v3724_v4, 0.0  ;;  %v4944_v9 = vmul.f32 0.2, %v3724_v4  ;;  %vm4560_vm12 = vcmp.ge.f32.partialorder %v4044_v5, 0.0 }
 0x488   : > { %v5072_v24 = vmul.f32 0.2, %v4044_v5  ;;  %vm4177_vm13 = vcmp.ge.f32.partialorder %v3087_v7, 0.0  ;;  %v4689_v10 = vmul.f32 0.2, %v3087_v7  ;;  %vm4305_vm14 = vcmp.ge.f32.partialorder %v3407_v8, 0.0 }
 0x489   : > { %v5456_v11 = vsel %vm4432_vm2, %v3724_v4, %v4944_v9  ;;  %v4817_v12 = vmul.f32 0.2, %v3407_v8 }
 0x48a   : > { %v5968_v13 = vpack.c.bf16 %v5456_v11, %v5456_v11  ;;  %v5584_v16 = vsel %vm4560_vm12, %v4044_v5, %v5072_v24  ;;  %v5201_v52 = vsel %vm4177_vm13, %v3087_v7, %v4689_v10 }
 0x48b   : > { %v6096_v17 = vpack.c.bf16 %v5584_v16, %v5584_v16  ;;  %v5713_v18 = vpack.c.bf16 %v5201_v52, %v5201_v52  ;;  %v5329_v19 = vsel %vm4305_vm14, %v3407_v8, %v4817_v12 }
 0x48c   : > { %6481 = vst.msk [vmem:[%s8388_s29 + $0x5f4] sm:$0xf] %vm6099_vm5, %v5968_v13  ;;  %v5841_v20 = vpack.c.bf16 %v5329_v19, %v5329_v19  ;;  %v3726_v40 = vpop.f32.mrf.mxu2  ;;  %v4046_v21 = vpop.f32.mrf.mxu3 }
 0x48d   : > { %6609 = vst.msk [vmem:[%s8388_s29 + $0x7f4] sm:$0xf] %vm6099_vm5, %v6096_v17  ;;  %v3727_v22 = vadd.f32 %v10219_v15, %v3726_v40  ;;  %v4047_v23 = vadd.f32 %v10219_v15, %v4046_v21  ;;  %v3088_v25 = vpop.f32.mrf.mxu0  ;;  %v3408_v26 = vpop.f32.mrf.mxu1 }
 0x48e   : > { %6226 = vst.msk [vmem:[%s8388_s29 + $0x1f8] sm:$0xf] %vm6099_vm5, %v5713_v18  ;;  %v3089_v27 = vadd.f32 %v10219_v15, %v3088_v25  ;;  %v3409_v28 = vadd.f32 %v10219_v15, %v3408_v26 }
 0x48f   : > { %6354 = vst.msk [vmem:[%s8388_s29 + $0x3f8] sm:$0xf] %vm6099_vm5, %v5841_v20  ;;  %vm4433_vm15 = vcmp.ge.f32.partialorder %v3727_v22, 0.0  ;;  %v4945_v30 = vmul.f32 0.2, %v3727_v22  ;;  %vm4561_vm0 = vcmp.ge.f32.partialorder %v4047_v23, 0.0 }
 0x490   : > { %v5073_v31 = vmul.f32 0.2, %v4047_v23  ;;  %vm4178_vm1 = vcmp.ge.f32.partialorder %v3089_v27, 0.0  ;;  %v4690_v3 = vmul.f32 0.2, %v3089_v27  ;;  %vm4306_vm3 = vcmp.ge.f32.partialorder %v3409_v28, 0.0 }
 0x491   : > { %v5457_v32 = vsel %vm4433_vm15, %v3727_v22, %v4945_v30  ;;  %v4818_v33 = vmul.f32 0.2, %v3409_v28 }
 0x492   : > { %v5969_v34 = vpack.c.bf16 %v5457_v32, %v5457_v32  ;;  %v5585_v35 = vsel %vm4561_vm0, %v4047_v23, %v5073_v31  ;;  %v5202_v36 = vsel %vm4178_vm1, %v3089_v27, %v4690_v3 }
 0x493   : > { %v6097_v37 = vpack.c.bf16 %v5585_v35, %v5585_v35  ;;  %v5714_v38 = vpack.c.bf16 %v5202_v36, %v5202_v36  ;;  %v5330_v39 = vsel %vm4306_vm3, %v3409_v28, %v4818_v33 }
 0x494   : > { %6482 = vst.msk [vmem:[%s8388_s29 + $0x5f8] sm:$0xf] %vm6099_vm5, %v5969_v34  ;;  %v5842_v42 = vpack.c.bf16 %v5330_v39, %v5330_v39  ;;  %v3728_v43 = vpop.f32.mrf.mxu2  ;;  %v4048_v14 = vpop.f32.mrf.mxu3 }
 0x495   : > { %6610 = vst.msk [vmem:[%s8388_s29 + $0x7f8] sm:$0xf] %vm6099_vm5, %v6097_v37  ;;  %v3729_v44 = vadd.f32 %v10219_v15, %v3728_v43  ;;  %v4049_v45 = vadd.f32 %v10219_v15, %v4048_v14 }
 0x496   : > { %6227 = vst.msk [vmem:[%s8388_s29 + $0x1fc] sm:$0xf] %vm6099_vm5, %v5714_v38 }
 0x497   : > { %6355 = vst.msk [vmem:[%s8388_s29 + $0x3fc] sm:$0xf] %vm6099_vm5, %v5842_v42  ;;  %vm4434_vm4 = vcmp.ge.f32.partialorder %v3729_v44, 0.0  ;;  %v4946_v46 = vmul.f32 0.2, %v3729_v44  ;;  %vm4562_vm6 = vcmp.ge.f32.partialorder %v4049_v45, 0.0 }
 0x498   : > { %v5074_v47 = vmul.f32 0.2, %v4049_v45 }
 0x499   : > { %v5458_v48 = vsel %vm4434_vm4, %v3729_v44, %v4946_v46 }
 0x49a   : > { %v5970_v49 = vpack.c.bf16 %v5458_v48, %v5458_v48  ;;  %v5586_v50 = vsel %vm4562_vm6, %v4049_v45, %v5074_v47 }
 0x49b   : > { %v6098_v51 = vpack.c.bf16 %v5586_v50, %v5586_v50 }
 0x49c   : > { %6483 = vst.msk [vmem:[%s8388_s29 + $0x5fc] sm:$0xf] %vm6099_vm5, %v5970_v49 }
 0x49d   : > { %6611 = vst.msk [vmem:[%s8388_s29 + $0x7fc] sm:$0xf] %vm6099_vm5, %v6098_v51 }
 0x49e PF: > { %s13_s12 = sadd.s32 1, %s8254_s12  }
 0x49f   : > { %p10_p4 = scmp.ge.s32.totalorder %s13_s12, 10  }
 0x4a1   :  { %12 = sbr.rel (!%p10_p4) target bundleno = 1 (0x1), region = 62 }

</bundles_post_ra>
